<compile_context>
chip_gen: v6e
topology: v6e:2x2x1
jax: 0.10.0
libtpu: 0.0.40
codegen_flags: <defaults>
</compile_context>

<pallas_src>
import functools
from typing import NamedTuple

import jax
import jax.numpy as jnp
from jax.experimental import pallas as pl
from jax.experimental.pallas import tpu as pltpu

LANES = 128    # output-channel padding / MXU lane width
KSIZE = 4      # conv kernel size (all layers)
STRIDE = 2     # conv stride (all layers)
PADS = (1, 2, 1, 0)                                           # per-layer padding
ACTS = ("leaky_relu", "leaky_relu", "leaky_relu", "sigmoid")  # fused epilogues


class _LayerCfg(NamedTuple):
    hp: int    # padded input height
    wp: int    # padded input width (flat row index = h * wp + w)
    oh: int    # output height
    ow: int    # output width
    pad: int   # this layer's conv padding
    act: str   # fused activation


def _make_cfgs(h, w):
    cfgs = []
    for pad, act in zip(PADS, ACTS):
        hp, wp = h + 2 * pad, w + 2 * pad
        oh = (hp - KSIZE) // STRIDE + 1
        ow = (wp - KSIZE) // STRIDE + 1
        cfgs.append(_LayerCfg(hp=hp, wp=wp, oh=oh, ow=ow, pad=pad, act=act))
        h, w = oh, ow
    return tuple(cfgs), (h, w)


# ----------------------------------------------------------------------------
# In-kernel building blocks
# ----------------------------------------------------------------------------
def _activate(y, act):
    if act == "leaky_relu":
        return jnp.where(y > 0, y, jnp.float32(0.2) * y)
    return jax.nn.sigmoid(y)                      # EUP, f32 epilogue


def _gather_tap(src_ref, cfg, kh, kw):
    """im2col rows for tap (kh, kw): (oh*ow, 128) value.

    Output pixel (oh, ow) reads padded input row (2*oh + kh)*wp + (2*ow + kw),
    i.e. one stride-2 sublane load per output row; rows are assembled as a
    value (no scratch round trip)."""
    rows = []
    for oh in range(cfg.oh):
        start = (STRIDE * oh + kh) * cfg.wp + kw
        if cfg.ow > 1:
            rows.append(src_ref[pl.ds(start, cfg.ow, stride=STRIDE), :])
        else:
            rows.append(src_ref[start:start + 1, :])
    return rows[0] if len(rows) == 1 else jnp.concatenate(rows, axis=0)


def _conv_from_scratch(src_ref, w_ref, cfg, in_ch):
    """Conv2d(k=4, s=2, bias=False) + fused activation for one layer.

    src_ref: (hp*wp, 128) f32 padded input, spatial flat on sublanes, channels
             in lanes [0, in_ch) (upper lanes ignored).
    w_ref:   (16*in_ch, 128) bf16 dense-K packed weights.
    The f32 accumulator is a value (vreg-resident) -> no VMEM read-modify-write.
    """
    m = cfg.oh * cfg.ow
    acc = jnp.zeros((m, LANES), jnp.float32)
    for t in range(KSIZE * KSIZE):
        kh, kw = divmod(t, KSIZE)
        tap = _gather_tap(src_ref, cfg, kh, kw)[:, :in_ch].astype(jnp.bfloat16)
        rhs = w_ref[t * in_ch:(t + 1) * in_ch, :]          # (in_ch, 128) bf16
        acc = acc + jnp.dot(tap, rhs, preferred_element_type=jnp.float32)
    return _activate(acc, cfg.act)


def _scatter_rows(dst_ref, val, src_cfg, dst_cfg):
    """Write the activated (oh*ow, 128) layer output into the next layer's
    padded flat input scratch.  Only interior rows are touched; the zero
    padding border is maintained separately (see _zero_pad_border)."""
    p, wp_d = dst_cfg.pad, dst_cfg.wp
    for oh in range(src_cfg.oh):
        r0 = (oh + p) * wp_d + p
        dst_ref[r0:r0 + src_cfg.ow, :] = val[oh * src_cfg.ow:(oh + 1) * src_cfg.ow, :]


def _zero_pad_border(dst_ref, cfg):
    """Zero only the static padding border of a padded activation scratch
    (contiguous row runs), instead of re-zeroing the whole buffer per image."""
    p, wp, hp = cfg.pad, cfg.wp, cfg.hp
    if p == 0:
        return
    iw, ih = wp - 2 * p, hp - 2 * p
    lead = p * wp + p                       # top pad rows + left pad of row 0
    dst_ref[0:lead, :] = jnp.zeros((lead, LANES), jnp.float32)
    for r in range(ih - 1):                 # right pad of row r + left pad of r+1
        r0 = lead + r * wp + iw
        dst_ref[r0:r0 + 2 * p, :] = jnp.zeros((2 * p, LANES), jnp.float32)
    r0 = lead + (ih - 1) * wp + iw          # right pad of last row + bottom rows
    dst_ref[r0:hp * wp, :] = jnp.zeros((hp * wp - r0, LANES), jnp.float32)


def _discriminator_kernel(x_ref, w1_ref, w2_ref, w3_ref, w4_ref, out_ref,
                          a2_ref, a3_ref, a4_ref, *, cfgs, in_chans, batch):
    # Border zeroing once per grid step (covers all `batch` images; interiors
    # are fully overwritten per image).  cfgs[3].pad == 0 -> a4 needs none.
    _zero_pad_border(a2_ref, cfgs[1])
    _zero_pad_border(a3_ref, cfgs[2])

    scratches = (a2_ref, a3_ref, a4_ref)
    wrefs = (w2_ref, w3_ref, w4_ref)

    for b in range(batch):
        # Layer 1: host-packed dense im2col LHS -> ONE MXU contraction.
        lhs1 = x_ref[b]                                    # (m1, 16*C0) bf16
        y = jnp.dot(lhs1, w1_ref[...], preferred_element_type=jnp.float32)
        y = _activate(y, cfgs[0].act)
        _scatter_rows(a2_ref, y, cfgs[0], cfgs[1])

        # Layers 2-4: in-kernel im2col gathers + dense-K dots, VMEM-resident.
        for li in range(1, 4):
            y = _conv_from_scratch(scratches[li - 1], wrefs[li - 1],
                                   cfgs[li], in_chans[li])
            if li < 3:
                _scatter_rows(scratches[li], y, cfgs[li], cfgs[li + 1])

        # Final layer is 1x1 with sigmoid applied; real channel lives in lane 0
        # (lanes 1..127 carry sigmoid(0)=0.5 from the zero-padded out channels).
        out_ref[b] = y


# ----------------------------------------------------------------------------
# Host-side wrappers
# ----------------------------------------------------------------------------
def pack_conv_weight(w_oihw):
    """One-time repack: PyTorch (OC, IC, 4, 4) -> dense (16*IC, 128) bf16.
    Rows are (kh*4 + kw)*IC + cin; cols are cout zero-padded to 128 lanes."""
    oc, ic, kh, kw = w_oihw.shape
    assert kh == KSIZE and kw == KSIZE and oc <= LANES
    w = jnp.transpose(w_oihw.astype(jnp.float32), (2, 3, 1, 0))   # (kh, kw, ic, oc)
    w = w.reshape(KSIZE * KSIZE * ic, oc)
    wp = jnp.zeros((KSIZE * KSIZE * ic, LANES), jnp.float32).at[:, :oc].set(w)
    return wp.astype(jnp.bfloat16)


def _im2col_layer1(x_nchw, cfg):
    """Host-side (one-time XLA layout op) im2col for layer 1:
    (N, C, H, W) -> (N, oh*ow, 16*C) bf16, K ordered (kh, kw, cin) to match
    pack_conv_weight.  For C=1 this is ~4x the raw image, vs. the previous
    128-lane padded input that was ~128x."""
    n, c, h, w = x_nchw.shape
    x = jnp.transpose(x_nchw, (0, 2, 3, 1)).astype(jnp.float32)   # NHWC
    x = jnp.pad(x, ((0, 0), (cfg.pad, cfg.pad), (cfg.pad, cfg.pad), (0, 0)))
    taps = []
    for t in range(KSIZE * KSIZE):
        kh, kw = divmod(t, KSIZE)
        taps.append(x[:, kh:kh + STRIDE * cfg.oh:STRIDE,
                      kw:kw + STRIDE * cfg.ow:STRIDE, :])
    p = jnp.stack(taps, axis=3)                            # (N, oh, ow, 16, C)
    return p.reshape(n, cfg.oh * cfg.ow, KSIZE * KSIZE * c).astype(jnp.bfloat16)


def discriminator_forward(packed_w, x_nchw, *, images_per_step=None):
    """Mirrors Discriminator.forward: 4 x (conv k4 s2 + act), sigmoid, squeeze."""
    n, c, h, w = x_nchw.shape
    cfgs, (fh, fw) = _make_cfgs(h, w)
    assert (fh, fw) == (1, 1), "demo kernel expects the final feature map to be 1x1"

    in_chans = tuple(int(packed_w[k].shape[0]) // (KSIZE * KSIZE)
                     for k in ("w1", "w2", "w3", "w4"))
    assert in_chans[0] == c, "input channels must match block1's weight"
    assert max(in_chans) <= LANES  # TODO(synk): channel tiling for ndf=64 shapes

    b = images_per_step if images_per_step is not None else min(n, 4)
    assert n % b == 0, "batch must be divisible by images_per_step"

    c0 = cfgs[0]
    m1 = c0.oh * c0.ow
    k1 = KSIZE * KSIZE * c
    lhs1 = _im2col_layer1(x_nchw, c0)                      # (n, m1, k1) bf16

    # Weights: constant-index full-extent blocks.
    # TODO(synk): at production shapes add pipeline_mode=pl.Buffered(1) here so
    # the (then multi-MiB) constant weight blocks aren't double-buffered (v7x).
    w_specs = [pl.BlockSpec(packed_w[k].shape, lambda i: (0, 0))
               for k in ("w1", "w2", "w3", "w4")]

    kernel = functools.partial(_discriminator_kernel, cfgs=cfgs,
                               in_chans=in_chans, batch=b)

    out = pl.pallas_call(
        kernel,
        out_shape=jax.ShapeDtypeStruct((n, 1, LANES), jnp.float32),
        grid=(n // b,),
        in_specs=[pl.BlockSpec((b, m1, k1), lambda i: (i, 0, 0))] + w_specs,
        out_specs=pl.BlockSpec((b, 1, LANES), lambda i: (i, 0, 0)),
        scratch_shapes=[
            pltpu.VMEM((cfgs[1].hp * cfgs[1].wp, LANES), jnp.float32),  # layer-2 in
            pltpu.VMEM((cfgs[2].hp * cfgs[2].wp, LANES), jnp.float32),  # layer-3 in
            pltpu.VMEM((cfgs[3].hp * cfgs[3].wp, LANES), jnp.float32),  # layer-4 in
        ],
        compiler_params=pltpu.CompilerParams(
            dimension_semantics=("parallel",),             # v7x: shard steps over TCs
            vmem_limit_bytes=32 * 1024 * 1024),
    )(lhs1, packed_w["w1"], packed_w["w2"], packed_w["w3"], packed_w["w4"])

    sig = out[:, 0, 0]                                     # real output channel = lane 0
    return jnp.squeeze(sig.reshape(n, 1, 1, 1))            # torch.squeeze() semantics


# ----------------------------------------------------------------------------
# Params, pure-JAX reference, demo
# ----------------------------------------------------------------------------
def init_discriminator_params(key, nc=1, ndf=64, std=0.05):
    """DCGAN-style N(0, std) conv weights, no bias.  (block1's input channel
    count is hard-coded to 1 in the reference module.)"""
    k1, k2, k3, k4 = jax.random.split(key, 4)
    return {
        "w1": std * jax.random.normal(k1, (ndf, 1, KSIZE, KSIZE), jnp.float32),
        "w2": std * jax.random.normal(k2, (2 * ndf, ndf, KSIZE, KSIZE), jnp.float32),
        "w3": std * jax.random.normal(k3, (4 * ndf, 2 * ndf, KSIZE, KSIZE), jnp.float32),
        "w4": std * jax.random.normal(k4, (nc, 4 * ndf, KSIZE, KSIZE), jnp.float32),
    }


def discriminator_reference(params, x_nchw):
    """Pure-JAX/XLA f32 reference mirroring the PyTorch module."""
    def conv(v, w, pad):
        return jax.lax.conv_general_dilated(
            v, w, window_strides=(STRIDE, STRIDE),
            padding=((pad, pad), (pad, pad)),
            dimension_numbers=("NCHW", "OIHW", "NCHW"))
    x = x_nchw.astype(jnp.float32)
    x = conv(x, params["w1"], 1); x = jnp.where(x > 0, x, 0.2 * x)
    x = conv(x, params["w2"], 2); x = jnp.where(x > 0, x, 0.2 * x)
    x = conv(x, params["w3"], 1); x = jnp.where(x > 0, x, 0.2 * x)
    x = conv(x, params["w4"], 0)
    return jnp.squeeze(jax.nn.sigmoid(x))


if __name__ == "__main__":
    NC, NDF = 1, 16                       # small demo config (all channels <= 128)
    N, H, W = 2, 28, 28                   # spatial trace: 28 -> 14 -> 8 -> 4 -> 1
    key = jax.random.PRNGKey(0)
    k_x, k_w = jax.random.split(key)

    x = jax.random.normal(k_x, (N, NC, H, W), jnp.float32)          # NCHW, like PyTorch
    params = init_discriminator_params(k_w, nc=NC, ndf=NDF)
    packed = {k: pack_conv_weight(v) for k, v in params.items()}    # one-time repack

    fwd = jax.jit(discriminator_forward)
    out = fwd(packed, x)
    jax.block_until_ready(out)
    assert out.shape == (N,), f"unexpected output shape {out.shape}"

    ref = discriminator_reference(params, x)
    # bf16 MXU inputs vs. f32 XLA reference: validated to 1e-2 max-abs error.
    err = float(jnp.max(jnp.abs(out - ref)))
    assert err < 1e-2, f"kernel mismatch vs reference: max abs err = {err}"
    print("KERNEL_OK")
</pallas_src>

<mosaic_0001>
module attributes {stable_mosaic.version = 11 : i64} {
  func.func @_discriminator_kernel(%arg0: i32, %arg1: memref<2x196x16xbf16, #tpu.memory_space<vmem>>, %arg2: memref<16x128xbf16, #tpu.memory_space<vmem>>, %arg3: memref<256x128xbf16, #tpu.memory_space<vmem>>, %arg4: memref<512x128xbf16, #tpu.memory_space<vmem>>, %arg5: memref<1024x128xbf16, #tpu.memory_space<vmem>>, %arg6: memref<2x1x128xf32, #tpu.memory_space<vmem>>, %arg7: memref<324x128xf32, #tpu.memory_space<vmem>>, %arg8: memref<100x128xf32, #tpu.memory_space<vmem>>, %arg9: memref<16x128xf32, #tpu.memory_space<vmem>>) attributes {dimension_semantics = [#tpu.dimension_semantics<parallel>], iteration_bounds = array<i64: 1>, scalar_prefetch = 0 : i64, scratch_operands = 3 : i64, tpu.core_type = #tpu.core_type<tc>, window_params = [{transform_indices = @transform_0, window_bounds = array<i64: 2, 196, 16>}, {pipeline_mode = #tpu.pipeline_mode<synchronous>, transform_indices = @transform_1, window_bounds = array<i64: 16, 128>}, {pipeline_mode = #tpu.pipeline_mode<synchronous>, transform_indices = @transform_2, window_bounds = array<i64: 256, 128>}, {pipeline_mode = #tpu.pipeline_mode<synchronous>, transform_indices = @transform_3, window_bounds = array<i64: 512, 128>}, {pipeline_mode = #tpu.pipeline_mode<synchronous>, transform_indices = @transform_4, window_bounds = array<i64: 1024, 128>}, {transform_indices = @transform_5, window_bounds = array<i64: 2, 1, 128>}]} {
    %cst = arith.constant 0.000000e+00 : f32
    %0 = vector.broadcast %cst : f32 to vector<38x128xf32>
    %c0 = arith.constant 0 : index
    %c0_0 = arith.constant 0 : index
    %1 = vector.load %arg7[%c0, %c0_0] : memref<324x128xf32, #tpu.memory_space<vmem>>, vector<38x128xf32>
    tpu.vector_store %arg7[%c0, %c0_0], %0 {strides = array<i32>} : memref<324x128xf32, #tpu.memory_space<vmem>>, vector<38x128xf32>,
    %cst_1 = arith.constant 0.000000e+00 : f32
    %2 = vector.broadcast %cst_1 : f32 to vector<4x128xf32>
    %c52 = arith.constant 52 : index
    %c0_2 = arith.constant 0 : index
    %3 = vector.load %arg7[%c52, %c0_2] : memref<324x128xf32, #tpu.memory_space<vmem>>, vector<4x128xf32>
    tpu.vector_store %arg7[%c52, %c0_2], %2 {strides = array<i32>} : memref<324x128xf32, #tpu.memory_space<vmem>>, vector<4x128xf32>,
    %cst_3 = arith.constant 0.000000e+00 : f32
    %4 = vector.broadcast %cst_3 : f32 to vector<4x128xf32>
    %c70 = arith.constant 70 : index
    %c0_4 = arith.constant 0 : index
    %5 = vector.load %arg7[%c70, %c0_4] : memref<324x128xf32, #tpu.memory_space<vmem>>, vector<4x128xf32>
    tpu.vector_store %arg7[%c70, %c0_4], %4 {strides = array<i32>} : memref<324x128xf32, #tpu.memory_space<vmem>>, vector<4x128xf32>,
    %cst_5 = arith.constant 0.000000e+00 : f32
    %6 = vector.broadcast %cst_5 : f32 to vector<4x128xf32>
    %c88 = arith.constant 88 : index
    %c0_6 = arith.constant 0 : index
    %7 = vector.load %arg7[%c88, %c0_6] : memref<324x128xf32, #tpu.memory_space<vmem>>, vector<4x128xf32>
    tpu.vector_store %arg7[%c88, %c0_6], %6 {strides = array<i32>} : memref<324x128xf32, #tpu.memory_space<vmem>>, vector<4x128xf32>,
    %cst_7 = arith.constant 0.000000e+00 : f32
    %8 = vector.broadcast %cst_7 : f32 to vector<4x128xf32>
    %c106 = arith.constant 106 : index
    %c0_8 = arith.constant 0 : index
    %9 = vector.load %arg7[%c106, %c0_8] : memref<324x128xf32, #tpu.memory_space<vmem>>, vector<4x128xf32>
    tpu.vector_store %arg7[%c106, %c0_8], %8 {strides = array<i32>} : memref<324x128xf32, #tpu.memory_space<vmem>>, vector<4x128xf32>,
    %cst_9 = arith.constant 0.000000e+00 : f32
    %10 = vector.broadcast %cst_9 : f32 to vector<4x128xf32>
    %c124 = arith.constant 124 : index
    %c0_10 = arith.constant 0 : index
    %11 = vector.load %arg7[%c124, %c0_10] : memref<324x128xf32, #tpu.memory_space<vmem>>, vector<4x128xf32>
    tpu.vector_store %arg7[%c124, %c0_10], %10 {strides = array<i32>} : memref<324x128xf32, #tpu.memory_space<vmem>>, vector<4x128xf32>,
    %cst_11 = arith.constant 0.000000e+00 : f32
    %12 = vector.broadcast %cst_11 : f32 to vector<4x128xf32>
    %c142 = arith.constant 142 : index
    %c0_12 = arith.constant 0 : index
    %13 = vector.load %arg7[%c142, %c0_12] : memref<324x128xf32, #tpu.memory_space<vmem>>, vector<4x128xf32>
    tpu.vector_store %arg7[%c142, %c0_12], %12 {strides = array<i32>} : memref<324x128xf32, #tpu.memory_space<vmem>>, vector<4x128xf32>,
    %cst_13 = arith.constant 0.000000e+00 : f32
    %14 = vector.broadcast %cst_13 : f32 to vector<4x128xf32>
    %c160 = arith.constant 160 : index
    %c0_14 = arith.constant 0 : index
    %15 = vector.load %arg7[%c160, %c0_14] : memref<324x128xf32, #tpu.memory_space<vmem>>, vector<4x128xf32>
    tpu.vector_store %arg7[%c160, %c0_14], %14 {strides = array<i32>} : memref<324x128xf32, #tpu.memory_space<vmem>>, vector<4x128xf32>,
    %cst_15 = arith.constant 0.000000e+00 : f32
    %16 = vector.broadcast %cst_15 : f32 to vector<4x128xf32>
    %c178 = arith.constant 178 : index
    %c0_16 = arith.constant 0 : index
    %17 = vector.load %arg7[%c178, %c0_16] : memref<324x128xf32, #tpu.memory_space<vmem>>, vector<4x128xf32>
    tpu.vector_store %arg7[%c178, %c0_16], %16 {strides = array<i32>} : memref<324x128xf32, #tpu.memory_space<vmem>>, vector<4x128xf32>,
    %cst_17 = arith.constant 0.000000e+00 : f32
    %18 = vector.broadcast %cst_17 : f32 to vector<4x128xf32>
    %c196 = arith.constant 196 : index
    %c0_18 = arith.constant 0 : index
    %19 = vector.load %arg7[%c196, %c0_18] : memref<324x128xf32, #tpu.memory_space<vmem>>, vector<4x128xf32>
    tpu.vector_store %arg7[%c196, %c0_18], %18 {strides = array<i32>} : memref<324x128xf32, #tpu.memory_space<vmem>>, vector<4x128xf32>,
    %cst_19 = arith.constant 0.000000e+00 : f32
    %20 = vector.broadcast %cst_19 : f32 to vector<4x128xf32>
    %c214 = arith.constant 214 : index
    %c0_20 = arith.constant 0 : index
    %21 = vector.load %arg7[%c214, %c0_20] : memref<324x128xf32, #tpu.memory_space<vmem>>, vector<4x128xf32>
    tpu.vector_store %arg7[%c214, %c0_20], %20 {strides = array<i32>} : memref<324x128xf32, #tpu.memory_space<vmem>>, vector<4x128xf32>,
    %cst_21 = arith.constant 0.000000e+00 : f32
    %22 = vector.broadcast %cst_21 : f32 to vector<4x128xf32>
    %c232 = arith.constant 232 : index
    %c0_22 = arith.constant 0 : index
    %23 = vector.load %arg7[%c232, %c0_22] : memref<324x128xf32, #tpu.memory_space<vmem>>, vector<4x128xf32>
    tpu.vector_store %arg7[%c232, %c0_22], %22 {strides = array<i32>} : memref<324x128xf32, #tpu.memory_space<vmem>>, vector<4x128xf32>,
    %cst_23 = arith.constant 0.000000e+00 : f32
    %24 = vector.broadcast %cst_23 : f32 to vector<4x128xf32>
    %c250 = arith.constant 250 : index
    %c0_24 = arith.constant 0 : index
    %25 = vector.load %arg7[%c250, %c0_24] : memref<324x128xf32, #tpu.memory_space<vmem>>, vector<4x128xf32>
    tpu.vector_store %arg7[%c250, %c0_24], %24 {strides = array<i32>} : memref<324x128xf32, #tpu.memory_space<vmem>>, vector<4x128xf32>,
    %cst_25 = arith.constant 0.000000e+00 : f32
    %26 = vector.broadcast %cst_25 : f32 to vector<4x128xf32>
    %c268 = arith.constant 268 : index
    %c0_26 = arith.constant 0 : index
    %27 = vector.load %arg7[%c268, %c0_26] : memref<324x128xf32, #tpu.memory_space<vmem>>, vector<4x128xf32>
    tpu.vector_store %arg7[%c268, %c0_26], %26 {strides = array<i32>} : memref<324x128xf32, #tpu.memory_space<vmem>>, vector<4x128xf32>,
    %cst_27 = arith.constant 0.000000e+00 : f32
    %28 = vector.broadcast %cst_27 : f32 to vector<38x128xf32>
    %c286 = arith.constant 286 : index
    %c0_28 = arith.constant 0 : index
    %29 = vector.load %arg7[%c286, %c0_28] : memref<324x128xf32, #tpu.memory_space<vmem>>, vector<38x128xf32>
    tpu.vector_store %arg7[%c286, %c0_28], %28 {strides = array<i32>} : memref<324x128xf32, #tpu.memory_space<vmem>>, vector<38x128xf32>,
    %cst_29 = arith.constant 0.000000e+00 : f32
    %30 = vector.broadcast %cst_29 : f32 to vector<11x128xf32>
    %c0_30 = arith.constant 0 : index
    %c0_31 = arith.constant 0 : index
    %31 = vector.load %arg8[%c0_30, %c0_31] : memref<100x128xf32, #tpu.memory_space<vmem>>, vector<11x128xf32>
    tpu.vector_store %arg8[%c0_30, %c0_31], %30 {strides = array<i32>} : memref<100x128xf32, #tpu.memory_space<vmem>>, vector<11x128xf32>,
    %cst_32 = arith.constant 0.000000e+00 : f32
    %32 = vector.broadcast %cst_32 : f32 to vector<2x128xf32>
    %c19 = arith.constant 19 : index
    %c0_33 = arith.constant 0 : index
    %33 = vector.load %arg8[%c19, %c0_33] : memref<100x128xf32, #tpu.memory_space<vmem>>, vector<2x128xf32>
    tpu.vector_store %arg8[%c19, %c0_33], %32 {strides = array<i32>} : memref<100x128xf32, #tpu.memory_space<vmem>>, vector<2x128xf32>,
    %cst_34 = arith.constant 0.000000e+00 : f32
    %34 = vector.broadcast %cst_34 : f32 to vector<2x128xf32>
    %c29 = arith.constant 29 : index
    %c0_35 = arith.constant 0 : index
    %35 = vector.load %arg8[%c29, %c0_35] : memref<100x128xf32, #tpu.memory_space<vmem>>, vector<2x128xf32>
    tpu.vector_store %arg8[%c29, %c0_35], %34 {strides = array<i32>} : memref<100x128xf32, #tpu.memory_space<vmem>>, vector<2x128xf32>,
    %cst_36 = arith.constant 0.000000e+00 : f32
    %36 = vector.broadcast %cst_36 : f32 to vector<2x128xf32>
    %c39 = arith.constant 39 : index
    %c0_37 = arith.constant 0 : index
    %37 = vector.load %arg8[%c39, %c0_37] : memref<100x128xf32, #tpu.memory_space<vmem>>, vector<2x128xf32>
    tpu.vector_store %arg8[%c39, %c0_37], %36 {strides = array<i32>} : memref<100x128xf32, #tpu.memory_space<vmem>>, vector<2x128xf32>,
    %cst_38 = arith.constant 0.000000e+00 : f32
    %38 = vector.broadcast %cst_38 : f32 to vector<2x128xf32>
    %c49 = arith.constant 49 : index
    %c0_39 = arith.constant 0 : index
    %39 = vector.load %arg8[%c49, %c0_39] : memref<100x128xf32, #tpu.memory_space<vmem>>, vector<2x128xf32>
    tpu.vector_store %arg8[%c49, %c0_39], %38 {strides = array<i32>} : memref<100x128xf32, #tpu.memory_space<vmem>>, vector<2x128xf32>,
    %cst_40 = arith.constant 0.000000e+00 : f32
    %40 = vector.broadcast %cst_40 : f32 to vector<2x128xf32>
    %c59 = arith.constant 59 : index
    %c0_41 = arith.constant 0 : index
    %41 = vector.load %arg8[%c59, %c0_41] : memref<100x128xf32, #tpu.memory_space<vmem>>, vector<2x128xf32>
    tpu.vector_store %arg8[%c59, %c0_41], %40 {strides = array<i32>} : memref<100x128xf32, #tpu.memory_space<vmem>>, vector<2x128xf32>,
    %cst_42 = arith.constant 0.000000e+00 : f32
    %42 = vector.broadcast %cst_42 : f32 to vector<2x128xf32>
    %c69 = arith.constant 69 : index
    %c0_43 = arith.constant 0 : index
    %43 = vector.load %arg8[%c69, %c0_43] : memref<100x128xf32, #tpu.memory_space<vmem>>, vector<2x128xf32>
    tpu.vector_store %arg8[%c69, %c0_43], %42 {strides = array<i32>} : memref<100x128xf32, #tpu.memory_space<vmem>>, vector<2x128xf32>,
    %cst_44 = arith.constant 0.000000e+00 : f32
    %44 = vector.broadcast %cst_44 : f32 to vector<2x128xf32>
    %c79 = arith.constant 79 : index
    %c0_45 = arith.constant 0 : index
    %45 = vector.load %arg8[%c79, %c0_45] : memref<100x128xf32, #tpu.memory_space<vmem>>, vector<2x128xf32>
    tpu.vector_store %arg8[%c79, %c0_45], %44 {strides = array<i32>} : memref<100x128xf32, #tpu.memory_space<vmem>>, vector<2x128xf32>,
    %cst_46 = arith.constant 0.000000e+00 : f32
    %46 = vector.broadcast %cst_46 : f32 to vector<11x128xf32>
    %c89 = arith.constant 89 : index
    %c0_47 = arith.constant 0 : index
    %47 = vector.load %arg8[%c89, %c0_47] : memref<100x128xf32, #tpu.memory_space<vmem>>, vector<11x128xf32>
    tpu.vector_store %arg8[%c89, %c0_47], %46 {strides = array<i32>} : memref<100x128xf32, #tpu.memory_space<vmem>>, vector<11x128xf32>,
    %c0_48 = arith.constant 0 : index
    %c0_49 = arith.constant 0 : index
    %c0_50 = arith.constant 0 : index
    %48 = vector.load %arg1[%c0_48, %c0_49, %c0_50] : memref<2x196x16xbf16, #tpu.memory_space<vmem>>, vector<1x196x16xbf16>
    %49 = vector.shape_cast %48 : vector<1x196x16xbf16> to vector<196x16xbf16>
    %c0_51 = arith.constant 0 : index
    %c0_52 = arith.constant 0 : index
    %50 = vector.load %arg2[%c0_51, %c0_52] : memref<16x128xbf16, #tpu.memory_space<vmem>>, vector<16x128xbf16>
    %cst_53 = arith.constant dense<0.000000e+00> : vector<196x128xf32>
    %51 = tpu.matmul %49, %50, %cst_53 {dimension_numbers = #tpu.dot_dimension_numbers<[1], [0], [0], [1], [0, 0, 1, 1], [], []>} : vector<196x16xbf16>, vector<16x128xbf16>, vector<196x128xf32> -> vector<196x128xf32>
    %cst_54 = arith.constant 0.000000e+00 : f32
    %52 = vector.broadcast %cst_54 : f32 to vector<196x128xf32>
    %53 = arith.cmpf ogt, %51, %52 : vector<196x128xf32>
    %cst_55 = arith.constant 2.000000e-01 : f32
    %54 = vector.broadcast %cst_55 : f32 to vector<196x128xf32>
    %55 = arith.mulf %54, %51 : vector<196x128xf32>
    %56 = arith.select %53, %51, %55 : vector<196x128xi1>, vector<196x128xf32>
    %57 = vector.extract_strided_slice %56 {offsets = [0, 0], sizes = [14, 128], strides = [1, 1]} : vector<196x128xf32> to vector<14x128xf32>
    %c38 = arith.constant 38 : index
    %c0_56 = arith.constant 0 : index
    %58 = vector.load %arg7[%c38, %c0_56] : memref<324x128xf32, #tpu.memory_space<vmem>>, vector<14x128xf32>
    tpu.vector_store %arg7[%c38, %c0_56], %57 {strides = array<i32>} : memref<324x128xf32, #tpu.memory_space<vmem>>, vector<14x128xf32>,
    %59 = vector.extract_strided_slice %56 {offsets = [14, 0], sizes = [14, 128], strides = [1, 1]} : vector<196x128xf32> to vector<14x128xf32>
    %c56 = arith.constant 56 : index
    %c0_57 = arith.constant 0 : index
    %60 = vector.load %arg7[%c56, %c0_57] : memref<324x128xf32, #tpu.memory_space<vmem>>, vector<14x128xf32>
    tpu.vector_store %arg7[%c56, %c0_57], %59 {strides = array<i32>} : memref<324x128xf32, #tpu.memory_space<vmem>>, vector<14x128xf32>,
    %61 = vector.extract_strided_slice %56 {offsets = [28, 0], sizes = [14, 128], strides = [1, 1]} : vector<196x128xf32> to vector<14x128xf32>
    %c74 = arith.constant 74 : index
    %c0_58 = arith.constant 0 : index
    %62 = vector.load %arg7[%c74, %c0_58] : memref<324x128xf32, #tpu.memory_space<vmem>>, vector<14x128xf32>
    tpu.vector_store %arg7[%c74, %c0_58], %61 {strides = array<i32>} : memref<324x128xf32, #tpu.memory_space<vmem>>, vector<14x128xf32>,
    %63 = vector.extract_strided_slice %56 {offsets = [42, 0], sizes = [14, 128], strides = [1, 1]} : vector<196x128xf32> to vector<14x128xf32>
    %c92 = arith.constant 92 : index
    %c0_59 = arith.constant 0 : index
    %64 = vector.load %arg7[%c92, %c0_59] : memref<324x128xf32, #tpu.memory_space<vmem>>, vector<14x128xf32>
    tpu.vector_store %arg7[%c92, %c0_59], %63 {strides = array<i32>} : memref<324x128xf32, #tpu.memory_space<vmem>>, vector<14x128xf32>,
    %65 = vector.extract_strided_slice %56 {offsets = [56, 0], sizes = [14, 128], strides = [1, 1]} : vector<196x128xf32> to vector<14x128xf32>
    %c110 = arith.constant 110 : index
    %c0_60 = arith.constant 0 : index
    %66 = vector.load %arg7[%c110, %c0_60] : memref<324x128xf32, #tpu.memory_space<vmem>>, vector<14x128xf32>
    tpu.vector_store %arg7[%c110, %c0_60], %65 {strides = array<i32>} : memref<324x128xf32, #tpu.memory_space<vmem>>, vector<14x128xf32>,
    %67 = vector.extract_strided_slice %56 {offsets = [70, 0], sizes = [14, 128], strides = [1, 1]} : vector<196x128xf32> to vector<14x128xf32>
    %c128 = arith.constant 128 : index
    %c0_61 = arith.constant 0 : index
    %68 = vector.load %arg7[%c128, %c0_61] : memref<324x128xf32, #tpu.memory_space<vmem>>, vector<14x128xf32>
    tpu.vector_store %arg7[%c128, %c0_61], %67 {strides = array<i32>} : memref<324x128xf32, #tpu.memory_space<vmem>>, vector<14x128xf32>,
    %69 = vector.extract_strided_slice %56 {offsets = [84, 0], sizes = [14, 128], strides = [1, 1]} : vector<196x128xf32> to vector<14x128xf32>
    %c146 = arith.constant 146 : index
    %c0_62 = arith.constant 0 : index
    %70 = vector.load %arg7[%c146, %c0_62] : memref<324x128xf32, #tpu.memory_space<vmem>>, vector<14x128xf32>
    tpu.vector_store %arg7[%c146, %c0_62], %69 {strides = array<i32>} : memref<324x128xf32, #tpu.memory_space<vmem>>, vector<14x128xf32>,
    %71 = vector.extract_strided_slice %56 {offsets = [98, 0], sizes = [14, 128], strides = [1, 1]} : vector<196x128xf32> to vector<14x128xf32>
    %c164 = arith.constant 164 : index
    %c0_63 = arith.constant 0 : index
    %72 = vector.load %arg7[%c164, %c0_63] : memref<324x128xf32, #tpu.memory_space<vmem>>, vector<14x128xf32>
    tpu.vector_store %arg7[%c164, %c0_63], %71 {strides = array<i32>} : memref<324x128xf32, #tpu.memory_space<vmem>>, vector<14x128xf32>,
    %73 = vector.extract_strided_slice %56 {offsets = [112, 0], sizes = [14, 128], strides = [1, 1]} : vector<196x128xf32> to vector<14x128xf32>
    %c182 = arith.constant 182 : index
    %c0_64 = arith.constant 0 : index
    %74 = vector.load %arg7[%c182, %c0_64] : memref<324x128xf32, #tpu.memory_space<vmem>>, vector<14x128xf32>
    tpu.vector_store %arg7[%c182, %c0_64], %73 {strides = array<i32>} : memref<324x128xf32, #tpu.memory_space<vmem>>, vector<14x128xf32>,
    %75 = vector.extract_strided_slice %56 {offsets = [126, 0], sizes = [14, 128], strides = [1, 1]} : vector<196x128xf32> to vector<14x128xf32>
    %c200 = arith.constant 200 : index
    %c0_65 = arith.constant 0 : index
    %76 = vector.load %arg7[%c200, %c0_65] : memref<324x128xf32, #tpu.memory_space<vmem>>, vector<14x128xf32>
    tpu.vector_store %arg7[%c200, %c0_65], %75 {strides = array<i32>} : memref<324x128xf32, #tpu.memory_space<vmem>>, vector<14x128xf32>,
    %77 = vector.extract_strided_slice %56 {offsets = [140, 0], sizes = [14, 128], strides = [1, 1]} : vector<196x128xf32> to vector<14x128xf32>
    %c218 = arith.constant 218 : index
    %c0_66 = arith.constant 0 : index
    %78 = vector.load %arg7[%c218, %c0_66] : memref<324x128xf32, #tpu.memory_space<vmem>>, vector<14x128xf32>
    tpu.vector_store %arg7[%c218, %c0_66], %77 {strides = array<i32>} : memref<324x128xf32, #tpu.memory_space<vmem>>, vector<14x128xf32>,
    %79 = vector.extract_strided_slice %56 {offsets = [154, 0], sizes = [14, 128], strides = [1, 1]} : vector<196x128xf32> to vector<14x128xf32>
    %c236 = arith.constant 236 : index
    %c0_67 = arith.constant 0 : index
    %80 = vector.load %arg7[%c236, %c0_67] : memref<324x128xf32, #tpu.memory_space<vmem>>, vector<14x128xf32>
    tpu.vector_store %arg7[%c236, %c0_67], %79 {strides = array<i32>} : memref<324x128xf32, #tpu.memory_space<vmem>>, vector<14x128xf32>,
    %81 = vector.extract_strided_slice %56 {offsets = [168, 0], sizes = [14, 128], strides = [1, 1]} : vector<196x128xf32> to vector<14x128xf32>
    %c254 = arith.constant 254 : index
    %c0_68 = arith.constant 0 : index
    %82 = vector.load %arg7[%c254, %c0_68] : memref<324x128xf32, #tpu.memory_space<vmem>>, vector<14x128xf32>
    tpu.vector_store %arg7[%c254, %c0_68], %81 {strides = array<i32>} : memref<324x128xf32, #tpu.memory_space<vmem>>, vector<14x128xf32>,
    %83 = vector.extract_strided_slice %56 {offsets = [182, 0], sizes = [14, 128], strides = [1, 1]} : vector<196x128xf32> to vector<14x128xf32>
    %c272 = arith.constant 272 : index
    %c0_69 = arith.constant 0 : index
    %84 = vector.load %arg7[%c272, %c0_69] : memref<324x128xf32, #tpu.memory_space<vmem>>, vector<14x128xf32>
    tpu.vector_store %arg7[%c272, %c0_69], %83 {strides = array<i32>} : memref<324x128xf32, #tpu.memory_space<vmem>>, vector<14x128xf32>,
    %cst_70 = arith.constant 0.000000e+00 : f32
    %85 = vector.broadcast %cst_70 : f32 to vector<64x128xf32>
    %c0_71 = arith.constant 0 : index
    %c0_72 = arith.constant 0 : index
    %86 = tpu.strided_load %arg7[%c0_71, %c0_72] {strides = array<i32: 2, 1>} : memref<324x128xf32, #tpu.memory_space<vmem>>, vector<8x128xf32>
    %c36 = arith.constant 36 : index
    %c0_73 = arith.constant 0 : index
    %87 = tpu.strided_load %arg7[%c36, %c0_73] {strides = array<i32: 2, 1>} : memref<324x128xf32, #tpu.memory_space<vmem>>, vector<8x128xf32>
    %c72 = arith.constant 72 : index
    %c0_74 = arith.constant 0 : index
    %88 = tpu.strided_load %arg7[%c72, %c0_74] {strides = array<i32: 2, 1>} : memref<324x128xf32, #tpu.memory_space<vmem>>, vector<8x128xf32>
    %c108 = arith.constant 108 : index
    %c0_75 = arith.constant 0 : index
    %89 = tpu.strided_load %arg7[%c108, %c0_75] {strides = array<i32: 2, 1>} : memref<324x128xf32, #tpu.memory_space<vmem>>, vector<8x128xf32>
    %c144 = arith.constant 144 : index
    %c0_76 = arith.constant 0 : index
    %90 = tpu.strided_load %arg7[%c144, %c0_76] {strides = array<i32: 2, 1>} : memref<324x128xf32, #tpu.memory_space<vmem>>, vector<8x128xf32>
    %c180 = arith.constant 180 : index
    %c0_77 = arith.constant 0 : index
    %91 = tpu.strided_load %arg7[%c180, %c0_77] {strides = array<i32: 2, 1>} : memref<324x128xf32, #tpu.memory_space<vmem>>, vector<8x128xf32>
    %c216 = arith.constant 216 : index
    %c0_78 = arith.constant 0 : index
    %92 = tpu.strided_load %arg7[%c216, %c0_78] {strides = array<i32: 2, 1>} : memref<324x128xf32, #tpu.memory_space<vmem>>, vector<8x128xf32>
    %c252 = arith.constant 252 : index
    %c0_79 = arith.constant 0 : index
    %93 = tpu.strided_load %arg7[%c252, %c0_79] {strides = array<i32: 2, 1>} : memref<324x128xf32, #tpu.memory_space<vmem>>, vector<8x128xf32>
    %94 = tpu.concatenate %86, %87, %88, %89, %90, %91, %92, %93 in 0 : vector<8x128xf32>, vector<8x128xf32>, vector<8x128xf32>, vector<8x128xf32>, vector<8x128xf32>, vector<8x128xf32>, vector<8x128xf32>, vector<8x128xf32> -> vector<64x128xf32>
    %95 = vector.extract_strided_slice %94 {offsets = [0, 0], sizes = [64, 16], strides = [1, 1]} : vector<64x128xf32> to vector<64x16xf32>
    %96 = arith.truncf %95 : vector<64x16xf32> to vector<64x16xbf16>
    %c0_80 = arith.constant 0 : index
    %c0_81 = arith.constant 0 : index
    %97 = vector.load %arg3[%c0_80, %c0_81] : memref<256x128xbf16, #tpu.memory_space<vmem>>, vector<16x128xbf16>
    %cst_82 = arith.constant dense<0.000000e+00> : vector<64x128xf32>
    %98 = tpu.matmul %96, %97, %cst_82 {dimension_numbers = #tpu.dot_dimension_numbers<[1], [0], [0], [1], [0, 0, 1, 1], [], []>} : vector<64x16xbf16>, vector<16x128xbf16>, vector<64x128xf32> -> vector<64x128xf32>
    %99 = arith.addf %85, %98 : vector<64x128xf32>
    %c1 = arith.constant 1 : index
    %c0_83 = arith.constant 0 : index
    %100 = tpu.strided_load %arg7[%c1, %c0_83] {strides = array<i32: 2, 1>} : memref<324x128xf32, #tpu.memory_space<vmem>>, vector<8x128xf32>
    %c37 = arith.constant 37 : index
    %c0_84 = arith.constant 0 : index
    %101 = tpu.strided_load %arg7[%c37, %c0_84] {strides = array<i32: 2, 1>} : memref<324x128xf32, #tpu.memory_space<vmem>>, vector<8x128xf32>
    %c73 = arith.constant 73 : index
    %c0_85 = arith.constant 0 : index
    %102 = tpu.strided_load %arg7[%c73, %c0_85] {strides = array<i32: 2, 1>} : memref<324x128xf32, #tpu.memory_space<vmem>>, vector<8x128xf32>
    %c109 = arith.constant 109 : index
    %c0_86 = arith.constant 0 : index
    %103 = tpu.strided_load %arg7[%c109, %c0_86] {strides = array<i32: 2, 1>} : memref<324x128xf32, #tpu.memory_space<vmem>>, vector<8x128xf32>
    %c145 = arith.constant 145 : index
    %c0_87 = arith.constant 0 : index
    %104 = tpu.strided_load %arg7[%c145, %c0_87] {strides = array<i32: 2, 1>} : memref<324x128xf32, #tpu.memory_space<vmem>>, vector<8x128xf32>
    %c181 = arith.constant 181 : index
    %c0_88 = arith.constant 0 : index
    %105 = tpu.strided_load %arg7[%c181, %c0_88] {strides = array<i32: 2, 1>} : memref<324x128xf32, #tpu.memory_space<vmem>>, vector<8x128xf32>
    %c217 = arith.constant 217 : index
    %c0_89 = arith.constant 0 : index
    %106 = tpu.strided_load %arg7[%c217, %c0_89] {strides = array<i32: 2, 1>} : memref<324x128xf32, #tpu.memory_space<vmem>>, vector<8x128xf32>
    %c253 = arith.constant 253 : index
    %c0_90 = arith.constant 0 : index
    %107 = tpu.strided_load %arg7[%c253, %c0_90] {strides = array<i32: 2, 1>} : memref<324x128xf32, #tpu.memory_space<vmem>>, vector<8x128xf32>
    %108 = tpu.concatenate %100, %101, %102, %103, %104, %105, %106, %107 in 0 : vector<8x128xf32>, vector<8x128xf32>, vector<8x128xf32>, vector<8x128xf32>, vector<8x128xf32>, vector<8x128xf32>, vector<8x128xf32>, vector<8x128xf32> -> vector<64x128xf32>
    %109 = vector.extract_strided_slice %108 {offsets = [0, 0], sizes = [64, 16], strides = [1, 1]} : vector<64x128xf32> to vector<64x16xf32>
    %110 = arith.truncf %109 : vector<64x16xf32> to vector<64x16xbf16>
    %c16 = arith.constant 16 : index
    %c0_91 = arith.constant 0 : index
    %111 = vector.load %arg3[%c16, %c0_91] : memref<256x128xbf16, #tpu.memory_space<vmem>>, vector<16x128xbf16>
    %cst_92 = arith.constant dense<0.000000e+00> : vector<64x128xf32>
    %112 = tpu.matmul %110, %111, %cst_92 {dimension_numbers = #tpu.dot_dimension_numbers<[1], [0], [0], [1], [0, 0, 1, 1], [], []>} : vector<64x16xbf16>, vector<16x128xbf16>, vector<64x128xf32> -> vector<64x128xf32>
    %113 = arith.addf %99, %112 : vector<64x128xf32>
    %c2 = arith.constant 2 : index
    %c0_93 = arith.constant 0 : index
    %114 = tpu.strided_load %arg7[%c2, %c0_93] {strides = array<i32: 2, 1>} : memref<324x128xf32, #tpu.memory_space<vmem>>, vector<8x128xf32>
    %c38_94 = arith.constant 38 : index
    %c0_95 = arith.constant 0 : index
    %115 = tpu.strided_load %arg7[%c38_94, %c0_95] {strides = array<i32: 2, 1>} : memref<324x128xf32, #tpu.memory_space<vmem>>, vector<8x128xf32>
    %c74_96 = arith.constant 74 : index
    %c0_97 = arith.constant 0 : index
    %116 = tpu.strided_load %arg7[%c74_96, %c0_97] {strides = array<i32: 2, 1>} : memref<324x128xf32, #tpu.memory_space<vmem>>, vector<8x128xf32>
    %c110_98 = arith.constant 110 : index
    %c0_99 = arith.constant 0 : index
    %117 = tpu.strided_load %arg7[%c110_98, %c0_99] {strides = array<i32: 2, 1>} : memref<324x128xf32, #tpu.memory_space<vmem>>, vector<8x128xf32>
    %c146_100 = arith.constant 146 : index
    %c0_101 = arith.constant 0 : index
    %118 = tpu.strided_load %arg7[%c146_100, %c0_101] {strides = array<i32: 2, 1>} : memref<324x128xf32, #tpu.memory_space<vmem>>, vector<8x128xf32>
    %c182_102 = arith.constant 182 : index
    %c0_103 = arith.constant 0 : index
    %119 = tpu.strided_load %arg7[%c182_102, %c0_103] {strides = array<i32: 2, 1>} : memref<324x128xf32, #tpu.memory_space<vmem>>, vector<8x128xf32>
    %c218_104 = arith.constant 218 : index
    %c0_105 = arith.constant 0 : index
    %120 = tpu.strided_load %arg7[%c218_104, %c0_105] {strides = array<i32: 2, 1>} : memref<324x128xf32, #tpu.memory_space<vmem>>, vector<8x128xf32>
    %c254_106 = arith.constant 254 : index
    %c0_107 = arith.constant 0 : index
    %121 = tpu.strided_load %arg7[%c254_106, %c0_107] {strides = array<i32: 2, 1>} : memref<324x128xf32, #tpu.memory_space<vmem>>, vector<8x128xf32>
    %122 = tpu.concatenate %114, %115, %116, %117, %118, %119, %120, %121 in 0 : vector<8x128xf32>, vector<8x128xf32>, vector<8x128xf32>, vector<8x128xf32>, vector<8x128xf32>, vector<8x128xf32>, vector<8x128xf32>, vector<8x128xf32> -> vector<64x128xf32>
    %123 = vector.extract_strided_slice %122 {offsets = [0, 0], sizes = [64, 16], strides = [1, 1]} : vector<64x128xf32> to vector<64x16xf32>
    %124 = arith.truncf %123 : vector<64x16xf32> to vector<64x16xbf16>
    %c32 = arith.constant 32 : index
    %c0_108 = arith.constant 0 : index
    %125 = vector.load %arg3[%c32, %c0_108] : memref<256x128xbf16, #tpu.memory_space<vmem>>, vector<16x128xbf16>
    %cst_109 = arith.constant dense<0.000000e+00> : vector<64x128xf32>
    %126 = tpu.matmul %124, %125, %cst_109 {dimension_numbers = #tpu.dot_dimension_numbers<[1], [0], [0], [1], [0, 0, 1, 1], [], []>} : vector<64x16xbf16>, vector<16x128xbf16>, vector<64x128xf32> -> vector<64x128xf32>
    %127 = arith.addf %113, %126 : vector<64x128xf32>
    %c3 = arith.constant 3 : index
    %c0_110 = arith.constant 0 : index
    %128 = tpu.strided_load %arg7[%c3, %c0_110] {strides = array<i32: 2, 1>} : memref<324x128xf32, #tpu.memory_space<vmem>>, vector<8x128xf32>
    %c39_111 = arith.constant 39 : index
    %c0_112 = arith.constant 0 : index
    %129 = tpu.strided_load %arg7[%c39_111, %c0_112] {strides = array<i32: 2, 1>} : memref<324x128xf32, #tpu.memory_space<vmem>>, vector<8x128xf32>
    %c75 = arith.constant 75 : index
    %c0_113 = arith.constant 0 : index
    %130 = tpu.strided_load %arg7[%c75, %c0_113] {strides = array<i32: 2, 1>} : memref<324x128xf32, #tpu.memory_space<vmem>>, vector<8x128xf32>
    %c111 = arith.constant 111 : index
    %c0_114 = arith.constant 0 : index
    %131 = tpu.strided_load %arg7[%c111, %c0_114] {strides = array<i32: 2, 1>} : memref<324x128xf32, #tpu.memory_space<vmem>>, vector<8x128xf32>
    %c147 = arith.constant 147 : index
    %c0_115 = arith.constant 0 : index
    %132 = tpu.strided_load %arg7[%c147, %c0_115] {strides = array<i32: 2, 1>} : memref<324x128xf32, #tpu.memory_space<vmem>>, vector<8x128xf32>
    %c183 = arith.constant 183 : index
    %c0_116 = arith.constant 0 : index
    %133 = tpu.strided_load %arg7[%c183, %c0_116] {strides = array<i32: 2, 1>} : memref<324x128xf32, #tpu.memory_space<vmem>>, vector<8x128xf32>
    %c219 = arith.constant 219 : index
    %c0_117 = arith.constant 0 : index
    %134 = tpu.strided_load %arg7[%c219, %c0_117] {strides = array<i32: 2, 1>} : memref<324x128xf32, #tpu.memory_space<vmem>>, vector<8x128xf32>
    %c255 = arith.constant 255 : index
    %c0_118 = arith.constant 0 : index
    %135 = tpu.strided_load %arg7[%c255, %c0_118] {strides = array<i32: 2, 1>} : memref<324x128xf32, #tpu.memory_space<vmem>>, vector<8x128xf32>
    %136 = tpu.concatenate %128, %129, %130, %131, %132, %133, %134, %135 in 0 : vector<8x128xf32>, vector<8x128xf32>, vector<8x128xf32>, vector<8x128xf32>, vector<8x128xf32>, vector<8x128xf32>, vector<8x128xf32>, vector<8x128xf32> -> vector<64x128xf32>
    %137 = vector.extract_strided_slice %136 {offsets = [0, 0], sizes = [64, 16], strides = [1, 1]} : vector<64x128xf32> to vector<64x16xf32>
    %138 = arith.truncf %137 : vector<64x16xf32> to vector<64x16xbf16>
    %c48 = arith.constant 48 : index
    %c0_119 = arith.constant 0 : index
    %139 = vector.load %arg3[%c48, %c0_119] : memref<256x128xbf16, #tpu.memory_space<vmem>>, vector<16x128xbf16>
    %cst_120 = arith.constant dense<0.000000e+00> : vector<64x128xf32>
    %140 = tpu.matmul %138, %139, %cst_120 {dimension_numbers = #tpu.dot_dimension_numbers<[1], [0], [0], [1], [0, 0, 1, 1], [], []>} : vector<64x16xbf16>, vector<16x128xbf16>, vector<64x128xf32> -> vector<64x128xf32>
    %141 = arith.addf %127, %140 : vector<64x128xf32>
    %c18 = arith.constant 18 : index
    %c0_121 = arith.constant 0 : index
    %142 = tpu.strided_load %arg7[%c18, %c0_121] {strides = array<i32: 2, 1>} : memref<324x128xf32, #tpu.memory_space<vmem>>, vector<8x128xf32>
    %c54 = arith.constant 54 : index
    %c0_122 = arith.constant 0 : index
    %143 = tpu.strided_load %arg7[%c54, %c0_122] {strides = array<i32: 2, 1>} : memref<324x128xf32, #tpu.memory_space<vmem>>, vector<8x128xf32>
    %c90 = arith.constant 90 : index
    %c0_123 = arith.constant 0 : index
    %144 = tpu.strided_load %arg7[%c90, %c0_123] {strides = array<i32: 2, 1>} : memref<324x128xf32, #tpu.memory_space<vmem>>, vector<8x128xf32>
    %c126 = arith.constant 126 : index
    %c0_124 = arith.constant 0 : index
    %145 = tpu.strided_load %arg7[%c126, %c0_124] {strides = array<i32: 2, 1>} : memref<324x128xf32, #tpu.memory_space<vmem>>, vector<8x128xf32>
    %c162 = arith.constant 162 : index
    %c0_125 = arith.constant 0 : index
    %146 = tpu.strided_load %arg7[%c162, %c0_125] {strides = array<i32: 2, 1>} : memref<324x128xf32, #tpu.memory_space<vmem>>, vector<8x128xf32>
    %c198 = arith.constant 198 : index
    %c0_126 = arith.constant 0 : index
    %147 = tpu.strided_load %arg7[%c198, %c0_126] {strides = array<i32: 2, 1>} : memref<324x128xf32, #tpu.memory_space<vmem>>, vector<8x128xf32>
    %c234 = arith.constant 234 : index
    %c0_127 = arith.constant 0 : index
    %148 = tpu.strided_load %arg7[%c234, %c0_127] {strides = array<i32: 2, 1>} : memref<324x128xf32, #tpu.memory_space<vmem>>, vector<8x128xf32>
    %c270 = arith.constant 270 : index
    %c0_128 = arith.constant 0 : index
    %149 = tpu.strided_load %arg7[%c270, %c0_128] {strides = array<i32: 2, 1>} : memref<324x128xf32, #tpu.memory_space<vmem>>, vector<8x128xf32>
    %150 = tpu.concatenate %142, %143, %144, %145, %146, %147, %148, %149 in 0 : vector<8x128xf32>, vector<8x128xf32>, vector<8x128xf32>, vector<8x128xf32>, vector<8x128xf32>, vector<8x128xf32>, vector<8x128xf32>, vector<8x128xf32> -> vector<64x128xf32>
    %151 = vector.extract_strided_slice %150 {offsets = [0, 0], sizes = [64, 16], strides = [1, 1]} : vector<64x128xf32> to vector<64x16xf32>
    %152 = arith.truncf %151 : vector<64x16xf32> to vector<64x16xbf16>
    %c64 = arith.constant 64 : index
    %c0_129 = arith.constant 0 : index
    %153 = vector.load %arg3[%c64, %c0_129] : memref<256x128xbf16, #tpu.memory_space<vmem>>, vector<16x128xbf16>
    %cst_130 = arith.constant dense<0.000000e+00> : vector<64x128xf32>
    %154 = tpu.matmul %152, %153, %cst_130 {dimension_numbers = #tpu.dot_dimension_numbers<[1], [0], [0], [1], [0, 0, 1, 1], [], []>} : vector<64x16xbf16>, vector<16x128xbf16>, vector<64x128xf32> -> vector<64x128xf32>
    %155 = arith.addf %141, %154 : vector<64x128xf32>
    %c19_131 = arith.constant 19 : index
    %c0_132 = arith.constant 0 : index
    %156 = tpu.strided_load %arg7[%c19_131, %c0_132] {strides = array<i32: 2, 1>} : memref<324x128xf32, #tpu.memory_space<vmem>>, vector<8x128xf32>
    %c55 = arith.constant 55 : index
    %c0_133 = arith.constant 0 : index
    %157 = tpu.strided_load %arg7[%c55, %c0_133] {strides = array<i32: 2, 1>} : memref<324x128xf32, #tpu.memory_space<vmem>>, vector<8x128xf32>
    %c91 = arith.constant 91 : index
    %c0_134 = arith.constant 0 : index
    %158 = tpu.strided_load %arg7[%c91, %c0_134] {strides = array<i32: 2, 1>} : memref<324x128xf32, #tpu.memory_space<vmem>>, vector<8x128xf32>
    %c127 = arith.constant 127 : index
    %c0_135 = arith.constant 0 : index
    %159 = tpu.strided_load %arg7[%c127, %c0_135] {strides = array<i32: 2, 1>} : memref<324x128xf32, #tpu.memory_space<vmem>>, vector<8x128xf32>
    %c163 = arith.constant 163 : index
    %c0_136 = arith.constant 0 : index
    %160 = tpu.strided_load %arg7[%c163, %c0_136] {strides = array<i32: 2, 1>} : memref<324x128xf32, #tpu.memory_space<vmem>>, vector<8x128xf32>
    %c199 = arith.constant 199 : index
    %c0_137 = arith.constant 0 : index
    %161 = tpu.strided_load %arg7[%c199, %c0_137] {strides = array<i32: 2, 1>} : memref<324x128xf32, #tpu.memory_space<vmem>>, vector<8x128xf32>
    %c235 = arith.constant 235 : index
    %c0_138 = arith.constant 0 : index
    %162 = tpu.strided_load %arg7[%c235, %c0_138] {strides = array<i32: 2, 1>} : memref<324x128xf32, #tpu.memory_space<vmem>>, vector<8x128xf32>
    %c271 = arith.constant 271 : index
    %c0_139 = arith.constant 0 : index
    %163 = tpu.strided_load %arg7[%c271, %c0_139] {strides = array<i32: 2, 1>} : memref<324x128xf32, #tpu.memory_space<vmem>>, vector<8x128xf32>
    %164 = tpu.concatenate %156, %157, %158, %159, %160, %161, %162, %163 in 0 : vector<8x128xf32>, vector<8x128xf32>, vector<8x128xf32>, vector<8x128xf32>, vector<8x128xf32>, vector<8x128xf32>, vector<8x128xf32>, vector<8x128xf32> -> vector<64x128xf32>
    %165 = vector.extract_strided_slice %164 {offsets = [0, 0], sizes = [64, 16], strides = [1, 1]} : vector<64x128xf32> to vector<64x16xf32>
    %166 = arith.truncf %165 : vector<64x16xf32> to vector<64x16xbf16>
    %c80 = arith.constant 80 : index
    %c0_140 = arith.constant 0 : index
    %167 = vector.load %arg3[%c80, %c0_140] : memref<256x128xbf16, #tpu.memory_space<vmem>>, vector<16x128xbf16>
    %cst_141 = arith.constant dense<0.000000e+00> : vector<64x128xf32>
    %168 = tpu.matmul %166, %167, %cst_141 {dimension_numbers = #tpu.dot_dimension_numbers<[1], [0], [0], [1], [0, 0, 1, 1], [], []>} : vector<64x16xbf16>, vector<16x128xbf16>, vector<64x128xf32> -> vector<64x128xf32>
    %169 = arith.addf %155, %168 : vector<64x128xf32>
    %c20 = arith.constant 20 : index
    %c0_142 = arith.constant 0 : index
    %170 = tpu.strided_load %arg7[%c20, %c0_142] {strides = array<i32: 2, 1>} : memref<324x128xf32, #tpu.memory_space<vmem>>, vector<8x128xf32>
    %c56_143 = arith.constant 56 : index
    %c0_144 = arith.constant 0 : index
    %171 = tpu.strided_load %arg7[%c56_143, %c0_144] {strides = array<i32: 2, 1>} : memref<324x128xf32, #tpu.memory_space<vmem>>, vector<8x128xf32>
    %c92_145 = arith.constant 92 : index
    %c0_146 = arith.constant 0 : index
    %172 = tpu.strided_load %arg7[%c92_145, %c0_146] {strides = array<i32: 2, 1>} : memref<324x128xf32, #tpu.memory_space<vmem>>, vector<8x128xf32>
    %c128_147 = arith.constant 128 : index
    %c0_148 = arith.constant 0 : index
    %173 = tpu.strided_load %arg7[%c128_147, %c0_148] {strides = array<i32: 2, 1>} : memref<324x128xf32, #tpu.memory_space<vmem>>, vector<8x128xf32>
    %c164_149 = arith.constant 164 : index
    %c0_150 = arith.constant 0 : index
    %174 = tpu.strided_load %arg7[%c164_149, %c0_150] {strides = array<i32: 2, 1>} : memref<324x128xf32, #tpu.memory_space<vmem>>, vector<8x128xf32>
    %c200_151 = arith.constant 200 : index
    %c0_152 = arith.constant 0 : index
    %175 = tpu.strided_load %arg7[%c200_151, %c0_152] {strides = array<i32: 2, 1>} : memref<324x128xf32, #tpu.memory_space<vmem>>, vector<8x128xf32>
    %c236_153 = arith.constant 236 : index
    %c0_154 = arith.constant 0 : index
    %176 = tpu.strided_load %arg7[%c236_153, %c0_154] {strides = array<i32: 2, 1>} : memref<324x128xf32, #tpu.memory_space<vmem>>, vector<8x128xf32>
    %c272_155 = arith.constant 272 : index
    %c0_156 = arith.constant 0 : index
    %177 = tpu.strided_load %arg7[%c272_155, %c0_156] {strides = array<i32: 2, 1>} : memref<324x128xf32, #tpu.memory_space<vmem>>, vector<8x128xf32>
    %178 = tpu.concatenate %170, %171, %172, %173, %174, %175, %176, %177 in 0 : vector<8x128xf32>, vector<8x128xf32>, vector<8x128xf32>, vector<8x128xf32>, vector<8x128xf32>, vector<8x128xf32>, vector<8x128xf32>, vector<8x128xf32> -> vector<64x128xf32>
    %179 = vector.extract_strided_slice %178 {offsets = [0, 0], sizes = [64, 16], strides = [1, 1]} : vector<64x128xf32> to vector<64x16xf32>
    %180 = arith.truncf %179 : vector<64x16xf32> to vector<64x16xbf16>
    %c96 = arith.constant 96 : index
    %c0_157 = arith.constant 0 : index
    %181 = vector.load %arg3[%c96, %c0_157] : memref<256x128xbf16, #tpu.memory_space<vmem>>, vector<16x128xbf16>
    %cst_158 = arith.constant dense<0.000000e+00> : vector<64x128xf32>
    %182 = tpu.matmul %180, %181, %cst_158 {dimension_numbers = #tpu.dot_dimension_numbers<[1], [0], [0], [1], [0, 0, 1, 1], [], []>} : vector<64x16xbf16>, vector<16x128xbf16>, vector<64x128xf32> -> vector<64x128xf32>
    %183 = arith.addf %169, %182 : vector<64x128xf32>
    %c21 = arith.constant 21 : index
    %c0_159 = arith.constant 0 : index
    %184 = tpu.strided_load %arg7[%c21, %c0_159] {strides = array<i32: 2, 1>} : memref<324x128xf32, #tpu.memory_space<vmem>>, vector<8x128xf32>
    %c57 = arith.constant 57 : index
    %c0_160 = arith.constant 0 : index
    %185 = tpu.strided_load %arg7[%c57, %c0_160] {strides = array<i32: 2, 1>} : memref<324x128xf32, #tpu.memory_space<vmem>>, vector<8x128xf32>
    %c93 = arith.constant 93 : index
    %c0_161 = arith.constant 0 : index
    %186 = tpu.strided_load %arg7[%c93, %c0_161] {strides = array<i32: 2, 1>} : memref<324x128xf32, #tpu.memory_space<vmem>>, vector<8x128xf32>
    %c129 = arith.constant 129 : index
    %c0_162 = arith.constant 0 : index
    %187 = tpu.strided_load %arg7[%c129, %c0_162] {strides = array<i32: 2, 1>} : memref<324x128xf32, #tpu.memory_space<vmem>>, vector<8x128xf32>
    %c165 = arith.constant 165 : index
    %c0_163 = arith.constant 0 : index
    %188 = tpu.strided_load %arg7[%c165, %c0_163] {strides = array<i32: 2, 1>} : memref<324x128xf32, #tpu.memory_space<vmem>>, vector<8x128xf32>
    %c201 = arith.constant 201 : index
    %c0_164 = arith.constant 0 : index
    %189 = tpu.strided_load %arg7[%c201, %c0_164] {strides = array<i32: 2, 1>} : memref<324x128xf32, #tpu.memory_space<vmem>>, vector<8x128xf32>
    %c237 = arith.constant 237 : index
    %c0_165 = arith.constant 0 : index
    %190 = tpu.strided_load %arg7[%c237, %c0_165] {strides = array<i32: 2, 1>} : memref<324x128xf32, #tpu.memory_space<vmem>>, vector<8x128xf32>
    %c273 = arith.constant 273 : index
    %c0_166 = arith.constant 0 : index
    %191 = tpu.strided_load %arg7[%c273, %c0_166] {strides = array<i32: 2, 1>} : memref<324x128xf32, #tpu.memory_space<vmem>>, vector<8x128xf32>
    %192 = tpu.concatenate %184, %185, %186, %187, %188, %189, %190, %191 in 0 : vector<8x128xf32>, vector<8x128xf32>, vector<8x128xf32>, vector<8x128xf32>, vector<8x128xf32>, vector<8x128xf32>, vector<8x128xf32>, vector<8x128xf32> -> vector<64x128xf32>
    %193 = vector.extract_strided_slice %192 {offsets = [0, 0], sizes = [64, 16], strides = [1, 1]} : vector<64x128xf32> to vector<64x16xf32>
    %194 = arith.truncf %193 : vector<64x16xf32> to vector<64x16xbf16>
    %c112 = arith.constant 112 : index
    %c0_167 = arith.constant 0 : index
    %195 = vector.load %arg3[%c112, %c0_167] : memref<256x128xbf16, #tpu.memory_space<vmem>>, vector<16x128xbf16>
    %cst_168 = arith.constant dense<0.000000e+00> : vector<64x128xf32>
    %196 = tpu.matmul %194, %195, %cst_168 {dimension_numbers = #tpu.dot_dimension_numbers<[1], [0], [0], [1], [0, 0, 1, 1], [], []>} : vector<64x16xbf16>, vector<16x128xbf16>, vector<64x128xf32> -> vector<64x128xf32>
    %197 = arith.addf %183, %196 : vector<64x128xf32>
    %c36_169 = arith.constant 36 : index
    %c0_170 = arith.constant 0 : index
    %198 = tpu.strided_load %arg7[%c36_169, %c0_170] {strides = array<i32: 2, 1>} : memref<324x128xf32, #tpu.memory_space<vmem>>, vector<8x128xf32>
    %c72_171 = arith.constant 72 : index
    %c0_172 = arith.constant 0 : index
    %199 = tpu.strided_load %arg7[%c72_171, %c0_172] {strides = array<i32: 2, 1>} : memref<324x128xf32, #tpu.memory_space<vmem>>, vector<8x128xf32>
    %c108_173 = arith.constant 108 : index
    %c0_174 = arith.constant 0 : index
    %200 = tpu.strided_load %arg7[%c108_173, %c0_174] {strides = array<i32: 2, 1>} : memref<324x128xf32, #tpu.memory_space<vmem>>, vector<8x128xf32>
    %c144_175 = arith.constant 144 : index
    %c0_176 = arith.constant 0 : index
    %201 = tpu.strided_load %arg7[%c144_175, %c0_176] {strides = array<i32: 2, 1>} : memref<324x128xf32, #tpu.memory_space<vmem>>, vector<8x128xf32>
    %c180_177 = arith.constant 180 : index
    %c0_178 = arith.constant 0 : index
    %202 = tpu.strided_load %arg7[%c180_177, %c0_178] {strides = array<i32: 2, 1>} : memref<324x128xf32, #tpu.memory_space<vmem>>, vector<8x128xf32>
    %c216_179 = arith.constant 216 : index
    %c0_180 = arith.constant 0 : index
    %203 = tpu.strided_load %arg7[%c216_179, %c0_180] {strides = array<i32: 2, 1>} : memref<324x128xf32, #tpu.memory_space<vmem>>, vector<8x128xf32>
    %c252_181 = arith.constant 252 : index
    %c0_182 = arith.constant 0 : index
    %204 = tpu.strided_load %arg7[%c252_181, %c0_182] {strides = array<i32: 2, 1>} : memref<324x128xf32, #tpu.memory_space<vmem>>, vector<8x128xf32>
    %c288 = arith.constant 288 : index
    %c0_183 = arith.constant 0 : index
    %205 = tpu.strided_load %arg7[%c288, %c0_183] {strides = array<i32: 2, 1>} : memref<324x128xf32, #tpu.memory_space<vmem>>, vector<8x128xf32>
    %206 = tpu.concatenate %198, %199, %200, %201, %202, %203, %204, %205 in 0 : vector<8x128xf32>, vector<8x128xf32>, vector<8x128xf32>, vector<8x128xf32>, vector<8x128xf32>, vector<8x128xf32>, vector<8x128xf32>, vector<8x128xf32> -> vector<64x128xf32>
    %207 = vector.extract_strided_slice %206 {offsets = [0, 0], sizes = [64, 16], strides = [1, 1]} : vector<64x128xf32> to vector<64x16xf32>
    %208 = arith.truncf %207 : vector<64x16xf32> to vector<64x16xbf16>
    %c128_184 = arith.constant 128 : index
    %c0_185 = arith.constant 0 : index
    %209 = vector.load %arg3[%c128_184, %c0_185] : memref<256x128xbf16, #tpu.memory_space<vmem>>, vector<16x128xbf16>
    %cst_186 = arith.constant dense<0.000000e+00> : vector<64x128xf32>
    %210 = tpu.matmul %208, %209, %cst_186 {dimension_numbers = #tpu.dot_dimension_numbers<[1], [0], [0], [1], [0, 0, 1, 1], [], []>} : vector<64x16xbf16>, vector<16x128xbf16>, vector<64x128xf32> -> vector<64x128xf32>
    %211 = arith.addf %197, %210 : vector<64x128xf32>
    %c37_187 = arith.constant 37 : index
    %c0_188 = arith.constant 0 : index
    %212 = tpu.strided_load %arg7[%c37_187, %c0_188] {strides = array<i32: 2, 1>} : memref<324x128xf32, #tpu.memory_space<vmem>>, vector<8x128xf32>
    %c73_189 = arith.constant 73 : index
    %c0_190 = arith.constant 0 : index
    %213 = tpu.strided_load %arg7[%c73_189, %c0_190] {strides = array<i32: 2, 1>} : memref<324x128xf32, #tpu.memory_space<vmem>>, vector<8x128xf32>
    %c109_191 = arith.constant 109 : index
    %c0_192 = arith.constant 0 : index
    %214 = tpu.strided_load %arg7[%c109_191, %c0_192] {strides = array<i32: 2, 1>} : memref<324x128xf32, #tpu.memory_space<vmem>>, vector<8x128xf32>
    %c145_193 = arith.constant 145 : index
    %c0_194 = arith.constant 0 : index
    %215 = tpu.strided_load %arg7[%c145_193, %c0_194] {strides = array<i32: 2, 1>} : memref<324x128xf32, #tpu.memory_space<vmem>>, vector<8x128xf32>
    %c181_195 = arith.constant 181 : index
    %c0_196 = arith.constant 0 : index
    %216 = tpu.strided_load %arg7[%c181_195, %c0_196] {strides = array<i32: 2, 1>} : memref<324x128xf32, #tpu.memory_space<vmem>>, vector<8x128xf32>
    %c217_197 = arith.constant 217 : index
    %c0_198 = arith.constant 0 : index
    %217 = tpu.strided_load %arg7[%c217_197, %c0_198] {strides = array<i32: 2, 1>} : memref<324x128xf32, #tpu.memory_space<vmem>>, vector<8x128xf32>
    %c253_199 = arith.constant 253 : index
    %c0_200 = arith.constant 0 : index
    %218 = tpu.strided_load %arg7[%c253_199, %c0_200] {strides = array<i32: 2, 1>} : memref<324x128xf32, #tpu.memory_space<vmem>>, vector<8x128xf32>
    %c289 = arith.constant 289 : index
    %c0_201 = arith.constant 0 : index
    %219 = tpu.strided_load %arg7[%c289, %c0_201] {strides = array<i32: 2, 1>} : memref<324x128xf32, #tpu.memory_space<vmem>>, vector<8x128xf32>
    %220 = tpu.concatenate %212, %213, %214, %215, %216, %217, %218, %219 in 0 : vector<8x128xf32>, vector<8x128xf32>, vector<8x128xf32>, vector<8x128xf32>, vector<8x128xf32>, vector<8x128xf32>, vector<8x128xf32>, vector<8x128xf32> -> vector<64x128xf32>
    %221 = vector.extract_strided_slice %220 {offsets = [0, 0], sizes = [64, 16], strides = [1, 1]} : vector<64x128xf32> to vector<64x16xf32>
    %222 = arith.truncf %221 : vector<64x16xf32> to vector<64x16xbf16>
    %c144_202 = arith.constant 144 : index
    %c0_203 = arith.constant 0 : index
    %223 = vector.load %arg3[%c144_202, %c0_203] : memref<256x128xbf16, #tpu.memory_space<vmem>>, vector<16x128xbf16>
    %cst_204 = arith.constant dense<0.000000e+00> : vector<64x128xf32>
    %224 = tpu.matmul %222, %223, %cst_204 {dimension_numbers = #tpu.dot_dimension_numbers<[1], [0], [0], [1], [0, 0, 1, 1], [], []>} : vector<64x16xbf16>, vector<16x128xbf16>, vector<64x128xf32> -> vector<64x128xf32>
    %225 = arith.addf %211, %224 : vector<64x128xf32>
    %c38_205 = arith.constant 38 : index
    %c0_206 = arith.constant 0 : index
    %226 = tpu.strided_load %arg7[%c38_205, %c0_206] {strides = array<i32: 2, 1>} : memref<324x128xf32, #tpu.memory_space<vmem>>, vector<8x128xf32>
    %c74_207 = arith.constant 74 : index
    %c0_208 = arith.constant 0 : index
    %227 = tpu.strided_load %arg7[%c74_207, %c0_208] {strides = array<i32: 2, 1>} : memref<324x128xf32, #tpu.memory_space<vmem>>, vector<8x128xf32>
    %c110_209 = arith.constant 110 : index
    %c0_210 = arith.constant 0 : index
    %228 = tpu.strided_load %arg7[%c110_209, %c0_210] {strides = array<i32: 2, 1>} : memref<324x128xf32, #tpu.memory_space<vmem>>, vector<8x128xf32>
    %c146_211 = arith.constant 146 : index
    %c0_212 = arith.constant 0 : index
    %229 = tpu.strided_load %arg7[%c146_211, %c0_212] {strides = array<i32: 2, 1>} : memref<324x128xf32, #tpu.memory_space<vmem>>, vector<8x128xf32>
    %c182_213 = arith.constant 182 : index
    %c0_214 = arith.constant 0 : index
    %230 = tpu.strided_load %arg7[%c182_213, %c0_214] {strides = array<i32: 2, 1>} : memref<324x128xf32, #tpu.memory_space<vmem>>, vector<8x128xf32>
    %c218_215 = arith.constant 218 : index
    %c0_216 = arith.constant 0 : index
    %231 = tpu.strided_load %arg7[%c218_215, %c0_216] {strides = array<i32: 2, 1>} : memref<324x128xf32, #tpu.memory_space<vmem>>, vector<8x128xf32>
    %c254_217 = arith.constant 254 : index
    %c0_218 = arith.constant 0 : index
    %232 = tpu.strided_load %arg7[%c254_217, %c0_218] {strides = array<i32: 2, 1>} : memref<324x128xf32, #tpu.memory_space<vmem>>, vector<8x128xf32>
    %c290 = arith.constant 290 : index
    %c0_219 = arith.constant 0 : index
    %233 = tpu.strided_load %arg7[%c290, %c0_219] {strides = array<i32: 2, 1>} : memref<324x128xf32, #tpu.memory_space<vmem>>, vector<8x128xf32>
    %234 = tpu.concatenate %226, %227, %228, %229, %230, %231, %232, %233 in 0 : vector<8x128xf32>, vector<8x128xf32>, vector<8x128xf32>, vector<8x128xf32>, vector<8x128xf32>, vector<8x128xf32>, vector<8x128xf32>, vector<8x128xf32> -> vector<64x128xf32>
    %235 = vector.extract_strided_slice %234 {offsets = [0, 0], sizes = [64, 16], strides = [1, 1]} : vector<64x128xf32> to vector<64x16xf32>
    %236 = arith.truncf %235 : vector<64x16xf32> to vector<64x16xbf16>
    %c160_220 = arith.constant 160 : index
    %c0_221 = arith.constant 0 : index
    %237 = vector.load %arg3[%c160_220, %c0_221] : memref<256x128xbf16, #tpu.memory_space<vmem>>, vector<16x128xbf16>
    %cst_222 = arith.constant dense<0.000000e+00> : vector<64x128xf32>
    %238 = tpu.matmul %236, %237, %cst_222 {dimension_numbers = #tpu.dot_dimension_numbers<[1], [0], [0], [1], [0, 0, 1, 1], [], []>} : vector<64x16xbf16>, vector<16x128xbf16>, vector<64x128xf32> -> vector<64x128xf32>
    %239 = arith.addf %225, %238 : vector<64x128xf32>
    %c39_223 = arith.constant 39 : index
    %c0_224 = arith.constant 0 : index
    %240 = tpu.strided_load %arg7[%c39_223, %c0_224] {strides = array<i32: 2, 1>} : memref<324x128xf32, #tpu.memory_space<vmem>>, vector<8x128xf32>
    %c75_225 = arith.constant 75 : index
    %c0_226 = arith.constant 0 : index
    %241 = tpu.strided_load %arg7[%c75_225, %c0_226] {strides = array<i32: 2, 1>} : memref<324x128xf32, #tpu.memory_space<vmem>>, vector<8x128xf32>
    %c111_227 = arith.constant 111 : index
    %c0_228 = arith.constant 0 : index
    %242 = tpu.strided_load %arg7[%c111_227, %c0_228] {strides = array<i32: 2, 1>} : memref<324x128xf32, #tpu.memory_space<vmem>>, vector<8x128xf32>
    %c147_229 = arith.constant 147 : index
    %c0_230 = arith.constant 0 : index
    %243 = tpu.strided_load %arg7[%c147_229, %c0_230] {strides = array<i32: 2, 1>} : memref<324x128xf32, #tpu.memory_space<vmem>>, vector<8x128xf32>
    %c183_231 = arith.constant 183 : index
    %c0_232 = arith.constant 0 : index
    %244 = tpu.strided_load %arg7[%c183_231, %c0_232] {strides = array<i32: 2, 1>} : memref<324x128xf32, #tpu.memory_space<vmem>>, vector<8x128xf32>
    %c219_233 = arith.constant 219 : index
    %c0_234 = arith.constant 0 : index
    %245 = tpu.strided_load %arg7[%c219_233, %c0_234] {strides = array<i32: 2, 1>} : memref<324x128xf32, #tpu.memory_space<vmem>>, vector<8x128xf32>
    %c255_235 = arith.constant 255 : index
    %c0_236 = arith.constant 0 : index
    %246 = tpu.strided_load %arg7[%c255_235, %c0_236] {strides = array<i32: 2, 1>} : memref<324x128xf32, #tpu.memory_space<vmem>>, vector<8x128xf32>
    %c291 = arith.constant 291 : index
    %c0_237 = arith.constant 0 : index
    %247 = tpu.strided_load %arg7[%c291, %c0_237] {strides = array<i32: 2, 1>} : memref<324x128xf32, #tpu.memory_space<vmem>>, vector<8x128xf32>
    %248 = tpu.concatenate %240, %241, %242, %243, %244, %245, %246, %247 in 0 : vector<8x128xf32>, vector<8x128xf32>, vector<8x128xf32>, vector<8x128xf32>, vector<8x128xf32>, vector<8x128xf32>, vector<8x128xf32>, vector<8x128xf32> -> vector<64x128xf32>
    %249 = vector.extract_strided_slice %248 {offsets = [0, 0], sizes = [64, 16], strides = [1, 1]} : vector<64x128xf32> to vector<64x16xf32>
    %250 = arith.truncf %249 : vector<64x16xf32> to vector<64x16xbf16>
    %c176 = arith.constant 176 : index
    %c0_238 = arith.constant 0 : index
    %251 = vector.load %arg3[%c176, %c0_238] : memref<256x128xbf16, #tpu.memory_space<vmem>>, vector<16x128xbf16>
    %cst_239 = arith.constant dense<0.000000e+00> : vector<64x128xf32>
    %252 = tpu.matmul %250, %251, %cst_239 {dimension_numbers = #tpu.dot_dimension_numbers<[1], [0], [0], [1], [0, 0, 1, 1], [], []>} : vector<64x16xbf16>, vector<16x128xbf16>, vector<64x128xf32> -> vector<64x128xf32>
    %253 = arith.addf %239, %252 : vector<64x128xf32>
    %c54_240 = arith.constant 54 : index
    %c0_241 = arith.constant 0 : index
    %254 = tpu.strided_load %arg7[%c54_240, %c0_241] {strides = array<i32: 2, 1>} : memref<324x128xf32, #tpu.memory_space<vmem>>, vector<8x128xf32>
    %c90_242 = arith.constant 90 : index
    %c0_243 = arith.constant 0 : index
    %255 = tpu.strided_load %arg7[%c90_242, %c0_243] {strides = array<i32: 2, 1>} : memref<324x128xf32, #tpu.memory_space<vmem>>, vector<8x128xf32>
    %c126_244 = arith.constant 126 : index
    %c0_245 = arith.constant 0 : index
    %256 = tpu.strided_load %arg7[%c126_244, %c0_245] {strides = array<i32: 2, 1>} : memref<324x128xf32, #tpu.memory_space<vmem>>, vector<8x128xf32>
    %c162_246 = arith.constant 162 : index
    %c0_247 = arith.constant 0 : index
    %257 = tpu.strided_load %arg7[%c162_246, %c0_247] {strides = array<i32: 2, 1>} : memref<324x128xf32, #tpu.memory_space<vmem>>, vector<8x128xf32>
    %c198_248 = arith.constant 198 : index
    %c0_249 = arith.constant 0 : index
    %258 = tpu.strided_load %arg7[%c198_248, %c0_249] {strides = array<i32: 2, 1>} : memref<324x128xf32, #tpu.memory_space<vmem>>, vector<8x128xf32>
    %c234_250 = arith.constant 234 : index
    %c0_251 = arith.constant 0 : index
    %259 = tpu.strided_load %arg7[%c234_250, %c0_251] {strides = array<i32: 2, 1>} : memref<324x128xf32, #tpu.memory_space<vmem>>, vector<8x128xf32>
    %c270_252 = arith.constant 270 : index
    %c0_253 = arith.constant 0 : index
    %260 = tpu.strided_load %arg7[%c270_252, %c0_253] {strides = array<i32: 2, 1>} : memref<324x128xf32, #tpu.memory_space<vmem>>, vector<8x128xf32>
    %c306 = arith.constant 306 : index
    %c0_254 = arith.constant 0 : index
    %261 = tpu.strided_load %arg7[%c306, %c0_254] {strides = array<i32: 2, 1>} : memref<324x128xf32, #tpu.memory_space<vmem>>, vector<8x128xf32>
    %262 = tpu.concatenate %254, %255, %256, %257, %258, %259, %260, %261 in 0 : vector<8x128xf32>, vector<8x128xf32>, vector<8x128xf32>, vector<8x128xf32>, vector<8x128xf32>, vector<8x128xf32>, vector<8x128xf32>, vector<8x128xf32> -> vector<64x128xf32>
    %263 = vector.extract_strided_slice %262 {offsets = [0, 0], sizes = [64, 16], strides = [1, 1]} : vector<64x128xf32> to vector<64x16xf32>
    %264 = arith.truncf %263 : vector<64x16xf32> to vector<64x16xbf16>
    %c192 = arith.constant 192 : index
    %c0_255 = arith.constant 0 : index
    %265 = vector.load %arg3[%c192, %c0_255] : memref<256x128xbf16, #tpu.memory_space<vmem>>, vector<16x128xbf16>
    %cst_256 = arith.constant dense<0.000000e+00> : vector<64x128xf32>
    %266 = tpu.matmul %264, %265, %cst_256 {dimension_numbers = #tpu.dot_dimension_numbers<[1], [0], [0], [1], [0, 0, 1, 1], [], []>} : vector<64x16xbf16>, vector<16x128xbf16>, vector<64x128xf32> -> vector<64x128xf32>
    %267 = arith.addf %253, %266 : vector<64x128xf32>
    %c55_257 = arith.constant 55 : index
    %c0_258 = arith.constant 0 : index
    %268 = tpu.strided_load %arg7[%c55_257, %c0_258] {strides = array<i32: 2, 1>} : memref<324x128xf32, #tpu.memory_space<vmem>>, vector<8x128xf32>
    %c91_259 = arith.constant 91 : index
    %c0_260 = arith.constant 0 : index
    %269 = tpu.strided_load %arg7[%c91_259, %c0_260] {strides = array<i32: 2, 1>} : memref<324x128xf32, #tpu.memory_space<vmem>>, vector<8x128xf32>
    %c127_261 = arith.constant 127 : index
    %c0_262 = arith.constant 0 : index
    %270 = tpu.strided_load %arg7[%c127_261, %c0_262] {strides = array<i32: 2, 1>} : memref<324x128xf32, #tpu.memory_space<vmem>>, vector<8x128xf32>
    %c163_263 = arith.constant 163 : index
    %c0_264 = arith.constant 0 : index
    %271 = tpu.strided_load %arg7[%c163_263, %c0_264] {strides = array<i32: 2, 1>} : memref<324x128xf32, #tpu.memory_space<vmem>>, vector<8x128xf32>
    %c199_265 = arith.constant 199 : index
    %c0_266 = arith.constant 0 : index
    %272 = tpu.strided_load %arg7[%c199_265, %c0_266] {strides = array<i32: 2, 1>} : memref<324x128xf32, #tpu.memory_space<vmem>>, vector<8x128xf32>
    %c235_267 = arith.constant 235 : index
    %c0_268 = arith.constant 0 : index
    %273 = tpu.strided_load %arg7[%c235_267, %c0_268] {strides = array<i32: 2, 1>} : memref<324x128xf32, #tpu.memory_space<vmem>>, vector<8x128xf32>
    %c271_269 = arith.constant 271 : index
    %c0_270 = arith.constant 0 : index
    %274 = tpu.strided_load %arg7[%c271_269, %c0_270] {strides = array<i32: 2, 1>} : memref<324x128xf32, #tpu.memory_space<vmem>>, vector<8x128xf32>
    %c307 = arith.constant 307 : index
    %c0_271 = arith.constant 0 : index
    %275 = tpu.strided_load %arg7[%c307, %c0_271] {strides = array<i32: 2, 1>} : memref<324x128xf32, #tpu.memory_space<vmem>>, vector<8x128xf32>
    %276 = tpu.concatenate %268, %269, %270, %271, %272, %273, %274, %275 in 0 : vector<8x128xf32>, vector<8x128xf32>, vector<8x128xf32>, vector<8x128xf32>, vector<8x128xf32>, vector<8x128xf32>, vector<8x128xf32>, vector<8x128xf32> -> vector<64x128xf32>
    %277 = vector.extract_strided_slice %276 {offsets = [0, 0], sizes = [64, 16], strides = [1, 1]} : vector<64x128xf32> to vector<64x16xf32>
    %278 = arith.truncf %277 : vector<64x16xf32> to vector<64x16xbf16>
    %c208 = arith.constant 208 : index
    %c0_272 = arith.constant 0 : index
    %279 = vector.load %arg3[%c208, %c0_272] : memref<256x128xbf16, #tpu.memory_space<vmem>>, vector<16x128xbf16>
    %cst_273 = arith.constant dense<0.000000e+00> : vector<64x128xf32>
    %280 = tpu.matmul %278, %279, %cst_273 {dimension_numbers = #tpu.dot_dimension_numbers<[1], [0], [0], [1], [0, 0, 1, 1], [], []>} : vector<64x16xbf16>, vector<16x128xbf16>, vector<64x128xf32> -> vector<64x128xf32>
    %281 = arith.addf %267, %280 : vector<64x128xf32>
    %c56_274 = arith.constant 56 : index
    %c0_275 = arith.constant 0 : index
    %282 = tpu.strided_load %arg7[%c56_274, %c0_275] {strides = array<i32: 2, 1>} : memref<324x128xf32, #tpu.memory_space<vmem>>, vector<8x128xf32>
    %c92_276 = arith.constant 92 : index
    %c0_277 = arith.constant 0 : index
    %283 = tpu.strided_load %arg7[%c92_276, %c0_277] {strides = array<i32: 2, 1>} : memref<324x128xf32, #tpu.memory_space<vmem>>, vector<8x128xf32>
    %c128_278 = arith.constant 128 : index
    %c0_279 = arith.constant 0 : index
    %284 = tpu.strided_load %arg7[%c128_278, %c0_279] {strides = array<i32: 2, 1>} : memref<324x128xf32, #tpu.memory_space<vmem>>, vector<8x128xf32>
    %c164_280 = arith.constant 164 : index
    %c0_281 = arith.constant 0 : index
    %285 = tpu.strided_load %arg7[%c164_280, %c0_281] {strides = array<i32: 2, 1>} : memref<324x128xf32, #tpu.memory_space<vmem>>, vector<8x128xf32>
    %c200_282 = arith.constant 200 : index
    %c0_283 = arith.constant 0 : index
    %286 = tpu.strided_load %arg7[%c200_282, %c0_283] {strides = array<i32: 2, 1>} : memref<324x128xf32, #tpu.memory_space<vmem>>, vector<8x128xf32>
    %c236_284 = arith.constant 236 : index
    %c0_285 = arith.constant 0 : index
    %287 = tpu.strided_load %arg7[%c236_284, %c0_285] {strides = array<i32: 2, 1>} : memref<324x128xf32, #tpu.memory_space<vmem>>, vector<8x128xf32>
    %c272_286 = arith.constant 272 : index
    %c0_287 = arith.constant 0 : index
    %288 = tpu.strided_load %arg7[%c272_286, %c0_287] {strides = array<i32: 2, 1>} : memref<324x128xf32, #tpu.memory_space<vmem>>, vector<8x128xf32>
    %c308 = arith.constant 308 : index
    %c0_288 = arith.constant 0 : index
    %289 = tpu.strided_load %arg7[%c308, %c0_288] {strides = array<i32: 2, 1>} : memref<324x128xf32, #tpu.memory_space<vmem>>, vector<8x128xf32>
    %290 = tpu.concatenate %282, %283, %284, %285, %286, %287, %288, %289 in 0 : vector<8x128xf32>, vector<8x128xf32>, vector<8x128xf32>, vector<8x128xf32>, vector<8x128xf32>, vector<8x128xf32>, vector<8x128xf32>, vector<8x128xf32> -> vector<64x128xf32>
    %291 = vector.extract_strided_slice %290 {offsets = [0, 0], sizes = [64, 16], strides = [1, 1]} : vector<64x128xf32> to vector<64x16xf32>
    %292 = arith.truncf %291 : vector<64x16xf32> to vector<64x16xbf16>
    %c224 = arith.constant 224 : index
    %c0_289 = arith.constant 0 : index
    %293 = vector.load %arg3[%c224, %c0_289] : memref<256x128xbf16, #tpu.memory_space<vmem>>, vector<16x128xbf16>
    %cst_290 = arith.constant dense<0.000000e+00> : vector<64x128xf32>
    %294 = tpu.matmul %292, %293, %cst_290 {dimension_numbers = #tpu.dot_dimension_numbers<[1], [0], [0], [1], [0, 0, 1, 1], [], []>} : vector<64x16xbf16>, vector<16x128xbf16>, vector<64x128xf32> -> vector<64x128xf32>
    %295 = arith.addf %281, %294 : vector<64x128xf32>
    %c57_291 = arith.constant 57 : index
    %c0_292 = arith.constant 0 : index
    %296 = tpu.strided_load %arg7[%c57_291, %c0_292] {strides = array<i32: 2, 1>} : memref<324x128xf32, #tpu.memory_space<vmem>>, vector<8x128xf32>
    %c93_293 = arith.constant 93 : index
    %c0_294 = arith.constant 0 : index
    %297 = tpu.strided_load %arg7[%c93_293, %c0_294] {strides = array<i32: 2, 1>} : memref<324x128xf32, #tpu.memory_space<vmem>>, vector<8x128xf32>
    %c129_295 = arith.constant 129 : index
    %c0_296 = arith.constant 0 : index
    %298 = tpu.strided_load %arg7[%c129_295, %c0_296] {strides = array<i32: 2, 1>} : memref<324x128xf32, #tpu.memory_space<vmem>>, vector<8x128xf32>
    %c165_297 = arith.constant 165 : index
    %c0_298 = arith.constant 0 : index
    %299 = tpu.strided_load %arg7[%c165_297, %c0_298] {strides = array<i32: 2, 1>} : memref<324x128xf32, #tpu.memory_space<vmem>>, vector<8x128xf32>
    %c201_299 = arith.constant 201 : index
    %c0_300 = arith.constant 0 : index
    %300 = tpu.strided_load %arg7[%c201_299, %c0_300] {strides = array<i32: 2, 1>} : memref<324x128xf32, #tpu.memory_space<vmem>>, vector<8x128xf32>
    %c237_301 = arith.constant 237 : index
    %c0_302 = arith.constant 0 : index
    %301 = tpu.strided_load %arg7[%c237_301, %c0_302] {strides = array<i32: 2, 1>} : memref<324x128xf32, #tpu.memory_space<vmem>>, vector<8x128xf32>
    %c273_303 = arith.constant 273 : index
    %c0_304 = arith.constant 0 : index
    %302 = tpu.strided_load %arg7[%c273_303, %c0_304] {strides = array<i32: 2, 1>} : memref<324x128xf32, #tpu.memory_space<vmem>>, vector<8x128xf32>
    %c309 = arith.constant 309 : index
    %c0_305 = arith.constant 0 : index
    %303 = tpu.strided_load %arg7[%c309, %c0_305] {strides = array<i32: 2, 1>} : memref<324x128xf32, #tpu.memory_space<vmem>>, vector<8x128xf32>
    %304 = tpu.concatenate %296, %297, %298, %299, %300, %301, %302, %303 in 0 : vector<8x128xf32>, vector<8x128xf32>, vector<8x128xf32>, vector<8x128xf32>, vector<8x128xf32>, vector<8x128xf32>, vector<8x128xf32>, vector<8x128xf32> -> vector<64x128xf32>
    %305 = vector.extract_strided_slice %304 {offsets = [0, 0], sizes = [64, 16], strides = [1, 1]} : vector<64x128xf32> to vector<64x16xf32>
    %306 = arith.truncf %305 : vector<64x16xf32> to vector<64x16xbf16>
    %c240 = arith.constant 240 : index
    %c0_306 = arith.constant 0 : index
    %307 = vector.load %arg3[%c240, %c0_306] : memref<256x128xbf16, #tpu.memory_space<vmem>>, vector<16x128xbf16>
    %cst_307 = arith.constant dense<0.000000e+00> : vector<64x128xf32>
    %308 = tpu.matmul %306, %307, %cst_307 {dimension_numbers = #tpu.dot_dimension_numbers<[1], [0], [0], [1], [0, 0, 1, 1], [], []>} : vector<64x16xbf16>, vector<16x128xbf16>, vector<64x128xf32> -> vector<64x128xf32>
    %309 = arith.addf %295, %308 : vector<64x128xf32>
    %cst_308 = arith.constant 0.000000e+00 : f32
    %310 = vector.broadcast %cst_308 : f32 to vector<64x128xf32>
    %311 = arith.cmpf ogt, %309, %310 : vector<64x128xf32>
    %cst_309 = arith.constant 2.000000e-01 : f32
    %312 = vector.broadcast %cst_309 : f32 to vector<64x128xf32>
    %313 = arith.mulf %312, %309 : vector<64x128xf32>
    %314 = arith.select %311, %309, %313 : vector<64x128xi1>, vector<64x128xf32>
    %315 = vector.extract_strided_slice %314 {offsets = [0, 0], sizes = [8, 128], strides = [1, 1]} : vector<64x128xf32> to vector<8x128xf32>
    %c11 = arith.constant 11 : index
    %c0_310 = arith.constant 0 : index
    %316 = vector.load %arg8[%c11, %c0_310] : memref<100x128xf32, #tpu.memory_space<vmem>>, vector<8x128xf32>
    tpu.vector_store %arg8[%c11, %c0_310], %315 {strides = array<i32>} : memref<100x128xf32, #tpu.memory_space<vmem>>, vector<8x128xf32>,
    %317 = vector.extract_strided_slice %314 {offsets = [8, 0], sizes = [8, 128], strides = [1, 1]} : vector<64x128xf32> to vector<8x128xf32>
    %c21_311 = arith.constant 21 : index
    %c0_312 = arith.constant 0 : index
    %318 = vector.load %arg8[%c21_311, %c0_312] : memref<100x128xf32, #tpu.memory_space<vmem>>, vector<8x128xf32>
    tpu.vector_store %arg8[%c21_311, %c0_312], %317 {strides = array<i32>} : memref<100x128xf32, #tpu.memory_space<vmem>>, vector<8x128xf32>,
    %319 = vector.extract_strided_slice %314 {offsets = [16, 0], sizes = [8, 128], strides = [1, 1]} : vector<64x128xf32> to vector<8x128xf32>
    %c31 = arith.constant 31 : index
    %c0_313 = arith.constant 0 : index
    %320 = vector.load %arg8[%c31, %c0_313] : memref<100x128xf32, #tpu.memory_space<vmem>>, vector<8x128xf32>
    tpu.vector_store %arg8[%c31, %c0_313], %319 {strides = array<i32>} : memref<100x128xf32, #tpu.memory_space<vmem>>, vector<8x128xf32>,
    %321 = vector.extract_strided_slice %314 {offsets = [24, 0], sizes = [8, 128], strides = [1, 1]} : vector<64x128xf32> to vector<8x128xf32>
    %c41 = arith.constant 41 : index
    %c0_314 = arith.constant 0 : index
    %322 = vector.load %arg8[%c41, %c0_314] : memref<100x128xf32, #tpu.memory_space<vmem>>, vector<8x128xf32>
    tpu.vector_store %arg8[%c41, %c0_314], %321 {strides = array<i32>} : memref<100x128xf32, #tpu.memory_space<vmem>>, vector<8x128xf32>,
    %323 = vector.extract_strided_slice %314 {offsets = [32, 0], sizes = [8, 128], strides = [1, 1]} : vector<64x128xf32> to vector<8x128xf32>
    %c51 = arith.constant 51 : index
    %c0_315 = arith.constant 0 : index
    %324 = vector.load %arg8[%c51, %c0_315] : memref<100x128xf32, #tpu.memory_space<vmem>>, vector<8x128xf32>
    tpu.vector_store %arg8[%c51, %c0_315], %323 {strides = array<i32>} : memref<100x128xf32, #tpu.memory_space<vmem>>, vector<8x128xf32>,
    %325 = vector.extract_strided_slice %314 {offsets = [40, 0], sizes = [8, 128], strides = [1, 1]} : vector<64x128xf32> to vector<8x128xf32>
    %c61 = arith.constant 61 : index
    %c0_316 = arith.constant 0 : index
    %326 = vector.load %arg8[%c61, %c0_316] : memref<100x128xf32, #tpu.memory_space<vmem>>, vector<8x128xf32>
    tpu.vector_store %arg8[%c61, %c0_316], %325 {strides = array<i32>} : memref<100x128xf32, #tpu.memory_space<vmem>>, vector<8x128xf32>,
    %327 = vector.extract_strided_slice %314 {offsets = [48, 0], sizes = [8, 128], strides = [1, 1]} : vector<64x128xf32> to vector<8x128xf32>
    %c71 = arith.constant 71 : index
    %c0_317 = arith.constant 0 : index
    %328 = vector.load %arg8[%c71, %c0_317] : memref<100x128xf32, #tpu.memory_space<vmem>>, vector<8x128xf32>
    tpu.vector_store %arg8[%c71, %c0_317], %327 {strides = array<i32>} : memref<100x128xf32, #tpu.memory_space<vmem>>, vector<8x128xf32>,
    %329 = vector.extract_strided_slice %314 {offsets = [56, 0], sizes = [8, 128], strides = [1, 1]} : vector<64x128xf32> to vector<8x128xf32>
    %c81 = arith.constant 81 : index
    %c0_318 = arith.constant 0 : index
    %330 = vector.load %arg8[%c81, %c0_318] : memref<100x128xf32, #tpu.memory_space<vmem>>, vector<8x128xf32>
    tpu.vector_store %arg8[%c81, %c0_318], %329 {strides = array<i32>} : memref<100x128xf32, #tpu.memory_space<vmem>>, vector<8x128xf32>,
    %cst_319 = arith.constant 0.000000e+00 : f32
    %331 = vector.broadcast %cst_319 : f32 to vector<16x128xf32>
    %c0_320 = arith.constant 0 : index
    %c0_321 = arith.constant 0 : index
    %332 = tpu.strided_load %arg8[%c0_320, %c0_321] {strides = array<i32: 2, 1>} : memref<100x128xf32, #tpu.memory_space<vmem>>, vector<4x128xf32>
    %c20_322 = arith.constant 20 : index
    %c0_323 = arith.constant 0 : index
    %333 = tpu.strided_load %arg8[%c20_322, %c0_323] {strides = array<i32: 2, 1>} : memref<100x128xf32, #tpu.memory_space<vmem>>, vector<4x128xf32>
    %c40 = arith.constant 40 : index
    %c0_324 = arith.constant 0 : index
    %334 = tpu.strided_load %arg8[%c40, %c0_324] {strides = array<i32: 2, 1>} : memref<100x128xf32, #tpu.memory_space<vmem>>, vector<4x128xf32>
    %c60 = arith.constant 60 : index
    %c0_325 = arith.constant 0 : index
    %335 = tpu.strided_load %arg8[%c60, %c0_325] {strides = array<i32: 2, 1>} : memref<100x128xf32, #tpu.memory_space<vmem>>, vector<4x128xf32>
    %336 = tpu.concatenate %332, %333, %334, %335 in 0 : vector<4x128xf32>, vector<4x128xf32>, vector<4x128xf32>, vector<4x128xf32> -> vector<16x128xf32>
    %337 = vector.extract_strided_slice %336 {offsets = [0, 0], sizes = [16, 32], strides = [1, 1]} : vector<16x128xf32> to vector<16x32xf32>
    %338 = arith.truncf %337 : vector<16x32xf32> to vector<16x32xbf16>
    %c0_326 = arith.constant 0 : index
    %c0_327 = arith.constant 0 : index
    %339 = vector.load %arg4[%c0_326, %c0_327] : memref<512x128xbf16, #tpu.memory_space<vmem>>, vector<32x128xbf16>
    %cst_328 = arith.constant dense<0.000000e+00> : vector<16x128xf32>
    %340 = tpu.matmul %338, %339, %cst_328 {dimension_numbers = #tpu.dot_dimension_numbers<[1], [0], [0], [1], [0, 0, 1, 1], [], []>} : vector<16x32xbf16>, vector<32x128xbf16>, vector<16x128xf32> -> vector<16x128xf32>
    %341 = arith.addf %331, %340 : vector<16x128xf32>
    %c1_329 = arith.constant 1 : index
    %c0_330 = arith.constant 0 : index
    %342 = tpu.strided_load %arg8[%c1_329, %c0_330] {strides = array<i32: 2, 1>} : memref<100x128xf32, #tpu.memory_space<vmem>>, vector<4x128xf32>
    %c21_331 = arith.constant 21 : index
    %c0_332 = arith.constant 0 : index
    %343 = tpu.strided_load %arg8[%c21_331, %c0_332] {strides = array<i32: 2, 1>} : memref<100x128xf32, #tpu.memory_space<vmem>>, vector<4x128xf32>
    %c41_333 = arith.constant 41 : index
    %c0_334 = arith.constant 0 : index
    %344 = tpu.strided_load %arg8[%c41_333, %c0_334] {strides = array<i32: 2, 1>} : memref<100x128xf32, #tpu.memory_space<vmem>>, vector<4x128xf32>
    %c61_335 = arith.constant 61 : index
    %c0_336 = arith.constant 0 : index
    %345 = tpu.strided_load %arg8[%c61_335, %c0_336] {strides = array<i32: 2, 1>} : memref<100x128xf32, #tpu.memory_space<vmem>>, vector<4x128xf32>
    %346 = tpu.concatenate %342, %343, %344, %345 in 0 : vector<4x128xf32>, vector<4x128xf32>, vector<4x128xf32>, vector<4x128xf32> -> vector<16x128xf32>
    %347 = vector.extract_strided_slice %346 {offsets = [0, 0], sizes = [16, 32], strides = [1, 1]} : vector<16x128xf32> to vector<16x32xf32>
    %348 = arith.truncf %347 : vector<16x32xf32> to vector<16x32xbf16>
    %c32_337 = arith.constant 32 : index
    %c0_338 = arith.constant 0 : index
    %349 = vector.load %arg4[%c32_337, %c0_338] : memref<512x128xbf16, #tpu.memory_space<vmem>>, vector<32x128xbf16>
    %cst_339 = arith.constant dense<0.000000e+00> : vector<16x128xf32>
    %350 = tpu.matmul %348, %349, %cst_339 {dimension_numbers = #tpu.dot_dimension_numbers<[1], [0], [0], [1], [0, 0, 1, 1], [], []>} : vector<16x32xbf16>, vector<32x128xbf16>, vector<16x128xf32> -> vector<16x128xf32>
    %351 = arith.addf %341, %350 : vector<16x128xf32>
    %c2_340 = arith.constant 2 : index
    %c0_341 = arith.constant 0 : index
    %352 = tpu.strided_load %arg8[%c2_340, %c0_341] {strides = array<i32: 2, 1>} : memref<100x128xf32, #tpu.memory_space<vmem>>, vector<4x128xf32>
    %c22 = arith.constant 22 : index
    %c0_342 = arith.constant 0 : index
    %353 = tpu.strided_load %arg8[%c22, %c0_342] {strides = array<i32: 2, 1>} : memref<100x128xf32, #tpu.memory_space<vmem>>, vector<4x128xf32>
    %c42 = arith.constant 42 : index
    %c0_343 = arith.constant 0 : index
    %354 = tpu.strided_load %arg8[%c42, %c0_343] {strides = array<i32: 2, 1>} : memref<100x128xf32, #tpu.memory_space<vmem>>, vector<4x128xf32>
    %c62 = arith.constant 62 : index
    %c0_344 = arith.constant 0 : index
    %355 = tpu.strided_load %arg8[%c62, %c0_344] {strides = array<i32: 2, 1>} : memref<100x128xf32, #tpu.memory_space<vmem>>, vector<4x128xf32>
    %356 = tpu.concatenate %352, %353, %354, %355 in 0 : vector<4x128xf32>, vector<4x128xf32>, vector<4x128xf32>, vector<4x128xf32> -> vector<16x128xf32>
    %357 = vector.extract_strided_slice %356 {offsets = [0, 0], sizes = [16, 32], strides = [1, 1]} : vector<16x128xf32> to vector<16x32xf32>
    %358 = arith.truncf %357 : vector<16x32xf32> to vector<16x32xbf16>
    %c64_345 = arith.constant 64 : index
    %c0_346 = arith.constant 0 : index
    %359 = vector.load %arg4[%c64_345, %c0_346] : memref<512x128xbf16, #tpu.memory_space<vmem>>, vector<32x128xbf16>
    %cst_347 = arith.constant dense<0.000000e+00> : vector<16x128xf32>
    %360 = tpu.matmul %358, %359, %cst_347 {dimension_numbers = #tpu.dot_dimension_numbers<[1], [0], [0], [1], [0, 0, 1, 1], [], []>} : vector<16x32xbf16>, vector<32x128xbf16>, vector<16x128xf32> -> vector<16x128xf32>
    %361 = arith.addf %351, %360 : vector<16x128xf32>
    %c3_348 = arith.constant 3 : index
    %c0_349 = arith.constant 0 : index
    %362 = tpu.strided_load %arg8[%c3_348, %c0_349] {strides = array<i32: 2, 1>} : memref<100x128xf32, #tpu.memory_space<vmem>>, vector<4x128xf32>
    %c23 = arith.constant 23 : index
    %c0_350 = arith.constant 0 : index
    %363 = tpu.strided_load %arg8[%c23, %c0_350] {strides = array<i32: 2, 1>} : memref<100x128xf32, #tpu.memory_space<vmem>>, vector<4x128xf32>
    %c43 = arith.constant 43 : index
    %c0_351 = arith.constant 0 : index
    %364 = tpu.strided_load %arg8[%c43, %c0_351] {strides = array<i32: 2, 1>} : memref<100x128xf32, #tpu.memory_space<vmem>>, vector<4x128xf32>
    %c63 = arith.constant 63 : index
    %c0_352 = arith.constant 0 : index
    %365 = tpu.strided_load %arg8[%c63, %c0_352] {strides = array<i32: 2, 1>} : memref<100x128xf32, #tpu.memory_space<vmem>>, vector<4x128xf32>
    %366 = tpu.concatenate %362, %363, %364, %365 in 0 : vector<4x128xf32>, vector<4x128xf32>, vector<4x128xf32>, vector<4x128xf32> -> vector<16x128xf32>
    %367 = vector.extract_strided_slice %366 {offsets = [0, 0], sizes = [16, 32], strides = [1, 1]} : vector<16x128xf32> to vector<16x32xf32>
    %368 = arith.truncf %367 : vector<16x32xf32> to vector<16x32xbf16>
    %c96_353 = arith.constant 96 : index
    %c0_354 = arith.constant 0 : index
    %369 = vector.load %arg4[%c96_353, %c0_354] : memref<512x128xbf16, #tpu.memory_space<vmem>>, vector<32x128xbf16>
    %cst_355 = arith.constant dense<0.000000e+00> : vector<16x128xf32>
    %370 = tpu.matmul %368, %369, %cst_355 {dimension_numbers = #tpu.dot_dimension_numbers<[1], [0], [0], [1], [0, 0, 1, 1], [], []>} : vector<16x32xbf16>, vector<32x128xbf16>, vector<16x128xf32> -> vector<16x128xf32>
    %371 = arith.addf %361, %370 : vector<16x128xf32>
    %c10 = arith.constant 10 : index
    %c0_356 = arith.constant 0 : index
    %372 = tpu.strided_load %arg8[%c10, %c0_356] {strides = array<i32: 2, 1>} : memref<100x128xf32, #tpu.memory_space<vmem>>, vector<4x128xf32>
    %c30 = arith.constant 30 : index
    %c0_357 = arith.constant 0 : index
    %373 = tpu.strided_load %arg8[%c30, %c0_357] {strides = array<i32: 2, 1>} : memref<100x128xf32, #tpu.memory_space<vmem>>, vector<4x128xf32>
    %c50 = arith.constant 50 : index
    %c0_358 = arith.constant 0 : index
    %374 = tpu.strided_load %arg8[%c50, %c0_358] {strides = array<i32: 2, 1>} : memref<100x128xf32, #tpu.memory_space<vmem>>, vector<4x128xf32>
    %c70_359 = arith.constant 70 : index
    %c0_360 = arith.constant 0 : index
    %375 = tpu.strided_load %arg8[%c70_359, %c0_360] {strides = array<i32: 2, 1>} : memref<100x128xf32, #tpu.memory_space<vmem>>, vector<4x128xf32>
    %376 = tpu.concatenate %372, %373, %374, %375 in 0 : vector<4x128xf32>, vector<4x128xf32>, vector<4x128xf32>, vector<4x128xf32> -> vector<16x128xf32>
    %377 = vector.extract_strided_slice %376 {offsets = [0, 0], sizes = [16, 32], strides = [1, 1]} : vector<16x128xf32> to vector<16x32xf32>
    %378 = arith.truncf %377 : vector<16x32xf32> to vector<16x32xbf16>
    %c128_361 = arith.constant 128 : index
    %c0_362 = arith.constant 0 : index
    %379 = vector.load %arg4[%c128_361, %c0_362] : memref<512x128xbf16, #tpu.memory_space<vmem>>, vector<32x128xbf16>
    %cst_363 = arith.constant dense<0.000000e+00> : vector<16x128xf32>
    %380 = tpu.matmul %378, %379, %cst_363 {dimension_numbers = #tpu.dot_dimension_numbers<[1], [0], [0], [1], [0, 0, 1, 1], [], []>} : vector<16x32xbf16>, vector<32x128xbf16>, vector<16x128xf32> -> vector<16x128xf32>
    %381 = arith.addf %371, %380 : vector<16x128xf32>
    %c11_364 = arith.constant 11 : index
    %c0_365 = arith.constant 0 : index
    %382 = tpu.strided_load %arg8[%c11_364, %c0_365] {strides = array<i32: 2, 1>} : memref<100x128xf32, #tpu.memory_space<vmem>>, vector<4x128xf32>
    %c31_366 = arith.constant 31 : index
    %c0_367 = arith.constant 0 : index
    %383 = tpu.strided_load %arg8[%c31_366, %c0_367] {strides = array<i32: 2, 1>} : memref<100x128xf32, #tpu.memory_space<vmem>>, vector<4x128xf32>
    %c51_368 = arith.constant 51 : index
    %c0_369 = arith.constant 0 : index
    %384 = tpu.strided_load %arg8[%c51_368, %c0_369] {strides = array<i32: 2, 1>} : memref<100x128xf32, #tpu.memory_space<vmem>>, vector<4x128xf32>
    %c71_370 = arith.constant 71 : index
    %c0_371 = arith.constant 0 : index
    %385 = tpu.strided_load %arg8[%c71_370, %c0_371] {strides = array<i32: 2, 1>} : memref<100x128xf32, #tpu.memory_space<vmem>>, vector<4x128xf32>
    %386 = tpu.concatenate %382, %383, %384, %385 in 0 : vector<4x128xf32>, vector<4x128xf32>, vector<4x128xf32>, vector<4x128xf32> -> vector<16x128xf32>
    %387 = vector.extract_strided_slice %386 {offsets = [0, 0], sizes = [16, 32], strides = [1, 1]} : vector<16x128xf32> to vector<16x32xf32>
    %388 = arith.truncf %387 : vector<16x32xf32> to vector<16x32xbf16>
    %c160_372 = arith.constant 160 : index
    %c0_373 = arith.constant 0 : index
    %389 = vector.load %arg4[%c160_372, %c0_373] : memref<512x128xbf16, #tpu.memory_space<vmem>>, vector<32x128xbf16>
    %cst_374 = arith.constant dense<0.000000e+00> : vector<16x128xf32>
    %390 = tpu.matmul %388, %389, %cst_374 {dimension_numbers = #tpu.dot_dimension_numbers<[1], [0], [0], [1], [0, 0, 1, 1], [], []>} : vector<16x32xbf16>, vector<32x128xbf16>, vector<16x128xf32> -> vector<16x128xf32>
    %391 = arith.addf %381, %390 : vector<16x128xf32>
    %c12 = arith.constant 12 : index
    %c0_375 = arith.constant 0 : index
    %392 = tpu.strided_load %arg8[%c12, %c0_375] {strides = array<i32: 2, 1>} : memref<100x128xf32, #tpu.memory_space<vmem>>, vector<4x128xf32>
    %c32_376 = arith.constant 32 : index
    %c0_377 = arith.constant 0 : index
    %393 = tpu.strided_load %arg8[%c32_376, %c0_377] {strides = array<i32: 2, 1>} : memref<100x128xf32, #tpu.memory_space<vmem>>, vector<4x128xf32>
    %c52_378 = arith.constant 52 : index
    %c0_379 = arith.constant 0 : index
    %394 = tpu.strided_load %arg8[%c52_378, %c0_379] {strides = array<i32: 2, 1>} : memref<100x128xf32, #tpu.memory_space<vmem>>, vector<4x128xf32>
    %c72_380 = arith.constant 72 : index
    %c0_381 = arith.constant 0 : index
    %395 = tpu.strided_load %arg8[%c72_380, %c0_381] {strides = array<i32: 2, 1>} : memref<100x128xf32, #tpu.memory_space<vmem>>, vector<4x128xf32>
    %396 = tpu.concatenate %392, %393, %394, %395 in 0 : vector<4x128xf32>, vector<4x128xf32>, vector<4x128xf32>, vector<4x128xf32> -> vector<16x128xf32>
    %397 = vector.extract_strided_slice %396 {offsets = [0, 0], sizes = [16, 32], strides = [1, 1]} : vector<16x128xf32> to vector<16x32xf32>
    %398 = arith.truncf %397 : vector<16x32xf32> to vector<16x32xbf16>
    %c192_382 = arith.constant 192 : index
    %c0_383 = arith.constant 0 : index
    %399 = vector.load %arg4[%c192_382, %c0_383] : memref<512x128xbf16, #tpu.memory_space<vmem>>, vector<32x128xbf16>
    %cst_384 = arith.constant dense<0.000000e+00> : vector<16x128xf32>
    %400 = tpu.matmul %398, %399, %cst_384 {dimension_numbers = #tpu.dot_dimension_numbers<[1], [0], [0], [1], [0, 0, 1, 1], [], []>} : vector<16x32xbf16>, vector<32x128xbf16>, vector<16x128xf32> -> vector<16x128xf32>
    %401 = arith.addf %391, %400 : vector<16x128xf32>
    %c13 = arith.constant 13 : index
    %c0_385 = arith.constant 0 : index
    %402 = tpu.strided_load %arg8[%c13, %c0_385] {strides = array<i32: 2, 1>} : memref<100x128xf32, #tpu.memory_space<vmem>>, vector<4x128xf32>
    %c33 = arith.constant 33 : index
    %c0_386 = arith.constant 0 : index
    %403 = tpu.strided_load %arg8[%c33, %c0_386] {strides = array<i32: 2, 1>} : memref<100x128xf32, #tpu.memory_space<vmem>>, vector<4x128xf32>
    %c53 = arith.constant 53 : index
    %c0_387 = arith.constant 0 : index
    %404 = tpu.strided_load %arg8[%c53, %c0_387] {strides = array<i32: 2, 1>} : memref<100x128xf32, #tpu.memory_space<vmem>>, vector<4x128xf32>
    %c73_388 = arith.constant 73 : index
    %c0_389 = arith.constant 0 : index
    %405 = tpu.strided_load %arg8[%c73_388, %c0_389] {strides = array<i32: 2, 1>} : memref<100x128xf32, #tpu.memory_space<vmem>>, vector<4x128xf32>
    %406 = tpu.concatenate %402, %403, %404, %405 in 0 : vector<4x128xf32>, vector<4x128xf32>, vector<4x128xf32>, vector<4x128xf32> -> vector<16x128xf32>
    %407 = vector.extract_strided_slice %406 {offsets = [0, 0], sizes = [16, 32], strides = [1, 1]} : vector<16x128xf32> to vector<16x32xf32>
    %408 = arith.truncf %407 : vector<16x32xf32> to vector<16x32xbf16>
    %c224_390 = arith.constant 224 : index
    %c0_391 = arith.constant 0 : index
    %409 = vector.load %arg4[%c224_390, %c0_391] : memref<512x128xbf16, #tpu.memory_space<vmem>>, vector<32x128xbf16>
    %cst_392 = arith.constant dense<0.000000e+00> : vector<16x128xf32>
    %410 = tpu.matmul %408, %409, %cst_392 {dimension_numbers = #tpu.dot_dimension_numbers<[1], [0], [0], [1], [0, 0, 1, 1], [], []>} : vector<16x32xbf16>, vector<32x128xbf16>, vector<16x128xf32> -> vector<16x128xf32>
    %411 = arith.addf %401, %410 : vector<16x128xf32>
    %c20_393 = arith.constant 20 : index
    %c0_394 = arith.constant 0 : index
    %412 = tpu.strided_load %arg8[%c20_393, %c0_394] {strides = array<i32: 2, 1>} : memref<100x128xf32, #tpu.memory_space<vmem>>, vector<4x128xf32>
    %c40_395 = arith.constant 40 : index
    %c0_396 = arith.constant 0 : index
    %413 = tpu.strided_load %arg8[%c40_395, %c0_396] {strides = array<i32: 2, 1>} : memref<100x128xf32, #tpu.memory_space<vmem>>, vector<4x128xf32>
    %c60_397 = arith.constant 60 : index
    %c0_398 = arith.constant 0 : index
    %414 = tpu.strided_load %arg8[%c60_397, %c0_398] {strides = array<i32: 2, 1>} : memref<100x128xf32, #tpu.memory_space<vmem>>, vector<4x128xf32>
    %c80_399 = arith.constant 80 : index
    %c0_400 = arith.constant 0 : index
    %415 = tpu.strided_load %arg8[%c80_399, %c0_400] {strides = array<i32: 2, 1>} : memref<100x128xf32, #tpu.memory_space<vmem>>, vector<4x128xf32>
    %416 = tpu.concatenate %412, %413, %414, %415 in 0 : vector<4x128xf32>, vector<4x128xf32>, vector<4x128xf32>, vector<4x128xf32> -> vector<16x128xf32>
    %417 = vector.extract_strided_slice %416 {offsets = [0, 0], sizes = [16, 32], strides = [1, 1]} : vector<16x128xf32> to vector<16x32xf32>
    %418 = arith.truncf %417 : vector<16x32xf32> to vector<16x32xbf16>
    %c256 = arith.constant 256 : index
    %c0_401 = arith.constant 0 : index
    %419 = vector.load %arg4[%c256, %c0_401] : memref<512x128xbf16, #tpu.memory_space<vmem>>, vector<32x128xbf16>
    %cst_402 = arith.constant dense<0.000000e+00> : vector<16x128xf32>
    %420 = tpu.matmul %418, %419, %cst_402 {dimension_numbers = #tpu.dot_dimension_numbers<[1], [0], [0], [1], [0, 0, 1, 1], [], []>} : vector<16x32xbf16>, vector<32x128xbf16>, vector<16x128xf32> -> vector<16x128xf32>
    %421 = arith.addf %411, %420 : vector<16x128xf32>
    %c21_403 = arith.constant 21 : index
    %c0_404 = arith.constant 0 : index
    %422 = tpu.strided_load %arg8[%c21_403, %c0_404] {strides = array<i32: 2, 1>} : memref<100x128xf32, #tpu.memory_space<vmem>>, vector<4x128xf32>
    %c41_405 = arith.constant 41 : index
    %c0_406 = arith.constant 0 : index
    %423 = tpu.strided_load %arg8[%c41_405, %c0_406] {strides = array<i32: 2, 1>} : memref<100x128xf32, #tpu.memory_space<vmem>>, vector<4x128xf32>
    %c61_407 = arith.constant 61 : index
    %c0_408 = arith.constant 0 : index
    %424 = tpu.strided_load %arg8[%c61_407, %c0_408] {strides = array<i32: 2, 1>} : memref<100x128xf32, #tpu.memory_space<vmem>>, vector<4x128xf32>
    %c81_409 = arith.constant 81 : index
    %c0_410 = arith.constant 0 : index
    %425 = tpu.strided_load %arg8[%c81_409, %c0_410] {strides = array<i32: 2, 1>} : memref<100x128xf32, #tpu.memory_space<vmem>>, vector<4x128xf32>
    %426 = tpu.concatenate %422, %423, %424, %425 in 0 : vector<4x128xf32>, vector<4x128xf32>, vector<4x128xf32>, vector<4x128xf32> -> vector<16x128xf32>
    %427 = vector.extract_strided_slice %426 {offsets = [0, 0], sizes = [16, 32], strides = [1, 1]} : vector<16x128xf32> to vector<16x32xf32>
    %428 = arith.truncf %427 : vector<16x32xf32> to vector<16x32xbf16>
    %c288_411 = arith.constant 288 : index
    %c0_412 = arith.constant 0 : index
    %429 = vector.load %arg4[%c288_411, %c0_412] : memref<512x128xbf16, #tpu.memory_space<vmem>>, vector<32x128xbf16>
    %cst_413 = arith.constant dense<0.000000e+00> : vector<16x128xf32>
    %430 = tpu.matmul %428, %429, %cst_413 {dimension_numbers = #tpu.dot_dimension_numbers<[1], [0], [0], [1], [0, 0, 1, 1], [], []>} : vector<16x32xbf16>, vector<32x128xbf16>, vector<16x128xf32> -> vector<16x128xf32>
    %431 = arith.addf %421, %430 : vector<16x128xf32>
    %c22_414 = arith.constant 22 : index
    %c0_415 = arith.constant 0 : index
    %432 = tpu.strided_load %arg8[%c22_414, %c0_415] {strides = array<i32: 2, 1>} : memref<100x128xf32, #tpu.memory_space<vmem>>, vector<4x128xf32>
    %c42_416 = arith.constant 42 : index
    %c0_417 = arith.constant 0 : index
    %433 = tpu.strided_load %arg8[%c42_416, %c0_417] {strides = array<i32: 2, 1>} : memref<100x128xf32, #tpu.memory_space<vmem>>, vector<4x128xf32>
    %c62_418 = arith.constant 62 : index
    %c0_419 = arith.constant 0 : index
    %434 = tpu.strided_load %arg8[%c62_418, %c0_419] {strides = array<i32: 2, 1>} : memref<100x128xf32, #tpu.memory_space<vmem>>, vector<4x128xf32>
    %c82 = arith.constant 82 : index
    %c0_420 = arith.constant 0 : index
    %435 = tpu.strided_load %arg8[%c82, %c0_420] {strides = array<i32: 2, 1>} : memref<100x128xf32, #tpu.memory_space<vmem>>, vector<4x128xf32>
    %436 = tpu.concatenate %432, %433, %434, %435 in 0 : vector<4x128xf32>, vector<4x128xf32>, vector<4x128xf32>, vector<4x128xf32> -> vector<16x128xf32>
    %437 = vector.extract_strided_slice %436 {offsets = [0, 0], sizes = [16, 32], strides = [1, 1]} : vector<16x128xf32> to vector<16x32xf32>
    %438 = arith.truncf %437 : vector<16x32xf32> to vector<16x32xbf16>
    %c320 = arith.constant 320 : index
    %c0_421 = arith.constant 0 : index
    %439 = vector.load %arg4[%c320, %c0_421] : memref<512x128xbf16, #tpu.memory_space<vmem>>, vector<32x128xbf16>
    %cst_422 = arith.constant dense<0.000000e+00> : vector<16x128xf32>
    %440 = tpu.matmul %438, %439, %cst_422 {dimension_numbers = #tpu.dot_dimension_numbers<[1], [0], [0], [1], [0, 0, 1, 1], [], []>} : vector<16x32xbf16>, vector<32x128xbf16>, vector<16x128xf32> -> vector<16x128xf32>
    %441 = arith.addf %431, %440 : vector<16x128xf32>
    %c23_423 = arith.constant 23 : index
    %c0_424 = arith.constant 0 : index
    %442 = tpu.strided_load %arg8[%c23_423, %c0_424] {strides = array<i32: 2, 1>} : memref<100x128xf32, #tpu.memory_space<vmem>>, vector<4x128xf32>
    %c43_425 = arith.constant 43 : index
    %c0_426 = arith.constant 0 : index
    %443 = tpu.strided_load %arg8[%c43_425, %c0_426] {strides = array<i32: 2, 1>} : memref<100x128xf32, #tpu.memory_space<vmem>>, vector<4x128xf32>
    %c63_427 = arith.constant 63 : index
    %c0_428 = arith.constant 0 : index
    %444 = tpu.strided_load %arg8[%c63_427, %c0_428] {strides = array<i32: 2, 1>} : memref<100x128xf32, #tpu.memory_space<vmem>>, vector<4x128xf32>
    %c83 = arith.constant 83 : index
    %c0_429 = arith.constant 0 : index
    %445 = tpu.strided_load %arg8[%c83, %c0_429] {strides = array<i32: 2, 1>} : memref<100x128xf32, #tpu.memory_space<vmem>>, vector<4x128xf32>
    %446 = tpu.concatenate %442, %443, %444, %445 in 0 : vector<4x128xf32>, vector<4x128xf32>, vector<4x128xf32>, vector<4x128xf32> -> vector<16x128xf32>
    %447 = vector.extract_strided_slice %446 {offsets = [0, 0], sizes = [16, 32], strides = [1, 1]} : vector<16x128xf32> to vector<16x32xf32>
    %448 = arith.truncf %447 : vector<16x32xf32> to vector<16x32xbf16>
    %c352 = arith.constant 352 : index
    %c0_430 = arith.constant 0 : index
    %449 = vector.load %arg4[%c352, %c0_430] : memref<512x128xbf16, #tpu.memory_space<vmem>>, vector<32x128xbf16>
    %cst_431 = arith.constant dense<0.000000e+00> : vector<16x128xf32>
    %450 = tpu.matmul %448, %449, %cst_431 {dimension_numbers = #tpu.dot_dimension_numbers<[1], [0], [0], [1], [0, 0, 1, 1], [], []>} : vector<16x32xbf16>, vector<32x128xbf16>, vector<16x128xf32> -> vector<16x128xf32>
    %451 = arith.addf %441, %450 : vector<16x128xf32>
    %c30_432 = arith.constant 30 : index
    %c0_433 = arith.constant 0 : index
    %452 = tpu.strided_load %arg8[%c30_432, %c0_433] {strides = array<i32: 2, 1>} : memref<100x128xf32, #tpu.memory_space<vmem>>, vector<4x128xf32>
    %c50_434 = arith.constant 50 : index
    %c0_435 = arith.constant 0 : index
    %453 = tpu.strided_load %arg8[%c50_434, %c0_435] {strides = array<i32: 2, 1>} : memref<100x128xf32, #tpu.memory_space<vmem>>, vector<4x128xf32>
    %c70_436 = arith.constant 70 : index
    %c0_437 = arith.constant 0 : index
    %454 = tpu.strided_load %arg8[%c70_436, %c0_437] {strides = array<i32: 2, 1>} : memref<100x128xf32, #tpu.memory_space<vmem>>, vector<4x128xf32>
    %c90_438 = arith.constant 90 : index
    %c0_439 = arith.constant 0 : index
    %455 = tpu.strided_load %arg8[%c90_438, %c0_439] {strides = array<i32: 2, 1>} : memref<100x128xf32, #tpu.memory_space<vmem>>, vector<4x128xf32>
    %456 = tpu.concatenate %452, %453, %454, %455 in 0 : vector<4x128xf32>, vector<4x128xf32>, vector<4x128xf32>, vector<4x128xf32> -> vector<16x128xf32>
    %457 = vector.extract_strided_slice %456 {offsets = [0, 0], sizes = [16, 32], strides = [1, 1]} : vector<16x128xf32> to vector<16x32xf32>
    %458 = arith.truncf %457 : vector<16x32xf32> to vector<16x32xbf16>
    %c384 = arith.constant 384 : index
    %c0_440 = arith.constant 0 : index
    %459 = vector.load %arg4[%c384, %c0_440] : memref<512x128xbf16, #tpu.memory_space<vmem>>, vector<32x128xbf16>
    %cst_441 = arith.constant dense<0.000000e+00> : vector<16x128xf32>
    %460 = tpu.matmul %458, %459, %cst_441 {dimension_numbers = #tpu.dot_dimension_numbers<[1], [0], [0], [1], [0, 0, 1, 1], [], []>} : vector<16x32xbf16>, vector<32x128xbf16>, vector<16x128xf32> -> vector<16x128xf32>
    %461 = arith.addf %451, %460 : vector<16x128xf32>
    %c31_442 = arith.constant 31 : index
    %c0_443 = arith.constant 0 : index
    %462 = tpu.strided_load %arg8[%c31_442, %c0_443] {strides = array<i32: 2, 1>} : memref<100x128xf32, #tpu.memory_space<vmem>>, vector<4x128xf32>
    %c51_444 = arith.constant 51 : index
    %c0_445 = arith.constant 0 : index
    %463 = tpu.strided_load %arg8[%c51_444, %c0_445] {strides = array<i32: 2, 1>} : memref<100x128xf32, #tpu.memory_space<vmem>>, vector<4x128xf32>
    %c71_446 = arith.constant 71 : index
    %c0_447 = arith.constant 0 : index
    %464 = tpu.strided_load %arg8[%c71_446, %c0_447] {strides = array<i32: 2, 1>} : memref<100x128xf32, #tpu.memory_space<vmem>>, vector<4x128xf32>
    %c91_448 = arith.constant 91 : index
    %c0_449 = arith.constant 0 : index
    %465 = tpu.strided_load %arg8[%c91_448, %c0_449] {strides = array<i32: 2, 1>} : memref<100x128xf32, #tpu.memory_space<vmem>>, vector<4x128xf32>
    %466 = tpu.concatenate %462, %463, %464, %465 in 0 : vector<4x128xf32>, vector<4x128xf32>, vector<4x128xf32>, vector<4x128xf32> -> vector<16x128xf32>
    %467 = vector.extract_strided_slice %466 {offsets = [0, 0], sizes = [16, 32], strides = [1, 1]} : vector<16x128xf32> to vector<16x32xf32>
    %468 = arith.truncf %467 : vector<16x32xf32> to vector<16x32xbf16>
    %c416 = arith.constant 416 : index
    %c0_450 = arith.constant 0 : index
    %469 = vector.load %arg4[%c416, %c0_450] : memref<512x128xbf16, #tpu.memory_space<vmem>>, vector<32x128xbf16>
    %cst_451 = arith.constant dense<0.000000e+00> : vector<16x128xf32>
    %470 = tpu.matmul %468, %469, %cst_451 {dimension_numbers = #tpu.dot_dimension_numbers<[1], [0], [0], [1], [0, 0, 1, 1], [], []>} : vector<16x32xbf16>, vector<32x128xbf16>, vector<16x128xf32> -> vector<16x128xf32>
    %471 = arith.addf %461, %470 : vector<16x128xf32>
    %c32_452 = arith.constant 32 : index
    %c0_453 = arith.constant 0 : index
    %472 = tpu.strided_load %arg8[%c32_452, %c0_453] {strides = array<i32: 2, 1>} : memref<100x128xf32, #tpu.memory_space<vmem>>, vector<4x128xf32>
    %c52_454 = arith.constant 52 : index
    %c0_455 = arith.constant 0 : index
    %473 = tpu.strided_load %arg8[%c52_454, %c0_455] {strides = array<i32: 2, 1>} : memref<100x128xf32, #tpu.memory_space<vmem>>, vector<4x128xf32>
    %c72_456 = arith.constant 72 : index
    %c0_457 = arith.constant 0 : index
    %474 = tpu.strided_load %arg8[%c72_456, %c0_457] {strides = array<i32: 2, 1>} : memref<100x128xf32, #tpu.memory_space<vmem>>, vector<4x128xf32>
    %c92_458 = arith.constant 92 : index
    %c0_459 = arith.constant 0 : index
    %475 = tpu.strided_load %arg8[%c92_458, %c0_459] {strides = array<i32: 2, 1>} : memref<100x128xf32, #tpu.memory_space<vmem>>, vector<4x128xf32>
    %476 = tpu.concatenate %472, %473, %474, %475 in 0 : vector<4x128xf32>, vector<4x128xf32>, vector<4x128xf32>, vector<4x128xf32> -> vector<16x128xf32>
    %477 = vector.extract_strided_slice %476 {offsets = [0, 0], sizes = [16, 32], strides = [1, 1]} : vector<16x128xf32> to vector<16x32xf32>
    %478 = arith.truncf %477 : vector<16x32xf32> to vector<16x32xbf16>
    %c448 = arith.constant 448 : index
    %c0_460 = arith.constant 0 : index
    %479 = vector.load %arg4[%c448, %c0_460] : memref<512x128xbf16, #tpu.memory_space<vmem>>, vector<32x128xbf16>
    %cst_461 = arith.constant dense<0.000000e+00> : vector<16x128xf32>
    %480 = tpu.matmul %478, %479, %cst_461 {dimension_numbers = #tpu.dot_dimension_numbers<[1], [0], [0], [1], [0, 0, 1, 1], [], []>} : vector<16x32xbf16>, vector<32x128xbf16>, vector<16x128xf32> -> vector<16x128xf32>
    %481 = arith.addf %471, %480 : vector<16x128xf32>
    %c33_462 = arith.constant 33 : index
    %c0_463 = arith.constant 0 : index
    %482 = tpu.strided_load %arg8[%c33_462, %c0_463] {strides = array<i32: 2, 1>} : memref<100x128xf32, #tpu.memory_space<vmem>>, vector<4x128xf32>
    %c53_464 = arith.constant 53 : index
    %c0_465 = arith.constant 0 : index
    %483 = tpu.strided_load %arg8[%c53_464, %c0_465] {strides = array<i32: 2, 1>} : memref<100x128xf32, #tpu.memory_space<vmem>>, vector<4x128xf32>
    %c73_466 = arith.constant 73 : index
    %c0_467 = arith.constant 0 : index
    %484 = tpu.strided_load %arg8[%c73_466, %c0_467] {strides = array<i32: 2, 1>} : memref<100x128xf32, #tpu.memory_space<vmem>>, vector<4x128xf32>
    %c93_468 = arith.constant 93 : index
    %c0_469 = arith.constant 0 : index
    %485 = tpu.strided_load %arg8[%c93_468, %c0_469] {strides = array<i32: 2, 1>} : memref<100x128xf32, #tpu.memory_space<vmem>>, vector<4x128xf32>
    %486 = tpu.concatenate %482, %483, %484, %485 in 0 : vector<4x128xf32>, vector<4x128xf32>, vector<4x128xf32>, vector<4x128xf32> -> vector<16x128xf32>
    %487 = vector.extract_strided_slice %486 {offsets = [0, 0], sizes = [16, 32], strides = [1, 1]} : vector<16x128xf32> to vector<16x32xf32>
    %488 = arith.truncf %487 : vector<16x32xf32> to vector<16x32xbf16>
    %c480 = arith.constant 480 : index
    %c0_470 = arith.constant 0 : index
    %489 = vector.load %arg4[%c480, %c0_470] : memref<512x128xbf16, #tpu.memory_space<vmem>>, vector<32x128xbf16>
    %cst_471 = arith.constant dense<0.000000e+00> : vector<16x128xf32>
    %490 = tpu.matmul %488, %489, %cst_471 {dimension_numbers = #tpu.dot_dimension_numbers<[1], [0], [0], [1], [0, 0, 1, 1], [], []>} : vector<16x32xbf16>, vector<32x128xbf16>, vector<16x128xf32> -> vector<16x128xf32>
    %491 = arith.addf %481, %490 : vector<16x128xf32>
    %cst_472 = arith.constant 0.000000e+00 : f32
    %492 = vector.broadcast %cst_472 : f32 to vector<16x128xf32>
    %493 = arith.cmpf ogt, %491, %492 : vector<16x128xf32>
    %cst_473 = arith.constant 2.000000e-01 : f32
    %494 = vector.broadcast %cst_473 : f32 to vector<16x128xf32>
    %495 = arith.mulf %494, %491 : vector<16x128xf32>
    %496 = arith.select %493, %491, %495 : vector<16x128xi1>, vector<16x128xf32>
    %497 = vector.extract_strided_slice %496 {offsets = [0, 0], sizes = [4, 128], strides = [1, 1]} : vector<16x128xf32> to vector<4x128xf32>
    %c0_474 = arith.constant 0 : index
    %c0_475 = arith.constant 0 : index
    %498 = vector.load %arg9[%c0_474, %c0_475] : memref<16x128xf32, #tpu.memory_space<vmem>>, vector<4x128xf32>
    tpu.vector_store %arg9[%c0_474, %c0_475], %497 {strides = array<i32>} : memref<16x128xf32, #tpu.memory_space<vmem>>, vector<4x128xf32>,
    %499 = vector.extract_strided_slice %496 {offsets = [4, 0], sizes = [4, 128], strides = [1, 1]} : vector<16x128xf32> to vector<4x128xf32>
    %c4 = arith.constant 4 : index
    %c0_476 = arith.constant 0 : index
    %500 = vector.load %arg9[%c4, %c0_476] : memref<16x128xf32, #tpu.memory_space<vmem>>, vector<4x128xf32>
    tpu.vector_store %arg9[%c4, %c0_476], %499 {strides = array<i32>} : memref<16x128xf32, #tpu.memory_space<vmem>>, vector<4x128xf32>,
    %501 = vector.extract_strided_slice %496 {offsets = [8, 0], sizes = [4, 128], strides = [1, 1]} : vector<16x128xf32> to vector<4x128xf32>
    %c8 = arith.constant 8 : index
    %c0_477 = arith.constant 0 : index
    %502 = vector.load %arg9[%c8, %c0_477] : memref<16x128xf32, #tpu.memory_space<vmem>>, vector<4x128xf32>
    tpu.vector_store %arg9[%c8, %c0_477], %501 {strides = array<i32>} : memref<16x128xf32, #tpu.memory_space<vmem>>, vector<4x128xf32>,
    %503 = vector.extract_strided_slice %496 {offsets = [12, 0], sizes = [4, 128], strides = [1, 1]} : vector<16x128xf32> to vector<4x128xf32>
    %c12_478 = arith.constant 12 : index
    %c0_479 = arith.constant 0 : index
    %504 = vector.load %arg9[%c12_478, %c0_479] : memref<16x128xf32, #tpu.memory_space<vmem>>, vector<4x128xf32>
    tpu.vector_store %arg9[%c12_478, %c0_479], %503 {strides = array<i32>} : memref<16x128xf32, #tpu.memory_space<vmem>>, vector<4x128xf32>,
    %cst_480 = arith.constant 0.000000e+00 : f32
    %505 = vector.broadcast %cst_480 : f32 to vector<1x128xf32>
    %c0_481 = arith.constant 0 : index
    %c0_482 = arith.constant 0 : index
    %506 = vector.load %arg9[%c0_481, %c0_482] : memref<16x128xf32, #tpu.memory_space<vmem>>, vector<1x128xf32>
    %507 = vector.extract_strided_slice %506 {offsets = [0, 0], sizes = [1, 64], strides = [1, 1]} : vector<1x128xf32> to vector<1x64xf32>
    %508 = arith.truncf %507 : vector<1x64xf32> to vector<1x64xbf16>
    %c0_483 = arith.constant 0 : index
    %c0_484 = arith.constant 0 : index
    %509 = vector.load %arg5[%c0_483, %c0_484] : memref<1024x128xbf16, #tpu.memory_space<vmem>>, vector<64x128xbf16>
    %cst_485 = arith.constant dense<0.000000e+00> : vector<1x128xf32>
    %510 = tpu.matmul %508, %509, %cst_485 {dimension_numbers = #tpu.dot_dimension_numbers<[1], [0], [0], [1], [0, 0, 1, 1], [], []>} : vector<1x64xbf16>, vector<64x128xbf16>, vector<1x128xf32> -> vector<1x128xf32>
    %511 = arith.addf %505, %510 : vector<1x128xf32>
    %c1_486 = arith.constant 1 : index
    %c0_487 = arith.constant 0 : index
    %512 = vector.load %arg9[%c1_486, %c0_487] : memref<16x128xf32, #tpu.memory_space<vmem>>, vector<1x128xf32>
    %513 = vector.extract_strided_slice %512 {offsets = [0, 0], sizes = [1, 64], strides = [1, 1]} : vector<1x128xf32> to vector<1x64xf32>
    %514 = arith.truncf %513 : vector<1x64xf32> to vector<1x64xbf16>
    %c64_488 = arith.constant 64 : index
    %c0_489 = arith.constant 0 : index
    %515 = vector.load %arg5[%c64_488, %c0_489] : memref<1024x128xbf16, #tpu.memory_space<vmem>>, vector<64x128xbf16>
    %cst_490 = arith.constant dense<0.000000e+00> : vector<1x128xf32>
    %516 = tpu.matmul %514, %515, %cst_490 {dimension_numbers = #tpu.dot_dimension_numbers<[1], [0], [0], [1], [0, 0, 1, 1], [], []>} : vector<1x64xbf16>, vector<64x128xbf16>, vector<1x128xf32> -> vector<1x128xf32>
    %517 = arith.addf %511, %516 : vector<1x128xf32>
    %c2_491 = arith.constant 2 : index
    %c0_492 = arith.constant 0 : index
    %518 = vector.load %arg9[%c2_491, %c0_492] : memref<16x128xf32, #tpu.memory_space<vmem>>, vector<1x128xf32>
    %519 = vector.extract_strided_slice %518 {offsets = [0, 0], sizes = [1, 64], strides = [1, 1]} : vector<1x128xf32> to vector<1x64xf32>
    %520 = arith.truncf %519 : vector<1x64xf32> to vector<1x64xbf16>
    %c128_493 = arith.constant 128 : index
    %c0_494 = arith.constant 0 : index
    %521 = vector.load %arg5[%c128_493, %c0_494] : memref<1024x128xbf16, #tpu.memory_space<vmem>>, vector<64x128xbf16>
    %cst_495 = arith.constant dense<0.000000e+00> : vector<1x128xf32>
    %522 = tpu.matmul %520, %521, %cst_495 {dimension_numbers = #tpu.dot_dimension_numbers<[1], [0], [0], [1], [0, 0, 1, 1], [], []>} : vector<1x64xbf16>, vector<64x128xbf16>, vector<1x128xf32> -> vector<1x128xf32>
    %523 = arith.addf %517, %522 : vector<1x128xf32>
    %c3_496 = arith.constant 3 : index
    %c0_497 = arith.constant 0 : index
    %524 = vector.load %arg9[%c3_496, %c0_497] : memref<16x128xf32, #tpu.memory_space<vmem>>, vector<1x128xf32>
    %525 = vector.extract_strided_slice %524 {offsets = [0, 0], sizes = [1, 64], strides = [1, 1]} : vector<1x128xf32> to vector<1x64xf32>
    %526 = arith.truncf %525 : vector<1x64xf32> to vector<1x64xbf16>
    %c192_498 = arith.constant 192 : index
    %c0_499 = arith.constant 0 : index
    %527 = vector.load %arg5[%c192_498, %c0_499] : memref<1024x128xbf16, #tpu.memory_space<vmem>>, vector<64x128xbf16>
    %cst_500 = arith.constant dense<0.000000e+00> : vector<1x128xf32>
    %528 = tpu.matmul %526, %527, %cst_500 {dimension_numbers = #tpu.dot_dimension_numbers<[1], [0], [0], [1], [0, 0, 1, 1], [], []>} : vector<1x64xbf16>, vector<64x128xbf16>, vector<1x128xf32> -> vector<1x128xf32>
    %529 = arith.addf %523, %528 : vector<1x128xf32>
    %c4_501 = arith.constant 4 : index
    %c0_502 = arith.constant 0 : index
    %530 = vector.load %arg9[%c4_501, %c0_502] : memref<16x128xf32, #tpu.memory_space<vmem>>, vector<1x128xf32>
    %531 = vector.extract_strided_slice %530 {offsets = [0, 0], sizes = [1, 64], strides = [1, 1]} : vector<1x128xf32> to vector<1x64xf32>
    %532 = arith.truncf %531 : vector<1x64xf32> to vector<1x64xbf16>
    %c256_503 = arith.constant 256 : index
    %c0_504 = arith.constant 0 : index
    %533 = vector.load %arg5[%c256_503, %c0_504] : memref<1024x128xbf16, #tpu.memory_space<vmem>>, vector<64x128xbf16>
    %cst_505 = arith.constant dense<0.000000e+00> : vector<1x128xf32>
    %534 = tpu.matmul %532, %533, %cst_505 {dimension_numbers = #tpu.dot_dimension_numbers<[1], [0], [0], [1], [0, 0, 1, 1], [], []>} : vector<1x64xbf16>, vector<64x128xbf16>, vector<1x128xf32> -> vector<1x128xf32>
    %535 = arith.addf %529, %534 : vector<1x128xf32>
    %c5 = arith.constant 5 : index
    %c0_506 = arith.constant 0 : index
    %536 = vector.load %arg9[%c5, %c0_506] : memref<16x128xf32, #tpu.memory_space<vmem>>, vector<1x128xf32>
    %537 = vector.extract_strided_slice %536 {offsets = [0, 0], sizes = [1, 64], strides = [1, 1]} : vector<1x128xf32> to vector<1x64xf32>
    %538 = arith.truncf %537 : vector<1x64xf32> to vector<1x64xbf16>
    %c320_507 = arith.constant 320 : index
    %c0_508 = arith.constant 0 : index
    %539 = vector.load %arg5[%c320_507, %c0_508] : memref<1024x128xbf16, #tpu.memory_space<vmem>>, vector<64x128xbf16>
    %cst_509 = arith.constant dense<0.000000e+00> : vector<1x128xf32>
    %540 = tpu.matmul %538, %539, %cst_509 {dimension_numbers = #tpu.dot_dimension_numbers<[1], [0], [0], [1], [0, 0, 1, 1], [], []>} : vector<1x64xbf16>, vector<64x128xbf16>, vector<1x128xf32> -> vector<1x128xf32>
    %541 = arith.addf %535, %540 : vector<1x128xf32>
    %c6 = arith.constant 6 : index
    %c0_510 = arith.constant 0 : index
    %542 = vector.load %arg9[%c6, %c0_510] : memref<16x128xf32, #tpu.memory_space<vmem>>, vector<1x128xf32>
    %543 = vector.extract_strided_slice %542 {offsets = [0, 0], sizes = [1, 64], strides = [1, 1]} : vector<1x128xf32> to vector<1x64xf32>
    %544 = arith.truncf %543 : vector<1x64xf32> to vector<1x64xbf16>
    %c384_511 = arith.constant 384 : index
    %c0_512 = arith.constant 0 : index
    %545 = vector.load %arg5[%c384_511, %c0_512] : memref<1024x128xbf16, #tpu.memory_space<vmem>>, vector<64x128xbf16>
    %cst_513 = arith.constant dense<0.000000e+00> : vector<1x128xf32>
    %546 = tpu.matmul %544, %545, %cst_513 {dimension_numbers = #tpu.dot_dimension_numbers<[1], [0], [0], [1], [0, 0, 1, 1], [], []>} : vector<1x64xbf16>, vector<64x128xbf16>, vector<1x128xf32> -> vector<1x128xf32>
    %547 = arith.addf %541, %546 : vector<1x128xf32>
    %c7 = arith.constant 7 : index
    %c0_514 = arith.constant 0 : index
    %548 = vector.load %arg9[%c7, %c0_514] : memref<16x128xf32, #tpu.memory_space<vmem>>, vector<1x128xf32>
    %549 = vector.extract_strided_slice %548 {offsets = [0, 0], sizes = [1, 64], strides = [1, 1]} : vector<1x128xf32> to vector<1x64xf32>
    %550 = arith.truncf %549 : vector<1x64xf32> to vector<1x64xbf16>
    %c448_515 = arith.constant 448 : index
    %c0_516 = arith.constant 0 : index
    %551 = vector.load %arg5[%c448_515, %c0_516] : memref<1024x128xbf16, #tpu.memory_space<vmem>>, vector<64x128xbf16>
    %cst_517 = arith.constant dense<0.000000e+00> : vector<1x128xf32>
    %552 = tpu.matmul %550, %551, %cst_517 {dimension_numbers = #tpu.dot_dimension_numbers<[1], [0], [0], [1], [0, 0, 1, 1], [], []>} : vector<1x64xbf16>, vector<64x128xbf16>, vector<1x128xf32> -> vector<1x128xf32>
    %553 = arith.addf %547, %552 : vector<1x128xf32>
    %c8_518 = arith.constant 8 : index
    %c0_519 = arith.constant 0 : index
    %554 = vector.load %arg9[%c8_518, %c0_519] : memref<16x128xf32, #tpu.memory_space<vmem>>, vector<1x128xf32>
    %555 = vector.extract_strided_slice %554 {offsets = [0, 0], sizes = [1, 64], strides = [1, 1]} : vector<1x128xf32> to vector<1x64xf32>
    %556 = arith.truncf %555 : vector<1x64xf32> to vector<1x64xbf16>
    %c512 = arith.constant 512 : index
    %c0_520 = arith.constant 0 : index
    %557 = vector.load %arg5[%c512, %c0_520] : memref<1024x128xbf16, #tpu.memory_space<vmem>>, vector<64x128xbf16>
    %cst_521 = arith.constant dense<0.000000e+00> : vector<1x128xf32>
    %558 = tpu.matmul %556, %557, %cst_521 {dimension_numbers = #tpu.dot_dimension_numbers<[1], [0], [0], [1], [0, 0, 1, 1], [], []>} : vector<1x64xbf16>, vector<64x128xbf16>, vector<1x128xf32> -> vector<1x128xf32>
    %559 = arith.addf %553, %558 : vector<1x128xf32>
    %c9 = arith.constant 9 : index
    %c0_522 = arith.constant 0 : index
    %560 = vector.load %arg9[%c9, %c0_522] : memref<16x128xf32, #tpu.memory_space<vmem>>, vector<1x128xf32>
    %561 = vector.extract_strided_slice %560 {offsets = [0, 0], sizes = [1, 64], strides = [1, 1]} : vector<1x128xf32> to vector<1x64xf32>
    %562 = arith.truncf %561 : vector<1x64xf32> to vector<1x64xbf16>
    %c576 = arith.constant 576 : index
    %c0_523 = arith.constant 0 : index
    %563 = vector.load %arg5[%c576, %c0_523] : memref<1024x128xbf16, #tpu.memory_space<vmem>>, vector<64x128xbf16>
    %cst_524 = arith.constant dense<0.000000e+00> : vector<1x128xf32>
    %564 = tpu.matmul %562, %563, %cst_524 {dimension_numbers = #tpu.dot_dimension_numbers<[1], [0], [0], [1], [0, 0, 1, 1], [], []>} : vector<1x64xbf16>, vector<64x128xbf16>, vector<1x128xf32> -> vector<1x128xf32>
    %565 = arith.addf %559, %564 : vector<1x128xf32>
    %c10_525 = arith.constant 10 : index
    %c0_526 = arith.constant 0 : index
    %566 = vector.load %arg9[%c10_525, %c0_526] : memref<16x128xf32, #tpu.memory_space<vmem>>, vector<1x128xf32>
    %567 = vector.extract_strided_slice %566 {offsets = [0, 0], sizes = [1, 64], strides = [1, 1]} : vector<1x128xf32> to vector<1x64xf32>
    %568 = arith.truncf %567 : vector<1x64xf32> to vector<1x64xbf16>
    %c640 = arith.constant 640 : index
    %c0_527 = arith.constant 0 : index
    %569 = vector.load %arg5[%c640, %c0_527] : memref<1024x128xbf16, #tpu.memory_space<vmem>>, vector<64x128xbf16>
    %cst_528 = arith.constant dense<0.000000e+00> : vector<1x128xf32>
    %570 = tpu.matmul %568, %569, %cst_528 {dimension_numbers = #tpu.dot_dimension_numbers<[1], [0], [0], [1], [0, 0, 1, 1], [], []>} : vector<1x64xbf16>, vector<64x128xbf16>, vector<1x128xf32> -> vector<1x128xf32>
    %571 = arith.addf %565, %570 : vector<1x128xf32>
    %c11_529 = arith.constant 11 : index
    %c0_530 = arith.constant 0 : index
    %572 = vector.load %arg9[%c11_529, %c0_530] : memref<16x128xf32, #tpu.memory_space<vmem>>, vector<1x128xf32>
    %573 = vector.extract_strided_slice %572 {offsets = [0, 0], sizes = [1, 64], strides = [1, 1]} : vector<1x128xf32> to vector<1x64xf32>
    %574 = arith.truncf %573 : vector<1x64xf32> to vector<1x64xbf16>
    %c704 = arith.constant 704 : index
    %c0_531 = arith.constant 0 : index
    %575 = vector.load %arg5[%c704, %c0_531] : memref<1024x128xbf16, #tpu.memory_space<vmem>>, vector<64x128xbf16>
    %cst_532 = arith.constant dense<0.000000e+00> : vector<1x128xf32>
    %576 = tpu.matmul %574, %575, %cst_532 {dimension_numbers = #tpu.dot_dimension_numbers<[1], [0], [0], [1], [0, 0, 1, 1], [], []>} : vector<1x64xbf16>, vector<64x128xbf16>, vector<1x128xf32> -> vector<1x128xf32>
    %577 = arith.addf %571, %576 : vector<1x128xf32>
    %c12_533 = arith.constant 12 : index
    %c0_534 = arith.constant 0 : index
    %578 = vector.load %arg9[%c12_533, %c0_534] : memref<16x128xf32, #tpu.memory_space<vmem>>, vector<1x128xf32>
    %579 = vector.extract_strided_slice %578 {offsets = [0, 0], sizes = [1, 64], strides = [1, 1]} : vector<1x128xf32> to vector<1x64xf32>
    %580 = arith.truncf %579 : vector<1x64xf32> to vector<1x64xbf16>
    %c768 = arith.constant 768 : index
    %c0_535 = arith.constant 0 : index
    %581 = vector.load %arg5[%c768, %c0_535] : memref<1024x128xbf16, #tpu.memory_space<vmem>>, vector<64x128xbf16>
    %cst_536 = arith.constant dense<0.000000e+00> : vector<1x128xf32>
    %582 = tpu.matmul %580, %581, %cst_536 {dimension_numbers = #tpu.dot_dimension_numbers<[1], [0], [0], [1], [0, 0, 1, 1], [], []>} : vector<1x64xbf16>, vector<64x128xbf16>, vector<1x128xf32> -> vector<1x128xf32>
    %583 = arith.addf %577, %582 : vector<1x128xf32>
    %c13_537 = arith.constant 13 : index
    %c0_538 = arith.constant 0 : index
    %584 = vector.load %arg9[%c13_537, %c0_538] : memref<16x128xf32, #tpu.memory_space<vmem>>, vector<1x128xf32>
    %585 = vector.extract_strided_slice %584 {offsets = [0, 0], sizes = [1, 64], strides = [1, 1]} : vector<1x128xf32> to vector<1x64xf32>
    %586 = arith.truncf %585 : vector<1x64xf32> to vector<1x64xbf16>
    %c832 = arith.constant 832 : index
    %c0_539 = arith.constant 0 : index
    %587 = vector.load %arg5[%c832, %c0_539] : memref<1024x128xbf16, #tpu.memory_space<vmem>>, vector<64x128xbf16>
    %cst_540 = arith.constant dense<0.000000e+00> : vector<1x128xf32>
    %588 = tpu.matmul %586, %587, %cst_540 {dimension_numbers = #tpu.dot_dimension_numbers<[1], [0], [0], [1], [0, 0, 1, 1], [], []>} : vector<1x64xbf16>, vector<64x128xbf16>, vector<1x128xf32> -> vector<1x128xf32>
    %589 = arith.addf %583, %588 : vector<1x128xf32>
    %c14 = arith.constant 14 : index
    %c0_541 = arith.constant 0 : index
    %590 = vector.load %arg9[%c14, %c0_541] : memref<16x128xf32, #tpu.memory_space<vmem>>, vector<1x128xf32>
    %591 = vector.extract_strided_slice %590 {offsets = [0, 0], sizes = [1, 64], strides = [1, 1]} : vector<1x128xf32> to vector<1x64xf32>
    %592 = arith.truncf %591 : vector<1x64xf32> to vector<1x64xbf16>
    %c896 = arith.constant 896 : index
    %c0_542 = arith.constant 0 : index
    %593 = vector.load %arg5[%c896, %c0_542] : memref<1024x128xbf16, #tpu.memory_space<vmem>>, vector<64x128xbf16>
    %cst_543 = arith.constant dense<0.000000e+00> : vector<1x128xf32>
    %594 = tpu.matmul %592, %593, %cst_543 {dimension_numbers = #tpu.dot_dimension_numbers<[1], [0], [0], [1], [0, 0, 1, 1], [], []>} : vector<1x64xbf16>, vector<64x128xbf16>, vector<1x128xf32> -> vector<1x128xf32>
    %595 = arith.addf %589, %594 : vector<1x128xf32>
    %c15 = arith.constant 15 : index
    %c0_544 = arith.constant 0 : index
    %596 = vector.load %arg9[%c15, %c0_544] : memref<16x128xf32, #tpu.memory_space<vmem>>, vector<1x128xf32>
    %597 = vector.extract_strided_slice %596 {offsets = [0, 0], sizes = [1, 64], strides = [1, 1]} : vector<1x128xf32> to vector<1x64xf32>
    %598 = arith.truncf %597 : vector<1x64xf32> to vector<1x64xbf16>
    %c960 = arith.constant 960 : index
    %c0_545 = arith.constant 0 : index
    %599 = vector.load %arg5[%c960, %c0_545] : memref<1024x128xbf16, #tpu.memory_space<vmem>>, vector<64x128xbf16>
    %cst_546 = arith.constant dense<0.000000e+00> : vector<1x128xf32>
    %600 = tpu.matmul %598, %599, %cst_546 {dimension_numbers = #tpu.dot_dimension_numbers<[1], [0], [0], [1], [0, 0, 1, 1], [], []>} : vector<1x64xbf16>, vector<64x128xbf16>, vector<1x128xf32> -> vector<1x128xf32>
    %601 = arith.addf %595, %600 : vector<1x128xf32>
    %602 = arith.negf %601 : vector<1x128xf32>
    %603 = math.exp %602 : vector<1x128xf32>
    %cst_547 = arith.constant 1.000000e+00 : f32
    %604 = vector.broadcast %cst_547 : f32 to vector<1x128xf32>
    %605 = arith.addf %604, %603 : vector<1x128xf32>
    %606 = arith.divf %604, %605 : vector<1x128xf32>
    %c0_548 = arith.constant 0 : index
    %c0_549 = arith.constant 0 : index
    %c0_550 = arith.constant 0 : index
    %607 = vector.load %arg6[%c0_548, %c0_549, %c0_550] : memref<2x1x128xf32, #tpu.memory_space<vmem>>, vector<1x1x128xf32>
    %608 = vector.shape_cast %607 : vector<1x1x128xf32> to vector<1x128xf32>
    %609 = vector.shape_cast %606 : vector<1x128xf32> to vector<1x1x128xf32>
    tpu.vector_store %arg6[%c0_548, %c0_549, %c0_550], %609 {strides = array<i32>} : memref<2x1x128xf32, #tpu.memory_space<vmem>>, vector<1x1x128xf32>,
    %c1_551 = arith.constant 1 : index
    %c0_552 = arith.constant 0 : index
    %c0_553 = arith.constant 0 : index
    %610 = vector.load %arg1[%c1_551, %c0_552, %c0_553] : memref<2x196x16xbf16, #tpu.memory_space<vmem>>, vector<1x196x16xbf16>
    %611 = vector.shape_cast %610 : vector<1x196x16xbf16> to vector<196x16xbf16>
    %c0_554 = arith.constant 0 : index
    %c0_555 = arith.constant 0 : index
    %612 = vector.load %arg2[%c0_554, %c0_555] : memref<16x128xbf16, #tpu.memory_space<vmem>>, vector<16x128xbf16>
    %cst_556 = arith.constant dense<0.000000e+00> : vector<196x128xf32>
    %613 = tpu.matmul %611, %612, %cst_556 {dimension_numbers = #tpu.dot_dimension_numbers<[1], [0], [0], [1], [0, 0, 1, 1], [], []>} : vector<196x16xbf16>, vector<16x128xbf16>, vector<196x128xf32> -> vector<196x128xf32>
    %cst_557 = arith.constant 0.000000e+00 : f32
    %614 = vector.broadcast %cst_557 : f32 to vector<196x128xf32>
    %615 = arith.cmpf ogt, %613, %614 : vector<196x128xf32>
    %cst_558 = arith.constant 2.000000e-01 : f32
    %616 = vector.broadcast %cst_558 : f32 to vector<196x128xf32>
    %617 = arith.mulf %616, %613 : vector<196x128xf32>
    %618 = arith.select %615, %613, %617 : vector<196x128xi1>, vector<196x128xf32>
    %619 = vector.extract_strided_slice %618 {offsets = [0, 0], sizes = [14, 128], strides = [1, 1]} : vector<196x128xf32> to vector<14x128xf32>
    %c38_559 = arith.constant 38 : index
    %c0_560 = arith.constant 0 : index
    %620 = vector.load %arg7[%c38_559, %c0_560] : memref<324x128xf32, #tpu.memory_space<vmem>>, vector<14x128xf32>
    tpu.vector_store %arg7[%c38_559, %c0_560], %619 {strides = array<i32>} : memref<324x128xf32, #tpu.memory_space<vmem>>, vector<14x128xf32>,
    %621 = vector.extract_strided_slice %618 {offsets = [14, 0], sizes = [14, 128], strides = [1, 1]} : vector<196x128xf32> to vector<14x128xf32>
    %c56_561 = arith.constant 56 : index
    %c0_562 = arith.constant 0 : index
    %622 = vector.load %arg7[%c56_561, %c0_562] : memref<324x128xf32, #tpu.memory_space<vmem>>, vector<14x128xf32>
    tpu.vector_store %arg7[%c56_561, %c0_562], %621 {strides = array<i32>} : memref<324x128xf32, #tpu.memory_space<vmem>>, vector<14x128xf32>,
    %623 = vector.extract_strided_slice %618 {offsets = [28, 0], sizes = [14, 128], strides = [1, 1]} : vector<196x128xf32> to vector<14x128xf32>
    %c74_563 = arith.constant 74 : index
    %c0_564 = arith.constant 0 : index
    %624 = vector.load %arg7[%c74_563, %c0_564] : memref<324x128xf32, #tpu.memory_space<vmem>>, vector<14x128xf32>
    tpu.vector_store %arg7[%c74_563, %c0_564], %623 {strides = array<i32>} : memref<324x128xf32, #tpu.memory_space<vmem>>, vector<14x128xf32>,
    %625 = vector.extract_strided_slice %618 {offsets = [42, 0], sizes = [14, 128], strides = [1, 1]} : vector<196x128xf32> to vector<14x128xf32>
    %c92_565 = arith.constant 92 : index
    %c0_566 = arith.constant 0 : index
    %626 = vector.load %arg7[%c92_565, %c0_566] : memref<324x128xf32, #tpu.memory_space<vmem>>, vector<14x128xf32>
    tpu.vector_store %arg7[%c92_565, %c0_566], %625 {strides = array<i32>} : memref<324x128xf32, #tpu.memory_space<vmem>>, vector<14x128xf32>,
    %627 = vector.extract_strided_slice %618 {offsets = [56, 0], sizes = [14, 128], strides = [1, 1]} : vector<196x128xf32> to vector<14x128xf32>
    %c110_567 = arith.constant 110 : index
    %c0_568 = arith.constant 0 : index
    %628 = vector.load %arg7[%c110_567, %c0_568] : memref<324x128xf32, #tpu.memory_space<vmem>>, vector<14x128xf32>
    tpu.vector_store %arg7[%c110_567, %c0_568], %627 {strides = array<i32>} : memref<324x128xf32, #tpu.memory_space<vmem>>, vector<14x128xf32>,
    %629 = vector.extract_strided_slice %618 {offsets = [70, 0], sizes = [14, 128], strides = [1, 1]} : vector<196x128xf32> to vector<14x128xf32>
    %c128_569 = arith.constant 128 : index
    %c0_570 = arith.constant 0 : index
    %630 = vector.load %arg7[%c128_569, %c0_570] : memref<324x128xf32, #tpu.memory_space<vmem>>, vector<14x128xf32>
    tpu.vector_store %arg7[%c128_569, %c0_570], %629 {strides = array<i32>} : memref<324x128xf32, #tpu.memory_space<vmem>>, vector<14x128xf32>,
    %631 = vector.extract_strided_slice %618 {offsets = [84, 0], sizes = [14, 128], strides = [1, 1]} : vector<196x128xf32> to vector<14x128xf32>
    %c146_571 = arith.constant 146 : index
    %c0_572 = arith.constant 0 : index
    %632 = vector.load %arg7[%c146_571, %c0_572] : memref<324x128xf32, #tpu.memory_space<vmem>>, vector<14x128xf32>
    tpu.vector_store %arg7[%c146_571, %c0_572], %631 {strides = array<i32>} : memref<324x128xf32, #tpu.memory_space<vmem>>, vector<14x128xf32>,
    %633 = vector.extract_strided_slice %618 {offsets = [98, 0], sizes = [14, 128], strides = [1, 1]} : vector<196x128xf32> to vector<14x128xf32>
    %c164_573 = arith.constant 164 : index
    %c0_574 = arith.constant 0 : index
    %634 = vector.load %arg7[%c164_573, %c0_574] : memref<324x128xf32, #tpu.memory_space<vmem>>, vector<14x128xf32>
    tpu.vector_store %arg7[%c164_573, %c0_574], %633 {strides = array<i32>} : memref<324x128xf32, #tpu.memory_space<vmem>>, vector<14x128xf32>,
    %635 = vector.extract_strided_slice %618 {offsets = [112, 0], sizes = [14, 128], strides = [1, 1]} : vector<196x128xf32> to vector<14x128xf32>
    %c182_575 = arith.constant 182 : index
    %c0_576 = arith.constant 0 : index
    %636 = vector.load %arg7[%c182_575, %c0_576] : memref<324x128xf32, #tpu.memory_space<vmem>>, vector<14x128xf32>
    tpu.vector_store %arg7[%c182_575, %c0_576], %635 {strides = array<i32>} : memref<324x128xf32, #tpu.memory_space<vmem>>, vector<14x128xf32>,
    %637 = vector.extract_strided_slice %618 {offsets = [126, 0], sizes = [14, 128], strides = [1, 1]} : vector<196x128xf32> to vector<14x128xf32>
    %c200_577 = arith.constant 200 : index
    %c0_578 = arith.constant 0 : index
    %638 = vector.load %arg7[%c200_577, %c0_578] : memref<324x128xf32, #tpu.memory_space<vmem>>, vector<14x128xf32>
    tpu.vector_store %arg7[%c200_577, %c0_578], %637 {strides = array<i32>} : memref<324x128xf32, #tpu.memory_space<vmem>>, vector<14x128xf32>,
    %639 = vector.extract_strided_slice %618 {offsets = [140, 0], sizes = [14, 128], strides = [1, 1]} : vector<196x128xf32> to vector<14x128xf32>
    %c218_579 = arith.constant 218 : index
    %c0_580 = arith.constant 0 : index
    %640 = vector.load %arg7[%c218_579, %c0_580] : memref<324x128xf32, #tpu.memory_space<vmem>>, vector<14x128xf32>
    tpu.vector_store %arg7[%c218_579, %c0_580], %639 {strides = array<i32>} : memref<324x128xf32, #tpu.memory_space<vmem>>, vector<14x128xf32>,
    %641 = vector.extract_strided_slice %618 {offsets = [154, 0], sizes = [14, 128], strides = [1, 1]} : vector<196x128xf32> to vector<14x128xf32>
    %c236_581 = arith.constant 236 : index
    %c0_582 = arith.constant 0 : index
    %642 = vector.load %arg7[%c236_581, %c0_582] : memref<324x128xf32, #tpu.memory_space<vmem>>, vector<14x128xf32>
    tpu.vector_store %arg7[%c236_581, %c0_582], %641 {strides = array<i32>} : memref<324x128xf32, #tpu.memory_space<vmem>>, vector<14x128xf32>,
    %643 = vector.extract_strided_slice %618 {offsets = [168, 0], sizes = [14, 128], strides = [1, 1]} : vector<196x128xf32> to vector<14x128xf32>
    %c254_583 = arith.constant 254 : index
    %c0_584 = arith.constant 0 : index
    %644 = vector.load %arg7[%c254_583, %c0_584] : memref<324x128xf32, #tpu.memory_space<vmem>>, vector<14x128xf32>
    tpu.vector_store %arg7[%c254_583, %c0_584], %643 {strides = array<i32>} : memref<324x128xf32, #tpu.memory_space<vmem>>, vector<14x128xf32>,
    %645 = vector.extract_strided_slice %618 {offsets = [182, 0], sizes = [14, 128], strides = [1, 1]} : vector<196x128xf32> to vector<14x128xf32>
    %c272_585 = arith.constant 272 : index
    %c0_586 = arith.constant 0 : index
    %646 = vector.load %arg7[%c272_585, %c0_586] : memref<324x128xf32, #tpu.memory_space<vmem>>, vector<14x128xf32>
    tpu.vector_store %arg7[%c272_585, %c0_586], %645 {strides = array<i32>} : memref<324x128xf32, #tpu.memory_space<vmem>>, vector<14x128xf32>,
    %cst_587 = arith.constant 0.000000e+00 : f32
    %647 = vector.broadcast %cst_587 : f32 to vector<64x128xf32>
    %c0_588 = arith.constant 0 : index
    %c0_589 = arith.constant 0 : index
    %648 = tpu.strided_load %arg7[%c0_588, %c0_589] {strides = array<i32: 2, 1>} : memref<324x128xf32, #tpu.memory_space<vmem>>, vector<8x128xf32>
    %c36_590 = arith.constant 36 : index
    %c0_591 = arith.constant 0 : index
    %649 = tpu.strided_load %arg7[%c36_590, %c0_591] {strides = array<i32: 2, 1>} : memref<324x128xf32, #tpu.memory_space<vmem>>, vector<8x128xf32>
    %c72_592 = arith.constant 72 : index
    %c0_593 = arith.constant 0 : index
    %650 = tpu.strided_load %arg7[%c72_592, %c0_593] {strides = array<i32: 2, 1>} : memref<324x128xf32, #tpu.memory_space<vmem>>, vector<8x128xf32>
    %c108_594 = arith.constant 108 : index
    %c0_595 = arith.constant 0 : index
    %651 = tpu.strided_load %arg7[%c108_594, %c0_595] {strides = array<i32: 2, 1>} : memref<324x128xf32, #tpu.memory_space<vmem>>, vector<8x128xf32>
    %c144_596 = arith.constant 144 : index
    %c0_597 = arith.constant 0 : index
    %652 = tpu.strided_load %arg7[%c144_596, %c0_597] {strides = array<i32: 2, 1>} : memref<324x128xf32, #tpu.memory_space<vmem>>, vector<8x128xf32>
    %c180_598 = arith.constant 180 : index
    %c0_599 = arith.constant 0 : index
    %653 = tpu.strided_load %arg7[%c180_598, %c0_599] {strides = array<i32: 2, 1>} : memref<324x128xf32, #tpu.memory_space<vmem>>, vector<8x128xf32>
    %c216_600 = arith.constant 216 : index
    %c0_601 = arith.constant 0 : index
    %654 = tpu.strided_load %arg7[%c216_600, %c0_601] {strides = array<i32: 2, 1>} : memref<324x128xf32, #tpu.memory_space<vmem>>, vector<8x128xf32>
    %c252_602 = arith.constant 252 : index
    %c0_603 = arith.constant 0 : index
    %655 = tpu.strided_load %arg7[%c252_602, %c0_603] {strides = array<i32: 2, 1>} : memref<324x128xf32, #tpu.memory_space<vmem>>, vector<8x128xf32>
    %656 = tpu.concatenate %648, %649, %650, %651, %652, %653, %654, %655 in 0 : vector<8x128xf32>, vector<8x128xf32>, vector<8x128xf32>, vector<8x128xf32>, vector<8x128xf32>, vector<8x128xf32>, vector<8x128xf32>, vector<8x128xf32> -> vector<64x128xf32>
    %657 = vector.extract_strided_slice %656 {offsets = [0, 0], sizes = [64, 16], strides = [1, 1]} : vector<64x128xf32> to vector<64x16xf32>
    %658 = arith.truncf %657 : vector<64x16xf32> to vector<64x16xbf16>
    %c0_604 = arith.constant 0 : index
    %c0_605 = arith.constant 0 : index
    %659 = vector.load %arg3[%c0_604, %c0_605] : memref<256x128xbf16, #tpu.memory_space<vmem>>, vector<16x128xbf16>
    %cst_606 = arith.constant dense<0.000000e+00> : vector<64x128xf32>
    %660 = tpu.matmul %658, %659, %cst_606 {dimension_numbers = #tpu.dot_dimension_numbers<[1], [0], [0], [1], [0, 0, 1, 1], [], []>} : vector<64x16xbf16>, vector<16x128xbf16>, vector<64x128xf32> -> vector<64x128xf32>
    %661 = arith.addf %647, %660 : vector<64x128xf32>
    %c1_607 = arith.constant 1 : index
    %c0_608 = arith.constant 0 : index
    %662 = tpu.strided_load %arg7[%c1_607, %c0_608] {strides = array<i32: 2, 1>} : memref<324x128xf32, #tpu.memory_space<vmem>>, vector<8x128xf32>
    %c37_609 = arith.constant 37 : index
    %c0_610 = arith.constant 0 : index
    %663 = tpu.strided_load %arg7[%c37_609, %c0_610] {strides = array<i32: 2, 1>} : memref<324x128xf32, #tpu.memory_space<vmem>>, vector<8x128xf32>
    %c73_611 = arith.constant 73 : index
    %c0_612 = arith.constant 0 : index
    %664 = tpu.strided_load %arg7[%c73_611, %c0_612] {strides = array<i32: 2, 1>} : memref<324x128xf32, #tpu.memory_space<vmem>>, vector<8x128xf32>
    %c109_613 = arith.constant 109 : index
    %c0_614 = arith.constant 0 : index
    %665 = tpu.strided_load %arg7[%c109_613, %c0_614] {strides = array<i32: 2, 1>} : memref<324x128xf32, #tpu.memory_space<vmem>>, vector<8x128xf32>
    %c145_615 = arith.constant 145 : index
    %c0_616 = arith.constant 0 : index
    %666 = tpu.strided_load %arg7[%c145_615, %c0_616] {strides = array<i32: 2, 1>} : memref<324x128xf32, #tpu.memory_space<vmem>>, vector<8x128xf32>
    %c181_617 = arith.constant 181 : index
    %c0_618 = arith.constant 0 : index
    %667 = tpu.strided_load %arg7[%c181_617, %c0_618] {strides = array<i32: 2, 1>} : memref<324x128xf32, #tpu.memory_space<vmem>>, vector<8x128xf32>
    %c217_619 = arith.constant 217 : index
    %c0_620 = arith.constant 0 : index
    %668 = tpu.strided_load %arg7[%c217_619, %c0_620] {strides = array<i32: 2, 1>} : memref<324x128xf32, #tpu.memory_space<vmem>>, vector<8x128xf32>
    %c253_621 = arith.constant 253 : index
    %c0_622 = arith.constant 0 : index
    %669 = tpu.strided_load %arg7[%c253_621, %c0_622] {strides = array<i32: 2, 1>} : memref<324x128xf32, #tpu.memory_space<vmem>>, vector<8x128xf32>
    %670 = tpu.concatenate %662, %663, %664, %665, %666, %667, %668, %669 in 0 : vector<8x128xf32>, vector<8x128xf32>, vector<8x128xf32>, vector<8x128xf32>, vector<8x128xf32>, vector<8x128xf32>, vector<8x128xf32>, vector<8x128xf32> -> vector<64x128xf32>
    %671 = vector.extract_strided_slice %670 {offsets = [0, 0], sizes = [64, 16], strides = [1, 1]} : vector<64x128xf32> to vector<64x16xf32>
    %672 = arith.truncf %671 : vector<64x16xf32> to vector<64x16xbf16>
    %c16_623 = arith.constant 16 : index
    %c0_624 = arith.constant 0 : index
    %673 = vector.load %arg3[%c16_623, %c0_624] : memref<256x128xbf16, #tpu.memory_space<vmem>>, vector<16x128xbf16>
    %cst_625 = arith.constant dense<0.000000e+00> : vector<64x128xf32>
    %674 = tpu.matmul %672, %673, %cst_625 {dimension_numbers = #tpu.dot_dimension_numbers<[1], [0], [0], [1], [0, 0, 1, 1], [], []>} : vector<64x16xbf16>, vector<16x128xbf16>, vector<64x128xf32> -> vector<64x128xf32>
    %675 = arith.addf %661, %674 : vector<64x128xf32>
    %c2_626 = arith.constant 2 : index
    %c0_627 = arith.constant 0 : index
    %676 = tpu.strided_load %arg7[%c2_626, %c0_627] {strides = array<i32: 2, 1>} : memref<324x128xf32, #tpu.memory_space<vmem>>, vector<8x128xf32>
    %c38_628 = arith.constant 38 : index
    %c0_629 = arith.constant 0 : index
    %677 = tpu.strided_load %arg7[%c38_628, %c0_629] {strides = array<i32: 2, 1>} : memref<324x128xf32, #tpu.memory_space<vmem>>, vector<8x128xf32>
    %c74_630 = arith.constant 74 : index
    %c0_631 = arith.constant 0 : index
    %678 = tpu.strided_load %arg7[%c74_630, %c0_631] {strides = array<i32: 2, 1>} : memref<324x128xf32, #tpu.memory_space<vmem>>, vector<8x128xf32>
    %c110_632 = arith.constant 110 : index
    %c0_633 = arith.constant 0 : index
    %679 = tpu.strided_load %arg7[%c110_632, %c0_633] {strides = array<i32: 2, 1>} : memref<324x128xf32, #tpu.memory_space<vmem>>, vector<8x128xf32>
    %c146_634 = arith.constant 146 : index
    %c0_635 = arith.constant 0 : index
    %680 = tpu.strided_load %arg7[%c146_634, %c0_635] {strides = array<i32: 2, 1>} : memref<324x128xf32, #tpu.memory_space<vmem>>, vector<8x128xf32>
    %c182_636 = arith.constant 182 : index
    %c0_637 = arith.constant 0 : index
    %681 = tpu.strided_load %arg7[%c182_636, %c0_637] {strides = array<i32: 2, 1>} : memref<324x128xf32, #tpu.memory_space<vmem>>, vector<8x128xf32>
    %c218_638 = arith.constant 218 : index
    %c0_639 = arith.constant 0 : index
    %682 = tpu.strided_load %arg7[%c218_638, %c0_639] {strides = array<i32: 2, 1>} : memref<324x128xf32, #tpu.memory_space<vmem>>, vector<8x128xf32>
    %c254_640 = arith.constant 254 : index
    %c0_641 = arith.constant 0 : index
    %683 = tpu.strided_load %arg7[%c254_640, %c0_641] {strides = array<i32: 2, 1>} : memref<324x128xf32, #tpu.memory_space<vmem>>, vector<8x128xf32>
    %684 = tpu.concatenate %676, %677, %678, %679, %680, %681, %682, %683 in 0 : vector<8x128xf32>, vector<8x128xf32>, vector<8x128xf32>, vector<8x128xf32>, vector<8x128xf32>, vector<8x128xf32>, vector<8x128xf32>, vector<8x128xf32> -> vector<64x128xf32>
    %685 = vector.extract_strided_slice %684 {offsets = [0, 0], sizes = [64, 16], strides = [1, 1]} : vector<64x128xf32> to vector<64x16xf32>
    %686 = arith.truncf %685 : vector<64x16xf32> to vector<64x16xbf16>
    %c32_642 = arith.constant 32 : index
    %c0_643 = arith.constant 0 : index
    %687 = vector.load %arg3[%c32_642, %c0_643] : memref<256x128xbf16, #tpu.memory_space<vmem>>, vector<16x128xbf16>
    %cst_644 = arith.constant dense<0.000000e+00> : vector<64x128xf32>
    %688 = tpu.matmul %686, %687, %cst_644 {dimension_numbers = #tpu.dot_dimension_numbers<[1], [0], [0], [1], [0, 0, 1, 1], [], []>} : vector<64x16xbf16>, vector<16x128xbf16>, vector<64x128xf32> -> vector<64x128xf32>
    %689 = arith.addf %675, %688 : vector<64x128xf32>
    %c3_645 = arith.constant 3 : index
    %c0_646 = arith.constant 0 : index
    %690 = tpu.strided_load %arg7[%c3_645, %c0_646] {strides = array<i32: 2, 1>} : memref<324x128xf32, #tpu.memory_space<vmem>>, vector<8x128xf32>
    %c39_647 = arith.constant 39 : index
    %c0_648 = arith.constant 0 : index
    %691 = tpu.strided_load %arg7[%c39_647, %c0_648] {strides = array<i32: 2, 1>} : memref<324x128xf32, #tpu.memory_space<vmem>>, vector<8x128xf32>
    %c75_649 = arith.constant 75 : index
    %c0_650 = arith.constant 0 : index
    %692 = tpu.strided_load %arg7[%c75_649, %c0_650] {strides = array<i32: 2, 1>} : memref<324x128xf32, #tpu.memory_space<vmem>>, vector<8x128xf32>
    %c111_651 = arith.constant 111 : index
    %c0_652 = arith.constant 0 : index
    %693 = tpu.strided_load %arg7[%c111_651, %c0_652] {strides = array<i32: 2, 1>} : memref<324x128xf32, #tpu.memory_space<vmem>>, vector<8x128xf32>
    %c147_653 = arith.constant 147 : index
    %c0_654 = arith.constant 0 : index
    %694 = tpu.strided_load %arg7[%c147_653, %c0_654] {strides = array<i32: 2, 1>} : memref<324x128xf32, #tpu.memory_space<vmem>>, vector<8x128xf32>
    %c183_655 = arith.constant 183 : index
    %c0_656 = arith.constant 0 : index
    %695 = tpu.strided_load %arg7[%c183_655, %c0_656] {strides = array<i32: 2, 1>} : memref<324x128xf32, #tpu.memory_space<vmem>>, vector<8x128xf32>
    %c219_657 = arith.constant 219 : index
    %c0_658 = arith.constant 0 : index
    %696 = tpu.strided_load %arg7[%c219_657, %c0_658] {strides = array<i32: 2, 1>} : memref<324x128xf32, #tpu.memory_space<vmem>>, vector<8x128xf32>
    %c255_659 = arith.constant 255 : index
    %c0_660 = arith.constant 0 : index
    %697 = tpu.strided_load %arg7[%c255_659, %c0_660] {strides = array<i32: 2, 1>} : memref<324x128xf32, #tpu.memory_space<vmem>>, vector<8x128xf32>
    %698 = tpu.concatenate %690, %691, %692, %693, %694, %695, %696, %697 in 0 : vector<8x128xf32>, vector<8x128xf32>, vector<8x128xf32>, vector<8x128xf32>, vector<8x128xf32>, vector<8x128xf32>, vector<8x128xf32>, vector<8x128xf32> -> vector<64x128xf32>
    %699 = vector.extract_strided_slice %698 {offsets = [0, 0], sizes = [64, 16], strides = [1, 1]} : vector<64x128xf32> to vector<64x16xf32>
    %700 = arith.truncf %699 : vector<64x16xf32> to vector<64x16xbf16>
    %c48_661 = arith.constant 48 : index
    %c0_662 = arith.constant 0 : index
    %701 = vector.load %arg3[%c48_661, %c0_662] : memref<256x128xbf16, #tpu.memory_space<vmem>>, vector<16x128xbf16>
    %cst_663 = arith.constant dense<0.000000e+00> : vector<64x128xf32>
    %702 = tpu.matmul %700, %701, %cst_663 {dimension_numbers = #tpu.dot_dimension_numbers<[1], [0], [0], [1], [0, 0, 1, 1], [], []>} : vector<64x16xbf16>, vector<16x128xbf16>, vector<64x128xf32> -> vector<64x128xf32>
    %703 = arith.addf %689, %702 : vector<64x128xf32>
    %c18_664 = arith.constant 18 : index
    %c0_665 = arith.constant 0 : index
    %704 = tpu.strided_load %arg7[%c18_664, %c0_665] {strides = array<i32: 2, 1>} : memref<324x128xf32, #tpu.memory_space<vmem>>, vector<8x128xf32>
    %c54_666 = arith.constant 54 : index
    %c0_667 = arith.constant 0 : index
    %705 = tpu.strided_load %arg7[%c54_666, %c0_667] {strides = array<i32: 2, 1>} : memref<324x128xf32, #tpu.memory_space<vmem>>, vector<8x128xf32>
    %c90_668 = arith.constant 90 : index
    %c0_669 = arith.constant 0 : index
    %706 = tpu.strided_load %arg7[%c90_668, %c0_669] {strides = array<i32: 2, 1>} : memref<324x128xf32, #tpu.memory_space<vmem>>, vector<8x128xf32>
    %c126_670 = arith.constant 126 : index
    %c0_671 = arith.constant 0 : index
    %707 = tpu.strided_load %arg7[%c126_670, %c0_671] {strides = array<i32: 2, 1>} : memref<324x128xf32, #tpu.memory_space<vmem>>, vector<8x128xf32>
    %c162_672 = arith.constant 162 : index
    %c0_673 = arith.constant 0 : index
    %708 = tpu.strided_load %arg7[%c162_672, %c0_673] {strides = array<i32: 2, 1>} : memref<324x128xf32, #tpu.memory_space<vmem>>, vector<8x128xf32>
    %c198_674 = arith.constant 198 : index
    %c0_675 = arith.constant 0 : index
    %709 = tpu.strided_load %arg7[%c198_674, %c0_675] {strides = array<i32: 2, 1>} : memref<324x128xf32, #tpu.memory_space<vmem>>, vector<8x128xf32>
    %c234_676 = arith.constant 234 : index
    %c0_677 = arith.constant 0 : index
    %710 = tpu.strided_load %arg7[%c234_676, %c0_677] {strides = array<i32: 2, 1>} : memref<324x128xf32, #tpu.memory_space<vmem>>, vector<8x128xf32>
    %c270_678 = arith.constant 270 : index
    %c0_679 = arith.constant 0 : index
    %711 = tpu.strided_load %arg7[%c270_678, %c0_679] {strides = array<i32: 2, 1>} : memref<324x128xf32, #tpu.memory_space<vmem>>, vector<8x128xf32>
    %712 = tpu.concatenate %704, %705, %706, %707, %708, %709, %710, %711 in 0 : vector<8x128xf32>, vector<8x128xf32>, vector<8x128xf32>, vector<8x128xf32>, vector<8x128xf32>, vector<8x128xf32>, vector<8x128xf32>, vector<8x128xf32> -> vector<64x128xf32>
    %713 = vector.extract_strided_slice %712 {offsets = [0, 0], sizes = [64, 16], strides = [1, 1]} : vector<64x128xf32> to vector<64x16xf32>
    %714 = arith.truncf %713 : vector<64x16xf32> to vector<64x16xbf16>
    %c64_680 = arith.constant 64 : index
    %c0_681 = arith.constant 0 : index
    %715 = vector.load %arg3[%c64_680, %c0_681] : memref<256x128xbf16, #tpu.memory_space<vmem>>, vector<16x128xbf16>
    %cst_682 = arith.constant dense<0.000000e+00> : vector<64x128xf32>
    %716 = tpu.matmul %714, %715, %cst_682 {dimension_numbers = #tpu.dot_dimension_numbers<[1], [0], [0], [1], [0, 0, 1, 1], [], []>} : vector<64x16xbf16>, vector<16x128xbf16>, vector<64x128xf32> -> vector<64x128xf32>
    %717 = arith.addf %703, %716 : vector<64x128xf32>
    %c19_683 = arith.constant 19 : index
    %c0_684 = arith.constant 0 : index
    %718 = tpu.strided_load %arg7[%c19_683, %c0_684] {strides = array<i32: 2, 1>} : memref<324x128xf32, #tpu.memory_space<vmem>>, vector<8x128xf32>
    %c55_685 = arith.constant 55 : index
    %c0_686 = arith.constant 0 : index
    %719 = tpu.strided_load %arg7[%c55_685, %c0_686] {strides = array<i32: 2, 1>} : memref<324x128xf32, #tpu.memory_space<vmem>>, vector<8x128xf32>
    %c91_687 = arith.constant 91 : index
    %c0_688 = arith.constant 0 : index
    %720 = tpu.strided_load %arg7[%c91_687, %c0_688] {strides = array<i32: 2, 1>} : memref<324x128xf32, #tpu.memory_space<vmem>>, vector<8x128xf32>
    %c127_689 = arith.constant 127 : index
    %c0_690 = arith.constant 0 : index
    %721 = tpu.strided_load %arg7[%c127_689, %c0_690] {strides = array<i32: 2, 1>} : memref<324x128xf32, #tpu.memory_space<vmem>>, vector<8x128xf32>
    %c163_691 = arith.constant 163 : index
    %c0_692 = arith.constant 0 : index
    %722 = tpu.strided_load %arg7[%c163_691, %c0_692] {strides = array<i32: 2, 1>} : memref<324x128xf32, #tpu.memory_space<vmem>>, vector<8x128xf32>
    %c199_693 = arith.constant 199 : index
    %c0_694 = arith.constant 0 : index
    %723 = tpu.strided_load %arg7[%c199_693, %c0_694] {strides = array<i32: 2, 1>} : memref<324x128xf32, #tpu.memory_space<vmem>>, vector<8x128xf32>
    %c235_695 = arith.constant 235 : index
    %c0_696 = arith.constant 0 : index
    %724 = tpu.strided_load %arg7[%c235_695, %c0_696] {strides = array<i32: 2, 1>} : memref<324x128xf32, #tpu.memory_space<vmem>>, vector<8x128xf32>
    %c271_697 = arith.constant 271 : index
    %c0_698 = arith.constant 0 : index
    %725 = tpu.strided_load %arg7[%c271_697, %c0_698] {strides = array<i32: 2, 1>} : memref<324x128xf32, #tpu.memory_space<vmem>>, vector<8x128xf32>
    %726 = tpu.concatenate %718, %719, %720, %721, %722, %723, %724, %725 in 0 : vector<8x128xf32>, vector<8x128xf32>, vector<8x128xf32>, vector<8x128xf32>, vector<8x128xf32>, vector<8x128xf32>, vector<8x128xf32>, vector<8x128xf32> -> vector<64x128xf32>
    %727 = vector.extract_strided_slice %726 {offsets = [0, 0], sizes = [64, 16], strides = [1, 1]} : vector<64x128xf32> to vector<64x16xf32>
    %728 = arith.truncf %727 : vector<64x16xf32> to vector<64x16xbf16>
    %c80_699 = arith.constant 80 : index
    %c0_700 = arith.constant 0 : index
    %729 = vector.load %arg3[%c80_699, %c0_700] : memref<256x128xbf16, #tpu.memory_space<vmem>>, vector<16x128xbf16>
    %cst_701 = arith.constant dense<0.000000e+00> : vector<64x128xf32>
    %730 = tpu.matmul %728, %729, %cst_701 {dimension_numbers = #tpu.dot_dimension_numbers<[1], [0], [0], [1], [0, 0, 1, 1], [], []>} : vector<64x16xbf16>, vector<16x128xbf16>, vector<64x128xf32> -> vector<64x128xf32>
    %731 = arith.addf %717, %730 : vector<64x128xf32>
    %c20_702 = arith.constant 20 : index
    %c0_703 = arith.constant 0 : index
    %732 = tpu.strided_load %arg7[%c20_702, %c0_703] {strides = array<i32: 2, 1>} : memref<324x128xf32, #tpu.memory_space<vmem>>, vector<8x128xf32>
    %c56_704 = arith.constant 56 : index
    %c0_705 = arith.constant 0 : index
    %733 = tpu.strided_load %arg7[%c56_704, %c0_705] {strides = array<i32: 2, 1>} : memref<324x128xf32, #tpu.memory_space<vmem>>, vector<8x128xf32>
    %c92_706 = arith.constant 92 : index
    %c0_707 = arith.constant 0 : index
    %734 = tpu.strided_load %arg7[%c92_706, %c0_707] {strides = array<i32: 2, 1>} : memref<324x128xf32, #tpu.memory_space<vmem>>, vector<8x128xf32>
    %c128_708 = arith.constant 128 : index
    %c0_709 = arith.constant 0 : index
    %735 = tpu.strided_load %arg7[%c128_708, %c0_709] {strides = array<i32: 2, 1>} : memref<324x128xf32, #tpu.memory_space<vmem>>, vector<8x128xf32>
    %c164_710 = arith.constant 164 : index
    %c0_711 = arith.constant 0 : index
    %736 = tpu.strided_load %arg7[%c164_710, %c0_711] {strides = array<i32: 2, 1>} : memref<324x128xf32, #tpu.memory_space<vmem>>, vector<8x128xf32>
    %c200_712 = arith.constant 200 : index
    %c0_713 = arith.constant 0 : index
    %737 = tpu.strided_load %arg7[%c200_712, %c0_713] {strides = array<i32: 2, 1>} : memref<324x128xf32, #tpu.memory_space<vmem>>, vector<8x128xf32>
    %c236_714 = arith.constant 236 : index
    %c0_715 = arith.constant 0 : index
    %738 = tpu.strided_load %arg7[%c236_714, %c0_715] {strides = array<i32: 2, 1>} : memref<324x128xf32, #tpu.memory_space<vmem>>, vector<8x128xf32>
    %c272_716 = arith.constant 272 : index
    %c0_717 = arith.constant 0 : index
    %739 = tpu.strided_load %arg7[%c272_716, %c0_717] {strides = array<i32: 2, 1>} : memref<324x128xf32, #tpu.memory_space<vmem>>, vector<8x128xf32>
    %740 = tpu.concatenate %732, %733, %734, %735, %736, %737, %738, %739 in 0 : vector<8x128xf32>, vector<8x128xf32>, vector<8x128xf32>, vector<8x128xf32>, vector<8x128xf32>, vector<8x128xf32>, vector<8x128xf32>, vector<8x128xf32> -> vector<64x128xf32>
    %741 = vector.extract_strided_slice %740 {offsets = [0, 0], sizes = [64, 16], strides = [1, 1]} : vector<64x128xf32> to vector<64x16xf32>
    %742 = arith.truncf %741 : vector<64x16xf32> to vector<64x16xbf16>
    %c96_718 = arith.constant 96 : index
    %c0_719 = arith.constant 0 : index
    %743 = vector.load %arg3[%c96_718, %c0_719] : memref<256x128xbf16, #tpu.memory_space<vmem>>, vector<16x128xbf16>
    %cst_720 = arith.constant dense<0.000000e+00> : vector<64x128xf32>
    %744 = tpu.matmul %742, %743, %cst_720 {dimension_numbers = #tpu.dot_dimension_numbers<[1], [0], [0], [1], [0, 0, 1, 1], [], []>} : vector<64x16xbf16>, vector<16x128xbf16>, vector<64x128xf32> -> vector<64x128xf32>
    %745 = arith.addf %731, %744 : vector<64x128xf32>
    %c21_721 = arith.constant 21 : index
    %c0_722 = arith.constant 0 : index
    %746 = tpu.strided_load %arg7[%c21_721, %c0_722] {strides = array<i32: 2, 1>} : memref<324x128xf32, #tpu.memory_space<vmem>>, vector<8x128xf32>
    %c57_723 = arith.constant 57 : index
    %c0_724 = arith.constant 0 : index
    %747 = tpu.strided_load %arg7[%c57_723, %c0_724] {strides = array<i32: 2, 1>} : memref<324x128xf32, #tpu.memory_space<vmem>>, vector<8x128xf32>
    %c93_725 = arith.constant 93 : index
    %c0_726 = arith.constant 0 : index
    %748 = tpu.strided_load %arg7[%c93_725, %c0_726] {strides = array<i32: 2, 1>} : memref<324x128xf32, #tpu.memory_space<vmem>>, vector<8x128xf32>
    %c129_727 = arith.constant 129 : index
    %c0_728 = arith.constant 0 : index
    %749 = tpu.strided_load %arg7[%c129_727, %c0_728] {strides = array<i32: 2, 1>} : memref<324x128xf32, #tpu.memory_space<vmem>>, vector<8x128xf32>
    %c165_729 = arith.constant 165 : index
    %c0_730 = arith.constant 0 : index
    %750 = tpu.strided_load %arg7[%c165_729, %c0_730] {strides = array<i32: 2, 1>} : memref<324x128xf32, #tpu.memory_space<vmem>>, vector<8x128xf32>
    %c201_731 = arith.constant 201 : index
    %c0_732 = arith.constant 0 : index
    %751 = tpu.strided_load %arg7[%c201_731, %c0_732] {strides = array<i32: 2, 1>} : memref<324x128xf32, #tpu.memory_space<vmem>>, vector<8x128xf32>
    %c237_733 = arith.constant 237 : index
    %c0_734 = arith.constant 0 : index
    %752 = tpu.strided_load %arg7[%c237_733, %c0_734] {strides = array<i32: 2, 1>} : memref<324x128xf32, #tpu.memory_space<vmem>>, vector<8x128xf32>
    %c273_735 = arith.constant 273 : index
    %c0_736 = arith.constant 0 : index
    %753 = tpu.strided_load %arg7[%c273_735, %c0_736] {strides = array<i32: 2, 1>} : memref<324x128xf32, #tpu.memory_space<vmem>>, vector<8x128xf32>
    %754 = tpu.concatenate %746, %747, %748, %749, %750, %751, %752, %753 in 0 : vector<8x128xf32>, vector<8x128xf32>, vector<8x128xf32>, vector<8x128xf32>, vector<8x128xf32>, vector<8x128xf32>, vector<8x128xf32>, vector<8x128xf32> -> vector<64x128xf32>
    %755 = vector.extract_strided_slice %754 {offsets = [0, 0], sizes = [64, 16], strides = [1, 1]} : vector<64x128xf32> to vector<64x16xf32>
    %756 = arith.truncf %755 : vector<64x16xf32> to vector<64x16xbf16>
    %c112_737 = arith.constant 112 : index
    %c0_738 = arith.constant 0 : index
    %757 = vector.load %arg3[%c112_737, %c0_738] : memref<256x128xbf16, #tpu.memory_space<vmem>>, vector<16x128xbf16>
    %cst_739 = arith.constant dense<0.000000e+00> : vector<64x128xf32>
    %758 = tpu.matmul %756, %757, %cst_739 {dimension_numbers = #tpu.dot_dimension_numbers<[1], [0], [0], [1], [0, 0, 1, 1], [], []>} : vector<64x16xbf16>, vector<16x128xbf16>, vector<64x128xf32> -> vector<64x128xf32>
    %759 = arith.addf %745, %758 : vector<64x128xf32>
    %c36_740 = arith.constant 36 : index
    %c0_741 = arith.constant 0 : index
    %760 = tpu.strided_load %arg7[%c36_740, %c0_741] {strides = array<i32: 2, 1>} : memref<324x128xf32, #tpu.memory_space<vmem>>, vector<8x128xf32>
    %c72_742 = arith.constant 72 : index
    %c0_743 = arith.constant 0 : index
    %761 = tpu.strided_load %arg7[%c72_742, %c0_743] {strides = array<i32: 2, 1>} : memref<324x128xf32, #tpu.memory_space<vmem>>, vector<8x128xf32>
    %c108_744 = arith.constant 108 : index
    %c0_745 = arith.constant 0 : index
    %762 = tpu.strided_load %arg7[%c108_744, %c0_745] {strides = array<i32: 2, 1>} : memref<324x128xf32, #tpu.memory_space<vmem>>, vector<8x128xf32>
    %c144_746 = arith.constant 144 : index
    %c0_747 = arith.constant 0 : index
    %763 = tpu.strided_load %arg7[%c144_746, %c0_747] {strides = array<i32: 2, 1>} : memref<324x128xf32, #tpu.memory_space<vmem>>, vector<8x128xf32>
    %c180_748 = arith.constant 180 : index
    %c0_749 = arith.constant 0 : index
    %764 = tpu.strided_load %arg7[%c180_748, %c0_749] {strides = array<i32: 2, 1>} : memref<324x128xf32, #tpu.memory_space<vmem>>, vector<8x128xf32>
    %c216_750 = arith.constant 216 : index
    %c0_751 = arith.constant 0 : index
    %765 = tpu.strided_load %arg7[%c216_750, %c0_751] {strides = array<i32: 2, 1>} : memref<324x128xf32, #tpu.memory_space<vmem>>, vector<8x128xf32>
    %c252_752 = arith.constant 252 : index
    %c0_753 = arith.constant 0 : index
    %766 = tpu.strided_load %arg7[%c252_752, %c0_753] {strides = array<i32: 2, 1>} : memref<324x128xf32, #tpu.memory_space<vmem>>, vector<8x128xf32>
    %c288_754 = arith.constant 288 : index
    %c0_755 = arith.constant 0 : index
    %767 = tpu.strided_load %arg7[%c288_754, %c0_755] {strides = array<i32: 2, 1>} : memref<324x128xf32, #tpu.memory_space<vmem>>, vector<8x128xf32>
    %768 = tpu.concatenate %760, %761, %762, %763, %764, %765, %766, %767 in 0 : vector<8x128xf32>, vector<8x128xf32>, vector<8x128xf32>, vector<8x128xf32>, vector<8x128xf32>, vector<8x128xf32>, vector<8x128xf32>, vector<8x128xf32> -> vector<64x128xf32>
    %769 = vector.extract_strided_slice %768 {offsets = [0, 0], sizes = [64, 16], strides = [1, 1]} : vector<64x128xf32> to vector<64x16xf32>
    %770 = arith.truncf %769 : vector<64x16xf32> to vector<64x16xbf16>
    %c128_756 = arith.constant 128 : index
    %c0_757 = arith.constant 0 : index
    %771 = vector.load %arg3[%c128_756, %c0_757] : memref<256x128xbf16, #tpu.memory_space<vmem>>, vector<16x128xbf16>
    %cst_758 = arith.constant dense<0.000000e+00> : vector<64x128xf32>
    %772 = tpu.matmul %770, %771, %cst_758 {dimension_numbers = #tpu.dot_dimension_numbers<[1], [0], [0], [1], [0, 0, 1, 1], [], []>} : vector<64x16xbf16>, vector<16x128xbf16>, vector<64x128xf32> -> vector<64x128xf32>
    %773 = arith.addf %759, %772 : vector<64x128xf32>
    %c37_759 = arith.constant 37 : index
    %c0_760 = arith.constant 0 : index
    %774 = tpu.strided_load %arg7[%c37_759, %c0_760] {strides = array<i32: 2, 1>} : memref<324x128xf32, #tpu.memory_space<vmem>>, vector<8x128xf32>
    %c73_761 = arith.constant 73 : index
    %c0_762 = arith.constant 0 : index
    %775 = tpu.strided_load %arg7[%c73_761, %c0_762] {strides = array<i32: 2, 1>} : memref<324x128xf32, #tpu.memory_space<vmem>>, vector<8x128xf32>
    %c109_763 = arith.constant 109 : index
    %c0_764 = arith.constant 0 : index
    %776 = tpu.strided_load %arg7[%c109_763, %c0_764] {strides = array<i32: 2, 1>} : memref<324x128xf32, #tpu.memory_space<vmem>>, vector<8x128xf32>
    %c145_765 = arith.constant 145 : index
    %c0_766 = arith.constant 0 : index
    %777 = tpu.strided_load %arg7[%c145_765, %c0_766] {strides = array<i32: 2, 1>} : memref<324x128xf32, #tpu.memory_space<vmem>>, vector<8x128xf32>
    %c181_767 = arith.constant 181 : index
    %c0_768 = arith.constant 0 : index
    %778 = tpu.strided_load %arg7[%c181_767, %c0_768] {strides = array<i32: 2, 1>} : memref<324x128xf32, #tpu.memory_space<vmem>>, vector<8x128xf32>
    %c217_769 = arith.constant 217 : index
    %c0_770 = arith.constant 0 : index
    %779 = tpu.strided_load %arg7[%c217_769, %c0_770] {strides = array<i32: 2, 1>} : memref<324x128xf32, #tpu.memory_space<vmem>>, vector<8x128xf32>
    %c253_771 = arith.constant 253 : index
    %c0_772 = arith.constant 0 : index
    %780 = tpu.strided_load %arg7[%c253_771, %c0_772] {strides = array<i32: 2, 1>} : memref<324x128xf32, #tpu.memory_space<vmem>>, vector<8x128xf32>
    %c289_773 = arith.constant 289 : index
    %c0_774 = arith.constant 0 : index
    %781 = tpu.strided_load %arg7[%c289_773, %c0_774] {strides = array<i32: 2, 1>} : memref<324x128xf32, #tpu.memory_space<vmem>>, vector<8x128xf32>
    %782 = tpu.concatenate %774, %775, %776, %777, %778, %779, %780, %781 in 0 : vector<8x128xf32>, vector<8x128xf32>, vector<8x128xf32>, vector<8x128xf32>, vector<8x128xf32>, vector<8x128xf32>, vector<8x128xf32>, vector<8x128xf32> -> vector<64x128xf32>
    %783 = vector.extract_strided_slice %782 {offsets = [0, 0], sizes = [64, 16], strides = [1, 1]} : vector<64x128xf32> to vector<64x16xf32>
    %784 = arith.truncf %783 : vector<64x16xf32> to vector<64x16xbf16>
    %c144_775 = arith.constant 144 : index
    %c0_776 = arith.constant 0 : index
    %785 = vector.load %arg3[%c144_775, %c0_776] : memref<256x128xbf16, #tpu.memory_space<vmem>>, vector<16x128xbf16>
    %cst_777 = arith.constant dense<0.000000e+00> : vector<64x128xf32>
    %786 = tpu.matmul %784, %785, %cst_777 {dimension_numbers = #tpu.dot_dimension_numbers<[1], [0], [0], [1], [0, 0, 1, 1], [], []>} : vector<64x16xbf16>, vector<16x128xbf16>, vector<64x128xf32> -> vector<64x128xf32>
    %787 = arith.addf %773, %786 : vector<64x128xf32>
    %c38_778 = arith.constant 38 : index
    %c0_779 = arith.constant 0 : index
    %788 = tpu.strided_load %arg7[%c38_778, %c0_779] {strides = array<i32: 2, 1>} : memref<324x128xf32, #tpu.memory_space<vmem>>, vector<8x128xf32>
    %c74_780 = arith.constant 74 : index
    %c0_781 = arith.constant 0 : index
    %789 = tpu.strided_load %arg7[%c74_780, %c0_781] {strides = array<i32: 2, 1>} : memref<324x128xf32, #tpu.memory_space<vmem>>, vector<8x128xf32>
    %c110_782 = arith.constant 110 : index
    %c0_783 = arith.constant 0 : index
    %790 = tpu.strided_load %arg7[%c110_782, %c0_783] {strides = array<i32: 2, 1>} : memref<324x128xf32, #tpu.memory_space<vmem>>, vector<8x128xf32>
    %c146_784 = arith.constant 146 : index
    %c0_785 = arith.constant 0 : index
    %791 = tpu.strided_load %arg7[%c146_784, %c0_785] {strides = array<i32: 2, 1>} : memref<324x128xf32, #tpu.memory_space<vmem>>, vector<8x128xf32>
    %c182_786 = arith.constant 182 : index
    %c0_787 = arith.constant 0 : index
    %792 = tpu.strided_load %arg7[%c182_786, %c0_787] {strides = array<i32: 2, 1>} : memref<324x128xf32, #tpu.memory_space<vmem>>, vector<8x128xf32>
    %c218_788 = arith.constant 218 : index
    %c0_789 = arith.constant 0 : index
    %793 = tpu.strided_load %arg7[%c218_788, %c0_789] {strides = array<i32: 2, 1>} : memref<324x128xf32, #tpu.memory_space<vmem>>, vector<8x128xf32>
    %c254_790 = arith.constant 254 : index
    %c0_791 = arith.constant 0 : index
    %794 = tpu.strided_load %arg7[%c254_790, %c0_791] {strides = array<i32: 2, 1>} : memref<324x128xf32, #tpu.memory_space<vmem>>, vector<8x128xf32>
    %c290_792 = arith.constant 290 : index
    %c0_793 = arith.constant 0 : index
    %795 = tpu.strided_load %arg7[%c290_792, %c0_793] {strides = array<i32: 2, 1>} : memref<324x128xf32, #tpu.memory_space<vmem>>, vector<8x128xf32>
    %796 = tpu.concatenate %788, %789, %790, %791, %792, %793, %794, %795 in 0 : vector<8x128xf32>, vector<8x128xf32>, vector<8x128xf32>, vector<8x128xf32>, vector<8x128xf32>, vector<8x128xf32>, vector<8x128xf32>, vector<8x128xf32> -> vector<64x128xf32>
    %797 = vector.extract_strided_slice %796 {offsets = [0, 0], sizes = [64, 16], strides = [1, 1]} : vector<64x128xf32> to vector<64x16xf32>
    %798 = arith.truncf %797 : vector<64x16xf32> to vector<64x16xbf16>
    %c160_794 = arith.constant 160 : index
    %c0_795 = arith.constant 0 : index
    %799 = vector.load %arg3[%c160_794, %c0_795] : memref<256x128xbf16, #tpu.memory_space<vmem>>, vector<16x128xbf16>
    %cst_796 = arith.constant dense<0.000000e+00> : vector<64x128xf32>
    %800 = tpu.matmul %798, %799, %cst_796 {dimension_numbers = #tpu.dot_dimension_numbers<[1], [0], [0], [1], [0, 0, 1, 1], [], []>} : vector<64x16xbf16>, vector<16x128xbf16>, vector<64x128xf32> -> vector<64x128xf32>
    %801 = arith.addf %787, %800 : vector<64x128xf32>
    %c39_797 = arith.constant 39 : index
    %c0_798 = arith.constant 0 : index
    %802 = tpu.strided_load %arg7[%c39_797, %c0_798] {strides = array<i32: 2, 1>} : memref<324x128xf32, #tpu.memory_space<vmem>>, vector<8x128xf32>
    %c75_799 = arith.constant 75 : index
    %c0_800 = arith.constant 0 : index
    %803 = tpu.strided_load %arg7[%c75_799, %c0_800] {strides = array<i32: 2, 1>} : memref<324x128xf32, #tpu.memory_space<vmem>>, vector<8x128xf32>
    %c111_801 = arith.constant 111 : index
    %c0_802 = arith.constant 0 : index
    %804 = tpu.strided_load %arg7[%c111_801, %c0_802] {strides = array<i32: 2, 1>} : memref<324x128xf32, #tpu.memory_space<vmem>>, vector<8x128xf32>
    %c147_803 = arith.constant 147 : index
    %c0_804 = arith.constant 0 : index
    %805 = tpu.strided_load %arg7[%c147_803, %c0_804] {strides = array<i32: 2, 1>} : memref<324x128xf32, #tpu.memory_space<vmem>>, vector<8x128xf32>
    %c183_805 = arith.constant 183 : index
    %c0_806 = arith.constant 0 : index
    %806 = tpu.strided_load %arg7[%c183_805, %c0_806] {strides = array<i32: 2, 1>} : memref<324x128xf32, #tpu.memory_space<vmem>>, vector<8x128xf32>
    %c219_807 = arith.constant 219 : index
    %c0_808 = arith.constant 0 : index
    %807 = tpu.strided_load %arg7[%c219_807, %c0_808] {strides = array<i32: 2, 1>} : memref<324x128xf32, #tpu.memory_space<vmem>>, vector<8x128xf32>
    %c255_809 = arith.constant 255 : index
    %c0_810 = arith.constant 0 : index
    %808 = tpu.strided_load %arg7[%c255_809, %c0_810] {strides = array<i32: 2, 1>} : memref<324x128xf32, #tpu.memory_space<vmem>>, vector<8x128xf32>
    %c291_811 = arith.constant 291 : index
    %c0_812 = arith.constant 0 : index
    %809 = tpu.strided_load %arg7[%c291_811, %c0_812] {strides = array<i32: 2, 1>} : memref<324x128xf32, #tpu.memory_space<vmem>>, vector<8x128xf32>
    %810 = tpu.concatenate %802, %803, %804, %805, %806, %807, %808, %809 in 0 : vector<8x128xf32>, vector<8x128xf32>, vector<8x128xf32>, vector<8x128xf32>, vector<8x128xf32>, vector<8x128xf32>, vector<8x128xf32>, vector<8x128xf32> -> vector<64x128xf32>
    %811 = vector.extract_strided_slice %810 {offsets = [0, 0], sizes = [64, 16], strides = [1, 1]} : vector<64x128xf32> to vector<64x16xf32>
    %812 = arith.truncf %811 : vector<64x16xf32> to vector<64x16xbf16>
    %c176_813 = arith.constant 176 : index
    %c0_814 = arith.constant 0 : index
    %813 = vector.load %arg3[%c176_813, %c0_814] : memref<256x128xbf16, #tpu.memory_space<vmem>>, vector<16x128xbf16>
    %cst_815 = arith.constant dense<0.000000e+00> : vector<64x128xf32>
    %814 = tpu.matmul %812, %813, %cst_815 {dimension_numbers = #tpu.dot_dimension_numbers<[1], [0], [0], [1], [0, 0, 1, 1], [], []>} : vector<64x16xbf16>, vector<16x128xbf16>, vector<64x128xf32> -> vector<64x128xf32>
    %815 = arith.addf %801, %814 : vector<64x128xf32>
    %c54_816 = arith.constant 54 : index
    %c0_817 = arith.constant 0 : index
    %816 = tpu.strided_load %arg7[%c54_816, %c0_817] {strides = array<i32: 2, 1>} : memref<324x128xf32, #tpu.memory_space<vmem>>, vector<8x128xf32>
    %c90_818 = arith.constant 90 : index
    %c0_819 = arith.constant 0 : index
    %817 = tpu.strided_load %arg7[%c90_818, %c0_819] {strides = array<i32: 2, 1>} : memref<324x128xf32, #tpu.memory_space<vmem>>, vector<8x128xf32>
    %c126_820 = arith.constant 126 : index
    %c0_821 = arith.constant 0 : index
    %818 = tpu.strided_load %arg7[%c126_820, %c0_821] {strides = array<i32: 2, 1>} : memref<324x128xf32, #tpu.memory_space<vmem>>, vector<8x128xf32>
    %c162_822 = arith.constant 162 : index
    %c0_823 = arith.constant 0 : index
    %819 = tpu.strided_load %arg7[%c162_822, %c0_823] {strides = array<i32: 2, 1>} : memref<324x128xf32, #tpu.memory_space<vmem>>, vector<8x128xf32>
    %c198_824 = arith.constant 198 : index
    %c0_825 = arith.constant 0 : index
    %820 = tpu.strided_load %arg7[%c198_824, %c0_825] {strides = array<i32: 2, 1>} : memref<324x128xf32, #tpu.memory_space<vmem>>, vector<8x128xf32>
    %c234_826 = arith.constant 234 : index
    %c0_827 = arith.constant 0 : index
    %821 = tpu.strided_load %arg7[%c234_826, %c0_827] {strides = array<i32: 2, 1>} : memref<324x128xf32, #tpu.memory_space<vmem>>, vector<8x128xf32>
    %c270_828 = arith.constant 270 : index
    %c0_829 = arith.constant 0 : index
    %822 = tpu.strided_load %arg7[%c270_828, %c0_829] {strides = array<i32: 2, 1>} : memref<324x128xf32, #tpu.memory_space<vmem>>, vector<8x128xf32>
    %c306_830 = arith.constant 306 : index
    %c0_831 = arith.constant 0 : index
    %823 = tpu.strided_load %arg7[%c306_830, %c0_831] {strides = array<i32: 2, 1>} : memref<324x128xf32, #tpu.memory_space<vmem>>, vector<8x128xf32>
    %824 = tpu.concatenate %816, %817, %818, %819, %820, %821, %822, %823 in 0 : vector<8x128xf32>, vector<8x128xf32>, vector<8x128xf32>, vector<8x128xf32>, vector<8x128xf32>, vector<8x128xf32>, vector<8x128xf32>, vector<8x128xf32> -> vector<64x128xf32>
    %825 = vector.extract_strided_slice %824 {offsets = [0, 0], sizes = [64, 16], strides = [1, 1]} : vector<64x128xf32> to vector<64x16xf32>
    %826 = arith.truncf %825 : vector<64x16xf32> to vector<64x16xbf16>
    %c192_832 = arith.constant 192 : index
    %c0_833 = arith.constant 0 : index
    %827 = vector.load %arg3[%c192_832, %c0_833] : memref<256x128xbf16, #tpu.memory_space<vmem>>, vector<16x128xbf16>
    %cst_834 = arith.constant dense<0.000000e+00> : vector<64x128xf32>
    %828 = tpu.matmul %826, %827, %cst_834 {dimension_numbers = #tpu.dot_dimension_numbers<[1], [0], [0], [1], [0, 0, 1, 1], [], []>} : vector<64x16xbf16>, vector<16x128xbf16>, vector<64x128xf32> -> vector<64x128xf32>
    %829 = arith.addf %815, %828 : vector<64x128xf32>
    %c55_835 = arith.constant 55 : index
    %c0_836 = arith.constant 0 : index
    %830 = tpu.strided_load %arg7[%c55_835, %c0_836] {strides = array<i32: 2, 1>} : memref<324x128xf32, #tpu.memory_space<vmem>>, vector<8x128xf32>
    %c91_837 = arith.constant 91 : index
    %c0_838 = arith.constant 0 : index
    %831 = tpu.strided_load %arg7[%c91_837, %c0_838] {strides = array<i32: 2, 1>} : memref<324x128xf32, #tpu.memory_space<vmem>>, vector<8x128xf32>
    %c127_839 = arith.constant 127 : index
    %c0_840 = arith.constant 0 : index
    %832 = tpu.strided_load %arg7[%c127_839, %c0_840] {strides = array<i32: 2, 1>} : memref<324x128xf32, #tpu.memory_space<vmem>>, vector<8x128xf32>
    %c163_841 = arith.constant 163 : index
    %c0_842 = arith.constant 0 : index
    %833 = tpu.strided_load %arg7[%c163_841, %c0_842] {strides = array<i32: 2, 1>} : memref<324x128xf32, #tpu.memory_space<vmem>>, vector<8x128xf32>
    %c199_843 = arith.constant 199 : index
    %c0_844 = arith.constant 0 : index
    %834 = tpu.strided_load %arg7[%c199_843, %c0_844] {strides = array<i32: 2, 1>} : memref<324x128xf32, #tpu.memory_space<vmem>>, vector<8x128xf32>
    %c235_845 = arith.constant 235 : index
    %c0_846 = arith.constant 0 : index
    %835 = tpu.strided_load %arg7[%c235_845, %c0_846] {strides = array<i32: 2, 1>} : memref<324x128xf32, #tpu.memory_space<vmem>>, vector<8x128xf32>
    %c271_847 = arith.constant 271 : index
    %c0_848 = arith.constant 0 : index
    %836 = tpu.strided_load %arg7[%c271_847, %c0_848] {strides = array<i32: 2, 1>} : memref<324x128xf32, #tpu.memory_space<vmem>>, vector<8x128xf32>
    %c307_849 = arith.constant 307 : index
    %c0_850 = arith.constant 0 : index
    %837 = tpu.strided_load %arg7[%c307_849, %c0_850] {strides = array<i32: 2, 1>} : memref<324x128xf32, #tpu.memory_space<vmem>>, vector<8x128xf32>
    %838 = tpu.concatenate %830, %831, %832, %833, %834, %835, %836, %837 in 0 : vector<8x128xf32>, vector<8x128xf32>, vector<8x128xf32>, vector<8x128xf32>, vector<8x128xf32>, vector<8x128xf32>, vector<8x128xf32>, vector<8x128xf32> -> vector<64x128xf32>
    %839 = vector.extract_strided_slice %838 {offsets = [0, 0], sizes = [64, 16], strides = [1, 1]} : vector<64x128xf32> to vector<64x16xf32>
    %840 = arith.truncf %839 : vector<64x16xf32> to vector<64x16xbf16>
    %c208_851 = arith.constant 208 : index
    %c0_852 = arith.constant 0 : index
    %841 = vector.load %arg3[%c208_851, %c0_852] : memref<256x128xbf16, #tpu.memory_space<vmem>>, vector<16x128xbf16>
    %cst_853 = arith.constant dense<0.000000e+00> : vector<64x128xf32>
    %842 = tpu.matmul %840, %841, %cst_853 {dimension_numbers = #tpu.dot_dimension_numbers<[1], [0], [0], [1], [0, 0, 1, 1], [], []>} : vector<64x16xbf16>, vector<16x128xbf16>, vector<64x128xf32> -> vector<64x128xf32>
    %843 = arith.addf %829, %842 : vector<64x128xf32>
    %c56_854 = arith.constant 56 : index
    %c0_855 = arith.constant 0 : index
    %844 = tpu.strided_load %arg7[%c56_854, %c0_855] {strides = array<i32: 2, 1>} : memref<324x128xf32, #tpu.memory_space<vmem>>, vector<8x128xf32>
    %c92_856 = arith.constant 92 : index
    %c0_857 = arith.constant 0 : index
    %845 = tpu.strided_load %arg7[%c92_856, %c0_857] {strides = array<i32: 2, 1>} : memref<324x128xf32, #tpu.memory_space<vmem>>, vector<8x128xf32>
    %c128_858 = arith.constant 128 : index
    %c0_859 = arith.constant 0 : index
    %846 = tpu.strided_load %arg7[%c128_858, %c0_859] {strides = array<i32: 2, 1>} : memref<324x128xf32, #tpu.memory_space<vmem>>, vector<8x128xf32>
    %c164_860 = arith.constant 164 : index
    %c0_861 = arith.constant 0 : index
    %847 = tpu.strided_load %arg7[%c164_860, %c0_861] {strides = array<i32: 2, 1>} : memref<324x128xf32, #tpu.memory_space<vmem>>, vector<8x128xf32>
    %c200_862 = arith.constant 200 : index
    %c0_863 = arith.constant 0 : index
    %848 = tpu.strided_load %arg7[%c200_862, %c0_863] {strides = array<i32: 2, 1>} : memref<324x128xf32, #tpu.memory_space<vmem>>, vector<8x128xf32>
    %c236_864 = arith.constant 236 : index
    %c0_865 = arith.constant 0 : index
    %849 = tpu.strided_load %arg7[%c236_864, %c0_865] {strides = array<i32: 2, 1>} : memref<324x128xf32, #tpu.memory_space<vmem>>, vector<8x128xf32>
    %c272_866 = arith.constant 272 : index
    %c0_867 = arith.constant 0 : index
    %850 = tpu.strided_load %arg7[%c272_866, %c0_867] {strides = array<i32: 2, 1>} : memref<324x128xf32, #tpu.memory_space<vmem>>, vector<8x128xf32>
    %c308_868 = arith.constant 308 : index
    %c0_869 = arith.constant 0 : index
    %851 = tpu.strided_load %arg7[%c308_868, %c0_869] {strides = array<i32: 2, 1>} : memref<324x128xf32, #tpu.memory_space<vmem>>, vector<8x128xf32>
    %852 = tpu.concatenate %844, %845, %846, %847, %848, %849, %850, %851 in 0 : vector<8x128xf32>, vector<8x128xf32>, vector<8x128xf32>, vector<8x128xf32>, vector<8x128xf32>, vector<8x128xf32>, vector<8x128xf32>, vector<8x128xf32> -> vector<64x128xf32>
    %853 = vector.extract_strided_slice %852 {offsets = [0, 0], sizes = [64, 16], strides = [1, 1]} : vector<64x128xf32> to vector<64x16xf32>
    %854 = arith.truncf %853 : vector<64x16xf32> to vector<64x16xbf16>
    %c224_870 = arith.constant 224 : index
    %c0_871 = arith.constant 0 : index
    %855 = vector.load %arg3[%c224_870, %c0_871] : memref<256x128xbf16, #tpu.memory_space<vmem>>, vector<16x128xbf16>
    %cst_872 = arith.constant dense<0.000000e+00> : vector<64x128xf32>
    %856 = tpu.matmul %854, %855, %cst_872 {dimension_numbers = #tpu.dot_dimension_numbers<[1], [0], [0], [1], [0, 0, 1, 1], [], []>} : vector<64x16xbf16>, vector<16x128xbf16>, vector<64x128xf32> -> vector<64x128xf32>
    %857 = arith.addf %843, %856 : vector<64x128xf32>
    %c57_873 = arith.constant 57 : index
    %c0_874 = arith.constant 0 : index
    %858 = tpu.strided_load %arg7[%c57_873, %c0_874] {strides = array<i32: 2, 1>} : memref<324x128xf32, #tpu.memory_space<vmem>>, vector<8x128xf32>
    %c93_875 = arith.constant 93 : index
    %c0_876 = arith.constant 0 : index
    %859 = tpu.strided_load %arg7[%c93_875, %c0_876] {strides = array<i32: 2, 1>} : memref<324x128xf32, #tpu.memory_space<vmem>>, vector<8x128xf32>
    %c129_877 = arith.constant 129 : index
    %c0_878 = arith.constant 0 : index
    %860 = tpu.strided_load %arg7[%c129_877, %c0_878] {strides = array<i32: 2, 1>} : memref<324x128xf32, #tpu.memory_space<vmem>>, vector<8x128xf32>
    %c165_879 = arith.constant 165 : index
    %c0_880 = arith.constant 0 : index
    %861 = tpu.strided_load %arg7[%c165_879, %c0_880] {strides = array<i32: 2, 1>} : memref<324x128xf32, #tpu.memory_space<vmem>>, vector<8x128xf32>
    %c201_881 = arith.constant 201 : index
    %c0_882 = arith.constant 0 : index
    %862 = tpu.strided_load %arg7[%c201_881, %c0_882] {strides = array<i32: 2, 1>} : memref<324x128xf32, #tpu.memory_space<vmem>>, vector<8x128xf32>
    %c237_883 = arith.constant 237 : index
    %c0_884 = arith.constant 0 : index
    %863 = tpu.strided_load %arg7[%c237_883, %c0_884] {strides = array<i32: 2, 1>} : memref<324x128xf32, #tpu.memory_space<vmem>>, vector<8x128xf32>
    %c273_885 = arith.constant 273 : index
    %c0_886 = arith.constant 0 : index
    %864 = tpu.strided_load %arg7[%c273_885, %c0_886] {strides = array<i32: 2, 1>} : memref<324x128xf32, #tpu.memory_space<vmem>>, vector<8x128xf32>
    %c309_887 = arith.constant 309 : index
    %c0_888 = arith.constant 0 : index
    %865 = tpu.strided_load %arg7[%c309_887, %c0_888] {strides = array<i32: 2, 1>} : memref<324x128xf32, #tpu.memory_space<vmem>>, vector<8x128xf32>
    %866 = tpu.concatenate %858, %859, %860, %861, %862, %863, %864, %865 in 0 : vector<8x128xf32>, vector<8x128xf32>, vector<8x128xf32>, vector<8x128xf32>, vector<8x128xf32>, vector<8x128xf32>, vector<8x128xf32>, vector<8x128xf32> -> vector<64x128xf32>
    %867 = vector.extract_strided_slice %866 {offsets = [0, 0], sizes = [64, 16], strides = [1, 1]} : vector<64x128xf32> to vector<64x16xf32>
    %868 = arith.truncf %867 : vector<64x16xf32> to vector<64x16xbf16>
    %c240_889 = arith.constant 240 : index
    %c0_890 = arith.constant 0 : index
    %869 = vector.load %arg3[%c240_889, %c0_890] : memref<256x128xbf16, #tpu.memory_space<vmem>>, vector<16x128xbf16>
    %cst_891 = arith.constant dense<0.000000e+00> : vector<64x128xf32>
    %870 = tpu.matmul %868, %869, %cst_891 {dimension_numbers = #tpu.dot_dimension_numbers<[1], [0], [0], [1], [0, 0, 1, 1], [], []>} : vector<64x16xbf16>, vector<16x128xbf16>, vector<64x128xf32> -> vector<64x128xf32>
    %871 = arith.addf %857, %870 : vector<64x128xf32>
    %cst_892 = arith.constant 0.000000e+00 : f32
    %872 = vector.broadcast %cst_892 : f32 to vector<64x128xf32>
    %873 = arith.cmpf ogt, %871, %872 : vector<64x128xf32>
    %cst_893 = arith.constant 2.000000e-01 : f32
    %874 = vector.broadcast %cst_893 : f32 to vector<64x128xf32>
    %875 = arith.mulf %874, %871 : vector<64x128xf32>
    %876 = arith.select %873, %871, %875 : vector<64x128xi1>, vector<64x128xf32>
    %877 = vector.extract_strided_slice %876 {offsets = [0, 0], sizes = [8, 128], strides = [1, 1]} : vector<64x128xf32> to vector<8x128xf32>
    %c11_894 = arith.constant 11 : index
    %c0_895 = arith.constant 0 : index
    %878 = vector.load %arg8[%c11_894, %c0_895] : memref<100x128xf32, #tpu.memory_space<vmem>>, vector<8x128xf32>
    tpu.vector_store %arg8[%c11_894, %c0_895], %877 {strides = array<i32>} : memref<100x128xf32, #tpu.memory_space<vmem>>, vector<8x128xf32>,
    %879 = vector.extract_strided_slice %876 {offsets = [8, 0], sizes = [8, 128], strides = [1, 1]} : vector<64x128xf32> to vector<8x128xf32>
    %c21_896 = arith.constant 21 : index
    %c0_897 = arith.constant 0 : index
    %880 = vector.load %arg8[%c21_896, %c0_897] : memref<100x128xf32, #tpu.memory_space<vmem>>, vector<8x128xf32>
    tpu.vector_store %arg8[%c21_896, %c0_897], %879 {strides = array<i32>} : memref<100x128xf32, #tpu.memory_space<vmem>>, vector<8x128xf32>,
    %881 = vector.extract_strided_slice %876 {offsets = [16, 0], sizes = [8, 128], strides = [1, 1]} : vector<64x128xf32> to vector<8x128xf32>
    %c31_898 = arith.constant 31 : index
    %c0_899 = arith.constant 0 : index
    %882 = vector.load %arg8[%c31_898, %c0_899] : memref<100x128xf32, #tpu.memory_space<vmem>>, vector<8x128xf32>
    tpu.vector_store %arg8[%c31_898, %c0_899], %881 {strides = array<i32>} : memref<100x128xf32, #tpu.memory_space<vmem>>, vector<8x128xf32>,
    %883 = vector.extract_strided_slice %876 {offsets = [24, 0], sizes = [8, 128], strides = [1, 1]} : vector<64x128xf32> to vector<8x128xf32>
    %c41_900 = arith.constant 41 : index
    %c0_901 = arith.constant 0 : index
    %884 = vector.load %arg8[%c41_900, %c0_901] : memref<100x128xf32, #tpu.memory_space<vmem>>, vector<8x128xf32>
    tpu.vector_store %arg8[%c41_900, %c0_901], %883 {strides = array<i32>} : memref<100x128xf32, #tpu.memory_space<vmem>>, vector<8x128xf32>,
    %885 = vector.extract_strided_slice %876 {offsets = [32, 0], sizes = [8, 128], strides = [1, 1]} : vector<64x128xf32> to vector<8x128xf32>
    %c51_902 = arith.constant 51 : index
    %c0_903 = arith.constant 0 : index
    %886 = vector.load %arg8[%c51_902, %c0_903] : memref<100x128xf32, #tpu.memory_space<vmem>>, vector<8x128xf32>
    tpu.vector_store %arg8[%c51_902, %c0_903], %885 {strides = array<i32>} : memref<100x128xf32, #tpu.memory_space<vmem>>, vector<8x128xf32>,
    %887 = vector.extract_strided_slice %876 {offsets = [40, 0], sizes = [8, 128], strides = [1, 1]} : vector<64x128xf32> to vector<8x128xf32>
    %c61_904 = arith.constant 61 : index
    %c0_905 = arith.constant 0 : index
    %888 = vector.load %arg8[%c61_904, %c0_905] : memref<100x128xf32, #tpu.memory_space<vmem>>, vector<8x128xf32>
    tpu.vector_store %arg8[%c61_904, %c0_905], %887 {strides = array<i32>} : memref<100x128xf32, #tpu.memory_space<vmem>>, vector<8x128xf32>,
    %889 = vector.extract_strided_slice %876 {offsets = [48, 0], sizes = [8, 128], strides = [1, 1]} : vector<64x128xf32> to vector<8x128xf32>
    %c71_906 = arith.constant 71 : index
    %c0_907 = arith.constant 0 : index
    %890 = vector.load %arg8[%c71_906, %c0_907] : memref<100x128xf32, #tpu.memory_space<vmem>>, vector<8x128xf32>
    tpu.vector_store %arg8[%c71_906, %c0_907], %889 {strides = array<i32>} : memref<100x128xf32, #tpu.memory_space<vmem>>, vector<8x128xf32>,
    %891 = vector.extract_strided_slice %876 {offsets = [56, 0], sizes = [8, 128], strides = [1, 1]} : vector<64x128xf32> to vector<8x128xf32>
    %c81_908 = arith.constant 81 : index
    %c0_909 = arith.constant 0 : index
    %892 = vector.load %arg8[%c81_908, %c0_909] : memref<100x128xf32, #tpu.memory_space<vmem>>, vector<8x128xf32>
    tpu.vector_store %arg8[%c81_908, %c0_909], %891 {strides = array<i32>} : memref<100x128xf32, #tpu.memory_space<vmem>>, vector<8x128xf32>,
    %cst_910 = arith.constant 0.000000e+00 : f32
    %893 = vector.broadcast %cst_910 : f32 to vector<16x128xf32>
    %c0_911 = arith.constant 0 : index
    %c0_912 = arith.constant 0 : index
    %894 = tpu.strided_load %arg8[%c0_911, %c0_912] {strides = array<i32: 2, 1>} : memref<100x128xf32, #tpu.memory_space<vmem>>, vector<4x128xf32>
    %c20_913 = arith.constant 20 : index
    %c0_914 = arith.constant 0 : index
    %895 = tpu.strided_load %arg8[%c20_913, %c0_914] {strides = array<i32: 2, 1>} : memref<100x128xf32, #tpu.memory_space<vmem>>, vector<4x128xf32>
    %c40_915 = arith.constant 40 : index
    %c0_916 = arith.constant 0 : index
    %896 = tpu.strided_load %arg8[%c40_915, %c0_916] {strides = array<i32: 2, 1>} : memref<100x128xf32, #tpu.memory_space<vmem>>, vector<4x128xf32>
    %c60_917 = arith.constant 60 : index
    %c0_918 = arith.constant 0 : index
    %897 = tpu.strided_load %arg8[%c60_917, %c0_918] {strides = array<i32: 2, 1>} : memref<100x128xf32, #tpu.memory_space<vmem>>, vector<4x128xf32>
    %898 = tpu.concatenate %894, %895, %896, %897 in 0 : vector<4x128xf32>, vector<4x128xf32>, vector<4x128xf32>, vector<4x128xf32> -> vector<16x128xf32>
    %899 = vector.extract_strided_slice %898 {offsets = [0, 0], sizes = [16, 32], strides = [1, 1]} : vector<16x128xf32> to vector<16x32xf32>
    %900 = arith.truncf %899 : vector<16x32xf32> to vector<16x32xbf16>
    %c0_919 = arith.constant 0 : index
    %c0_920 = arith.constant 0 : index
    %901 = vector.load %arg4[%c0_919, %c0_920] : memref<512x128xbf16, #tpu.memory_space<vmem>>, vector<32x128xbf16>
    %cst_921 = arith.constant dense<0.000000e+00> : vector<16x128xf32>
    %902 = tpu.matmul %900, %901, %cst_921 {dimension_numbers = #tpu.dot_dimension_numbers<[1], [0], [0], [1], [0, 0, 1, 1], [], []>} : vector<16x32xbf16>, vector<32x128xbf16>, vector<16x128xf32> -> vector<16x128xf32>
    %903 = arith.addf %893, %902 : vector<16x128xf32>
    %c1_922 = arith.constant 1 : index
    %c0_923 = arith.constant 0 : index
    %904 = tpu.strided_load %arg8[%c1_922, %c0_923] {strides = array<i32: 2, 1>} : memref<100x128xf32, #tpu.memory_space<vmem>>, vector<4x128xf32>
    %c21_924 = arith.constant 21 : index
    %c0_925 = arith.constant 0 : index
    %905 = tpu.strided_load %arg8[%c21_924, %c0_925] {strides = array<i32: 2, 1>} : memref<100x128xf32, #tpu.memory_space<vmem>>, vector<4x128xf32>
    %c41_926 = arith.constant 41 : index
    %c0_927 = arith.constant 0 : index
    %906 = tpu.strided_load %arg8[%c41_926, %c0_927] {strides = array<i32: 2, 1>} : memref<100x128xf32, #tpu.memory_space<vmem>>, vector<4x128xf32>
    %c61_928 = arith.constant 61 : index
    %c0_929 = arith.constant 0 : index
    %907 = tpu.strided_load %arg8[%c61_928, %c0_929] {strides = array<i32: 2, 1>} : memref<100x128xf32, #tpu.memory_space<vmem>>, vector<4x128xf32>
    %908 = tpu.concatenate %904, %905, %906, %907 in 0 : vector<4x128xf32>, vector<4x128xf32>, vector<4x128xf32>, vector<4x128xf32> -> vector<16x128xf32>
    %909 = vector.extract_strided_slice %908 {offsets = [0, 0], sizes = [16, 32], strides = [1, 1]} : vector<16x128xf32> to vector<16x32xf32>
    %910 = arith.truncf %909 : vector<16x32xf32> to vector<16x32xbf16>
    %c32_930 = arith.constant 32 : index
    %c0_931 = arith.constant 0 : index
    %911 = vector.load %arg4[%c32_930, %c0_931] : memref<512x128xbf16, #tpu.memory_space<vmem>>, vector<32x128xbf16>
    %cst_932 = arith.constant dense<0.000000e+00> : vector<16x128xf32>
    %912 = tpu.matmul %910, %911, %cst_932 {dimension_numbers = #tpu.dot_dimension_numbers<[1], [0], [0], [1], [0, 0, 1, 1], [], []>} : vector<16x32xbf16>, vector<32x128xbf16>, vector<16x128xf32> -> vector<16x128xf32>
    %913 = arith.addf %903, %912 : vector<16x128xf32>
    %c2_933 = arith.constant 2 : index
    %c0_934 = arith.constant 0 : index
    %914 = tpu.strided_load %arg8[%c2_933, %c0_934] {strides = array<i32: 2, 1>} : memref<100x128xf32, #tpu.memory_space<vmem>>, vector<4x128xf32>
    %c22_935 = arith.constant 22 : index
    %c0_936 = arith.constant 0 : index
    %915 = tpu.strided_load %arg8[%c22_935, %c0_936] {strides = array<i32: 2, 1>} : memref<100x128xf32, #tpu.memory_space<vmem>>, vector<4x128xf32>
    %c42_937 = arith.constant 42 : index
    %c0_938 = arith.constant 0 : index
    %916 = tpu.strided_load %arg8[%c42_937, %c0_938] {strides = array<i32: 2, 1>} : memref<100x128xf32, #tpu.memory_space<vmem>>, vector<4x128xf32>
    %c62_939 = arith.constant 62 : index
    %c0_940 = arith.constant 0 : index
    %917 = tpu.strided_load %arg8[%c62_939, %c0_940] {strides = array<i32: 2, 1>} : memref<100x128xf32, #tpu.memory_space<vmem>>, vector<4x128xf32>
    %918 = tpu.concatenate %914, %915, %916, %917 in 0 : vector<4x128xf32>, vector<4x128xf32>, vector<4x128xf32>, vector<4x128xf32> -> vector<16x128xf32>
    %919 = vector.extract_strided_slice %918 {offsets = [0, 0], sizes = [16, 32], strides = [1, 1]} : vector<16x128xf32> to vector<16x32xf32>
    %920 = arith.truncf %919 : vector<16x32xf32> to vector<16x32xbf16>
    %c64_941 = arith.constant 64 : index
    %c0_942 = arith.constant 0 : index
    %921 = vector.load %arg4[%c64_941, %c0_942] : memref<512x128xbf16, #tpu.memory_space<vmem>>, vector<32x128xbf16>
    %cst_943 = arith.constant dense<0.000000e+00> : vector<16x128xf32>
    %922 = tpu.matmul %920, %921, %cst_943 {dimension_numbers = #tpu.dot_dimension_numbers<[1], [0], [0], [1], [0, 0, 1, 1], [], []>} : vector<16x32xbf16>, vector<32x128xbf16>, vector<16x128xf32> -> vector<16x128xf32>
    %923 = arith.addf %913, %922 : vector<16x128xf32>
    %c3_944 = arith.constant 3 : index
    %c0_945 = arith.constant 0 : index
    %924 = tpu.strided_load %arg8[%c3_944, %c0_945] {strides = array<i32: 2, 1>} : memref<100x128xf32, #tpu.memory_space<vmem>>, vector<4x128xf32>
    %c23_946 = arith.constant 23 : index
    %c0_947 = arith.constant 0 : index
    %925 = tpu.strided_load %arg8[%c23_946, %c0_947] {strides = array<i32: 2, 1>} : memref<100x128xf32, #tpu.memory_space<vmem>>, vector<4x128xf32>
    %c43_948 = arith.constant 43 : index
    %c0_949 = arith.constant 0 : index
    %926 = tpu.strided_load %arg8[%c43_948, %c0_949] {strides = array<i32: 2, 1>} : memref<100x128xf32, #tpu.memory_space<vmem>>, vector<4x128xf32>
    %c63_950 = arith.constant 63 : index
    %c0_951 = arith.constant 0 : index
    %927 = tpu.strided_load %arg8[%c63_950, %c0_951] {strides = array<i32: 2, 1>} : memref<100x128xf32, #tpu.memory_space<vmem>>, vector<4x128xf32>
    %928 = tpu.concatenate %924, %925, %926, %927 in 0 : vector<4x128xf32>, vector<4x128xf32>, vector<4x128xf32>, vector<4x128xf32> -> vector<16x128xf32>
    %929 = vector.extract_strided_slice %928 {offsets = [0, 0], sizes = [16, 32], strides = [1, 1]} : vector<16x128xf32> to vector<16x32xf32>
    %930 = arith.truncf %929 : vector<16x32xf32> to vector<16x32xbf16>
    %c96_952 = arith.constant 96 : index
    %c0_953 = arith.constant 0 : index
    %931 = vector.load %arg4[%c96_952, %c0_953] : memref<512x128xbf16, #tpu.memory_space<vmem>>, vector<32x128xbf16>
    %cst_954 = arith.constant dense<0.000000e+00> : vector<16x128xf32>
    %932 = tpu.matmul %930, %931, %cst_954 {dimension_numbers = #tpu.dot_dimension_numbers<[1], [0], [0], [1], [0, 0, 1, 1], [], []>} : vector<16x32xbf16>, vector<32x128xbf16>, vector<16x128xf32> -> vector<16x128xf32>
    %933 = arith.addf %923, %932 : vector<16x128xf32>
    %c10_955 = arith.constant 10 : index
    %c0_956 = arith.constant 0 : index
    %934 = tpu.strided_load %arg8[%c10_955, %c0_956] {strides = array<i32: 2, 1>} : memref<100x128xf32, #tpu.memory_space<vmem>>, vector<4x128xf32>
    %c30_957 = arith.constant 30 : index
    %c0_958 = arith.constant 0 : index
    %935 = tpu.strided_load %arg8[%c30_957, %c0_958] {strides = array<i32: 2, 1>} : memref<100x128xf32, #tpu.memory_space<vmem>>, vector<4x128xf32>
    %c50_959 = arith.constant 50 : index
    %c0_960 = arith.constant 0 : index
    %936 = tpu.strided_load %arg8[%c50_959, %c0_960] {strides = array<i32: 2, 1>} : memref<100x128xf32, #tpu.memory_space<vmem>>, vector<4x128xf32>
    %c70_961 = arith.constant 70 : index
    %c0_962 = arith.constant 0 : index
    %937 = tpu.strided_load %arg8[%c70_961, %c0_962] {strides = array<i32: 2, 1>} : memref<100x128xf32, #tpu.memory_space<vmem>>, vector<4x128xf32>
    %938 = tpu.concatenate %934, %935, %936, %937 in 0 : vector<4x128xf32>, vector<4x128xf32>, vector<4x128xf32>, vector<4x128xf32> -> vector<16x128xf32>
    %939 = vector.extract_strided_slice %938 {offsets = [0, 0], sizes = [16, 32], strides = [1, 1]} : vector<16x128xf32> to vector<16x32xf32>
    %940 = arith.truncf %939 : vector<16x32xf32> to vector<16x32xbf16>
    %c128_963 = arith.constant 128 : index
    %c0_964 = arith.constant 0 : index
    %941 = vector.load %arg4[%c128_963, %c0_964] : memref<512x128xbf16, #tpu.memory_space<vmem>>, vector<32x128xbf16>
    %cst_965 = arith.constant dense<0.000000e+00> : vector<16x128xf32>
    %942 = tpu.matmul %940, %941, %cst_965 {dimension_numbers = #tpu.dot_dimension_numbers<[1], [0], [0], [1], [0, 0, 1, 1], [], []>} : vector<16x32xbf16>, vector<32x128xbf16>, vector<16x128xf32> -> vector<16x128xf32>
    %943 = arith.addf %933, %942 : vector<16x128xf32>
    %c11_966 = arith.constant 11 : index
    %c0_967 = arith.constant 0 : index
    %944 = tpu.strided_load %arg8[%c11_966, %c0_967] {strides = array<i32: 2, 1>} : memref<100x128xf32, #tpu.memory_space<vmem>>, vector<4x128xf32>
    %c31_968 = arith.constant 31 : index
    %c0_969 = arith.constant 0 : index
    %945 = tpu.strided_load %arg8[%c31_968, %c0_969] {strides = array<i32: 2, 1>} : memref<100x128xf32, #tpu.memory_space<vmem>>, vector<4x128xf32>
    %c51_970 = arith.constant 51 : index
    %c0_971 = arith.constant 0 : index
    %946 = tpu.strided_load %arg8[%c51_970, %c0_971] {strides = array<i32: 2, 1>} : memref<100x128xf32, #tpu.memory_space<vmem>>, vector<4x128xf32>
    %c71_972 = arith.constant 71 : index
    %c0_973 = arith.constant 0 : index
    %947 = tpu.strided_load %arg8[%c71_972, %c0_973] {strides = array<i32: 2, 1>} : memref<100x128xf32, #tpu.memory_space<vmem>>, vector<4x128xf32>
    %948 = tpu.concatenate %944, %945, %946, %947 in 0 : vector<4x128xf32>, vector<4x128xf32>, vector<4x128xf32>, vector<4x128xf32> -> vector<16x128xf32>
    %949 = vector.extract_strided_slice %948 {offsets = [0, 0], sizes = [16, 32], strides = [1, 1]} : vector<16x128xf32> to vector<16x32xf32>
    %950 = arith.truncf %949 : vector<16x32xf32> to vector<16x32xbf16>
    %c160_974 = arith.constant 160 : index
    %c0_975 = arith.constant 0 : index
    %951 = vector.load %arg4[%c160_974, %c0_975] : memref<512x128xbf16, #tpu.memory_space<vmem>>, vector<32x128xbf16>
    %cst_976 = arith.constant dense<0.000000e+00> : vector<16x128xf32>
    %952 = tpu.matmul %950, %951, %cst_976 {dimension_numbers = #tpu.dot_dimension_numbers<[1], [0], [0], [1], [0, 0, 1, 1], [], []>} : vector<16x32xbf16>, vector<32x128xbf16>, vector<16x128xf32> -> vector<16x128xf32>
    %953 = arith.addf %943, %952 : vector<16x128xf32>
    %c12_977 = arith.constant 12 : index
    %c0_978 = arith.constant 0 : index
    %954 = tpu.strided_load %arg8[%c12_977, %c0_978] {strides = array<i32: 2, 1>} : memref<100x128xf32, #tpu.memory_space<vmem>>, vector<4x128xf32>
    %c32_979 = arith.constant 32 : index
    %c0_980 = arith.constant 0 : index
    %955 = tpu.strided_load %arg8[%c32_979, %c0_980] {strides = array<i32: 2, 1>} : memref<100x128xf32, #tpu.memory_space<vmem>>, vector<4x128xf32>
    %c52_981 = arith.constant 52 : index
    %c0_982 = arith.constant 0 : index
    %956 = tpu.strided_load %arg8[%c52_981, %c0_982] {strides = array<i32: 2, 1>} : memref<100x128xf32, #tpu.memory_space<vmem>>, vector<4x128xf32>
    %c72_983 = arith.constant 72 : index
    %c0_984 = arith.constant 0 : index
    %957 = tpu.strided_load %arg8[%c72_983, %c0_984] {strides = array<i32: 2, 1>} : memref<100x128xf32, #tpu.memory_space<vmem>>, vector<4x128xf32>
    %958 = tpu.concatenate %954, %955, %956, %957 in 0 : vector<4x128xf32>, vector<4x128xf32>, vector<4x128xf32>, vector<4x128xf32> -> vector<16x128xf32>
    %959 = vector.extract_strided_slice %958 {offsets = [0, 0], sizes = [16, 32], strides = [1, 1]} : vector<16x128xf32> to vector<16x32xf32>
    %960 = arith.truncf %959 : vector<16x32xf32> to vector<16x32xbf16>
    %c192_985 = arith.constant 192 : index
    %c0_986 = arith.constant 0 : index
    %961 = vector.load %arg4[%c192_985, %c0_986] : memref<512x128xbf16, #tpu.memory_space<vmem>>, vector<32x128xbf16>
    %cst_987 = arith.constant dense<0.000000e+00> : vector<16x128xf32>
    %962 = tpu.matmul %960, %961, %cst_987 {dimension_numbers = #tpu.dot_dimension_numbers<[1], [0], [0], [1], [0, 0, 1, 1], [], []>} : vector<16x32xbf16>, vector<32x128xbf16>, vector<16x128xf32> -> vector<16x128xf32>
    %963 = arith.addf %953, %962 : vector<16x128xf32>
    %c13_988 = arith.constant 13 : index
    %c0_989 = arith.constant 0 : index
    %964 = tpu.strided_load %arg8[%c13_988, %c0_989] {strides = array<i32: 2, 1>} : memref<100x128xf32, #tpu.memory_space<vmem>>, vector<4x128xf32>
    %c33_990 = arith.constant 33 : index
    %c0_991 = arith.constant 0 : index
    %965 = tpu.strided_load %arg8[%c33_990, %c0_991] {strides = array<i32: 2, 1>} : memref<100x128xf32, #tpu.memory_space<vmem>>, vector<4x128xf32>
    %c53_992 = arith.constant 53 : index
    %c0_993 = arith.constant 0 : index
    %966 = tpu.strided_load %arg8[%c53_992, %c0_993] {strides = array<i32: 2, 1>} : memref<100x128xf32, #tpu.memory_space<vmem>>, vector<4x128xf32>
    %c73_994 = arith.constant 73 : index
    %c0_995 = arith.constant 0 : index
    %967 = tpu.strided_load %arg8[%c73_994, %c0_995] {strides = array<i32: 2, 1>} : memref<100x128xf32, #tpu.memory_space<vmem>>, vector<4x128xf32>
    %968 = tpu.concatenate %964, %965, %966, %967 in 0 : vector<4x128xf32>, vector<4x128xf32>, vector<4x128xf32>, vector<4x128xf32> -> vector<16x128xf32>
    %969 = vector.extract_strided_slice %968 {offsets = [0, 0], sizes = [16, 32], strides = [1, 1]} : vector<16x128xf32> to vector<16x32xf32>
    %970 = arith.truncf %969 : vector<16x32xf32> to vector<16x32xbf16>
    %c224_996 = arith.constant 224 : index
    %c0_997 = arith.constant 0 : index
    %971 = vector.load %arg4[%c224_996, %c0_997] : memref<512x128xbf16, #tpu.memory_space<vmem>>, vector<32x128xbf16>
    %cst_998 = arith.constant dense<0.000000e+00> : vector<16x128xf32>
    %972 = tpu.matmul %970, %971, %cst_998 {dimension_numbers = #tpu.dot_dimension_numbers<[1], [0], [0], [1], [0, 0, 1, 1], [], []>} : vector<16x32xbf16>, vector<32x128xbf16>, vector<16x128xf32> -> vector<16x128xf32>
    %973 = arith.addf %963, %972 : vector<16x128xf32>
    %c20_999 = arith.constant 20 : index
    %c0_1000 = arith.constant 0 : index
    %974 = tpu.strided_load %arg8[%c20_999, %c0_1000] {strides = array<i32: 2, 1>} : memref<100x128xf32, #tpu.memory_space<vmem>>, vector<4x128xf32>
    %c40_1001 = arith.constant 40 : index
    %c0_1002 = arith.constant 0 : index
    %975 = tpu.strided_load %arg8[%c40_1001, %c0_1002] {strides = array<i32: 2, 1>} : memref<100x128xf32, #tpu.memory_space<vmem>>, vector<4x128xf32>
    %c60_1003 = arith.constant 60 : index
    %c0_1004 = arith.constant 0 : index
    %976 = tpu.strided_load %arg8[%c60_1003, %c0_1004] {strides = array<i32: 2, 1>} : memref<100x128xf32, #tpu.memory_space<vmem>>, vector<4x128xf32>
    %c80_1005 = arith.constant 80 : index
    %c0_1006 = arith.constant 0 : index
    %977 = tpu.strided_load %arg8[%c80_1005, %c0_1006] {strides = array<i32: 2, 1>} : memref<100x128xf32, #tpu.memory_space<vmem>>, vector<4x128xf32>
    %978 = tpu.concatenate %974, %975, %976, %977 in 0 : vector<4x128xf32>, vector<4x128xf32>, vector<4x128xf32>, vector<4x128xf32> -> vector<16x128xf32>
    %979 = vector.extract_strided_slice %978 {offsets = [0, 0], sizes = [16, 32], strides = [1, 1]} : vector<16x128xf32> to vector<16x32xf32>
    %980 = arith.truncf %979 : vector<16x32xf32> to vector<16x32xbf16>
    %c256_1007 = arith.constant 256 : index
    %c0_1008 = arith.constant 0 : index
    %981 = vector.load %arg4[%c256_1007, %c0_1008] : memref<512x128xbf16, #tpu.memory_space<vmem>>, vector<32x128xbf16>
    %cst_1009 = arith.constant dense<0.000000e+00> : vector<16x128xf32>
    %982 = tpu.matmul %980, %981, %cst_1009 {dimension_numbers = #tpu.dot_dimension_numbers<[1], [0], [0], [1], [0, 0, 1, 1], [], []>} : vector<16x32xbf16>, vector<32x128xbf16>, vector<16x128xf32> -> vector<16x128xf32>
    %983 = arith.addf %973, %982 : vector<16x128xf32>
    %c21_1010 = arith.constant 21 : index
    %c0_1011 = arith.constant 0 : index
    %984 = tpu.strided_load %arg8[%c21_1010, %c0_1011] {strides = array<i32: 2, 1>} : memref<100x128xf32, #tpu.memory_space<vmem>>, vector<4x128xf32>
    %c41_1012 = arith.constant 41 : index
    %c0_1013 = arith.constant 0 : index
    %985 = tpu.strided_load %arg8[%c41_1012, %c0_1013] {strides = array<i32: 2, 1>} : memref<100x128xf32, #tpu.memory_space<vmem>>, vector<4x128xf32>
    %c61_1014 = arith.constant 61 : index
    %c0_1015 = arith.constant 0 : index
    %986 = tpu.strided_load %arg8[%c61_1014, %c0_1015] {strides = array<i32: 2, 1>} : memref<100x128xf32, #tpu.memory_space<vmem>>, vector<4x128xf32>
    %c81_1016 = arith.constant 81 : index
    %c0_1017 = arith.constant 0 : index
    %987 = tpu.strided_load %arg8[%c81_1016, %c0_1017] {strides = array<i32: 2, 1>} : memref<100x128xf32, #tpu.memory_space<vmem>>, vector<4x128xf32>
    %988 = tpu.concatenate %984, %985, %986, %987 in 0 : vector<4x128xf32>, vector<4x128xf32>, vector<4x128xf32>, vector<4x128xf32> -> vector<16x128xf32>
    %989 = vector.extract_strided_slice %988 {offsets = [0, 0], sizes = [16, 32], strides = [1, 1]} : vector<16x128xf32> to vector<16x32xf32>
    %990 = arith.truncf %989 : vector<16x32xf32> to vector<16x32xbf16>
    %c288_1018 = arith.constant 288 : index
    %c0_1019 = arith.constant 0 : index
    %991 = vector.load %arg4[%c288_1018, %c0_1019] : memref<512x128xbf16, #tpu.memory_space<vmem>>, vector<32x128xbf16>
    %cst_1020 = arith.constant dense<0.000000e+00> : vector<16x128xf32>
    %992 = tpu.matmul %990, %991, %cst_1020 {dimension_numbers = #tpu.dot_dimension_numbers<[1], [0], [0], [1], [0, 0, 1, 1], [], []>} : vector<16x32xbf16>, vector<32x128xbf16>, vector<16x128xf32> -> vector<16x128xf32>
    %993 = arith.addf %983, %992 : vector<16x128xf32>
    %c22_1021 = arith.constant 22 : index
    %c0_1022 = arith.constant 0 : index
    %994 = tpu.strided_load %arg8[%c22_1021, %c0_1022] {strides = array<i32: 2, 1>} : memref<100x128xf32, #tpu.memory_space<vmem>>, vector<4x128xf32>
    %c42_1023 = arith.constant 42 : index
    %c0_1024 = arith.constant 0 : index
    %995 = tpu.strided_load %arg8[%c42_1023, %c0_1024] {strides = array<i32: 2, 1>} : memref<100x128xf32, #tpu.memory_space<vmem>>, vector<4x128xf32>
    %c62_1025 = arith.constant 62 : index
    %c0_1026 = arith.constant 0 : index
    %996 = tpu.strided_load %arg8[%c62_1025, %c0_1026] {strides = array<i32: 2, 1>} : memref<100x128xf32, #tpu.memory_space<vmem>>, vector<4x128xf32>
    %c82_1027 = arith.constant 82 : index
    %c0_1028 = arith.constant 0 : index
    %997 = tpu.strided_load %arg8[%c82_1027, %c0_1028] {strides = array<i32: 2, 1>} : memref<100x128xf32, #tpu.memory_space<vmem>>, vector<4x128xf32>
    %998 = tpu.concatenate %994, %995, %996, %997 in 0 : vector<4x128xf32>, vector<4x128xf32>, vector<4x128xf32>, vector<4x128xf32> -> vector<16x128xf32>
    %999 = vector.extract_strided_slice %998 {offsets = [0, 0], sizes = [16, 32], strides = [1, 1]} : vector<16x128xf32> to vector<16x32xf32>
    %1000 = arith.truncf %999 : vector<16x32xf32> to vector<16x32xbf16>
    %c320_1029 = arith.constant 320 : index
    %c0_1030 = arith.constant 0 : index
    %1001 = vector.load %arg4[%c320_1029, %c0_1030] : memref<512x128xbf16, #tpu.memory_space<vmem>>, vector<32x128xbf16>
    %cst_1031 = arith.constant dense<0.000000e+00> : vector<16x128xf32>
    %1002 = tpu.matmul %1000, %1001, %cst_1031 {dimension_numbers = #tpu.dot_dimension_numbers<[1], [0], [0], [1], [0, 0, 1, 1], [], []>} : vector<16x32xbf16>, vector<32x128xbf16>, vector<16x128xf32> -> vector<16x128xf32>
    %1003 = arith.addf %993, %1002 : vector<16x128xf32>
    %c23_1032 = arith.constant 23 : index
    %c0_1033 = arith.constant 0 : index
    %1004 = tpu.strided_load %arg8[%c23_1032, %c0_1033] {strides = array<i32: 2, 1>} : memref<100x128xf32, #tpu.memory_space<vmem>>, vector<4x128xf32>
    %c43_1034 = arith.constant 43 : index
    %c0_1035 = arith.constant 0 : index
    %1005 = tpu.strided_load %arg8[%c43_1034, %c0_1035] {strides = array<i32: 2, 1>} : memref<100x128xf32, #tpu.memory_space<vmem>>, vector<4x128xf32>
    %c63_1036 = arith.constant 63 : index
    %c0_1037 = arith.constant 0 : index
    %1006 = tpu.strided_load %arg8[%c63_1036, %c0_1037] {strides = array<i32: 2, 1>} : memref<100x128xf32, #tpu.memory_space<vmem>>, vector<4x128xf32>
    %c83_1038 = arith.constant 83 : index
    %c0_1039 = arith.constant 0 : index
    %1007 = tpu.strided_load %arg8[%c83_1038, %c0_1039] {strides = array<i32: 2, 1>} : memref<100x128xf32, #tpu.memory_space<vmem>>, vector<4x128xf32>
    %1008 = tpu.concatenate %1004, %1005, %1006, %1007 in 0 : vector<4x128xf32>, vector<4x128xf32>, vector<4x128xf32>, vector<4x128xf32> -> vector<16x128xf32>
    %1009 = vector.extract_strided_slice %1008 {offsets = [0, 0], sizes = [16, 32], strides = [1, 1]} : vector<16x128xf32> to vector<16x32xf32>
    %1010 = arith.truncf %1009 : vector<16x32xf32> to vector<16x32xbf16>
    %c352_1040 = arith.constant 352 : index
    %c0_1041 = arith.constant 0 : index
    %1011 = vector.load %arg4[%c352_1040, %c0_1041] : memref<512x128xbf16, #tpu.memory_space<vmem>>, vector<32x128xbf16>
    %cst_1042 = arith.constant dense<0.000000e+00> : vector<16x128xf32>
    %1012 = tpu.matmul %1010, %1011, %cst_1042 {dimension_numbers = #tpu.dot_dimension_numbers<[1], [0], [0], [1], [0, 0, 1, 1], [], []>} : vector<16x32xbf16>, vector<32x128xbf16>, vector<16x128xf32> -> vector<16x128xf32>
    %1013 = arith.addf %1003, %1012 : vector<16x128xf32>
    %c30_1043 = arith.constant 30 : index
    %c0_1044 = arith.constant 0 : index
    %1014 = tpu.strided_load %arg8[%c30_1043, %c0_1044] {strides = array<i32: 2, 1>} : memref<100x128xf32, #tpu.memory_space<vmem>>, vector<4x128xf32>
    %c50_1045 = arith.constant 50 : index
    %c0_1046 = arith.constant 0 : index
    %1015 = tpu.strided_load %arg8[%c50_1045, %c0_1046] {strides = array<i32: 2, 1>} : memref<100x128xf32, #tpu.memory_space<vmem>>, vector<4x128xf32>
    %c70_1047 = arith.constant 70 : index
    %c0_1048 = arith.constant 0 : index
    %1016 = tpu.strided_load %arg8[%c70_1047, %c0_1048] {strides = array<i32: 2, 1>} : memref<100x128xf32, #tpu.memory_space<vmem>>, vector<4x128xf32>
    %c90_1049 = arith.constant 90 : index
    %c0_1050 = arith.constant 0 : index
    %1017 = tpu.strided_load %arg8[%c90_1049, %c0_1050] {strides = array<i32: 2, 1>} : memref<100x128xf32, #tpu.memory_space<vmem>>, vector<4x128xf32>
    %1018 = tpu.concatenate %1014, %1015, %1016, %1017 in 0 : vector<4x128xf32>, vector<4x128xf32>, vector<4x128xf32>, vector<4x128xf32> -> vector<16x128xf32>
    %1019 = vector.extract_strided_slice %1018 {offsets = [0, 0], sizes = [16, 32], strides = [1, 1]} : vector<16x128xf32> to vector<16x32xf32>
    %1020 = arith.truncf %1019 : vector<16x32xf32> to vector<16x32xbf16>
    %c384_1051 = arith.constant 384 : index
    %c0_1052 = arith.constant 0 : index
    %1021 = vector.load %arg4[%c384_1051, %c0_1052] : memref<512x128xbf16, #tpu.memory_space<vmem>>, vector<32x128xbf16>
    %cst_1053 = arith.constant dense<0.000000e+00> : vector<16x128xf32>
    %1022 = tpu.matmul %1020, %1021, %cst_1053 {dimension_numbers = #tpu.dot_dimension_numbers<[1], [0], [0], [1], [0, 0, 1, 1], [], []>} : vector<16x32xbf16>, vector<32x128xbf16>, vector<16x128xf32> -> vector<16x128xf32>
    %1023 = arith.addf %1013, %1022 : vector<16x128xf32>
    %c31_1054 = arith.constant 31 : index
    %c0_1055 = arith.constant 0 : index
    %1024 = tpu.strided_load %arg8[%c31_1054, %c0_1055] {strides = array<i32: 2, 1>} : memref<100x128xf32, #tpu.memory_space<vmem>>, vector<4x128xf32>
    %c51_1056 = arith.constant 51 : index
    %c0_1057 = arith.constant 0 : index
    %1025 = tpu.strided_load %arg8[%c51_1056, %c0_1057] {strides = array<i32: 2, 1>} : memref<100x128xf32, #tpu.memory_space<vmem>>, vector<4x128xf32>
    %c71_1058 = arith.constant 71 : index
    %c0_1059 = arith.constant 0 : index
    %1026 = tpu.strided_load %arg8[%c71_1058, %c0_1059] {strides = array<i32: 2, 1>} : memref<100x128xf32, #tpu.memory_space<vmem>>, vector<4x128xf32>
    %c91_1060 = arith.constant 91 : index
    %c0_1061 = arith.constant 0 : index
    %1027 = tpu.strided_load %arg8[%c91_1060, %c0_1061] {strides = array<i32: 2, 1>} : memref<100x128xf32, #tpu.memory_space<vmem>>, vector<4x128xf32>
    %1028 = tpu.concatenate %1024, %1025, %1026, %1027 in 0 : vector<4x128xf32>, vector<4x128xf32>, vector<4x128xf32>, vector<4x128xf32> -> vector<16x128xf32>
    %1029 = vector.extract_strided_slice %1028 {offsets = [0, 0], sizes = [16, 32], strides = [1, 1]} : vector<16x128xf32> to vector<16x32xf32>
    %1030 = arith.truncf %1029 : vector<16x32xf32> to vector<16x32xbf16>
    %c416_1062 = arith.constant 416 : index
    %c0_1063 = arith.constant 0 : index
    %1031 = vector.load %arg4[%c416_1062, %c0_1063] : memref<512x128xbf16, #tpu.memory_space<vmem>>, vector<32x128xbf16>
    %cst_1064 = arith.constant dense<0.000000e+00> : vector<16x128xf32>
    %1032 = tpu.matmul %1030, %1031, %cst_1064 {dimension_numbers = #tpu.dot_dimension_numbers<[1], [0], [0], [1], [0, 0, 1, 1], [], []>} : vector<16x32xbf16>, vector<32x128xbf16>, vector<16x128xf32> -> vector<16x128xf32>
    %1033 = arith.addf %1023, %1032 : vector<16x128xf32>
    %c32_1065 = arith.constant 32 : index
    %c0_1066 = arith.constant 0 : index
    %1034 = tpu.strided_load %arg8[%c32_1065, %c0_1066] {strides = array<i32: 2, 1>} : memref<100x128xf32, #tpu.memory_space<vmem>>, vector<4x128xf32>
    %c52_1067 = arith.constant 52 : index
    %c0_1068 = arith.constant 0 : index
    %1035 = tpu.strided_load %arg8[%c52_1067, %c0_1068] {strides = array<i32: 2, 1>} : memref<100x128xf32, #tpu.memory_space<vmem>>, vector<4x128xf32>
    %c72_1069 = arith.constant 72 : index
    %c0_1070 = arith.constant 0 : index
    %1036 = tpu.strided_load %arg8[%c72_1069, %c0_1070] {strides = array<i32: 2, 1>} : memref<100x128xf32, #tpu.memory_space<vmem>>, vector<4x128xf32>
    %c92_1071 = arith.constant 92 : index
    %c0_1072 = arith.constant 0 : index
    %1037 = tpu.strided_load %arg8[%c92_1071, %c0_1072] {strides = array<i32: 2, 1>} : memref<100x128xf32, #tpu.memory_space<vmem>>, vector<4x128xf32>
    %1038 = tpu.concatenate %1034, %1035, %1036, %1037 in 0 : vector<4x128xf32>, vector<4x128xf32>, vector<4x128xf32>, vector<4x128xf32> -> vector<16x128xf32>
    %1039 = vector.extract_strided_slice %1038 {offsets = [0, 0], sizes = [16, 32], strides = [1, 1]} : vector<16x128xf32> to vector<16x32xf32>
    %1040 = arith.truncf %1039 : vector<16x32xf32> to vector<16x32xbf16>
    %c448_1073 = arith.constant 448 : index
    %c0_1074 = arith.constant 0 : index
    %1041 = vector.load %arg4[%c448_1073, %c0_1074] : memref<512x128xbf16, #tpu.memory_space<vmem>>, vector<32x128xbf16>
    %cst_1075 = arith.constant dense<0.000000e+00> : vector<16x128xf32>
    %1042 = tpu.matmul %1040, %1041, %cst_1075 {dimension_numbers = #tpu.dot_dimension_numbers<[1], [0], [0], [1], [0, 0, 1, 1], [], []>} : vector<16x32xbf16>, vector<32x128xbf16>, vector<16x128xf32> -> vector<16x128xf32>
    %1043 = arith.addf %1033, %1042 : vector<16x128xf32>
    %c33_1076 = arith.constant 33 : index
    %c0_1077 = arith.constant 0 : index
    %1044 = tpu.strided_load %arg8[%c33_1076, %c0_1077] {strides = array<i32: 2, 1>} : memref<100x128xf32, #tpu.memory_space<vmem>>, vector<4x128xf32>
    %c53_1078 = arith.constant 53 : index
    %c0_1079 = arith.constant 0 : index
    %1045 = tpu.strided_load %arg8[%c53_1078, %c0_1079] {strides = array<i32: 2, 1>} : memref<100x128xf32, #tpu.memory_space<vmem>>, vector<4x128xf32>
    %c73_1080 = arith.constant 73 : index
    %c0_1081 = arith.constant 0 : index
    %1046 = tpu.strided_load %arg8[%c73_1080, %c0_1081] {strides = array<i32: 2, 1>} : memref<100x128xf32, #tpu.memory_space<vmem>>, vector<4x128xf32>
    %c93_1082 = arith.constant 93 : index
    %c0_1083 = arith.constant 0 : index
    %1047 = tpu.strided_load %arg8[%c93_1082, %c0_1083] {strides = array<i32: 2, 1>} : memref<100x128xf32, #tpu.memory_space<vmem>>, vector<4x128xf32>
    %1048 = tpu.concatenate %1044, %1045, %1046, %1047 in 0 : vector<4x128xf32>, vector<4x128xf32>, vector<4x128xf32>, vector<4x128xf32> -> vector<16x128xf32>
    %1049 = vector.extract_strided_slice %1048 {offsets = [0, 0], sizes = [16, 32], strides = [1, 1]} : vector<16x128xf32> to vector<16x32xf32>
    %1050 = arith.truncf %1049 : vector<16x32xf32> to vector<16x32xbf16>
    %c480_1084 = arith.constant 480 : index
    %c0_1085 = arith.constant 0 : index
    %1051 = vector.load %arg4[%c480_1084, %c0_1085] : memref<512x128xbf16, #tpu.memory_space<vmem>>, vector<32x128xbf16>
    %cst_1086 = arith.constant dense<0.000000e+00> : vector<16x128xf32>
    %1052 = tpu.matmul %1050, %1051, %cst_1086 {dimension_numbers = #tpu.dot_dimension_numbers<[1], [0], [0], [1], [0, 0, 1, 1], [], []>} : vector<16x32xbf16>, vector<32x128xbf16>, vector<16x128xf32> -> vector<16x128xf32>
    %1053 = arith.addf %1043, %1052 : vector<16x128xf32>
    %cst_1087 = arith.constant 0.000000e+00 : f32
    %1054 = vector.broadcast %cst_1087 : f32 to vector<16x128xf32>
    %1055 = arith.cmpf ogt, %1053, %1054 : vector<16x128xf32>
    %cst_1088 = arith.constant 2.000000e-01 : f32
    %1056 = vector.broadcast %cst_1088 : f32 to vector<16x128xf32>
    %1057 = arith.mulf %1056, %1053 : vector<16x128xf32>
    %1058 = arith.select %1055, %1053, %1057 : vector<16x128xi1>, vector<16x128xf32>
    %1059 = vector.extract_strided_slice %1058 {offsets = [0, 0], sizes = [4, 128], strides = [1, 1]} : vector<16x128xf32> to vector<4x128xf32>
    %c0_1089 = arith.constant 0 : index
    %c0_1090 = arith.constant 0 : index
    %1060 = vector.load %arg9[%c0_1089, %c0_1090] : memref<16x128xf32, #tpu.memory_space<vmem>>, vector<4x128xf32>
    tpu.vector_store %arg9[%c0_1089, %c0_1090], %1059 {strides = array<i32>} : memref<16x128xf32, #tpu.memory_space<vmem>>, vector<4x128xf32>,
    %1061 = vector.extract_strided_slice %1058 {offsets = [4, 0], sizes = [4, 128], strides = [1, 1]} : vector<16x128xf32> to vector<4x128xf32>
    %c4_1091 = arith.constant 4 : index
    %c0_1092 = arith.constant 0 : index
    %1062 = vector.load %arg9[%c4_1091, %c0_1092] : memref<16x128xf32, #tpu.memory_space<vmem>>, vector<4x128xf32>
    tpu.vector_store %arg9[%c4_1091, %c0_1092], %1061 {strides = array<i32>} : memref<16x128xf32, #tpu.memory_space<vmem>>, vector<4x128xf32>,
    %1063 = vector.extract_strided_slice %1058 {offsets = [8, 0], sizes = [4, 128], strides = [1, 1]} : vector<16x128xf32> to vector<4x128xf32>
    %c8_1093 = arith.constant 8 : index
    %c0_1094 = arith.constant 0 : index
    %1064 = vector.load %arg9[%c8_1093, %c0_1094] : memref<16x128xf32, #tpu.memory_space<vmem>>, vector<4x128xf32>
    tpu.vector_store %arg9[%c8_1093, %c0_1094], %1063 {strides = array<i32>} : memref<16x128xf32, #tpu.memory_space<vmem>>, vector<4x128xf32>,
    %1065 = vector.extract_strided_slice %1058 {offsets = [12, 0], sizes = [4, 128], strides = [1, 1]} : vector<16x128xf32> to vector<4x128xf32>
    %c12_1095 = arith.constant 12 : index
    %c0_1096 = arith.constant 0 : index
    %1066 = vector.load %arg9[%c12_1095, %c0_1096] : memref<16x128xf32, #tpu.memory_space<vmem>>, vector<4x128xf32>
    tpu.vector_store %arg9[%c12_1095, %c0_1096], %1065 {strides = array<i32>} : memref<16x128xf32, #tpu.memory_space<vmem>>, vector<4x128xf32>,
    %cst_1097 = arith.constant 0.000000e+00 : f32
    %1067 = vector.broadcast %cst_1097 : f32 to vector<1x128xf32>
    %c0_1098 = arith.constant 0 : index
    %c0_1099 = arith.constant 0 : index
    %1068 = vector.load %arg9[%c0_1098, %c0_1099] : memref<16x128xf32, #tpu.memory_space<vmem>>, vector<1x128xf32>
    %1069 = vector.extract_strided_slice %1068 {offsets = [0, 0], sizes = [1, 64], strides = [1, 1]} : vector<1x128xf32> to vector<1x64xf32>
    %1070 = arith.truncf %1069 : vector<1x64xf32> to vector<1x64xbf16>
    %c0_1100 = arith.constant 0 : index
    %c0_1101 = arith.constant 0 : index
    %1071 = vector.load %arg5[%c0_1100, %c0_1101] : memref<1024x128xbf16, #tpu.memory_space<vmem>>, vector<64x128xbf16>
    %cst_1102 = arith.constant dense<0.000000e+00> : vector<1x128xf32>
    %1072 = tpu.matmul %1070, %1071, %cst_1102 {dimension_numbers = #tpu.dot_dimension_numbers<[1], [0], [0], [1], [0, 0, 1, 1], [], []>} : vector<1x64xbf16>, vector<64x128xbf16>, vector<1x128xf32> -> vector<1x128xf32>
    %1073 = arith.addf %1067, %1072 : vector<1x128xf32>
    %c1_1103 = arith.constant 1 : index
    %c0_1104 = arith.constant 0 : index
    %1074 = vector.load %arg9[%c1_1103, %c0_1104] : memref<16x128xf32, #tpu.memory_space<vmem>>, vector<1x128xf32>
    %1075 = vector.extract_strided_slice %1074 {offsets = [0, 0], sizes = [1, 64], strides = [1, 1]} : vector<1x128xf32> to vector<1x64xf32>
    %1076 = arith.truncf %1075 : vector<1x64xf32> to vector<1x64xbf16>
    %c64_1105 = arith.constant 64 : index
    %c0_1106 = arith.constant 0 : index
    %1077 = vector.load %arg5[%c64_1105, %c0_1106] : memref<1024x128xbf16, #tpu.memory_space<vmem>>, vector<64x128xbf16>
    %cst_1107 = arith.constant dense<0.000000e+00> : vector<1x128xf32>
    %1078 = tpu.matmul %1076, %1077, %cst_1107 {dimension_numbers = #tpu.dot_dimension_numbers<[1], [0], [0], [1], [0, 0, 1, 1], [], []>} : vector<1x64xbf16>, vector<64x128xbf16>, vector<1x128xf32> -> vector<1x128xf32>
    %1079 = arith.addf %1073, %1078 : vector<1x128xf32>
    %c2_1108 = arith.constant 2 : index
    %c0_1109 = arith.constant 0 : index
    %1080 = vector.load %arg9[%c2_1108, %c0_1109] : memref<16x128xf32, #tpu.memory_space<vmem>>, vector<1x128xf32>
    %1081 = vector.extract_strided_slice %1080 {offsets = [0, 0], sizes = [1, 64], strides = [1, 1]} : vector<1x128xf32> to vector<1x64xf32>
    %1082 = arith.truncf %1081 : vector<1x64xf32> to vector<1x64xbf16>
    %c128_1110 = arith.constant 128 : index
    %c0_1111 = arith.constant 0 : index
    %1083 = vector.load %arg5[%c128_1110, %c0_1111] : memref<1024x128xbf16, #tpu.memory_space<vmem>>, vector<64x128xbf16>
    %cst_1112 = arith.constant dense<0.000000e+00> : vector<1x128xf32>
    %1084 = tpu.matmul %1082, %1083, %cst_1112 {dimension_numbers = #tpu.dot_dimension_numbers<[1], [0], [0], [1], [0, 0, 1, 1], [], []>} : vector<1x64xbf16>, vector<64x128xbf16>, vector<1x128xf32> -> vector<1x128xf32>
    %1085 = arith.addf %1079, %1084 : vector<1x128xf32>
    %c3_1113 = arith.constant 3 : index
    %c0_1114 = arith.constant 0 : index
    %1086 = vector.load %arg9[%c3_1113, %c0_1114] : memref<16x128xf32, #tpu.memory_space<vmem>>, vector<1x128xf32>
    %1087 = vector.extract_strided_slice %1086 {offsets = [0, 0], sizes = [1, 64], strides = [1, 1]} : vector<1x128xf32> to vector<1x64xf32>
    %1088 = arith.truncf %1087 : vector<1x64xf32> to vector<1x64xbf16>
    %c192_1115 = arith.constant 192 : index
    %c0_1116 = arith.constant 0 : index
    %1089 = vector.load %arg5[%c192_1115, %c0_1116] : memref<1024x128xbf16, #tpu.memory_space<vmem>>, vector<64x128xbf16>
    %cst_1117 = arith.constant dense<0.000000e+00> : vector<1x128xf32>
    %1090 = tpu.matmul %1088, %1089, %cst_1117 {dimension_numbers = #tpu.dot_dimension_numbers<[1], [0], [0], [1], [0, 0, 1, 1], [], []>} : vector<1x64xbf16>, vector<64x128xbf16>, vector<1x128xf32> -> vector<1x128xf32>
    %1091 = arith.addf %1085, %1090 : vector<1x128xf32>
    %c4_1118 = arith.constant 4 : index
    %c0_1119 = arith.constant 0 : index
    %1092 = vector.load %arg9[%c4_1118, %c0_1119] : memref<16x128xf32, #tpu.memory_space<vmem>>, vector<1x128xf32>
    %1093 = vector.extract_strided_slice %1092 {offsets = [0, 0], sizes = [1, 64], strides = [1, 1]} : vector<1x128xf32> to vector<1x64xf32>
    %1094 = arith.truncf %1093 : vector<1x64xf32> to vector<1x64xbf16>
    %c256_1120 = arith.constant 256 : index
    %c0_1121 = arith.constant 0 : index
    %1095 = vector.load %arg5[%c256_1120, %c0_1121] : memref<1024x128xbf16, #tpu.memory_space<vmem>>, vector<64x128xbf16>
    %cst_1122 = arith.constant dense<0.000000e+00> : vector<1x128xf32>
    %1096 = tpu.matmul %1094, %1095, %cst_1122 {dimension_numbers = #tpu.dot_dimension_numbers<[1], [0], [0], [1], [0, 0, 1, 1], [], []>} : vector<1x64xbf16>, vector<64x128xbf16>, vector<1x128xf32> -> vector<1x128xf32>
    %1097 = arith.addf %1091, %1096 : vector<1x128xf32>
    %c5_1123 = arith.constant 5 : index
    %c0_1124 = arith.constant 0 : index
    %1098 = vector.load %arg9[%c5_1123, %c0_1124] : memref<16x128xf32, #tpu.memory_space<vmem>>, vector<1x128xf32>
    %1099 = vector.extract_strided_slice %1098 {offsets = [0, 0], sizes = [1, 64], strides = [1, 1]} : vector<1x128xf32> to vector<1x64xf32>
    %1100 = arith.truncf %1099 : vector<1x64xf32> to vector<1x64xbf16>
    %c320_1125 = arith.constant 320 : index
    %c0_1126 = arith.constant 0 : index
    %1101 = vector.load %arg5[%c320_1125, %c0_1126] : memref<1024x128xbf16, #tpu.memory_space<vmem>>, vector<64x128xbf16>
    %cst_1127 = arith.constant dense<0.000000e+00> : vector<1x128xf32>
    %1102 = tpu.matmul %1100, %1101, %cst_1127 {dimension_numbers = #tpu.dot_dimension_numbers<[1], [0], [0], [1], [0, 0, 1, 1], [], []>} : vector<1x64xbf16>, vector<64x128xbf16>, vector<1x128xf32> -> vector<1x128xf32>
    %1103 = arith.addf %1097, %1102 : vector<1x128xf32>
    %c6_1128 = arith.constant 6 : index
    %c0_1129 = arith.constant 0 : index
    %1104 = vector.load %arg9[%c6_1128, %c0_1129] : memref<16x128xf32, #tpu.memory_space<vmem>>, vector<1x128xf32>
    %1105 = vector.extract_strided_slice %1104 {offsets = [0, 0], sizes = [1, 64], strides = [1, 1]} : vector<1x128xf32> to vector<1x64xf32>
    %1106 = arith.truncf %1105 : vector<1x64xf32> to vector<1x64xbf16>
    %c384_1130 = arith.constant 384 : index
    %c0_1131 = arith.constant 0 : index
    %1107 = vector.load %arg5[%c384_1130, %c0_1131] : memref<1024x128xbf16, #tpu.memory_space<vmem>>, vector<64x128xbf16>
    %cst_1132 = arith.constant dense<0.000000e+00> : vector<1x128xf32>
    %1108 = tpu.matmul %1106, %1107, %cst_1132 {dimension_numbers = #tpu.dot_dimension_numbers<[1], [0], [0], [1], [0, 0, 1, 1], [], []>} : vector<1x64xbf16>, vector<64x128xbf16>, vector<1x128xf32> -> vector<1x128xf32>
    %1109 = arith.addf %1103, %1108 : vector<1x128xf32>
    %c7_1133 = arith.constant 7 : index
    %c0_1134 = arith.constant 0 : index
    %1110 = vector.load %arg9[%c7_1133, %c0_1134] : memref<16x128xf32, #tpu.memory_space<vmem>>, vector<1x128xf32>
    %1111 = vector.extract_strided_slice %1110 {offsets = [0, 0], sizes = [1, 64], strides = [1, 1]} : vector<1x128xf32> to vector<1x64xf32>
    %1112 = arith.truncf %1111 : vector<1x64xf32> to vector<1x64xbf16>
    %c448_1135 = arith.constant 448 : index
    %c0_1136 = arith.constant 0 : index
    %1113 = vector.load %arg5[%c448_1135, %c0_1136] : memref<1024x128xbf16, #tpu.memory_space<vmem>>, vector<64x128xbf16>
    %cst_1137 = arith.constant dense<0.000000e+00> : vector<1x128xf32>
    %1114 = tpu.matmul %1112, %1113, %cst_1137 {dimension_numbers = #tpu.dot_dimension_numbers<[1], [0], [0], [1], [0, 0, 1, 1], [], []>} : vector<1x64xbf16>, vector<64x128xbf16>, vector<1x128xf32> -> vector<1x128xf32>
    %1115 = arith.addf %1109, %1114 : vector<1x128xf32>
    %c8_1138 = arith.constant 8 : index
    %c0_1139 = arith.constant 0 : index
    %1116 = vector.load %arg9[%c8_1138, %c0_1139] : memref<16x128xf32, #tpu.memory_space<vmem>>, vector<1x128xf32>
    %1117 = vector.extract_strided_slice %1116 {offsets = [0, 0], sizes = [1, 64], strides = [1, 1]} : vector<1x128xf32> to vector<1x64xf32>
    %1118 = arith.truncf %1117 : vector<1x64xf32> to vector<1x64xbf16>
    %c512_1140 = arith.constant 512 : index
    %c0_1141 = arith.constant 0 : index
    %1119 = vector.load %arg5[%c512_1140, %c0_1141] : memref<1024x128xbf16, #tpu.memory_space<vmem>>, vector<64x128xbf16>
    %cst_1142 = arith.constant dense<0.000000e+00> : vector<1x128xf32>
    %1120 = tpu.matmul %1118, %1119, %cst_1142 {dimension_numbers = #tpu.dot_dimension_numbers<[1], [0], [0], [1], [0, 0, 1, 1], [], []>} : vector<1x64xbf16>, vector<64x128xbf16>, vector<1x128xf32> -> vector<1x128xf32>
    %1121 = arith.addf %1115, %1120 : vector<1x128xf32>
    %c9_1143 = arith.constant 9 : index
    %c0_1144 = arith.constant 0 : index
    %1122 = vector.load %arg9[%c9_1143, %c0_1144] : memref<16x128xf32, #tpu.memory_space<vmem>>, vector<1x128xf32>
    %1123 = vector.extract_strided_slice %1122 {offsets = [0, 0], sizes = [1, 64], strides = [1, 1]} : vector<1x128xf32> to vector<1x64xf32>
    %1124 = arith.truncf %1123 : vector<1x64xf32> to vector<1x64xbf16>
    %c576_1145 = arith.constant 576 : index
    %c0_1146 = arith.constant 0 : index
    %1125 = vector.load %arg5[%c576_1145, %c0_1146] : memref<1024x128xbf16, #tpu.memory_space<vmem>>, vector<64x128xbf16>
    %cst_1147 = arith.constant dense<0.000000e+00> : vector<1x128xf32>
    %1126 = tpu.matmul %1124, %1125, %cst_1147 {dimension_numbers = #tpu.dot_dimension_numbers<[1], [0], [0], [1], [0, 0, 1, 1], [], []>} : vector<1x64xbf16>, vector<64x128xbf16>, vector<1x128xf32> -> vector<1x128xf32>
    %1127 = arith.addf %1121, %1126 : vector<1x128xf32>
    %c10_1148 = arith.constant 10 : index
    %c0_1149 = arith.constant 0 : index
    %1128 = vector.load %arg9[%c10_1148, %c0_1149] : memref<16x128xf32, #tpu.memory_space<vmem>>, vector<1x128xf32>
    %1129 = vector.extract_strided_slice %1128 {offsets = [0, 0], sizes = [1, 64], strides = [1, 1]} : vector<1x128xf32> to vector<1x64xf32>
    %1130 = arith.truncf %1129 : vector<1x64xf32> to vector<1x64xbf16>
    %c640_1150 = arith.constant 640 : index
    %c0_1151 = arith.constant 0 : index
    %1131 = vector.load %arg5[%c640_1150, %c0_1151] : memref<1024x128xbf16, #tpu.memory_space<vmem>>, vector<64x128xbf16>
    %cst_1152 = arith.constant dense<0.000000e+00> : vector<1x128xf32>
    %1132 = tpu.matmul %1130, %1131, %cst_1152 {dimension_numbers = #tpu.dot_dimension_numbers<[1], [0], [0], [1], [0, 0, 1, 1], [], []>} : vector<1x64xbf16>, vector<64x128xbf16>, vector<1x128xf32> -> vector<1x128xf32>
    %1133 = arith.addf %1127, %1132 : vector<1x128xf32>
    %c11_1153 = arith.constant 11 : index
    %c0_1154 = arith.constant 0 : index
    %1134 = vector.load %arg9[%c11_1153, %c0_1154] : memref<16x128xf32, #tpu.memory_space<vmem>>, vector<1x128xf32>
    %1135 = vector.extract_strided_slice %1134 {offsets = [0, 0], sizes = [1, 64], strides = [1, 1]} : vector<1x128xf32> to vector<1x64xf32>
    %1136 = arith.truncf %1135 : vector<1x64xf32> to vector<1x64xbf16>
    %c704_1155 = arith.constant 704 : index
    %c0_1156 = arith.constant 0 : index
    %1137 = vector.load %arg5[%c704_1155, %c0_1156] : memref<1024x128xbf16, #tpu.memory_space<vmem>>, vector<64x128xbf16>
    %cst_1157 = arith.constant dense<0.000000e+00> : vector<1x128xf32>
    %1138 = tpu.matmul %1136, %1137, %cst_1157 {dimension_numbers = #tpu.dot_dimension_numbers<[1], [0], [0], [1], [0, 0, 1, 1], [], []>} : vector<1x64xbf16>, vector<64x128xbf16>, vector<1x128xf32> -> vector<1x128xf32>
    %1139 = arith.addf %1133, %1138 : vector<1x128xf32>
    %c12_1158 = arith.constant 12 : index
    %c0_1159 = arith.constant 0 : index
    %1140 = vector.load %arg9[%c12_1158, %c0_1159] : memref<16x128xf32, #tpu.memory_space<vmem>>, vector<1x128xf32>
    %1141 = vector.extract_strided_slice %1140 {offsets = [0, 0], sizes = [1, 64], strides = [1, 1]} : vector<1x128xf32> to vector<1x64xf32>
    %1142 = arith.truncf %1141 : vector<1x64xf32> to vector<1x64xbf16>
    %c768_1160 = arith.constant 768 : index
    %c0_1161 = arith.constant 0 : index
    %1143 = vector.load %arg5[%c768_1160, %c0_1161] : memref<1024x128xbf16, #tpu.memory_space<vmem>>, vector<64x128xbf16>
    %cst_1162 = arith.constant dense<0.000000e+00> : vector<1x128xf32>
    %1144 = tpu.matmul %1142, %1143, %cst_1162 {dimension_numbers = #tpu.dot_dimension_numbers<[1], [0], [0], [1], [0, 0, 1, 1], [], []>} : vector<1x64xbf16>, vector<64x128xbf16>, vector<1x128xf32> -> vector<1x128xf32>
    %1145 = arith.addf %1139, %1144 : vector<1x128xf32>
    %c13_1163 = arith.constant 13 : index
    %c0_1164 = arith.constant 0 : index
    %1146 = vector.load %arg9[%c13_1163, %c0_1164] : memref<16x128xf32, #tpu.memory_space<vmem>>, vector<1x128xf32>
    %1147 = vector.extract_strided_slice %1146 {offsets = [0, 0], sizes = [1, 64], strides = [1, 1]} : vector<1x128xf32> to vector<1x64xf32>
    %1148 = arith.truncf %1147 : vector<1x64xf32> to vector<1x64xbf16>
    %c832_1165 = arith.constant 832 : index
    %c0_1166 = arith.constant 0 : index
    %1149 = vector.load %arg5[%c832_1165, %c0_1166] : memref<1024x128xbf16, #tpu.memory_space<vmem>>, vector<64x128xbf16>
    %cst_1167 = arith.constant dense<0.000000e+00> : vector<1x128xf32>
    %1150 = tpu.matmul %1148, %1149, %cst_1167 {dimension_numbers = #tpu.dot_dimension_numbers<[1], [0], [0], [1], [0, 0, 1, 1], [], []>} : vector<1x64xbf16>, vector<64x128xbf16>, vector<1x128xf32> -> vector<1x128xf32>
    %1151 = arith.addf %1145, %1150 : vector<1x128xf32>
    %c14_1168 = arith.constant 14 : index
    %c0_1169 = arith.constant 0 : index
    %1152 = vector.load %arg9[%c14_1168, %c0_1169] : memref<16x128xf32, #tpu.memory_space<vmem>>, vector<1x128xf32>
    %1153 = vector.extract_strided_slice %1152 {offsets = [0, 0], sizes = [1, 64], strides = [1, 1]} : vector<1x128xf32> to vector<1x64xf32>
    %1154 = arith.truncf %1153 : vector<1x64xf32> to vector<1x64xbf16>
    %c896_1170 = arith.constant 896 : index
    %c0_1171 = arith.constant 0 : index
    %1155 = vector.load %arg5[%c896_1170, %c0_1171] : memref<1024x128xbf16, #tpu.memory_space<vmem>>, vector<64x128xbf16>
    %cst_1172 = arith.constant dense<0.000000e+00> : vector<1x128xf32>
    %1156 = tpu.matmul %1154, %1155, %cst_1172 {dimension_numbers = #tpu.dot_dimension_numbers<[1], [0], [0], [1], [0, 0, 1, 1], [], []>} : vector<1x64xbf16>, vector<64x128xbf16>, vector<1x128xf32> -> vector<1x128xf32>
    %1157 = arith.addf %1151, %1156 : vector<1x128xf32>
    %c15_1173 = arith.constant 15 : index
    %c0_1174 = arith.constant 0 : index
    %1158 = vector.load %arg9[%c15_1173, %c0_1174] : memref<16x128xf32, #tpu.memory_space<vmem>>, vector<1x128xf32>
    %1159 = vector.extract_strided_slice %1158 {offsets = [0, 0], sizes = [1, 64], strides = [1, 1]} : vector<1x128xf32> to vector<1x64xf32>
    %1160 = arith.truncf %1159 : vector<1x64xf32> to vector<1x64xbf16>
    %c960_1175 = arith.constant 960 : index
    %c0_1176 = arith.constant 0 : index
    %1161 = vector.load %arg5[%c960_1175, %c0_1176] : memref<1024x128xbf16, #tpu.memory_space<vmem>>, vector<64x128xbf16>
    %cst_1177 = arith.constant dense<0.000000e+00> : vector<1x128xf32>
    %1162 = tpu.matmul %1160, %1161, %cst_1177 {dimension_numbers = #tpu.dot_dimension_numbers<[1], [0], [0], [1], [0, 0, 1, 1], [], []>} : vector<1x64xbf16>, vector<64x128xbf16>, vector<1x128xf32> -> vector<1x128xf32>
    %1163 = arith.addf %1157, %1162 : vector<1x128xf32>
    %1164 = arith.negf %1163 : vector<1x128xf32>
    %1165 = math.exp %1164 : vector<1x128xf32>
    %cst_1178 = arith.constant 1.000000e+00 : f32
    %1166 = vector.broadcast %cst_1178 : f32 to vector<1x128xf32>
    %1167 = arith.addf %1166, %1165 : vector<1x128xf32>
    %1168 = arith.divf %1166, %1167 : vector<1x128xf32>
    %c1_1179 = arith.constant 1 : index
    %c0_1180 = arith.constant 0 : index
    %c0_1181 = arith.constant 0 : index
    %1169 = vector.load %arg6[%c1_1179, %c0_1180, %c0_1181] : memref<2x1x128xf32, #tpu.memory_space<vmem>>, vector<1x1x128xf32>
    %1170 = vector.shape_cast %1169 : vector<1x1x128xf32> to vector<1x128xf32>
    %1171 = vector.shape_cast %1168 : vector<1x128xf32> to vector<1x1x128xf32>
    tpu.vector_store %arg6[%c1_1179, %c0_1180, %c0_1181], %1171 {strides = array<i32>} : memref<2x1x128xf32, #tpu.memory_space<vmem>>, vector<1x1x128xf32>,
    return
  }
  func.func @transform_0(%arg0: i32) -> (i32, i32, i32) {
    %c0_i32 = arith.constant 0 : i32
    %c0_i32_0 = arith.constant 0 : i32
    %c0_i32_1 = arith.constant 0 : i32
    return %arg0, %c0_i32, %c0_i32_0 : i32, i32, i32
  }
  func.func @transform_1(%arg0: i32) -> (i32, i32) {
    %c0_i32 = arith.constant 0 : i32
    %c0_i32_0 = arith.constant 0 : i32
    %c0_i32_1 = arith.constant 0 : i32
    return %c0_i32, %c0_i32_0 : i32, i32
  }
  func.func @transform_2(%arg0: i32) -> (i32, i32) {
    %c0_i32 = arith.constant 0 : i32
    %c0_i32_0 = arith.constant 0 : i32
    %c0_i32_1 = arith.constant 0 : i32
    return %c0_i32, %c0_i32_0 : i32, i32
  }
  func.func @transform_3(%arg0: i32) -> (i32, i32) {
    %c0_i32 = arith.constant 0 : i32
    %c0_i32_0 = arith.constant 0 : i32
    %c0_i32_1 = arith.constant 0 : i32
    return %c0_i32, %c0_i32_0 : i32, i32
  }
  func.func @transform_4(%arg0: i32) -> (i32, i32) {
    %c0_i32 = arith.constant 0 : i32
    %c0_i32_0 = arith.constant 0 : i32
    %c0_i32_1 = arith.constant 0 : i32
    return %c0_i32, %c0_i32_0 : i32, i32
  }
  func.func @transform_5(%arg0: i32) -> (i32, i32, i32) {
    %c0_i32 = arith.constant 0 : i32
    %c0_i32_0 = arith.constant 0 : i32
    %c0_i32_1 = arith.constant 0 : i32
    return %arg0, %c0_i32, %c0_i32_0 : i32, i32, i32
  }
}

</mosaic_0001>

<bundles_post_ra>
// kernel: discriminator_forward.1
= control target key start
LH: loop header
LB: loop body
LE: loop exit
PB: predicated region body
PF: predicated region fallthrough
CT: control target
= control target key end

     0   :  { %v11364_v0 = vmov 0.0   ;;  %vm11365_vm0 = vmmov 0   ;;  %vm151_vm1 = vcmask 130048   ;;  %s13716_s1 = inlined_call_operand.vmem [shape: bf16[16,128], index: 1, kind: input, shape index: {}]   ;;  %s13717_s0 = inlined_call_operand.vmem [shape: bf16[2,196,16], index: 0, kind: input, shape index: {}]   ;;  %s13718_s2 = inlined_call_operand.vmem [shape: bf16[256,128], index: 2, kind: input, shape index: {}]   ;;  %s13719_s3 = inlined_call_operand.vmem [shape: bf16[512,128], index: 3, kind: input, shape index: {}]   ;;  %s13720_s4 = inlined_call_operand.vmem [shape: bf16[1024,128], index: 4, kind: input, shape index: {}]   ;;  %s13721_s5 = inlined_call_operand.vmem [shape: f32[2,1,128], index: 5, kind: output, shape index: {}]  }
   0x1   :  { %10029 = vmatprep.subr.bf16.mxu0 %v11364_v0  ;;  %21 = vst [vmem:[#allocation2] sm:$0xff] %v11364_v0  ;;  %22 = vst [vmem:[#allocation2 + $0x8] sm:$0xff] %v11364_v0  ;;  %v11099_v1 = vld [vmem:[%s13716_s1] sm:$0xff]   ;;  %10031 = vmatprep.mubr.msk.bf16.mxu0 %vm11365_vm0, %v11364_v0  ;;  %v11101_v3 = vld [vmem:[%s13717_s0 + $0x8] sm:$0xff]  }
   0x2   :  { %23 = vst [vmem:[#allocation2 + $0x10] sm:$0xff] %v11364_v0  ;;  %24 = vst [vmem:[#allocation2 + $0x18] sm:$0xff] %v11364_v0  ;;  %v11100_v2 = vld [vmem:[%s13717_s0] sm:$0xff]   ;;  %10030 = vmatpush3.bf16.msra.mxu0 %v11099_v1  ;;  %v11102_v4 = vld [vmem:[%s13717_s0 + $0x10] sm:$0xff]  }
   0x3   :  { %25 = vst [vmem:[#allocation2 + $0x20] sm:$0x3f] %v11364_v0  ;;  %26 = vst [vmem:[#allocation2 + $0x34] sm:$0xf] %v11364_v0  ;;  %v11103_v5 = vld [vmem:[%s13717_s0 + $0x18] sm:$0xff]   ;;  %v11104_v6 = vld [vmem:[%s13717_s0 + $0x20] sm:$0xff]  }
   0x4   :  { %27 = vst [vmem:[#allocation2 + $0x46] sm:$0xf] %v11364_v0  ;;  %28 = vst [vmem:[#allocation2 + $0x58] sm:$0xf] %v11364_v0  ;;  %v11105_v7 = vld [vmem:[%s13717_s0 + $0x28] sm:$0xff]   ;;  %v11106_v8 = vld [vmem:[%s13717_s0 + $0x30] sm:$0xff]  }
   0x5   :  { %29 = vst [vmem:[#allocation2 + $0x6a] sm:$0xf] %v11364_v0  ;;  %30 = vst [vmem:[#allocation2 + $0x7c] sm:$0xf] %v11364_v0  ;;  %10032 = vmatmul.mubr.msk.bf16.vlgmr.msra.gmra.mxu0 %vm151_vm1, %v11100_v2  ;;  %v11107_v9 = vld [vmem:[%s13717_s0 + $0x38] sm:$0xff]   ;;  %v11108_v10 = vld [vmem:[%s13717_s0 + $0x40] sm:$0xff]  }
   0x6   :  { %31 = vst [vmem:[#allocation2 + $0x8e] sm:$0xf] %v11364_v0  ;;  %32 = vst [vmem:[#allocation2 + $0xa0] sm:$0xf] %v11364_v0  ;;  %10035 = vmatprep.mubr.msk.bf16.mxu0 %vm11365_vm0, %v11364_v0  ;;  %v11109_v11 = vld [vmem:[%s13717_s0 + $0x48] sm:$0xff]   ;;  %v11110_v12 = vld [vmem:[%s13717_s0 + $0x50] sm:$0xff]  }
   0x7   :  { %33 = vst [vmem:[#allocation2 + $0xb2] sm:$0xf] %v11364_v0  ;;  %34 = vst [vmem:[#allocation2 + $0xc4] sm:$0xf] %v11364_v0  ;;  %v11111_v13 = vld [vmem:[%s13717_s0 + $0x58] sm:$0xff]   ;;  %v11113_v15 = vld [vmem:[%s13718_s2 + $0x8] sm:$0xff]  }
   0x8   :  { %35 = vst [vmem:[#allocation2 + $0xd6] sm:$0xf] %v11364_v0  ;;  %36 = vst [vmem:[#allocation2 + $0xe8] sm:$0xf] %v11364_v0  ;;  %10083 = vmatprep.subr.bf16.mxu1 %v11113_v15  ;;  %v11114_v16 = vld [vmem:[%s13718_s2 + $0x38] sm:$0xff]   ;;  %v11521_v17 = vld [vmem:[%s13718_s2] sm:$0xff]  }
   0x9   :  { %37 = vst [vmem:[#allocation2 + $0xfa] sm:$0xf] %v11364_v0  ;;  %38 = vst [vmem:[#allocation2 + $0x10c] sm:$0xf] %v11364_v0  ;;  %10084 = vmatpush3.bf16.msra.mxu1 %v11113_v15  ;;  %10153 = vmatprep.subr.bf16.mxu0 %v11114_v16  ;;  %v11527_v18 = vld [vmem:[%s13718_s2 + $0x48] sm:$0xff]  }
   0xa   :  { %39 = vst [vmem:[#allocation2 + $0x11e] sm:$0xff] %v11364_v0  ;;  %40 = vst [vmem:[#allocation2 + $0x126] sm:$0xff] %v11364_v0  ;;  %v11112_v14 = vld [vmem:[%s13717_s0 + $0x60] ss:$0 sps:$4 sm:$0x33]   ;;  %10154 = vmatpush3.bf16.msra.mxu0 %v11114_v16  ;;  %10093 = vmatprep.subr.bf16.mxu1 %v11521_v17 }
   0xb   :  { %41 = vst [vmem:[#allocation2 + $0x12e] sm:$0xff] %v11364_v0  ;;  %42 = vst [vmem:[#allocation2 + $0x136] sm:$0xff] %v11364_v0  ;;  %10173 = vmatprep.subr.bf16.mxu0 %v11527_v18  ;;  %v459_v33 = vld [vmem:[#allocation2 + $0x1] ss:$2 sm:$0xff] }
   0xc   :  { %43 = vst [vmem:[#allocation2 + $0x13e] sm:$0x3f] %v11364_v0  ;;  %44 = vst [vmem:[#allocation3] sm:$0xff] %v11364_v0  ;;  %v1212_v44 = vld [vmem:[#allocation2 + $0x15] ss:$2 sm:$0xff] }
   0xd   :  { %45 = vst [vmem:[#allocation3 + $0x8] sm:$0x7] %v11364_v0  ;;  %46 = vst [vmem:[#allocation3 + $0x13] sm:$0x3] %v11364_v0  ;;  %10036 = vmatmul.mubr.msk.bf16.gmra.mxu0 %vm151_vm1, %v11101_v3 }
   0xe   :  { %47 = vst [vmem:[#allocation3 + $0x1d] sm:$0x3] %v11364_v0  ;;  %48 = vst [vmem:[#allocation3 + $0x27] sm:$0x3] %v11364_v0  ;;  %10039 = vmatprep.mubr.msk.bf16.mxu0 %vm11365_vm0, %v11364_v0 }
   0xf   :  { %49 = vst [vmem:[#allocation3 + $0x31] sm:$0x3] %v11364_v0  ;;  %50 = vst [vmem:[#allocation3 + $0x3b] sm:$0x3] %v11364_v0 }
  0x10   :  { %51 = vst [vmem:[#allocation3 + $0x45] sm:$0x3] %v11364_v0  ;;  %52 = vst [vmem:[#allocation3 + $0x4f] sm:$0x3] %v11364_v0 }
  0x11   :  { %53 = vst [vmem:[#allocation3 + $0x59] sm:$0xff] %v11364_v0  ;;  %54 = vst [vmem:[#allocation3 + $0x61] sm:$0x7] %v11364_v0 }
  0x15   :  { %10040 = vmatmul.mubr.msk.bf16.gmra.mxu0 %vm151_vm1, %v11102_v4 }
  0x16   :  { %10043 = vmatprep.mubr.msk.bf16.mxu0 %vm11365_vm0, %v11364_v0 }
  0x1d   :  { %10044 = vmatmul.mubr.msk.bf16.gmra.mxu0 %vm151_vm1, %v11103_v5 }
  0x1e   :  { %10047 = vmatprep.mubr.msk.bf16.mxu0 %vm11365_vm0, %v11364_v0 }
  0x25   :  { %10048 = vmatmul.mubr.msk.bf16.gmra.mxu0 %vm151_vm1, %v11104_v6 }
  0x26   :  { %10051 = vmatprep.mubr.msk.bf16.mxu0 %vm11365_vm0, %v11364_v0 }
  0x2d   :  { %10052 = vmatmul.mubr.msk.bf16.gmra.mxu0 %vm151_vm1, %v11105_v7 }
  0x2e   :  { %10055 = vmatprep.mubr.msk.bf16.mxu0 %vm11365_vm0, %v11364_v0 }
  0x35   :  { %10056 = vmatmul.mubr.msk.bf16.gmra.mxu0 %vm151_vm1, %v11106_v8 }
  0x36   :  { %10059 = vmatprep.mubr.msk.bf16.mxu0 %vm11365_vm0, %v11364_v0 }
  0x3d   :  { %10060 = vmatmul.mubr.msk.bf16.gmra.mxu0 %vm151_vm1, %v11107_v9 }
  0x3e   :  { %10063 = vmatprep.mubr.msk.bf16.mxu0 %vm11365_vm0, %v11364_v0 }
  0x45   :  { %10064 = vmatmul.mubr.msk.bf16.gmra.mxu0 %vm151_vm1, %v11108_v10  ;;  %v11547_v10 = vld [vmem:[%s13718_s2 + $0x10] sm:$0xff]  }
  0x46   :  { %10067 = vmatprep.mubr.msk.bf16.mxu0 %vm11365_vm0, %v11364_v0 }
  0x4d   :  { %10068 = vmatmul.mubr.msk.bf16.gmra.mxu0 %vm151_vm1, %v11109_v11 }
  0x4e   :  { %10071 = vmatprep.mubr.msk.bf16.mxu0 %vm11365_vm0, %v11364_v0 }
  0x55   :  { %10072 = vmatmul.mubr.msk.bf16.gmra.mxu0 %vm151_vm1, %v11110_v12 }
  0x56   :  { %10075 = vmatprep.mubr.msk.bf16.mxu0 %vm11365_vm0, %v11364_v0 }
  0x5d   :  { %10076 = vmatmul.mubr.msk.bf16.gmra.mxu0 %vm151_vm1, %v11111_v13 }
  0x5e   :  { %10079 = vmatprep.mubr.msk.bf16.mxu0 %vm11365_vm0, %v11364_v0 }
  0x65   :  { %10080 = vmatmul.mubr.msk.bf16.gmra.mxu0 %vm151_vm1, %v11112_v14 }
  0xc5   :  { %v225_v19 = vpop.f32.mrf.mxu0 }
  0xc6   :  { %vm327_vm2 = vcmp.gt.f32.partialorder %v225_v19, 0.0  ;;  %v352_v20 = vmul.f32 0.2, %v225_v19 }
  0xc7   :  { %v10033_v21 = vpop.f32.mrf.mxu0 }
  0xc8   :  { %v377_v22 = vsel %vm327_vm2, %v225_v19, %v352_v20 }
  0xc9   :  { %402 = vst [vmem:[#allocation2 + $0x26] sm:$0xff] %v377_v22  ;;  %v228_v23 = vpop.f32.mrf.mxu0 }
  0xca   :  { %vm328_vm3 = vcmp.gt.f32.partialorder %v228_v23, 0.0  ;;  %v353_v24 = vmul.f32 0.2, %v228_v23 }
  0xcb   :  { %v10034_v25 = vpop.f32.mrf.mxu0 }
  0xcc   :  { %v378_v26 = vsel %vm328_vm3, %v228_v23, %v353_v24 }
  0xcd   :  { %403 = vst [vmem:[#allocation2 + $0x2e] sm:$0x3f] %v378_v26  ;;  %404 = vst [vmem:[#allocation2 + $0x32] sm:$0xc0] %v378_v26  ;;  %v233_v27 = vpop.f32.mrf.mxu0 }
  0xce   :  { %vm329_vm4 = vcmp.gt.f32.partialorder %v233_v27, 0.0  ;;  %v354_v28 = vmul.f32 0.2, %v233_v27 }
  0xcf   :  { %v10037_v29 = vpop.f32.mrf.mxu0 }
  0xd0   :  { %v379_v30 = vsel %vm329_vm4, %v233_v27, %v354_v28 }
  0xd1   :  { %405 = vst [vmem:[#allocation2 + $0x3a] sm:$0xff] %v379_v30  ;;  %v236_v31 = vpop.f32.mrf.mxu0 }
  0xd2   :  { %vm330_vm5 = vcmp.gt.f32.partialorder %v236_v31, 0.0  ;;  %v355_v32 = vmul.f32 0.2, %v236_v31 }
  0xd3   :  { %v10038_v34 = vpop.f32.mrf.mxu0 }
  0xd4   :  { %v380_v35 = vsel %vm330_vm5, %v236_v31, %v355_v32  ;;  %v11530_v36 = vld [vmem:[#allocation2 + $0x25] ss:$2 sm:$0xff] }
  0xd5   :  { %406 = vst [vmem:[#allocation2 + $0x42] ss:$8 sps:$4 sm:$0xff] %v380_v35   ;;  %v241_v37 = vpop.f32.mrf.mxu0  ;;  %v474_v38 = vpack.c.bf16 %v11530_v36, %v459_v33 }
  0xd6   :  { %vm331_vm6 = vcmp.gt.f32.partialorder %v241_v37, 0.0  ;;  %v356_v39 = vmul.f32 0.2, %v241_v37 }
  0xd7   :  { %v10041_v40 = vpop.f32.mrf.mxu0  ;;  %10085 = vmatprep.mubr.msk.bf16.mxu1 %vm151_vm1, %v474_v38 }
  0xd8   :  { %v381_v41 = vsel %vm331_vm6, %v241_v37, %v356_v39 }
  0xd9   :  { %408 = vst [vmem:[#allocation2 + $0x4e] sm:$0xff] %v381_v41  ;;  %v244_v42 = vpop.f32.mrf.mxu0 }
  0xda   :  { %vm332_vm7 = vcmp.gt.f32.partialorder %v244_v42, 0.0  ;;  %v357_v43 = vmul.f32 0.2, %v244_v42 }
  0xdb   :  { %v10042_v45 = vpop.f32.mrf.mxu0 }
  0xdc   :  { %v382_v46 = vsel %vm332_vm7, %v244_v42, %v357_v43  ;;  %v11534_v47 = vld [vmem:[#allocation2 + $0x39] ss:$2 sm:$0xff] }
  0xdd   :  { %409 = vst [vmem:[#allocation2 + $0x56] sm:$0x3] %v382_v46  ;;  %410 = vst [vmem:[#allocation2 + $0x5a] sm:$0xfc] %v382_v46  ;;  %v249_v48 = vpop.f32.mrf.mxu0  ;;  %v1227_v49 = vpack.c.bf16 %v11534_v47, %v1212_v44 }
  0xde   :  { %vm333_vm8 = vcmp.gt.f32.partialorder %v249_v48, 0.0  ;;  %v358_v50 = vmul.f32 0.2, %v249_v48 }
  0xdf   :  { %v10045_v51 = vpop.f32.mrf.mxu0  ;;  %10155 = vmatprep.mubr.msk.bf16.mxu0 %vm151_vm1, %v1227_v49 }
  0xe0   :  { %v383_v52 = vsel %vm333_vm8, %v249_v48, %v358_v50 }
  0xe1   :  { %411 = vst [vmem:[#allocation2 + $0x62] sm:$0xff] %v383_v52  ;;  %v252_v53 = vpop.f32.mrf.mxu0 }
  0xe2   :  { %vm334_vm9 = vcmp.gt.f32.partialorder %v252_v53, 0.0  ;;  %v359_v54 = vmul.f32 0.2, %v252_v53 }
  0xe3   :  { %v10046_v55 = vpop.f32.mrf.mxu0 }
  0xe4   :  { %v384_v56 = vsel %vm334_vm9, %v252_v53, %v359_v54  ;;  %v11538_v6 = vld [vmem:[#allocation2 + $0x49] ss:$2 sm:$0xff] }
  0xe5   :  { %412 = vst [vmem:[#allocation2 + $0x6e] sm:$0xff] %v384_v56  ;;  %v257_v57 = vpop.f32.mrf.mxu0 }
  0xe6   :  { %vm335_vm10 = vcmp.gt.f32.partialorder %v257_v57, 0.0  ;;  %v360_v58 = vmul.f32 0.2, %v257_v57 }
  0xe7   :  { %v10049_v59 = vpop.f32.mrf.mxu0 }
  0xe8   :  { %v385_v60 = vsel %vm335_vm10, %v257_v57, %v360_v58  ;;  %v11552_v20 = vld [vmem:[#allocation2 + $0x5d] ss:$2 sm:$0xff] }
  0xe9   :  { %413 = vst [vmem:[#allocation2 + $0x76] sm:$0x3f] %v385_v60  ;;  %414 = vst [vmem:[#allocation2 + $0x7a] sm:$0xc0] %v385_v60  ;;  %v260_v61 = vpop.f32.mrf.mxu0 }
  0xea   :  { %vm336_vm11 = vcmp.gt.f32.partialorder %v260_v61, 0.0  ;;  %v361_v62 = vmul.f32 0.2, %v260_v61 }
  0xeb   :  { %v10050_v63 = vpop.f32.mrf.mxu0 }
  0xec   :  { %v386_v1 = vsel %vm336_vm11, %v260_v61, %v361_v62 }
  0xed   :  { %415 = vst [vmem:[#allocation2 + $0x82] sm:$0xff] %v386_v1  ;;  %v265_v2 = vpop.f32.mrf.mxu0 }
  0xee   :  { %vm337_vm12 = vcmp.gt.f32.partialorder %v265_v2, 0.0  ;;  %v362_v3 = vmul.f32 0.2, %v265_v2 }
  0xef   :  { %v10053_v4 = vpop.f32.mrf.mxu0 }
  0xf0   :  { %v387_v5 = vsel %vm337_vm12, %v265_v2, %v362_v3  ;;  %v11540_v7 = vld [vmem:[#allocation2 + $0x6d] ss:$2 sm:$0xff] }
  0xf1   :  { %416 = vst [vmem:[#allocation2 + $0x8a] ss:$8 sps:$4 sm:$0xff] %v387_v5   ;;  %v268_v8 = vpop.f32.mrf.mxu0  ;;  %v475_v9 = vpack.c.bf16 %v11540_v7, %v11538_v6 }
  0xf2   :  { %vm338_vm13 = vcmp.gt.f32.partialorder %v268_v8, 0.0  ;;  %v363_v11 = vmul.f32 0.2, %v268_v8 }
  0xf3   :  { %v10054_v12 = vpop.f32.mrf.mxu0  ;;  %10086 = vmatmul.mubr.msk.bf16.vlgmr.msra.gmra.mxu1 %vm151_vm1, %v475_v9 }
  0xf4   :  { %v388_v13 = vsel %vm338_vm13, %v268_v8, %v363_v11  ;;  %10094 = vmatpush3.bf16.msra.mxu1 %v11521_v17  ;;  %v11561_v17 = vld [vmem:[%s13718_s2 + $0x58] sm:$0xff]  }
  0xf5   :  { %418 = vst [vmem:[#allocation2 + $0x96] sm:$0xff] %v388_v13  ;;  %v273_v14 = vpop.f32.mrf.mxu0  ;;  %10103 = vmatprep.subr.bf16.mxu1 %v11547_v10 }
  0xf6   :  { %vm339_vm14 = vcmp.gt.f32.partialorder %v273_v14, 0.0  ;;  %v364_v15 = vmul.f32 0.2, %v273_v14 }
  0xf7   :  { %v10057_v16 = vpop.f32.mrf.mxu0 }
  0xf8   :  { %v389_v19 = vsel %vm339_vm14, %v273_v14, %v364_v15  ;;  %v11554_v21 = vld [vmem:[#allocation2 + $0x81] ss:$2 sm:$0xff]  ;;  %v437_v16 = vld [vmem:[#allocation2] ss:$2 sm:$0xff] }
  0xf9   :  { %419 = vst [vmem:[#allocation2 + $0x9e] sm:$0x3] %v389_v19  ;;  %420 = vst [vmem:[#allocation2 + $0xa2] sm:$0xfc] %v389_v19  ;;  %v276_v22 = vpop.f32.mrf.mxu0  ;;  %v1228_v23 = vpack.c.bf16 %v11554_v21, %v11552_v20  ;;  %v11580_v19 = vld [vmem:[#allocation2 + $0x24] ss:$2 sm:$0xff] }
  0xfa   :  { %vm340_vm15 = vcmp.gt.f32.partialorder %v276_v22, 0.0  ;;  %v365_v24 = vmul.f32 0.2, %v276_v22 }
  0xfb   :  { %v10058_v25 = vpop.f32.mrf.mxu0  ;;  %10156 = vmatmul.mubr.msk.bf16.vlgmr.msra.gmra.mxu0 %vm151_vm1, %v1228_v23 }
  0xfc   :  { %v390_v26 = vsel %vm340_vm15, %v276_v22, %v365_v24  ;;  %10174 = vmatpush3.bf16.msra.mxu0 %v11527_v18 }
  0xfd   :  { %421 = vst [vmem:[#allocation2 + $0xaa] sm:$0xff] %v390_v26  ;;  %v281_v27 = vpop.f32.mrf.mxu0  ;;  %10193 = vmatprep.subr.bf16.mxu0 %v11561_v17 }
  0xfe   :  { %vm341_vm2 = vcmp.gt.f32.partialorder %v281_v27, 0.0  ;;  %v366_v28 = vmul.f32 0.2, %v281_v27 }
  0xff   :  { %v10061_v29 = vpop.f32.mrf.mxu0 }
 0x100   :  { %v391_v30 = vsel %vm341_vm2, %v281_v27, %v366_v28  ;;  %v11566_v43 = vld [vmem:[#allocation2 + $0x91] ss:$2 sm:$0xff]  ;;  %v452_v28 = vpack.c.bf16 %v11580_v19, %v437_v16 }
 0x101   :  { %422 = vst [vmem:[#allocation2 + $0xb6] sm:$0xff] %v391_v30  ;;  %v284_v31 = vpop.f32.mrf.mxu0  ;;  %v11585_v30 = vld [vmem:[#allocation2 + $0x6c] ss:$2 sm:$0xff] }
 0x102   :  { %vm342_vm3 = vcmp.gt.f32.partialorder %v284_v31, 0.0  ;;  %v367_v32 = vmul.f32 0.2, %v284_v31 }
 0x103   :  { %v10062_v33 = vpop.f32.mrf.mxu0 }
 0x104   :  { %v392_v34 = vsel %vm342_vm3, %v284_v31, %v367_v32  ;;  %v11573_v55 = vld [vmem:[#allocation2 + $0xa5] ss:$2 sm:$0xff]  ;;  %v11589_v32 = vld [vmem:[#allocation2 + $0x48] ss:$2 sm:$0xff] }
 0x105   :  { %423 = vst [vmem:[#allocation2 + $0xbe] sm:$0x3f] %v392_v34  ;;  %424 = vst [vmem:[#allocation2 + $0xc2] sm:$0xc0] %v392_v34  ;;  %v289_v35 = vpop.f32.mrf.mxu0 }
 0x106   :  { %vm343_vm4 = vcmp.gt.f32.partialorder %v289_v35, 0.0  ;;  %v368_v37 = vmul.f32 0.2, %v289_v35 }
 0x107   :  { %v10065_v18 = vpop.f32.mrf.mxu0 }
 0x108   :  { %v393_v38 = vsel %vm343_vm4, %v289_v35, %v368_v37  ;;  %v453_v35 = vpack.c.bf16 %v11585_v30, %v11589_v32  ;;  %v11599_v18 = vld [vmem:[#allocation2 + $0x90] ss:$2 sm:$0xff] }
 0x109   :  { %425 = vst [vmem:[#allocation2 + $0xca] sm:$0xff] %v393_v38  ;;  %v292_v39 = vpop.f32.mrf.mxu0  ;;  %v11118_v38 = vld [vmem:[%s13718_s2 + $0x18] sm:$0xff]  }
 0x10a   :  { %vm344_vm5 = vcmp.gt.f32.partialorder %v292_v39, 0.0  ;;  %v369_v40 = vmul.f32 0.2, %v292_v39 }
 0x10b   :  { %v10066_v41 = vpop.f32.mrf.mxu0 }
 0x10c   :  { %v394_v42 = vsel %vm344_vm5, %v292_v39, %v369_v40  ;;  %v11568_v44 = vld [vmem:[#allocation2 + $0xb5] ss:$2 sm:$0xff]  ;;  %v11587_v31 = vld [vmem:[#allocation2 + $0xb4] ss:$2 sm:$0xff]  ;;  %v1425_v40 = vpack.c.bf16 %v11538_v6, %v11530_v36  ;;  %v1426_v36 = vpack.c.bf16 %v11566_v43, %v11540_v7 }
 0x10d   :  { %426 = vst [vmem:[#allocation2 + $0xd2] ss:$8 sps:$4 sm:$0xff] %v394_v42   ;;  %v297_v45 = vpop.f32.mrf.mxu0  ;;  %v476_v46 = vpack.c.bf16 %v11568_v44, %v11566_v43  ;;  %v454_v39 = vpack.c.bf16 %v11587_v31, %v11599_v18  ;;  %v647_v42 = vld [vmem:[#allocation2 + $0x2] ss:$2 sm:$0xff]  ;;  %v1424_v7 = vld [vmem:[#allocation2 + $0x121] ss:$2 sm:$0xff] }
 0x10e   :  { %vm345_vm6 = vcmp.gt.f32.partialorder %v297_v45, 0.0  ;;  %v370_v48 = vmul.f32 0.2, %v297_v45  ;;  %v11635_v43 = vld [vmem:[#allocation2 + $0xb6] ss:$2 sm:$0xff] }
 0x10f   :  { %v10069_v49 = vpop.f32.mrf.mxu0  ;;  %10089 = vmatprep.mubr.msk.bf16.mxu1 %vm151_vm1, %v476_v46 }
 0x110   :  { %v395_v50 = vsel %vm345_vm6, %v297_v45, %v370_v48  ;;  %v11615_v45 = vld [vmem:[#allocation2 + $0x26] ss:$2 sm:$0xff] }
 0x111   :  { %428 = vst [vmem:[#allocation2 + $0xde] sm:$0xff] %v395_v50  ;;  %v300_v51 = vpop.f32.mrf.mxu0  ;;  %v662_v6 = vpack.c.bf16 %v11615_v45, %v647_v42  ;;  %v11121_v49 = vld [vmem:[%s13718_s2 + $0x68] sm:$0xff]  }
 0x112   :  { %vm346_vm7 = vcmp.gt.f32.partialorder %v300_v51, 0.0  ;;  %v371_v52 = vmul.f32 0.2, %v300_v51  ;;  %v11633_v50 = vld [vmem:[#allocation2 + $0x6e] ss:$2 sm:$0xff] }
 0x113   :  { %v10070_v53 = vpop.f32.mrf.mxu0 }
 0x114   :  { %v396_v54 = vsel %vm346_vm7, %v300_v51, %v371_v52  ;;  %v11575_v56 = vld [vmem:[#allocation2 + $0xc9] ss:$2 sm:$0xff]  ;;  %vm2161_vm7 = vcmask 1043456  }
 0x115   :  { %429 = vst [vmem:[#allocation2 + $0xe6] sm:$0x3] %v396_v54  ;;  %430 = vst [vmem:[#allocation2 + $0xea] sm:$0xfc] %v396_v54  ;;  %v305_v57 = vpop.f32.mrf.mxu0  ;;  %v1229_v58 = vpack.c.bf16 %v11575_v56, %v11573_v55  ;;  %v764_v51 = vld [vmem:[#allocation2 + $0x4b] ss:$2 sm:$0xff] }
 0x116   :  { %vm347_vm8 = vcmp.gt.f32.partialorder %v305_v57, 0.0  ;;  %v372_v59 = vmul.f32 0.2, %v305_v57  ;;  %v11641_v54 = vld [vmem:[#allocation2 + $0x92] ss:$2 sm:$0xff] }
 0x117   :  { %v10073_v60 = vpop.f32.mrf.mxu0  ;;  %10159 = vmatprep.mubr.msk.bf16.mxu0 %vm151_vm1, %v1229_v58  ;;  %v762_v58 = vld [vmem:[#allocation2 + $0x27] ss:$2 sm:$0xff] }
 0x118   :  { %v397_v61 = vsel %vm347_vm8, %v305_v57, %v372_v59  ;;  %v11120_v57 = vld [vmem:[%s13718_s2 + $0x20] sm:$0xff]   ;;  %v1623_v59 = vpack.c.bf16 %v764_v51, %v762_v58  ;;  %vm2202_vm8 = vcmask 261120  }
 0x119   :  { %431 = vst [vmem:[#allocation2 + $0xf2] sm:$0xff] %v397_v61  ;;  %v308_v62 = vpop.f32.mrf.mxu0  ;;  %v768_v61 = vld [vmem:[#allocation2 + $0x93] ss:$2 sm:$0xff] }
 0x11a   :  { %vm348_vm9 = vcmp.gt.f32.partialorder %v308_v62, 0.0  ;;  %v373_v63 = vmul.f32 0.2, %v308_v62 }
 0x11b   :  { %v10074_v1 = vpop.f32.mrf.mxu0 }
 0x11c   :  { %v398_v2 = vsel %vm348_vm9, %v308_v62, %v373_v63  ;;  %v471_v24 = vld [vmem:[#allocation2 + $0xd9] ss:$2 sm:$0xff]  ;;  %v11617_v46 = vld [vmem:[#allocation2 + $0xd8] ss:$2 sm:$0xff] }
 0x11d   :  { %432 = vst [vmem:[#allocation2 + $0xfe] sm:$0xff] %v398_v2  ;;  %v313_v3 = vpop.f32.mrf.mxu0  ;;  %v760_v62 = vld [vmem:[#allocation2 + $0x3] ss:$2 sm:$0xff]  ;;  %v11654_v1 = vld [vmem:[#allocation2 + $0xda] ss:$2 sm:$0xff] }
 0x11e   :  { %vm349_vm10 = vcmp.gt.f32.partialorder %v313_v3, 0.0  ;;  %v374_v4 = vmul.f32 0.2, %v313_v3  ;;  %v772_v63 = vld [vmem:[#allocation2 + $0xdb] ss:$2 sm:$0xff] }
 0x11f   :  { %v10077_v5 = vpop.f32.mrf.mxu0  ;;  %v766_v2 = vld [vmem:[#allocation2 + $0x6f] ss:$2 sm:$0xff] }
 0x120   :  { %v399_v8 = vsel %vm349_vm10, %v313_v3, %v374_v4  ;;  %v11591_v33 = vld [vmem:[#allocation2 + $0xed] ss:$2 sm:$0xff]  ;;  %v1624_v4 = vpack.c.bf16 %v768_v61, %v766_v2 }
 0x121   :  { %433 = vst [vmem:[#allocation2 + $0x106] sm:$0x3f] %v399_v8  ;;  %434 = vst [vmem:[#allocation2 + $0x10a] sm:$0xc0] %v399_v8  ;;  %v316_v9 = vpop.f32.mrf.mxu0  ;;  %v770_v5 = vld [vmem:[#allocation2 + $0xb7] ss:$2 sm:$0xff]  ;;  %v775_v8 = vpack.c.bf16 %v762_v58, %v760_v62 }
 0x122   :  { %vm350_vm11 = vcmp.gt.f32.partialorder %v316_v9, 0.0  ;;  %v375_v11 = vmul.f32 0.2, %v316_v9  ;;  %v986_v58 = vld [vmem:[#allocation2 + $0x13] ss:$2 sm:$0xff] }
 0x123   :  { %v10078_v12 = vpop.f32.mrf.mxu0 }
 0x124   :  { %v400_v13 = vsel %vm350_vm11, %v316_v9, %v375_v11  ;;  %v1625_v9 = vpack.c.bf16 %v772_v63, %v770_v5  ;;  %v11123_v11 = vld [vmem:[%s13718_s2 + $0x78] sm:$0xff]   ;;  %vm3415_vm11 = vcmask 523264  }
 0x125   :  { %435 = vst [vmem:[#allocation2 + $0x112] sm:$0xff] %v400_v13  ;;  %v321_v14 = vpop.f32.mrf.mxu0  ;;  %v1622_v13 = vld [vmem:[#allocation2 + $0x123] ss:$2 sm:$0xff] }
 0x126   :  { %vm351_vm12 = vcmp.gt.f32.partialorder %v321_v14, 0.0  ;;  %v376_v15 = vmul.f32 0.2, %v321_v14 }
 0x127   :  { %v10081_v22 = vpop.f32.mrf.mxu0 }
 0x128   :  { %v401_v23 = vsel %vm351_vm12, %v321_v14, %v376_v15  ;;  %v473_v25 = vld [vmem:[#allocation2 + $0xfd] ss:$2 sm:$0xff]  ;;  %v11613_v41 = vld [vmem:[#allocation2 + $0xfc] ss:$2 sm:$0xff]  ;;  %v776_v15 = vpack.c.bf16 %v766_v2, %v764_v51 }
 0x129   :  { %436 = vst [vmem:[#allocation2 + $0x11a] sm:$0xf] %v401_v23  ;;  %v477_v26 = vpack.c.bf16 %v473_v25, %v471_v24  ;;  %v324_v27 = vpop.f32.mrf.mxu0  ;;  %v455_v48 = vpack.c.bf16 %v11613_v41, %v11617_v46  ;;  %v1428_v53 = vpack.c.bf16 %v1424_v7, %v473_v25  ;;  %v11652_v60 = vld [vmem:[#allocation2 + $0xfe] ss:$2 sm:$0xff]  ;;  %v774_v12 = vld [vmem:[#allocation2 + $0xff] ss:$2 sm:$0xff]  ;;  %v777_v23 = vpack.c.bf16 %v770_v5, %v768_v61 }
 0x12a   :  { %v665_v3 = vpack.c.bf16 %v11652_v60, %v11654_v1  ;;  %v11665_v14 = vld [vmem:[#allocation2 + $0x5b] ss:$2 sm:$0xff]  ;;  %v1626_v16 = vpack.c.bf16 %v1622_v13, %v774_v12  ;;  %v873_v27 = vld [vmem:[#allocation2 + $0x12] ss:$2 sm:$0xff]  ;;  %v2020_v61 = vpack.c.bf16 %v11573_v55, %v11554_v21 }
 0x12b   :  { %10090 = vmatmul.mubr.msk.bf16.gmra.mxu1 %vm151_vm1, %v477_v26  ;;  %v10082_v29 = vpop.f32.mrf.mxu0  ;;  %v11122_v22 = vld [vmem:[%s13718_s2 + $0x28] sm:$0xff]   ;;  %v11125_v55 = vld [vmem:[%s13718_s2 + $0x40] sm:$0xff]  }
 0x12c   :  { %10095 = vmatprep.mubr.msk.bf16.mxu1 %vm151_vm1, %v452_v28  ;;  %v994_v26 = vld [vmem:[#allocation2 + $0xa3] ss:$2 sm:$0xff]  ;;  %v11675_v28 = vld [vmem:[#allocation2 + $0x36] ss:$2 sm:$0xff] }
 0x12d   :  { %v998_v29 = vld [vmem:[#allocation2 + $0xeb] ss:$2 sm:$0xff]  ;;  %v1107_v13 = vld [vmem:[#allocation2 + $0xa4] ss:$2 sm:$0xff] }
 0x130   :  { %v11593_v34 = vld [vmem:[#allocation2 + $0x111] ss:$2 sm:$0xff] }
 0x131   :  { %v1230_v37 = vpack.c.bf16 %v11593_v34, %v11591_v33 }
 0x133   :  { %10096 = vmatmul.mubr.msk.bf16.vlgmr.msra.gmra.mxu1 %vm151_vm1, %v453_v35  ;;  %10160 = vmatmul.mubr.msk.bf16.gmra.mxu0 %vm151_vm1, %v1230_v37  ;;  %v992_v35 = vld [vmem:[#allocation2 + $0x7f] ss:$2 sm:$0xff]  ;;  %v778_v37 = vpack.c.bf16 %v774_v12, %v772_v63 }
 0x134   :  { %10099 = vmatprep.mubr.msk.bf16.mxu1 %vm151_vm1, %v454_v39  ;;  %10104 = vmatpush3.bf16.msra.mxu1 %v11547_v10  ;;  %v1427_v10 = vpack.c.bf16 %v471_v24, %v11568_v44  ;;  %v11637_v44 = vld [vmem:[#allocation2 + $0x4a] ss:$2 sm:$0xff]  ;;  %v988_v24 = vld [vmem:[#allocation2 + $0x37] ss:$2 sm:$0xff]  ;;  %v996_v39 = vld [vmem:[#allocation2 + $0xc7] ss:$2 sm:$0xff]  ;;  %v1002_v2 = vpack.c.bf16 %v992_v35, %v11665_v14 }
 0x135   :  { %10175 = vmatprep.mubr.msk.bf16.mxu0 %vm151_vm1, %v1425_v40  ;;  %10113 = vmatprep.subr.bf16.mxu1 %v11118_v38  ;;  %v663_v52 = vpack.c.bf16 %v11633_v50, %v11637_v44  ;;  %v1821_v25 = vpack.c.bf16 %v11665_v14, %v988_v24  ;;  %v888_v40 = vpack.c.bf16 %v11675_v28, %v873_v27  ;;  %v11126_v14 = vld [vmem:[%s13718_s2 + $0x50] sm:$0xff]  }
 0x136   :  { %v1823_v42 = vpack.c.bf16 %v998_v29, %v996_v39  ;;  %v1001_v63 = vpack.c.bf16 %v988_v24, %v986_v58  ;;  %v1326_v24 = vpack.c.bf16 %v11589_v32, %v11580_v19  ;;  %v1328_v27 = vpack.c.bf16 %v11617_v46, %v11587_v31  ;;  %v1325_v19 = vld [vmem:[#allocation2 + $0x120] ss:$2 sm:$0xff]  ;;  %v11128_v31 = vld [vmem:[%s13718_s2 + $0x70] sm:$0xff]  }
 0x137   :  { %v1329_v32 = vpack.c.bf16 %v1325_v19, %v11613_v41  ;;  %v1523_v41 = vld [vmem:[#allocation2 + $0x122] ss:$2 sm:$0xff] }
 0x13b   :  { %10100 = vmatmul.mubr.msk.bf16.gmra.mxu1 %vm151_vm1, %v455_v48  ;;  %10176 = vmatmul.mubr.msk.bf16.vlgmr.msra.gmra.mxu0 %vm151_vm1, %v1426_v36  ;;  %v11682_v48 = vld [vmem:[#allocation2 + $0x7e] ss:$2 sm:$0xff]  ;;  %v1000_v36 = vld [vmem:[#allocation2 + $0x10f] ss:$2 sm:$0xff] }
 0x13c   :  { %10105 = vmatprep.mubr.msk.bf16.mxu1 %vm151_vm1, %v662_v6  ;;  %10179 = vmatprep.mubr.msk.bf16.mxu0 %vm151_vm1, %v1427_v10  ;;  %v1820_v6 = vld [vmem:[#allocation2 + $0x133] ss:$2 sm:$0xff]  ;;  %v11685_v10 = vld [vmem:[#allocation2 + $0xc6] ss:$2 sm:$0xff] }
 0x13d   :  { %10194 = vmatpush3.bf16.msra.mxu0 %v11561_v17  ;;  %v664_v17 = vpack.c.bf16 %v11635_v43, %v11641_v54  ;;  %v1824_v51 = vpack.c.bf16 %v1820_v6, %v1000_v36 }
 0x13e   :  { %10213 = vmatprep.subr.bf16.mxu0 %v11121_v49 }
 0x143   :  { %10106 = vmatmul.mubr.msk.bf16.vlgmr.msra.gmra.mxu1 %vm151_vm1, %v663_v52  ;;  %10180 = vmatmul.mubr.msk.bf16.gmra.mxu0 %vm151_vm1, %v1428_v53  ;;  %v11691_v52 = vld [vmem:[#allocation2 + $0xa2] ss:$2 sm:$0xff] }
 0x144   :  { %10109 = vmatprep.mubr.msk.bf16.mxu1 %vm151_vm1, %v664_v17  ;;  %10114 = vmatpush3.bf16.msra.mxu1 %v11118_v38  ;;  %v1822_v38 = vpack.c.bf16 %v994_v26, %v992_v35  ;;  %v11124_v53 = vld [vmem:[%s13718_s2 + $0x30] sm:$0xff]  }
 0x145   :  { %10195 = vmatprep.mubr.msk.bf16.mxu0 %vm151_vm1, %v1623_v59  ;;  %10123 = vmatprep.subr.bf16.mxu1 %v11120_v57  ;;  %v11704_v17 = vld [vmem:[#allocation2 + $0x10e] ss:$2 sm:$0xff] }
 0x146   :  { %v11706_v59 = vld [vmem:[#allocation2 + $0xea] ss:$2 sm:$0xff] }
 0x147   :  { %v891_v62 = vpack.c.bf16 %v11704_v17, %v11706_v59  ;;  %v1919_v35 = vld [vmem:[#allocation2 + $0x134] ss:$2 sm:$0xff] }
 0x14b   :  { %10110 = vmatmul.mubr.msk.bf16.gmra.mxu1 %vm151_vm1, %v665_v3  ;;  %10196 = vmatmul.mubr.msk.bf16.vlgmr.msra.gmra.mxu0 %vm151_vm1, %v1624_v4  ;;  %v1003_v3 = vpack.c.bf16 %v996_v39, %v994_v26  ;;  %v1004_v4 = vpack.c.bf16 %v1000_v36, %v998_v29  ;;  %v11127_v26 = vld [vmem:[%s13718_s2 + $0x60] sm:$0xff]   ;;  %v1524_v29 = vpack.c.bf16 %v11637_v44, %v11615_v45 }
 0x14c   :  { %10115 = vmatprep.mubr.msk.bf16.mxu1 %vm151_vm1, %v775_v8  ;;  %10199 = vmatprep.mubr.msk.bf16.mxu0 %vm151_vm1, %v1625_v9  ;;  %v1105_v8 = vld [vmem:[#allocation2 + $0x80] ss:$2 sm:$0xff]  ;;  %v1527_v45 = vpack.c.bf16 %v1523_v41, %v11652_v60 }
 0x14d   :  { %10214 = vmatpush3.bf16.msra.mxu0 %v11121_v49  ;;  %v11687_v49 = vld [vmem:[#allocation2 + $0x5a] ss:$2 sm:$0xff] }
 0x14e   :  { %10233 = vmatprep.subr.bf16.mxu0 %v11123_v11  ;;  %v889_v7 = vpack.c.bf16 %v11682_v48, %v11687_v49  ;;  %v1109_v9 = vld [vmem:[#allocation2 + $0xc8] ss:$2 sm:$0xff]  ;;  %v1722_v46 = vpack.c.bf16 %v11687_v49, %v11675_v28 }
 0x14f   :  { %v1721_v44 = vld [vmem:[#allocation2 + $0x132] ss:$2 sm:$0xff] }
 0x153   :  { %10116 = vmatmul.mubr.msk.bf16.vlgmr.msra.gmra.mxu1 %vm151_vm1, %v776_v15  ;;  %10200 = vmatmul.mubr.msk.bf16.gmra.mxu0 %vm151_vm1, %v1626_v16  ;;  %v1116_v15 = vpack.c.bf16 %v1109_v9, %v1107_v13  ;;  %v1113_v16 = vld [vmem:[#allocation2 + $0x110] ss:$2 sm:$0xff] }
 0x154   :  { %10119 = vmatprep.mubr.msk.bf16.mxu1 %vm151_vm1, %v777_v23  ;;  %10124 = vmatpush3.bf16.msra.mxu1 %v11120_v57  ;;  %v890_v57 = vpack.c.bf16 %v11685_v10, %v11691_v52 }
 0x155   :  { %10215 = vmatprep.mubr.msk.bf16.mxu0 %vm151_vm1, %v1821_v25  ;;  %10133 = vmatprep.subr.bf16.mxu1 %v11122_v22  ;;  %v1327_v25 = vpack.c.bf16 %v11599_v18, %v11585_v30  ;;  %v1525_v30 = vpack.c.bf16 %v11641_v54, %v11633_v50  ;;  %v1526_v18 = vpack.c.bf16 %v11654_v1, %v11635_v43 }
 0x156   :  { %v1723_v50 = vpack.c.bf16 %v11691_v52, %v11682_v48  ;;  %v1724_v43 = vpack.c.bf16 %v11706_v59, %v11685_v10  ;;  %v1725_v54 = vpack.c.bf16 %v1721_v44, %v11704_v17  ;;  %v1921_v1 = vpack.c.bf16 %v1107_v13, %v1105_v8  ;;  %v11130_v44 = vld [vmem:[%s13719_s3 + $0x8] sm:$0xff]  }
 0x15b   :  { %10120 = vmatmul.mubr.msk.bf16.gmra.mxu1 %vm151_vm1, %v778_v37  ;;  %10216 = vmatmul.mubr.msk.bf16.vlgmr.msra.gmra.mxu0 %vm151_vm1, %v1822_v38  ;;  %v1923_v37 = vpack.c.bf16 %v1919_v35, %v1113_v16 }
 0x15c   :  { %10125 = vmatprep.mubr.msk.bf16.mxu1 %vm151_vm1, %v888_v40  ;;  %10219 = vmatprep.mubr.msk.bf16.mxu0 %vm151_vm1, %v1823_v42 }
 0x15d   :  { %10234 = vmatpush3.bf16.msra.mxu0 %v11123_v11  ;;  %v1103_v11 = vld [vmem:[#allocation2 + $0x5c] ss:$2 sm:$0xff] }
 0x15e   :  { %10251 = vmatprep.subr.bf16.mxu0 %v11364_v0  ;;  %v2019_v0 = vpack.c.bf16 %v11552_v20, %v11534_v47  ;;  %v2021_v47 = vpack.c.bf16 %v11591_v33, %v11575_v56  ;;  %v2018_v20 = vld [vmem:[#allocation2 + $0x135] ss:$2 sm:$0xff]  ;;  %v1099_v33 = vld [vmem:[#allocation2 + $0x14] ss:$2 sm:$0xff]  ;;  %v1115_v12 = vpack.c.bf16 %v1105_v8, %v1103_v11 }
 0x15f   :  { %v2022_v21 = vpack.c.bf16 %v2018_v20, %v11593_v34  ;;  %v11726_v56 = vld [vmem:[#allocation2] sm:$0xff] }
 0x160   :  { %v1101_v34 = vld [vmem:[#allocation2 + $0x38] ss:$2 sm:$0xff] }
 0x161   :  { %v1114_v5 = vpack.c.bf16 %v1101_v34, %v1099_v33  ;;  %v1920_v60 = vpack.c.bf16 %v1103_v11, %v1101_v34 }
 0x163   :  { %10126 = vmatmul.mubr.msk.bf16.vlgmr.msra.gmra.mxu1 %vm151_vm1, %v889_v7  ;;  %10220 = vmatmul.mubr.msk.bf16.gmra.mxu0 %vm151_vm1, %v1824_v51 }
 0x164   :  { %10129 = vmatprep.mubr.msk.bf16.mxu1 %vm151_vm1, %v890_v57  ;;  %10134 = vmatpush3.bf16.msra.mxu1 %v11122_v22  ;;  %v1111_v22 = vld [vmem:[#allocation2 + $0xec] ss:$2 sm:$0xff] }
 0x165   :  { %10235 = vmatprep.mubr.msk.bf16.mxu0 %vm151_vm1, %v2019_v0  ;;  %10143 = vmatprep.subr.bf16.mxu1 %v11124_v53  ;;  %v1117_v23 = vpack.c.bf16 %v1113_v16, %v1111_v22  ;;  %v1922_v28 = vpack.c.bf16 %v1111_v22, %v1109_v9 }
 0x16b   :  { %10130 = vmatmul.mubr.msk.bf16.gmra.mxu1 %vm151_vm1, %v891_v62  ;;  %10236 = vmatmul.mubr.msk.bf16.vlgmr.msra.gmra.mxu0 %vm151_vm1, %v2020_v61 }
 0x16c   :  { %10135 = vmatprep.mubr.msk.bf16.mxu1 %vm151_vm1, %v1001_v63  ;;  %10239 = vmatprep.mubr.msk.bf16.mxu0 %vm151_vm1, %v2021_v47 }
 0x16d   :  { %10252 = vmatpush3.bf16.msra.mxu0 %v11130_v44 }
 0x16e   :  { %10253 = vmatprep.subr.bf16.mxu0 %v11726_v56 }
 0x173   :  { %10136 = vmatmul.mubr.msk.bf16.vlgmr.msra.gmra.mxu1 %vm151_vm1, %v1002_v2  ;;  %10240 = vmatmul.mubr.msk.bf16.gmra.mxu0 %vm151_vm1, %v2022_v21 }
 0x174   :  { %10139 = vmatprep.mubr.msk.bf16.mxu1 %vm151_vm1, %v1003_v3  ;;  %10144 = vmatpush3.bf16.msra.mxu1 %v11124_v53 }
 0x175   :  { %10163 = vmatprep.subr.bf16.mxu1 %v11125_v55  ;;  %10255 = vmatprep.mubr.msk.bf16.mxu0 %vm11365_vm0, %v11726_v56 }
 0x17b   :  { %10140 = vmatmul.mubr.msk.bf16.gmra.mxu1 %vm151_vm1, %v1004_v4 }
 0x17c   :  { %10145 = vmatprep.mubr.msk.bf16.mxu1 %vm151_vm1, %v1114_v5 }
 0x183   :  { %10146 = vmatmul.mubr.msk.bf16.vlgmr.msra.gmra.mxu1 %vm151_vm1, %v1115_v12 }
 0x184   :  { %10149 = vmatprep.mubr.msk.bf16.mxu1 %vm151_vm1, %v1116_v15  ;;  %10164 = vmatpush3.bf16.msra.mxu1 %v11125_v55 }
 0x185   :  { %10183 = vmatprep.subr.bf16.mxu1 %v11126_v14 }
 0x18b   :  { %10150 = vmatmul.mubr.msk.bf16.gmra.mxu1 %vm151_vm1, %v1117_v23 }
 0x18c   :  { %10165 = vmatprep.mubr.msk.bf16.mxu1 %vm151_vm1, %v1326_v24 }
 0x193   :  { %10166 = vmatmul.mubr.msk.bf16.vlgmr.msra.gmra.mxu1 %vm151_vm1, %v1327_v25 }
 0x194   :  { %10169 = vmatprep.mubr.msk.bf16.mxu1 %vm151_vm1, %v1328_v27  ;;  %10184 = vmatpush3.bf16.msra.mxu1 %v11126_v14 }
 0x195   :  { %10203 = vmatprep.subr.bf16.mxu1 %v11127_v26 }
 0x19b   :  { %10170 = vmatmul.mubr.msk.bf16.gmra.mxu1 %vm151_vm1, %v1329_v32 }
 0x19c   :  { %10185 = vmatprep.mubr.msk.bf16.mxu1 %vm151_vm1, %v1524_v29 }
 0x1a3   :  { %10186 = vmatmul.mubr.msk.bf16.vlgmr.msra.gmra.mxu1 %vm151_vm1, %v1525_v30 }
 0x1a4   :  { %10189 = vmatprep.mubr.msk.bf16.mxu1 %vm151_vm1, %v1526_v18  ;;  %10204 = vmatpush3.bf16.msra.mxu1 %v11127_v26 }
 0x1a5   :  { %10223 = vmatprep.subr.bf16.mxu1 %v11128_v31 }
 0x1ab   :  { %10190 = vmatmul.mubr.msk.bf16.gmra.mxu1 %vm151_vm1, %v1527_v45 }
 0x1ac   :  { %10205 = vmatprep.mubr.msk.bf16.mxu1 %vm151_vm1, %v1722_v46  ;;  %v11129_v46 = vld [vmem:[%s13719_s3 + $0x18] sm:$0xff]  }
 0x1b3   :  { %10206 = vmatmul.mubr.msk.bf16.vlgmr.msra.gmra.mxu1 %vm151_vm1, %v1723_v50  ;;  %v10087_v38 = vpop.f32.mrf.mxu1 }
 0x1b4   :  { %10209 = vmatprep.mubr.msk.bf16.mxu1 %vm151_vm1, %v1724_v43  ;;  %10224 = vmatpush3.bf16.msra.mxu1 %v11128_v31 }
 0x1b5   :  { %10243 = vmatprep.subr.bf16.mxu1 %v11726_v56  ;;  %v532_v39 = vpop.f32.mrf.mxu1 }
 0x1b7   :  { %v10088_v40 = vpop.f32.mrf.mxu1 }
 0x1b9   :  { %v11784_v42 = vpop.f32.mrf.mxu1 }
 0x1bb   :  { %10210 = vmatmul.mubr.msk.bf16.gmra.mxu1 %vm151_vm1, %v1725_v54  ;;  %v11790_v17 = vpop.f32.mrf.mxu0 }
 0x1bc   :  { %10225 = vmatprep.mubr.msk.bf16.mxu1 %vm151_vm1, %v1920_v60  ;;  %v11131_v60 = vld [vmem:[%s13719_s3 + $0x10] sm:$0xff]  }
 0x1bd   :  { %v11792_v62 = vpop.f32.mrf.mxu0 }
 0x1bf   :  { %v11796_v21 = vpop.f32.mrf.mxu0 }
 0x1c1   :  { %v11798_v34 = vpop.f32.mrf.mxu0 }
 0x1c3   :  { %10226 = vmatmul.mubr.msk.bf16.vlgmr.msra.gmra.mxu1 %vm151_vm1, %v1921_v1 }
 0x1c4   :  { %10229 = vmatprep.mubr.msk.bf16.mxu1 %vm151_vm1, %v1922_v28  ;;  %10244 = vmatpush3.bf16.msra.mxu1 %v11129_v46  ;;  %v11132_v28 = vld [vmem:[%s13719_s3] sm:$0xff]  }
 0x1c5   :  { %10245 = vmatprep.subr.bf16.mxu1 %v11726_v56  ;;  %10254 = vmatpush3.bf16.msra.mxu0 %v11132_v28 }
 0x1c6   :  { %10267 = vmatprep.subr.bf16.mxu0 %v11726_v56 }
 0x1c8   :  { %10246 = vmatpush3.bf16.msra.mxu1 %v11131_v60 }
 0x1c9   :  { %10259 = vmatprep.subr.bf16.mxu1 %v11726_v56 }
 0x1cb   :  { %10230 = vmatmul.mubr.msk.bf16.gmra.mxu1 %vm151_vm1, %v1923_v37 }
 0x1cc   :  { %10247 = vmatprep.mubr.msk.bf16.mxu1 %vm11365_vm0, %v11726_v56 }
 0x1eb   :  { %v10091_v48 = vpop.f32.mrf.mxu1 }
 0x1ed   :  { %v548_v36 = vpop.f32.mrf.mxu1 }
 0x1ef   :  { %v10092_v6 = vpop.f32.mrf.mxu1 }
 0x1f1   :  { %v11786_v10 = vpop.f32.mrf.mxu1 }
 0x1f3   :  { %v10097_v49 = vpop.f32.mrf.mxu1  ;;  %v11800_v8 = vpop.f32.mrf.mxu0 }
 0x1f4   :  { %v624_v7 = vadd.f32 %v10097_v49, %v10087_v38 }
 0x1f5   :  { %v615_v51 = vpop.f32.mrf.mxu1  ;;  %v11804_v13 = vpop.f32.mrf.mxu0 }
 0x1f6   :  { %v616_v52 = vadd.f32 %v615_v51, %v532_v39 }
 0x1f7   :  { %v10098_v53 = vpop.f32.mrf.mxu1  ;;  %v11806_v23 = vpop.f32.mrf.mxu0 }
 0x1f8   :  { %v627_v57 = vadd.f32 %v10098_v53, %v10088_v40 }
 0x1f9   :  { %v11788_v0 = vpop.f32.mrf.mxu1  ;;  %v11810_v27 = vpop.f32.mrf.mxu0 }
 0x1fa   :  { %13724 = vst [vmem:[#allocation5_spill] sm:$0xff] %v11810_v27 }
 0x1fb   :  { %v10101_v58 = vpop.f32.mrf.mxu1  ;;  %v11812_v31 = vpop.f32.mrf.mxu0 }
 0x1fc   :  { %v640_v59 = vadd.f32 %v10101_v58, %v10091_v48 }
 0x1fd   :  { %v631_v61 = vpop.f32.mrf.mxu1  ;;  %v11819_v50 = vpop.f32.mrf.mxu0 }
 0x1fe   :  { %v632_v63 = vadd.f32 %v631_v61, %v548_v36 }
 0x1ff   :  { %v10102_v47 = vpop.f32.mrf.mxu1  ;;  %v11832_v37 = vpop.f32.mrf.mxu0 }
 0x200   :  { %v643_v20 = vadd.f32 %v10102_v47, %v10092_v6 }
 0x201   :  { %v11794_v2 = vpop.f32.mrf.mxu1  ;;  %v11838_v48 = vpop.f32.mrf.mxu0 }
 0x202   :  { %13725 = vst [vmem:[#allocation6_spill] sm:$0xff] %v11838_v48 }
 0x203   :  { %v10107_v55 = vpop.f32.mrf.mxu1  ;;  %v11840_v51 = vpop.f32.mrf.mxu0 }
 0x204   :  { %v753_v3 = vadd.f32 %v10107_v55, %v624_v7  ;;  %13726 = vst [vmem:[#allocation7_spill] sm:$0xff] %v11840_v51 }
 0x205   :  { %v720_v33 = vpop.f32.mrf.mxu1  ;;  %v11844_v58 = vpop.f32.mrf.mxu0 }
 0x206   :  { %v751_v4 = vadd.f32 %v720_v33, %v616_v52  ;;  %13727 = vst [vmem:[#allocation8_spill] sm:$0xff] %v11844_v58 }
 0x207   :  { %v10108_v5 = vpop.f32.mrf.mxu1  ;;  %v11850_v47 = vpop.f32.mrf.mxu0 }
 0x208   :  { %v754_v9 = vadd.f32 %v10108_v5, %v627_v57  ;;  %13728 = vst [vmem:[#allocation9_spill] sm:$0xff] %v11850_v47 }
 0x209   :  { %v11802_v11 = vpop.f32.mrf.mxu1  ;;  %v11856_v33 = vpop.f32.mrf.mxu0 }
 0x20a   :  { %13729 = vst [vmem:[#allocation10_spill] sm:$0xff] %v11856_v33 }
 0x20b   :  { %v10111_v12 = vpop.f32.mrf.mxu1 }
 0x20c   :  { %v757_v14 = vadd.f32 %v10111_v12, %v640_v59 }
 0x20d   :  { %v736_v15 = vpop.f32.mrf.mxu1 }
 0x20e   :  { %v755_v16 = vadd.f32 %v736_v15, %v632_v63 }
 0x20f   :  { %v10112_v22 = vpop.f32.mrf.mxu1 }
 0x210   :  { %v758_v24 = vadd.f32 %v10112_v22, %v643_v20 }
 0x211   :  { %v11808_v25 = vpop.f32.mrf.mxu1 }
 0x213   :  { %v10117_v26 = vpop.f32.mrf.mxu1 }
 0x214   :  { %v866_v19 = vadd.f32 %v10117_v26, %v753_v3 }
 0x215   :  { %v833_v32 = vpop.f32.mrf.mxu1 }
 0x216   :  { %v864_v29 = vadd.f32 %v833_v32, %v751_v4 }
 0x217   :  { %v10118_v30 = vpop.f32.mrf.mxu1 }
 0x218   :  { %v867_v18 = vadd.f32 %v10118_v30, %v754_v9  ;;  %v11858_v9 = vpop.f32.mrf.mxu0 }
 0x219   :  { %v11814_v41 = vpop.f32.mrf.mxu1  ;;  %13730 = vst [vmem:[#allocation11_spill] sm:$0xff] %v11858_v9 }
 0x21a   :  { %v11860_v15 = vpop.f32.mrf.mxu0 }
 0x21b   :  { %v10121_v45 = vpop.f32.mrf.mxu1  ;;  %13731 = vst [vmem:[#allocation12_spill] sm:$0xff] %v11860_v15 }
 0x21c   :  { %v870_v43 = vadd.f32 %v10121_v45, %v757_v14 }
 0x21d   :  { %v849_v54 = vpop.f32.mrf.mxu1 }
 0x21e   :  { %v868_v1 = vadd.f32 %v849_v54, %v755_v16 }
 0x21f   :  { %v10122_v35 = vpop.f32.mrf.mxu1 }
 0x220   :  { %v871_v38 = vadd.f32 %v10122_v35, %v758_v24  ;;  %v11864_v24 = vpop.f32.mrf.mxu0 }
 0x221   :  { %v11834_v39 = vpop.f32.mrf.mxu1  ;;  %13732 = vst [vmem:[#allocation13_spill] sm:$0xff] %v11864_v24 }
 0x222   :  { %v11868_v32 = vpop.f32.mrf.mxu0 }
 0x223   :  { %v10127_v40 = vpop.f32.mrf.mxu1  ;;  %13733 = vst [vmem:[#allocation14_spill] sm:$0xff] %v11868_v32 }
 0x224   :  { %v979_v36 = vadd.f32 %v10127_v40, %v866_v19 }
 0x225   :  { %v946_v6 = vpop.f32.mrf.mxu1 }
 0x226   :  { %v977_v49 = vadd.f32 %v946_v6, %v864_v29 }
 0x227   :  { %v10128_v7 = vpop.f32.mrf.mxu1 }
 0x228   :  { %v980_v52 = vadd.f32 %v10128_v7, %v867_v18  ;;  %v11870_v18 = vpop.f32.mrf.mxu0 }
 0x229   :  { %v11842_v53 = vpop.f32.mrf.mxu1  ;;  %13734 = vst [vmem:[#allocation15_spill] sm:$0xff] %v11870_v18 }
 0x22b   :  { %v10131_v57 = vpop.f32.mrf.mxu1 }
 0x22c   :  { %v11846_v59 = vadd.f32 %v10131_v57, %v870_v43  ;;  %v11872_v43 = vpop.f32.mrf.mxu0 }
 0x22d   :  { %v962_v61 = vpop.f32.mrf.mxu1  ;;  %13735 = vst [vmem:[#allocation16_spill] sm:$0xff] %v11872_v43 }
 0x22e   :  { %v11848_v63 = vadd.f32 %v962_v61, %v868_v1  ;;  %v11874_v60 = vpop.f32.mrf.mxu0 }
 0x22f   :  { %v10132_v56 = vpop.f32.mrf.mxu1  ;;  %13736 = vst [vmem:[#allocation17_spill] sm:$0xff] %v11874_v60 }
 0x230   :  { %v11852_v20 = vadd.f32 %v10132_v56, %v871_v38  ;;  %v11878_v35 = vpop.f32.mrf.mxu0 }
 0x231   :  { %v11854_v55 = vpop.f32.mrf.mxu1  ;;  %13737 = vst [vmem:[#allocation18_spill] sm:$0xff] %v11878_v35 }
 0x232   :  { %v11880_v6 = vpop.f32.mrf.mxu0 }
 0x233   :  { %v10137_v3 = vpop.f32.mrf.mxu1  ;;  %13738 = vst [vmem:[#allocation19_spill] sm:$0xff] %v11880_v6  ;;  %v619_v6 = vadd.f32 %v11788_v0, %v11784_v42 }
 0x234   :  { %v11882_v61 = vpop.f32.mrf.mxu0 }
 0x235   :  { %v1059_v4 = vpop.f32.mrf.mxu1  ;;  %13739 = vst [vmem:[#allocation20_spill] sm:$0xff] %v11882_v61  ;;  %v1092_v61 = vadd.f32 %v10137_v3, %v979_v36  ;;  %v752_v27 = vadd.f32 %v11802_v11, %v619_v6  ;;  %v635_v3 = vadd.f32 %v11794_v2, %v11786_v10  ;;  %v13747_v6 = vld [vmem:[#allocation6_spill] sm:$0xff] }
 0x236   :  { %v11886_v43 = vpop.f32.mrf.mxu0 }
 0x237   :  { %v10138_v5 = vpop.f32.mrf.mxu1  ;;  %13741 = vst [vmem:[#allocation22_spill] sm:$0xff] %v11886_v43 }
 0x238   :  { %v11890_v32 = vpop.f32.mrf.mxu0 }
 0x239   :  { %v1062_v12 = vpop.f32.mrf.mxu1  ;;  %13743 = vst [vmem:[#allocation24_spill] sm:$0xff] %v11890_v32  ;;  %v865_v32 = vadd.f32 %v11814_v41, %v752_v27 }
 0x23a   :  { %v11892_v24 = vpop.f32.mrf.mxu0 }
 0x23b   :  { %v10141_v14 = vpop.f32.mrf.mxu1  ;;  %13744 = vst [vmem:[#allocation25_spill] sm:$0xff] %v11892_v24  ;;  %v978_v9 = vadd.f32 %v11842_v53, %v865_v32  ;;  %v756_v53 = vadd.f32 %v11808_v25, %v635_v3  ;;  %v13751_v3 = vld [vmem:[#allocation8_spill] sm:$0xff] }
 0x23c   :  { %v11901_v43 = vpop.f32.mrf.mxu0 }
 0x23d   :  { %v1075_v16 = vpop.f32.mrf.mxu1  ;;  %v869_v2 = vadd.f32 %v11834_v39, %v756_v53 }
 0x23e   :  { %v11909_v0 = vpop.f32.mrf.mxu0 }
 0x23f   :  { %v11862_v22 = vpop.f32.mrf.mxu1 }
 0x241   :  { %v11866_v26 = vpop.f32.mrf.mxu1 }
 0x243   :  { %v10147_v19 = vpop.f32.mrf.mxu1 }
 0x244   :  { %v1205_v51 = vadd.f32 %v10147_v19, %v1092_v61 }
 0x245   :  { %v1172_v29 = vpop.f32.mrf.mxu1 }
 0x246   :  { %v1318_v11 = vadd.f32 %v11790_v17, %v1205_v51  ;;  %v1097_v51 = vadd.f32 %v11862_v22, %v11852_v20 }
 0x247   :  { %v10148_v30 = vpop.f32.mrf.mxu1 }
 0x249   :  { %v1175_v45 = vpop.f32.mrf.mxu1 }
 0x24b   :  { %v10151_v46 = vpop.f32.mrf.mxu1 }
 0x24d   :  { %v1188_v44 = vpop.f32.mrf.mxu1 }
 0x24f   :  { %v10152_v54 = vpop.f32.mrf.mxu1 }
 0x251   :  { %v11876_v1 = vpop.f32.mrf.mxu1 }
 0x253   :  { %v10167_v28 = vpop.f32.mrf.mxu1 }
 0x254   :  { %v1417_v41 = vadd.f32 %v10167_v28, %v1318_v11  ;;  %v13750_v11 = vld [vmem:[#allocation5_spill] sm:$0xff] }
 0x255   :  { %v1384_v38 = vpop.f32.mrf.mxu1 }
 0x256   :  { %v1516_v25 = vadd.f32 %v11812_v31, %v1417_v41 }
 0x257   :  { %v10168_v40 = vpop.f32.mrf.mxu1 }
 0x259   :  { %v1387_v7 = vpop.f32.mrf.mxu1 }
 0x25b   :  { %v10171_v57 = vpop.f32.mrf.mxu1 }
 0x25d   :  { %v1400_v56 = vpop.f32.mrf.mxu1 }
 0x25f   :  { %v11884_v33 = vpop.f32.mrf.mxu1 }
 0x260   :  { %13740 = vst [vmem:[#allocation21_spill] sm:$0xff] %v11884_v33  ;;  %v1093_v33 = vadd.f32 %v10138_v5, %v980_v52  ;;  %v1094_v5 = vadd.f32 %v1075_v16, %v11848_v63  ;;  %v982_v63 = vadd.f32 %v11854_v55, %v869_v2 }
 0x261   :  { %v11888_v18 = vpop.f32.mrf.mxu1 }
 0x262   :  { %13742 = vst [vmem:[#allocation23_spill] sm:$0xff] %v11888_v18  ;;  %v1090_v18 = vadd.f32 %v1059_v4, %v977_v49  ;;  %v1206_v36 = vadd.f32 %v10148_v30, %v1093_v33  ;;  %v1091_v49 = vadd.f32 %v1062_v12, %v978_v9  ;;  %v1096_v4 = vadd.f32 %v10141_v14, %v11846_v59 }
 0x263   :  { %v10187_v60 = vpop.f32.mrf.mxu1  ;;  %v1207_v59 = vadd.f32 %v1188_v44, %v1094_v5  ;;  %v1210_v12 = vadd.f32 %v10152_v54, %v1097_v51  ;;  %v13755_v51 = vld [vmem:[#allocation19_spill] sm:$0xff] }
 0x264   :  { %v1203_v24 = vadd.f32 %v1172_v29, %v1090_v18  ;;  %v1204_v19 = vadd.f32 %v1175_v45, %v1091_v49  ;;  %v1209_v32 = vadd.f32 %v10151_v46, %v1096_v4  ;;  %v11920_v29 = vpop.f32.mrf.mxu0  ;;  %v1319_v10 = vadd.f32 %v11796_v21, %v1206_v36  ;;  %v13749_v36 = vld [vmem:[#allocation12_spill] sm:$0xff] }
 0x265   :  { %v1582_v47 = vpop.f32.mrf.mxu1  ;;  %v1615_v21 = vadd.f32 %v10187_v60, %v1516_v25  ;;  %v1095_v18 = vadd.f32 %v11866_v26, %v982_v63  ;;  %v1320_v45 = vadd.f32 %v11804_v13, %v1207_v59  ;;  %v13757_v25 = vld [vmem:[#allocation15_spill] sm:$0xff] }
 0x266   :  { %v1316_v52 = vadd.f32 %v11792_v62, %v1203_v24  ;;  %v1418_v62 = vadd.f32 %v10168_v40, %v1319_v10  ;;  %v1317_v14 = vadd.f32 %v11798_v34, %v1204_v19  ;;  %v1322_v16 = vadd.f32 %v11800_v8, %v1209_v32  ;;  %v10237_v30 = vpop.f32.mrf.mxu0 }
 0x267   :  { %v10188_v35 = vpop.f32.mrf.mxu1  ;;  %v1208_v44 = vadd.f32 %v11876_v1, %v1095_v18  ;;  %v1419_v34 = vadd.f32 %v1400_v56, %v1320_v45  ;;  %v1323_v8 = vadd.f32 %v11806_v23, %v1210_v12  ;;  %v13746_v40 = vld [vmem:[#allocation21_spill] sm:$0xff] }
 0x268   :  { %v1415_v17 = vadd.f32 %v1384_v38, %v1316_v52  ;;  %v1416_v20 = vadd.f32 %v1387_v7, %v1317_v14  ;;  %v1421_v22 = vadd.f32 %v10171_v57, %v1322_v16  ;;  %v1517_v55 = vadd.f32 %v11832_v37, %v1418_v62  ;;  %v2077_v28 = vpop.f32.mrf.mxu0  ;;  %v13745_v38 = vld [vmem:[#allocation11_spill] sm:$0xff]  ;;  %v13752_v52 = vld [vmem:[#allocation13_spill] sm:$0xff]  ;;  %v13758_v16 = vld [vmem:[#allocation20_spill] sm:$0xff] }
 0x269   :  { %v11896_v58 = vpop.f32.mrf.mxu1  ;;  %v1422_v26 = vadd.f32 %v13746_v40, %v1323_v8  ;;  %v13748_v57 = vld [vmem:[#allocation7_spill] sm:$0xff]  ;;  %v1321_v1 = vadd.f32 %v13750_v11, %v1208_v44  ;;  %v13761_v44 = vld [vmem:[#allocation22_spill] sm:$0xff] }
 0x26a   :  { %v1514_v39 = vadd.f32 %v11819_v50, %v1415_v17  ;;  %v1616_v60 = vadd.f32 %v10188_v35, %v1517_v55  ;;  %v1714_v50 = vadd.f32 %v13745_v38, %v1615_v21  ;;  %v1515_v7 = vadd.f32 %v13747_v6, %v1416_v20  ;;  %v10238_v4 = vpop.f32.mrf.mxu0  ;;  %v13753_v5 = vld [vmem:[#allocation23_spill] sm:$0xff] }
 0x26b   :  { %v11899_v15 = vpop.f32.mrf.mxu1  ;;  %v1520_v13 = vadd.f32 %v13748_v57, %v1421_v22  ;;  %v1518_v35 = vadd.f32 %v13751_v3, %v1419_v34  ;;  %v1420_v19 = vadd.f32 %v13753_v5, %v1321_v1  ;;  %v13760_v22 = vld [vmem:[#allocation16_spill] sm:$0xff] }
 0x26c   :  { %v1613_v31 = vadd.f32 %v1582_v47, %v1514_v39  ;;  %v1614_v56 = vadd.f32 %v11896_v58, %v1515_v7  ;;  %v1715_v53 = vadd.f32 %v13752_v52, %v1616_v60  ;;  %v13759_v39 = vld [vmem:[#allocation10_spill] sm:$0xff]  ;;  %v13762_v60 = vld [vmem:[#allocation17_spill] sm:$0xff] }
 0x26d   :  { %v11904_v48 = vpop.f32.mrf.mxu1  ;;  %v1619_v23 = vadd.f32 %v11899_v15, %v1520_v13  ;;  %v13756_v15 = vld [vmem:[#allocation14_spill] sm:$0xff]  ;;  %v1519_v18 = vadd.f32 %v13759_v39, %v1420_v19 }
 0x26e   :  { %v1712_v37 = vadd.f32 %v13749_v36, %v1613_v31  ;;  %v1617_v32 = vadd.f32 %v11904_v48, %v1518_v35  ;;  %v1713_v62 = vadd.f32 %v13756_v15, %v1614_v56 }
 0x26f   :  { %v11907_v42 = vpop.f32.mrf.mxu1  ;;  %v1718_v63 = vadd.f32 %v13757_v25, %v1619_v23 }
 0x270   :  { %v1716_v45 = vadd.f32 %v13760_v22, %v1617_v32 }
 0x271   :  { %v11915_v27 = vpop.f32.mrf.mxu1 }
 0x272   :  { %v1618_v34 = vadd.f32 %v11915_v27, %v1519_v18  ;;  %v13765_v27 = vld [vmem:[#allocation18_spill] sm:$0xff] }
 0x273   :  { %v10207_v33 = vpop.f32.mrf.mxu1 }
 0x274   :  { %v1813_v47 = vadd.f32 %v10207_v33, %v1714_v50  ;;  %v13754_v33 = vld [vmem:[#allocation9_spill] sm:$0xff] }
 0x275   :  { %v1780_v9 = vpop.f32.mrf.mxu1  ;;  %v1521_v17 = vadd.f32 %v13754_v33, %v1422_v26 }
 0x276   :  { %v1811_v41 = vadd.f32 %v1780_v9, %v1712_v37  ;;  %v1912_v59 = vadd.f32 %v13755_v51, %v1813_v47  ;;  %v2080_v9 = vpop.f32.mrf.mxu0  ;;  %v13764_v47 = vld [vmem:[#allocation25_spill] sm:$0xff] }
 0x277   :  { %v10208_v24 = vpop.f32.mrf.mxu1  ;;  %v1620_v58 = vadd.f32 %v11907_v42, %v1521_v17 }
 0x278   :  { %v1814_v2 = vadd.f32 %v10208_v24, %v1715_v53  ;;  %v1910_v21 = vadd.f32 %v13758_v16, %v1811_v41  ;;  %v10241_v40 = vpop.f32.mrf.mxu0 }
 0x279   :  { %v1783_v46 = vpop.f32.mrf.mxu1  ;;  %v1719_v38 = vadd.f32 %v13762_v60, %v1620_v58 }
 0x27a   :  { %v1812_v48 = vadd.f32 %v1783_v46, %v1713_v62  ;;  %v1913_v42 = vadd.f32 %v13761_v44, %v1814_v2  ;;  %v2093_v3 = vpop.f32.mrf.mxu0 }
 0x27b   :  { %v10211_v54 = vpop.f32.mrf.mxu1 }
 0x27c   :  { %v1817_v20 = vadd.f32 %v10211_v54, %v1718_v63  ;;  %v13763_v54 = vld [vmem:[#allocation24_spill] sm:$0xff]  ;;  %v10242_v2 = vpop.f32.mrf.mxu0 }
 0x27d   :  { %v1796_v61 = vpop.f32.mrf.mxu1  ;;  %v1911_v57 = vadd.f32 %v13763_v54, %v1812_v48 }
 0x27e   :  { %v1815_v8 = vadd.f32 %v1796_v61, %v1716_v45  ;;  %v1717_v61 = vadd.f32 %v13765_v27, %v1618_v34  ;;  %v2148_v45 = vld [vmem:[#allocation3] ss:$2 sm:$0xf]  ;;  %v11135_v27 = vld [vmem:[%s13719_s3 + $0x20] sm:$0xff]  }
 0x27f   :  { %v10212_v49 = vpop.f32.mrf.mxu1 }
 0x280   :  { %v1818_v46 = vadd.f32 %v10212_v49, %v1719_v38  ;;  %v1914_v23 = vadd.f32 %v11901_v43, %v1815_v8 }
 0x281   :  { %v1799_v10 = vpop.f32.mrf.mxu1 }
 0x282   :  { %v1816_v41 = vadd.f32 %v1799_v10, %v1717_v61  ;;  %v11136_v61 = vld [vmem:[%s13719_s3 + $0x30] sm:$0xff]  }
 0x283   :  { %v10227_v12 = vpop.f32.mrf.mxu1 }
 0x284   :  { %v2011_v14 = vadd.f32 %v10227_v12, %v1912_v59  ;;  %v1915_v10 = vadd.f32 %v11920_v29, %v1816_v41  ;;  %v2096_v12 = vpop.f32.mrf.mxu0 }
 0x285   :  { %v1978_v24 = vpop.f32.mrf.mxu1 }
 0x286   :  { %v2110_v31 = vadd.f32 %v10237_v30, %v2011_v14  ;;  %v2009_v55 = vadd.f32 %v1978_v24, %v1910_v21  ;;  %v1916_v30 = vadd.f32 %v13764_v47, %v1817_v20  ;;  %v2170_v20 = vld [vmem:[#allocation3 + $0x1] ss:$2 sm:$0xf] }
 0x287   :  { %v10228_v50 = vpop.f32.mrf.mxu1 }
 0x288   :  { %vm2118_vm13 = vcmp.gt.f32.partialorder %v2110_v31, 0.0  ;;  %v2126_v26 = vmul.f32 0.2, %v2110_v31  ;;  %v2108_v6 = vadd.f32 %v2077_v28, %v2009_v55  ;;  %v2012_v7 = vadd.f32 %v10228_v50, %v1913_v42 }
 0x289   :  { %v1981_v13 = vpop.f32.mrf.mxu1 }
 0x28a   :  { %v2134_v36 = vsel %vm2118_vm13, %v2110_v31, %v2126_v26  ;;  %vm2116_vm14 = vcmp.gt.f32.partialorder %v2108_v6, 0.0  ;;  %v2124_v37 = vmul.f32 0.2, %v2108_v6  ;;  %v2111_v11 = vadd.f32 %v10238_v4, %v2012_v7  ;;  %v11133_v7 = vld [vmem:[%s13719_s3 + $0x28] sm:$0xff]  }
 0x28b   :  { %2142 = vst [vmem:[#allocation3 + $0x1f] sm:$0xff] %v2134_v36  ;;  %v2010_v1 = vadd.f32 %v1981_v13, %v1911_v57  ;;  %v10231_v56 = vpop.f32.mrf.mxu1  ;;  %v1917_v4 = vadd.f32 %v11909_v0, %v1818_v46  ;;  %v11134_v46 = vld [vmem:[%s13719_s3 + $0x38] sm:$0xff]  }
 0x28c   :  { %v2132_v28 = vsel %vm2116_vm14, %v2108_v6, %v2124_v37  ;;  %vm2119_vm15 = vcmp.gt.f32.partialorder %v2111_v11, 0.0  ;;  %v2127_v35 = vmul.f32 0.2, %v2111_v11  ;;  %v2015_v49 = vadd.f32 %v10231_v56, %v1916_v30  ;;  %v2304_v37 = vld [vmem:[#allocation3 + $0x2] ss:$2 sm:$0xf] }
 0x28d   :  { %2140 = vst [vmem:[#allocation3 + $0xb] sm:$0xff] %v2132_v28  ;;  %v2109_v52 = vadd.f32 %v2080_v9, %v2010_v1  ;;  %v1994_v53 = vpop.f32.mrf.mxu1 }
 0x28e   :  { %v2135_v5 = vsel %vm2119_vm15, %v2111_v11, %v2127_v35  ;;  %v2114_v19 = vadd.f32 %v10241_v40, %v2015_v49  ;;  %v2013_v32 = vadd.f32 %v1994_v53, %v1914_v23  ;;  %v2383_v11 = vld [vmem:[#allocation3 + $0x3] ss:$2 sm:$0xf]  ;;  %v12013_v23 = vld [vmem:[#allocation2] sm:$0xff] }
 0x28f   :  { %2143 = vst [vmem:[#allocation3 + $0x29] sm:$0xff] %v2135_v5  ;;  %vm2117_vm2 = vcmp.gt.f32.partialorder %v2109_v52, 0.0  ;;  %v2125_v33 = vmul.f32 0.2, %v2109_v52  ;;  %v10232_v17 = vpop.f32.mrf.mxu1 }
 0x290   :  { %vm2122_vm3 = vcmp.gt.f32.partialorder %v2114_v19, 0.0  ;;  %v2130_v43 = vmul.f32 0.2, %v2114_v19  ;;  %v2112_v51 = vadd.f32 %v2093_v3, %v2013_v32  ;;  %v2016_v59 = vadd.f32 %v10232_v17, %v1917_v4  ;;  %v11138_v32 = vld [vmem:[%s13719_s3 + $0x58] sm:$0xff]  }
 0x291   :  { %v2133_v58 = vsel %vm2117_vm2, %v2109_v52, %v2125_v33  ;;  %v1997_v15 = vpop.f32.mrf.mxu1 }
 0x292   :  { %2141 = vst [vmem:[#allocation3 + $0x15] sm:$0xff] %v2133_v58  ;;  %v2138_v62 = vsel %vm2122_vm3, %v2114_v19, %v2130_v43  ;;  %vm2120_vm4 = vcmp.gt.f32.partialorder %v2112_v51, 0.0  ;;  %v2128_v25 = vmul.f32 0.2, %v2112_v51  ;;  %v2115_v63 = vadd.f32 %v10242_v2, %v2016_v59  ;;  %v11137_v19 = vld [vmem:[%s13719_s3 + $0x48] sm:$0xff]  }
 0x293   :  { %2146 = vst [vmem:[#allocation3 + $0x47] sm:$0xff] %v2138_v62  ;;  %v2014_v0 = vadd.f32 %v1997_v15, %v1915_v10  ;;  %v12043_v17 = vld [vmem:[#allocation3 + $0x1e] ss:$2 sm:$0xf]  ;;  %v11140_v15 = vld [vmem:[%s13719_s3 + $0x50] sm:$0xff]  }
 0x294   :  { %v2136_v9 = vsel %vm2120_vm4, %v2112_v51, %v2128_v25  ;;  %vm2123_vm5 = vcmp.gt.f32.partialorder %v2115_v63, 0.0  ;;  %v2131_v14 = vmul.f32 0.2, %v2115_v63  ;;  %v12045_v2 = vld [vmem:[#allocation3 + $0x1f] ss:$2 sm:$0xf] }
 0x295   :  { %2144 = vst [vmem:[#allocation3 + $0x33] sm:$0xff] %v2136_v9  ;;  %v2113_v16 = vadd.f32 %v2096_v12, %v2014_v0  ;;  %v11139_v10 = vld [vmem:[%s13719_s3 + $0x40] sm:$0xff]   ;;  %v2470_v62 = vrot.slane %v12043_v17, 4  ;;  %v2549_v25 = vrot.slane %v12045_v2, 4 }
 0x296   :  { %v2139_v21 = vsel %vm2123_vm5, %v2115_v63, %v2131_v14  ;;  %v11971_v31 = vld [vmem:[#allocation3 + $0x29] ss:$2 sm:$0xf]  ;;  %v11978_v34 = vld [vmem:[#allocation3 + $0x28] ss:$2 sm:$0xf] }
 0x297   :  { %2147 = vst [vmem:[#allocation3 + $0x51] sm:$0xff] %v2139_v21  ;;  %vm2121_vm6 = vcmp.gt.f32.partialorder %v2113_v16, 0.0  ;;  %v2129_v39 = vmul.f32 0.2, %v2113_v16 }
 0x298   :  { %v12017_v3 = vld [vmem:[#allocation3 + $0x2a] ss:$2 sm:$0xf]  ;;  %v12019_v28 = vld [vmem:[#allocation3 + $0x2b] ss:$2 sm:$0xf] }
 0x299   :  { %v2137_v18 = vsel %vm2121_vm6, %v2113_v16, %v2129_v39  ;;  %v11965_v29 = vld [vmem:[#allocation3 + $0x15] ss:$2 sm:$0xf]  ;;  %v11967_v48 = vld [vmem:[#allocation3 + $0x14] ss:$2 sm:$0xf] }
 0x29a   :  { %2145 = vst [vmem:[#allocation3 + $0x3d] sm:$0xff] %v2137_v18  ;;  %v2178_v22 = vrot.slane %v11965_v29, 4  ;;  %v2156_v24 = vrot.slane %v11967_v48, 4  ;;  %v11997_v13 = vld [vmem:[#allocation3 + $0x16] ss:$2 sm:$0xf] }
 0x29b   :  { %v11999_v47 = vld [vmem:[#allocation3 + $0x17] ss:$2 sm:$0xf]  ;;  %v2312_v1 = vrot.slane %v11997_v13, 4  ;;  %v11141_v18 = vld [vmem:[%s13719_s3 + $0x68] sm:$0xff]  }
 0x29c   :  { %v2183_v50 = vsel %vm2161_vm7, %v2170_v20, %v2178_v22  ;;  %v2162_v26 = vsel %vm2161_vm7, %v2148_v45, %v2156_v24  ;;  %v2391_v56 = vrot.slane %v11999_v47, 4  ;;  %v12029_v41 = vld [vmem:[#allocation3 + $0x46] ss:$2 sm:$0xf]  ;;  %v11142_v20 = vld [vmem:[%s13719_s3 + $0x78] sm:$0xff]  }
 0x29d   :  { %v12031_v52 = vld [vmem:[#allocation3 + $0x47] ss:$2 sm:$0xf]  ;;  %v2317_v53 = vsel %vm2161_vm7, %v2304_v37, %v2312_v1  ;;  %v2473_v43 = vrot.slane %v12029_v41, 4 }
 0x29e   :  { %v2396_v5 = vsel %vm2161_vm7, %v2383_v11, %v2391_v56  ;;  %v2552_v51 = vrot.slane %v12031_v52, 4  ;;  %v12051_v59 = vld [vmem:[#allocation3 + $0x32] ss:$2 sm:$0xf]  ;;  %v11145_v56 = vld [vmem:[%s13719_s3 + $0x88] sm:$0xff]  }
 0x29f   :  { %v12053_v58 = vld [vmem:[#allocation3 + $0x33] ss:$2 sm:$0xf]  ;;  %v2462_v63 = vld [vmem:[#allocation3 + $0xa] ss:$2 sm:$0xf]  ;;  %v2476_v12 = vsel %vm2161_vm7, %v12051_v59, %v2473_v43 }
 0x2a0   :  { %v2541_v0 = vld [vmem:[#allocation3 + $0xb] ss:$2 sm:$0xf]  ;;  %v2555_v9 = vsel %vm2161_vm7, %v12053_v58, %v2552_v51  ;;  %v12073_v14 = vld [vmem:[#allocation3 + $0x48] ss:$2 sm:$0xf]  ;;  %v2475_v21 = vsel %vm2161_vm7, %v2462_v63, %v2470_v62 }
 0x2a1   :  { %v11973_v55 = vld [vmem:[#allocation3 + $0x3d] ss:$2 sm:$0xf]  ;;  %v11975_v44 = vld [vmem:[#allocation3 + $0x3c] ss:$2 sm:$0xf]  ;;  %v2554_v39 = vsel %vm2161_vm7, %v2541_v0, %v2549_v25  ;;  %v2477_v22 = vpack.c.bf16 %v2476_v12, %v2475_v21 }
 0x2a2   :  { %v2181_v42 = vrot.slane %v11973_v55, 4  ;;  %v2159_v8 = vrot.slane %v11975_v44, 4  ;;  %v11981_v60 = vld [vmem:[#allocation3 + $0x3e] ss:$2 sm:$0xf]  ;;  %v2556_v45 = vpack.c.bf16 %v2555_v9, %v2554_v39  ;;  %v2853_v43 = vrot.slane %v11971_v31, 4 }
 0x2a3   :  { %v11983_v38 = vld [vmem:[#allocation3 + $0x3f] ss:$2 sm:$0xf]  ;;  %v2315_v30 = vrot.slane %v11981_v60, 4  ;;  %v11152_v9 = vld [vmem:[%s13719_s3 + $0xb0] sm:$0xff]   ;;  %v2926_v21 = vrot.slane %v12017_v3, 4 }
 0x2a4   :  { %v2184_v40 = vsel %vm2161_vm7, %v11971_v31, %v2181_v42  ;;  %v2163_v6 = vsel %vm2161_vm7, %v11978_v34, %v2159_v8  ;;  %v2394_v36 = vrot.slane %v11983_v38, 4  ;;  %v12075_v16 = vld [vmem:[#allocation3 + $0x49] ss:$2 sm:$0xf]  ;;  %v2631_v8 = vrot.slane %v12073_v14, 4  ;;  %v11149_v25 = vld [vmem:[%s13719_s3 + $0xa8] sm:$0xff]  }
 0x2a5   :  { %v2185_v54 = vpack.c.bf16 %v2184_v40, %v2183_v50  ;;  %v2164_v57 = vpack.c.bf16 %v2163_v6, %v2162_v26  ;;  %v2318_v35 = vsel %vm2161_vm7, %v12017_v3, %v2315_v30  ;;  %v12087_v24 = vld [vmem:[#allocation3 + $0x20] ss:$2 sm:$0xf]  ;;  %v12089_v42 = vld [vmem:[#allocation3 + $0x21] ss:$2 sm:$0xf]  ;;  %v2858_v62 = vsel %vm2161_vm7, %v11965_v29, %v2853_v43 }
 0x2a6   :  { %v2397_v49 = vsel %vm2161_vm7, %v12019_v28, %v2394_v36  ;;  %v2319_v4 = vpack.c.bf16 %v2318_v35, %v2317_v53  ;;  %v2710_v50 = vrot.slane %v12075_v16, 4  ;;  %v12095_v40 = vld [vmem:[#allocation3 + $0x34] ss:$2 sm:$0xf]  ;;  %v2999_v29 = vrot.slane %v12019_v28, 4 }
 0x2a7   :  { %10248 = vmatmul.mubr.msk.bf16.vlgmr.msra.gmra.mxu1 %vm2202_vm8, %v2185_v54  ;;  %10256 = vmatmul.mubr.msk.bf16.vlgmr.msra.gmra.mxu0 %vm2202_vm8, %v2164_v57  ;;  %v2398_v33 = vpack.c.bf16 %v2397_v49, %v2396_v5  ;;  %v12097_v26 = vld [vmem:[#allocation3 + $0x35] ss:$2 sm:$0xf]  ;;  %v2707_v54 = vrot.slane %v12089_v42, 4  ;;  %v2634_v36 = vsel %vm2161_vm7, %v12095_v40, %v2631_v8  ;;  %v2931_v3 = vsel %vm2161_vm7, %v11997_v13, %v2926_v21 }
 0x2a8   :  { %10260 = vmatpush3.bf16.msra.mxu1 %v11133_v7  ;;  %10268 = vmatpush3.bf16.msra.mxu0 %v11134_v46  ;;  %v11143_v6 = vld [vmem:[%s13719_s3 + $0x60] sm:$0xff]   ;;  %v11144_v7 = vld [vmem:[%s13719_s3 + $0x70] sm:$0xff]   ;;  %v2628_v46 = vrot.slane %v12087_v24, 4  ;;  %v2713_v37 = vsel %vm2161_vm7, %v12097_v26, %v2710_v50  ;;  %v2778_v11 = vld [vmem:[#allocation3 + $0x50] ss:$2 sm:$0xf] }
 0x2a9   :  { %10261 = vmatprep.subr.bf16.mxu1 %v12013_v23  ;;  %10269 = vmatprep.subr.bf16.mxu0 %v12013_v23  ;;  %v2620_v57 = vld [vmem:[#allocation3 + $0xc] ss:$2 sm:$0xf]  ;;  %v2699_v30 = vld [vmem:[#allocation3 + $0xd] ss:$2 sm:$0xf] }
 0x2aa   :  { %10263 = vmatprep.mubr.msk.bf16.mxu1 %vm11365_vm0, %v12013_v23  ;;  %10271 = vmatprep.mubr.msk.bf16.mxu0 %vm11365_vm0, %v12013_v23  ;;  %v2712_v1 = vsel %vm2161_vm7, %v2699_v30, %v2707_v54  ;;  %v11146_v35 = vld [vmem:[%s13719_s3 + $0x98] sm:$0xff]   ;;  %v2783_v5 = vrot.slane %v2778_v11, 4  ;;  %v3143_v8 = vld [vmem:[#allocation3 + $0x5b] ss:$2 sm:$0xf]  ;;  %v3072_v13 = vrot.slane %v12051_v59, 4 }
 0x2ab   :  { %v2714_v53 = vpack.c.bf16 %v2713_v37, %v2712_v1  ;;  %v11155_v50 = vld [vmem:[%s13719_s3 + $0xc0] sm:$0xff]   ;;  %v11157_v30 = vld [vmem:[%s13719_s3 + $0xe8] sm:$0xff]  }
 0x2ac   :  { %10262 = vmatpush3.bf16.msra.mxu1 %v11135_v27  ;;  %10270 = vmatpush3.bf16.msra.mxu0 %v11136_v61  ;;  %v2851_v27 = vld [vmem:[#allocation3 + $0x51] ss:$2 sm:$0xf]  ;;  %v2633_v61 = vsel %vm2161_vm7, %v2620_v57, %v2628_v46  ;;  %v2786_v51 = vsel %vm2161_vm7, %v11975_v44, %v2783_v5  ;;  %v3148_v46 = vrot.slane %v3143_v8, 4  ;;  %v3077_v59 = vsel %vm2161_vm7, %v12043_v17, %v3072_v13 }
 0x2ad   :  { %10275 = vmatprep.subr.bf16.mxu1 %v12013_v23  ;;  %10283 = vmatprep.subr.bf16.mxu0 %v12013_v23  ;;  %v2635_v49 = vpack.c.bf16 %v2634_v36, %v2633_v61  ;;  %v11150_v44 = vld [vmem:[%s13719_s3 + $0xb8] sm:$0xff]   ;;  %v3289_v11 = vld [vmem:[#allocation3 + $0x5d] ss:$2 sm:$0xf]  ;;  %v11160_v61 = vld [vmem:[%s13719_s3 + $0xf0] sm:$0xff]  }
 0x2ae   :  { %v3151_v57 = vsel %vm2161_vm7, %v12031_v52, %v3148_v46  ;;  %v11158_v36 = vld [vmem:[%s13719_s3 + $0xf8] sm:$0xff]   ;;  %v3291_v52 = vrot.slane %v12097_v26, 4 }
 0x2af   :  { %10264 = vmatmul.mubr.msk.bf16.vlgmr.msra.gmra.mxu1 %vm2202_vm8, %v2319_v4  ;;  %10272 = vmatmul.mubr.msk.bf16.vlgmr.msra.gmra.mxu0 %vm2202_vm8, %v2398_v33  ;;  %v11148_v4 = vld [vmem:[%s13719_s3 + $0x90] sm:$0xff]   ;;  %v2780_v33 = vrot.slane %v11978_v34, 4  ;;  %v2997_v34 = vld [vmem:[#allocation3 + $0x53] ss:$2 sm:$0xf] }
 0x2b0   :  { %10276 = vmatpush3.bf16.msra.mxu1 %v11137_v19  ;;  %10284 = vmatpush3.bf16.msra.mxu0 %v11138_v32  ;;  %v2856_v19 = vrot.slane %v2851_v27, 4  ;;  %v11147_v32 = vld [vmem:[%s13719_s3 + $0x80] sm:$0xff]   ;;  %v3002_v12 = vrot.slane %v2997_v34, 4  ;;  %v3296_v26 = vsel %vm2161_vm7, %v12089_v42, %v3291_v52  ;;  %v11164_v42 = vld [vmem:[%s13720_s4 + $0x10] sm:$0xff]  }
 0x2b1   :  { %10277 = vmatprep.subr.bf16.mxu1 %v12013_v23  ;;  %10285 = vmatprep.subr.bf16.mxu0 %v12013_v23  ;;  %v2785_v31 = vsel %vm2161_vm7, %v11967_v48, %v2780_v33  ;;  %v11151_v48 = vld [vmem:[%s13719_s3 + $0xa0] sm:$0xff]  }
 0x2b2   :  { %10279 = vmatprep.mubr.msk.bf16.mxu1 %vm11365_vm0, %v12013_v23  ;;  %10287 = vmatprep.mubr.msk.bf16.mxu0 %vm11365_vm0, %v12013_v23  ;;  %v2787_v63 = vpack.c.bf16 %v2786_v51, %v2785_v31  ;;  %v3005_v39 = vsel %vm2161_vm7, %v11983_v38, %v3002_v12  ;;  %v3070_v38 = vld [vmem:[#allocation3 + $0x5a] ss:$2 sm:$0xf] }
 0x2b3   :  { %v11159_v27 = vld [vmem:[%s13719_s3 + $0xe0] sm:$0xff]  }
 0x2b4   :  { %10278 = vmatpush3.bf16.msra.mxu1 %v11139_v10  ;;  %10286 = vmatpush3.bf16.msra.mxu0 %v11140_v15  ;;  %v2859_v10 = vsel %vm2161_vm7, %v11973_v55, %v2856_v19  ;;  %v2924_v15 = vld [vmem:[#allocation3 + $0x52] ss:$2 sm:$0xf]  ;;  %v11165_v19 = vld [vmem:[%s13720_s4 + $0x28] sm:$0xff]  }
 0x2b5   :  { %10291 = vmatprep.subr.bf16.mxu1 %v12013_v23  ;;  %10299 = vmatprep.subr.bf16.mxu0 %v12013_v23  ;;  %v2860_v55 = vpack.c.bf16 %v2859_v10, %v2858_v62  ;;  %v2929_v0 = vrot.slane %v2924_v15, 4  ;;  %v11168_v33 = vld [vmem:[%s13720_s4] sm:$0xff]  }
 0x2b7   :  { %10280 = vmatmul.mubr.msk.bf16.vlgmr.msra.gmra.mxu1 %vm2202_vm8, %v2477_v22  ;;  %10288 = vmatmul.mubr.msk.bf16.vlgmr.msra.gmra.mxu0 %vm2202_vm8, %v2556_v45  ;;  %v2932_v28 = vsel %vm2161_vm7, %v11981_v60, %v2929_v0  ;;  %v11154_v22 = vld [vmem:[%s13719_s3 + $0xd8] sm:$0xff]  }
 0x2b8   :  { %10292 = vmatpush3.bf16.msra.mxu1 %v11141_v18  ;;  %10300 = vmatpush3.bf16.msra.mxu0 %v11142_v20  ;;  %v3004_v18 = vsel %vm2161_vm7, %v11999_v47, %v2999_v29  ;;  %v11153_v20 = vld [vmem:[%s13719_s3 + $0xc8] sm:$0xff]   ;;  %v2933_v60 = vpack.c.bf16 %v2932_v28, %v2931_v3  ;;  %v3145_v47 = vrot.slane %v12053_v58, 4 }
 0x2b9   :  { %10293 = vmatprep.subr.bf16.mxu1 %v12013_v23  ;;  %10301 = vmatprep.subr.bf16.mxu0 %v12013_v23  ;;  %v3006_v45 = vpack.c.bf16 %v3005_v39, %v3004_v18 }
 0x2ba   :  { %10295 = vmatprep.mubr.msk.bf16.mxu1 %vm11365_vm0, %v12013_v23  ;;  %10303 = vmatprep.mubr.msk.bf16.mxu0 %vm11365_vm0, %v12013_v23  ;;  %v3150_v58 = vsel %vm2161_vm7, %v12045_v2, %v3145_v47  ;;  %v3216_v2 = vld [vmem:[#allocation3 + $0x5c] ss:$2 sm:$0xf] }
 0x2bb   :  { %v3152_v37 = vpack.c.bf16 %v3151_v57, %v3150_v58  ;;  %v3221_v1 = vrot.slane %v3216_v2, 4 }
 0x2bc   :  { %10294 = vmatpush3.bf16.msra.mxu1 %v11143_v6  ;;  %10302 = vmatpush3.bf16.msra.mxu0 %v11144_v7  ;;  %v11156_v6 = vld [vmem:[%s13719_s3 + $0xd0] sm:$0xff]   ;;  %v3075_v7 = vrot.slane %v3070_v38, 4 }
 0x2bd   :  { %10307 = vmatprep.subr.bf16.mxu1 %v12013_v23  ;;  %10315 = vmatprep.subr.bf16.mxu0 %v12013_v23 }
 0x2be   :  { %v3078_v54 = vsel %vm2161_vm7, %v12029_v41, %v3075_v7  ;;  %v3218_v41 = vrot.slane %v12095_v40, 4 }
 0x2bf   :  { %10296 = vmatmul.mubr.msk.bf16.vlgmr.msra.gmra.mxu1 %vm2202_vm8, %v2635_v49  ;;  %10304 = vmatmul.mubr.msk.bf16.vlgmr.msra.gmra.mxu0 %vm2202_vm8, %v2714_v53  ;;  %v3079_v17 = vpack.c.bf16 %v3078_v54, %v3077_v59 }
 0x2c0   :  { %10308 = vmatpush3.bf16.msra.mxu1 %v11145_v56  ;;  %10316 = vmatpush3.bf16.msra.mxu0 %v11146_v35  ;;  %v3294_v56 = vrot.slane %v3289_v11, 4  ;;  %v3223_v40 = vsel %vm2161_vm7, %v12087_v24, %v3218_v41  ;;  %v3224_v35 = vsel %vm2161_vm7, %v12073_v14, %v3221_v1  ;;  %v11161_v14 = vld [vmem:[%s13720_s4 + $0x38] sm:$0xff]   ;;  %v11163_v24 = vld [vmem:[%s13720_s4 + $0x30] sm:$0xff]  }
 0x2c1   :  { %10309 = vmatprep.subr.bf16.mxu1 %v12013_v23  ;;  %10317 = vmatprep.subr.bf16.mxu0 %v12013_v23  ;;  %v3225_v53 = vpack.c.bf16 %v3224_v35, %v3223_v40 }
 0x2c2   :  { %10311 = vmatprep.mubr.msk.bf16.mxu1 %vm11365_vm0, %v12013_v23  ;;  %10319 = vmatprep.mubr.msk.bf16.mxu0 %vm11365_vm0, %v12013_v23  ;;  %v3297_v49 = vsel %vm2161_vm7, %v12075_v16, %v3294_v56  ;;  %v11162_v16 = vld [vmem:[%s13720_s4 + $0x18] sm:$0xff]  }
 0x2c3   :  { %v3298_v5 = vpack.c.bf16 %v3297_v49, %v3296_v26 }
 0x2c4   :  { %10310 = vmatpush3.bf16.msra.mxu1 %v11147_v32  ;;  %10318 = vmatpush3.bf16.msra.mxu0 %v11148_v4  ;;  %v11166_v32 = vld [vmem:[%s13720_s4 + $0x8] sm:$0xff]   ;;  %v11167_v4 = vld [vmem:[%s13720_s4 + $0x20] sm:$0xff]  }
 0x2c5   :  { %10323 = vmatprep.subr.bf16.mxu1 %v12013_v23  ;;  %10331 = vmatprep.subr.bf16.mxu0 %v12013_v23 }
 0x2c7   :  { %10312 = vmatmul.mubr.msk.bf16.vlgmr.msra.gmra.mxu1 %vm2202_vm8, %v2787_v63  ;;  %10320 = vmatmul.mubr.msk.bf16.vlgmr.msra.gmra.mxu0 %vm2202_vm8, %v2860_v55 }
 0x2c8   :  { %10324 = vmatpush3.bf16.msra.mxu1 %v11149_v25  ;;  %10332 = vmatpush3.bf16.msra.mxu0 %v11150_v44 }
 0x2c9   :  { %10325 = vmatprep.subr.bf16.mxu1 %v12013_v23  ;;  %10333 = vmatprep.subr.bf16.mxu0 %v12013_v23 }
 0x2ca   :  { %10327 = vmatprep.mubr.msk.bf16.mxu1 %vm11365_vm0, %v12013_v23  ;;  %10335 = vmatprep.mubr.msk.bf16.mxu0 %vm11365_vm0, %v12013_v23 }
 0x2cc   :  { %10326 = vmatpush3.bf16.msra.mxu1 %v11151_v48  ;;  %10334 = vmatpush3.bf16.msra.mxu0 %v11152_v9 }
 0x2cd   :  { %10339 = vmatprep.subr.bf16.mxu1 %v12013_v23  ;;  %10347 = vmatprep.subr.bf16.mxu0 %v12013_v23 }
 0x2cf   :  { %10328 = vmatmul.mubr.msk.bf16.vlgmr.msra.gmra.mxu1 %vm2202_vm8, %v2933_v60  ;;  %10336 = vmatmul.mubr.msk.bf16.vlgmr.msra.gmra.mxu0 %vm2202_vm8, %v3006_v45 }
 0x2d0   :  { %10340 = vmatpush3.bf16.msra.mxu1 %v11153_v20  ;;  %10348 = vmatpush3.bf16.msra.mxu0 %v11154_v22 }
 0x2d1   :  { %10341 = vmatprep.subr.bf16.mxu1 %v12013_v23  ;;  %10349 = vmatprep.subr.bf16.mxu0 %v12013_v23 }
 0x2d2   :  { %10343 = vmatprep.mubr.msk.bf16.mxu1 %vm11365_vm0, %v12013_v23  ;;  %10351 = vmatprep.mubr.msk.bf16.mxu0 %vm11365_vm0, %v12013_v23 }
 0x2d4   :  { %10342 = vmatpush3.bf16.msra.mxu1 %v11155_v50  ;;  %10350 = vmatpush3.bf16.msra.mxu0 %v11156_v6 }
 0x2d5   :  { %10355 = vmatprep.subr.bf16.mxu1 %v12013_v23  ;;  %10363 = vmatprep.subr.bf16.mxu0 %v12013_v23 }
 0x2d7   :  { %10344 = vmatmul.mubr.msk.bf16.vlgmr.msra.gmra.mxu1 %vm2202_vm8, %v3079_v17  ;;  %10352 = vmatmul.mubr.msk.bf16.vlgmr.msra.gmra.mxu0 %vm2202_vm8, %v3152_v37 }
 0x2d8   :  { %10356 = vmatpush3.bf16.msra.mxu1 %v11157_v30  ;;  %10364 = vmatpush3.bf16.msra.mxu0 %v11158_v36 }
 0x2d9   :  { %10357 = vmatprep.subr.bf16.mxu1 %v12013_v23  ;;  %10365 = vmatprep.subr.bf16.mxu0 %v12013_v23 }
 0x2da   :  { %10359 = vmatprep.mubr.msk.bf16.mxu1 %vm11365_vm0, %v12013_v23  ;;  %10367 = vmatprep.mubr.msk.bf16.mxu0 %vm11365_vm0, %v12013_v23 }
 0x2dc   :  { %10358 = vmatpush3.bf16.msra.mxu1 %v11159_v27  ;;  %10366 = vmatpush3.bf16.msra.mxu0 %v11160_v61 }
 0x2dd   :  { %10371 = vmatprep.subr.bf16.mxu1 %v12013_v23  ;;  %10383 = vmatprep.subr.bf16.mxu0 %v12013_v23 }
 0x2df   :  { %10360 = vmatmul.mubr.msk.bf16.vlgmr.msra.gmra.mxu1 %vm2202_vm8, %v3225_v53  ;;  %10368 = vmatmul.mubr.msk.bf16.vlgmr.msra.gmra.mxu0 %vm2202_vm8, %v3298_v5 }
 0x2e0   :  { %10379 = vmatprep.mubr.msk.bf16.mxu1 %vm11365_vm0, %v12013_v23  ;;  %10391 = vmatprep.mubr.msk.bf16.mxu0 %vm11365_vm0, %v12013_v23 }
 0x2e1   :  { %10372 = vmatpush3.bf16.msra.mxu1 %v11161_v14  ;;  %10384 = vmatpush3.bf16.msra.mxu0 %v11162_v16 }
 0x2e2   :  { %10373 = vmatprep.subr.bf16.mxu1 %v12013_v23  ;;  %10385 = vmatprep.subr.bf16.mxu0 %v12013_v23 }
 0x2e5   :  { %10374 = vmatpush3.bf16.msra.mxu1 %v11163_v24  ;;  %10386 = vmatpush3.bf16.msra.mxu0 %v11164_v42 }
 0x2e6   :  { %10375 = vmatprep.subr.bf16.mxu1 %v12013_v23  ;;  %10387 = vmatprep.subr.bf16.mxu0 %v12013_v23 }
 0x2e9   :  { %10376 = vmatpush3.bf16.msra.mxu1 %v11165_v19  ;;  %10388 = vmatpush3.bf16.msra.mxu0 %v11166_v32 }
 0x2ea   :  { %10377 = vmatprep.subr.bf16.mxu1 %v12013_v23  ;;  %10389 = vmatprep.subr.bf16.mxu0 %v12013_v23 }
 0x2ed   :  { %10378 = vmatpush3.bf16.msra.mxu1 %v11167_v4  ;;  %10390 = vmatpush3.bf16.msra.mxu0 %v11168_v33 }
 0x2ee   :  { %10395 = vmatprep.subr.bf16.mxu1 %v12013_v23  ;;  %10407 = vmatprep.subr.bf16.mxu0 %v12013_v23 }
 0x367   :  { %v2240_v43 = vpop.f32.mrf.mxu1  ;;  %v2296_v51 = vpop.f32.mrf.mxu0 }
 0x368   :  { %v2297_v3 = vadd.f32 %v2296_v51, %v2240_v43 }
 0x369   :  { %v10249_v10 = vpop.f32.mrf.mxu1  ;;  %v10257_v15 = vpop.f32.mrf.mxu0 }
 0x36b   :  { %v2243_v34 = vpop.f32.mrf.mxu1  ;;  %v2299_v31 = vpop.f32.mrf.mxu0 }
 0x36c   :  { %v2300_v38 = vadd.f32 %v2299_v31, %v2243_v34 }
 0x36d   :  { %v10250_v62 = vpop.f32.mrf.mxu1  ;;  %v10258_v25 = vpop.f32.mrf.mxu0 }
 0x36f   :  { %v2373_v44 = vpop.f32.mrf.mxu1  ;;  %v2452_v63 = vpop.f32.mrf.mxu0 }
 0x370   :  { %v2380_v22 = vadd.f32 %v2373_v44, %v2297_v3 }
 0x371   :  { %v10265_v55 = vpop.f32.mrf.mxu1  ;;  %v10273_v0 = vpop.f32.mrf.mxu0 }
 0x372   :  { %v2459_v47 = vadd.f32 %v2452_v63, %v2380_v22 }
 0x373   :  { %v2376_v12 = vpop.f32.mrf.mxu1  ;;  %v2455_v29 = vpop.f32.mrf.mxu0 }
 0x374   :  { %v2381_v50 = vadd.f32 %v2376_v12, %v2300_v38 }
 0x375   :  { %v10266_v48 = vpop.f32.mrf.mxu1  ;;  %v10274_v9 = vpop.f32.mrf.mxu0 }
 0x376   :  { %v2460_v54 = vadd.f32 %v2455_v29, %v2381_v50 }
 0x377   :  { %v2531_v21 = vpop.f32.mrf.mxu1  ;;  %v2610_v28 = vpop.f32.mrf.mxu0 }
 0x378   :  { %v2538_v46 = vadd.f32 %v2531_v21, %v2459_v47 }
 0x379   :  { %v10281_v39 = vpop.f32.mrf.mxu1  ;;  %v10289_v23 = vpop.f32.mrf.mxu0 }
 0x37a   :  { %v2617_v36 = vadd.f32 %v2610_v28, %v2538_v46 }
 0x37b   :  { %v2534_v18 = vpop.f32.mrf.mxu1  ;;  %v2613_v20 = vpop.f32.mrf.mxu0 }
 0x37c   :  { %v2539_v17 = vadd.f32 %v2534_v18, %v2460_v54 }
 0x37d   :  { %v10282_v60 = vpop.f32.mrf.mxu1  ;;  %v10290_v45 = vpop.f32.mrf.mxu0 }
 0x37e   :  { %v2618_v27 = vadd.f32 %v2613_v20, %v2539_v17  ;;  %v11171_v17 = vld [vmem:[%s13720_s4 + $0x50] sm:$0xff]  }
 0x37f   :  { %v2689_v8 = vpop.f32.mrf.mxu1  ;;  %v2768_v13 = vpop.f32.mrf.mxu0 }
 0x380   :  { %v2696_v11 = vadd.f32 %v2689_v8, %v2617_v36 }
 0x381   :  { %v10297_v6 = vpop.f32.mrf.mxu1  ;;  %v10305_v7 = vpop.f32.mrf.mxu0 }
 0x382   :  { %v2775_v56 = vadd.f32 %v2768_v13, %v2696_v11  ;;  %v11173_v11 = vld [vmem:[%s13720_s4 + $0x48] sm:$0xff]  }
 0x383   :  { %v2692_v59 = vpop.f32.mrf.mxu1  ;;  %v2771_v58 = vpop.f32.mrf.mxu0 }
 0x384   :  { %v2697_v40 = vadd.f32 %v2692_v59, %v2618_v27  ;;  %v11169_v59 = vld [vmem:[%s13720_s4 + $0x58] sm:$0xff]   ;;  %v11176_v27 = vld [vmem:[%s13720_s4 + $0x60] sm:$0xff]  }
 0x385   :  { %v10298_v57 = vpop.f32.mrf.mxu1  ;;  %v10306_v30 = vpop.f32.mrf.mxu0 }
 0x386   :  { %v2776_v14 = vadd.f32 %v2771_v58, %v2697_v40  ;;  %v11170_v57 = vld [vmem:[%s13720_s4 + $0x78] sm:$0xff]  }
 0x387   :  { %v2841_v37 = vpop.f32.mrf.mxu1  ;;  %v2914_v2 = vpop.f32.mrf.mxu0  ;;  %v11178_v40 = vld [vmem:[%s13720_s4 + $0xb8] sm:$0xff]  }
 0x388   :  { %v2848_v49 = vadd.f32 %v2841_v37, %v2775_v56  ;;  %v11172_v37 = vld [vmem:[%s13720_s4 + $0x70] sm:$0xff]   ;;  %v11177_v56 = vld [vmem:[%s13720_s4 + $0x98] sm:$0xff]  }
 0x389   :  { %v10313_v41 = vpop.f32.mrf.mxu1  ;;  %v10321_v52 = vpop.f32.mrf.mxu0 }
 0x38a   :  { %v2921_v42 = vadd.f32 %v2914_v2, %v2848_v49  ;;  %v12301_v2 = vld [vmem:[#allocation2] sm:$0xff]  ;;  %v11174_v41 = vld [vmem:[%s13720_s4 + $0x68] sm:$0xff]   ;;  %v11179_v49 = vld [vmem:[%s13720_s4 + $0x90] sm:$0xff]  }
 0x38b   :  { %v2844_v61 = vpop.f32.mrf.mxu1  ;;  %v2917_v1 = vpop.f32.mrf.mxu0  ;;  %v11175_v52 = vld [vmem:[%s13720_s4 + $0x40] sm:$0xff]  }
 0x38c   :  { %v2849_v19 = vadd.f32 %v2844_v61, %v2776_v14  ;;  %v11182_v14 = vld [vmem:[%s13720_s4 + $0xa8] sm:$0xff]  }
 0x38d   :  { %v10314_v26 = vpop.f32.mrf.mxu1  ;;  %v10322_v35 = vpop.f32.mrf.mxu0 }
 0x38e   :  { %v2922_v10 = vadd.f32 %v2917_v1, %v2849_v19 }
 0x38f   :  { %v2987_v53 = vpop.f32.mrf.mxu1  ;;  %v3060_v5 = vpop.f32.mrf.mxu0 }
 0x390   :  { %v2994_v33 = vadd.f32 %v2987_v53, %v2921_v42  ;;  %v11180_v53 = vld [vmem:[%s13720_s4 + $0xb0] sm:$0xff]  }
 0x391   :  { %v10329_v16 = vpop.f32.mrf.mxu1  ;;  %v10337_v24 = vpop.f32.mrf.mxu0 }
 0x392   :  { %v3067_v31 = vadd.f32 %v3060_v5, %v2994_v33  ;;  %v11181_v5 = vld [vmem:[%s13720_s4 + $0x88] sm:$0xff]   ;;  %v11183_v16 = vld [vmem:[%s13720_s4 + $0x80] sm:$0xff]  }
 0x393   :  { %v2990_v32 = vpop.f32.mrf.mxu1  ;;  %v3063_v4 = vpop.f32.mrf.mxu0  ;;  %v11184_v24 = vld [vmem:[%s13720_s4 + $0xa0] sm:$0xff]  }
 0x394   :  { %v2995_v62 = vadd.f32 %v2990_v32, %v2922_v10  ;;  %v11185_v32 = vld [vmem:[%s13720_s4 + $0xd8] sm:$0xff]   ;;  %v11188_v10 = vld [vmem:[%s13720_s4 + $0xf0] sm:$0xff]  }
 0x395   :  { %v10330_v43 = vpop.f32.mrf.mxu1  ;;  %v10338_v51 = vpop.f32.mrf.mxu0 }
 0x396   :  { %v3068_v12 = vadd.f32 %v3063_v4, %v2995_v62  ;;  %v11186_v4 = vld [vmem:[%s13720_s4 + $0xf8] sm:$0xff]   ;;  %v11187_v51 = vld [vmem:[%s13720_s4 + $0xd0] sm:$0xff]   ;;  %v11192_v62 = vld [vmem:[%s13720_s4 + $0xe0] sm:$0xff]  }
 0x397   :  { %v3133_v15 = vpop.f32.mrf.mxu1  ;;  %v3206_v34 = vpop.f32.mrf.mxu0 }
 0x398   :  { %v3140_v63 = vadd.f32 %v3133_v15, %v3067_v31  ;;  %v11189_v15 = vld [vmem:[%s13720_s4 + $0xc8] sm:$0xff]   ;;  %v11191_v31 = vld [vmem:[%s13720_s4 + $0xc0] sm:$0xff]  }
 0x399   :  { %v10345_v25 = vpop.f32.mrf.mxu1  ;;  %v10353_v44 = vpop.f32.mrf.mxu0 }
 0x39a   :  { %v3213_v9 = vadd.f32 %v3206_v34, %v3140_v63  ;;  %v11190_v34 = vld [vmem:[%s13720_s4 + $0xe8] sm:$0xff]   ;;  %v11193_v63 = vld [vmem:[%s13720_s4 + $0x118] sm:$0xff]  }
 0x39b   :  { %v3136_v55 = vpop.f32.mrf.mxu1  ;;  %v3209_v0 = vpop.f32.mrf.mxu0 }
 0x39c   :  { %v3141_v21 = vadd.f32 %v3136_v55, %v3068_v12  ;;  %v11194_v55 = vld [vmem:[%s13720_s4 + $0x138] sm:$0xff]  }
 0x39d   :  { %v10346_v29 = vpop.f32.mrf.mxu1  ;;  %v10354_v48 = vpop.f32.mrf.mxu0 }
 0x39e   :  { %v3214_v20 = vadd.f32 %v3209_v0, %v3141_v21  ;;  %v11195_v29 = vld [vmem:[%s13720_s4 + $0x110] sm:$0xff]   ;;  %v11198_v21 = vld [vmem:[%s13720_s4 + $0x128] sm:$0xff]  }
 0x39f   :  { %v3279_v28 = vpop.f32.mrf.mxu1  ;;  %v3352_v39 = vpop.f32.mrf.mxu0  ;;  %v11196_v48 = vld [vmem:[%s13720_s4 + $0x130] sm:$0xff]  }
 0x3a0   :  { %v3286_v23 = vadd.f32 %v3279_v28, %v3213_v9  ;;  %v11197_v9 = vld [vmem:[%s13720_s4 + $0x108] sm:$0xff]   ;;  %v11199_v28 = vld [vmem:[%s13720_s4 + $0x100] sm:$0xff]  }
 0x3a1   :  { %v10361_v3 = vpop.f32.mrf.mxu1  ;;  %v10369_v18 = vpop.f32.mrf.mxu0 }
 0x3a2   :  { %v3359_v22 = vadd.f32 %v3352_v39, %v3286_v23  ;;  %v11200_v39 = vld [vmem:[%s13720_s4 + $0x120] sm:$0xff]   ;;  %v11201_v18 = vld [vmem:[%s13720_s4 + $0x158] sm:$0xff]  }
 0x3a3   :  { %v3282_v60 = vpop.f32.mrf.mxu1  ;;  %v3355_v45 = vpop.f32.mrf.mxu0 }
 0x3a4   :  { %vm3361_vm9 = vcmp.gt.f32.partialorder %v3359_v22, 0.0  ;;  %v3363_v38 = vmul.f32 0.2, %v3359_v22  ;;  %v3287_v8 = vadd.f32 %v3282_v60, %v3214_v20  ;;  %v11202_v20 = vld [vmem:[%s13720_s4 + $0x178] sm:$0xff]  }
 0x3a5   :  { %v10362_v13 = vpop.f32.mrf.mxu1  ;;  %v10370_v47 = vpop.f32.mrf.mxu0 }
 0x3a6   :  { %v3365_v50 = vsel %vm3361_vm9, %v3359_v22, %v3363_v38  ;;  %v3360_v6 = vadd.f32 %v3355_v45, %v3287_v8  ;;  %v11203_v45 = vld [vmem:[%s13720_s4 + $0x150] sm:$0xff]   ;;  %v11205_v8 = vld [vmem:[%s13720_s4 + $0x148] sm:$0xff]   ;;  %v11207_v47 = vld [vmem:[%s13720_s4 + $0x140] sm:$0xff]  }
 0x3a7   :  { %3367 = vst [vmem:[#allocation4] sm:$0xff] %v3365_v50   ;;  %v11204_v38 = vld [vmem:[%s13720_s4 + $0x170] sm:$0xff]   ;;  %v11206_v13 = vld [vmem:[%s13720_s4 + $0x168] sm:$0xff]   ;;  %v11208_v50 = vld [vmem:[%s13720_s4 + $0x160] sm:$0xff]  }
 0x3a8   :  { %vm3362_vm10 = vcmp.gt.f32.partialorder %v3360_v6, 0.0  ;;  %v3364_v7 = vmul.f32 0.2, %v3360_v6 }
 0x3aa   :  { %v3366_v46 = vsel %vm3362_vm10, %v3360_v6, %v3364_v7 }
 0x3ab   :  { %3369 = vst [vmem:[#allocation4 + $0x8] sm:$0xff] %v3366_v46   ;;  %v11209_v46 = vld [vmem:[%s13720_s4 + $0x198] sm:$0xff]  }
 0x3ae   :  { %v3381_v58 = vld [vmem:[#allocation4 + $0x1] sm:$0x1]  ;;  %v3371_v54 = vld [vmem:[#allocation4] sm:$0x1]  ;;  %v3526_v61 = vld [vmem:[#allocation4 + $0x2] sm:$0x1] }
 0x3af   :  { %v3382_v30 = vpack.c.bf16 %v3381_v58, %v3381_v58  ;;  %v3372_v36 = vpack.c.bf16 %v3371_v54, %v3371_v54  ;;  %v3604_v1 = vld [vmem:[#allocation4 + $0x3] sm:$0x1]  ;;  %v3527_v26 = vpack.c.bf16 %v3526_v61, %v3526_v61  ;;  %v3682_v42 = vld [vmem:[#allocation4 + $0x4] sm:$0x1]  ;;  %v3760_v19 = vld [vmem:[#allocation4 + $0x5] sm:$0x1] }
 0x3b0   :  { %v3605_v35 = vpack.c.bf16 %v3604_v1, %v3604_v1  ;;  %v3683_v33 = vpack.c.bf16 %v3682_v42, %v3682_v42  ;;  %v3761_v43 = vpack.c.bf16 %v3760_v19, %v3760_v19  ;;  %v3838_v25 = vld [vmem:[#allocation4 + $0x6] sm:$0x1]  ;;  %v3916_v44 = vld [vmem:[#allocation4 + $0x7] sm:$0x1]  ;;  %v11218_v61 = vld [vmem:[%s13720_s4 + $0x1f8] sm:$0xff]  }
 0x3b1   :  { %10380 = vmatmul.mubr.msk.bf16.vlgmr.msra.gmra.mxu1 %vm3415_vm11, %v3382_v30  ;;  %10392 = vmatmul.mubr.msk.bf16.vlgmr.msra.gmra.mxu0 %vm3415_vm11, %v3372_v36  ;;  %v3839_v0 = vpack.c.bf16 %v3838_v25, %v3838_v25  ;;  %v3917_v12 = vpack.c.bf16 %v3916_v44, %v3916_v44  ;;  %v11212_v30 = vld [vmem:[%s13720_s4 + $0x1b0] sm:$0xff]   ;;  %v11213_v36 = vld [vmem:[%s13720_s4 + $0x188] sm:$0xff]  }
 0x3b2   :  { %10396 = vmatpush3.bf16.msra.mxu1 %v11169_v59  ;;  %10408 = vmatpush3.bf16.msra.mxu0 %v11170_v57  ;;  %v3994_v23 = vld [vmem:[#allocation4 + $0x8] sm:$0x1]  ;;  %v4072_v3 = vld [vmem:[#allocation4 + $0x9] sm:$0x1]  ;;  %v4150_v6 = vld [vmem:[#allocation4 + $0xa] sm:$0x1] }
 0x3b3   :  { %10397 = vmatprep.subr.bf16.mxu1 %v12301_v2  ;;  %10409 = vmatprep.subr.bf16.mxu0 %v12301_v2  ;;  %v3995_v22 = vpack.c.bf16 %v3994_v23, %v3994_v23  ;;  %v4073_v60 = vpack.c.bf16 %v4072_v3, %v4072_v3  ;;  %v4228_v7 = vld [vmem:[#allocation4 + $0xb] sm:$0x1]  ;;  %v4151_v58 = vpack.c.bf16 %v4150_v6, %v4150_v6  ;;  %v11211_v57 = vld [vmem:[%s13720_s4 + $0x190] sm:$0xff]  }
 0x3b4   :  { %10403 = vmatprep.mubr.msk.bf16.mxu1 %vm11365_vm0, %v12301_v2  ;;  %10415 = vmatprep.mubr.msk.bf16.mxu0 %vm11365_vm0, %v12301_v2  ;;  %v11210_v59 = vld [vmem:[%s13720_s4 + $0x1b8] sm:$0xff]   ;;  %v4229_v54 = vpack.c.bf16 %v4228_v7, %v4228_v7 }
 0x3b6   :  { %10398 = vmatpush3.bf16.msra.mxu1 %v11171_v17  ;;  %10410 = vmatpush3.bf16.msra.mxu0 %v11172_v37  ;;  %v11214_v17 = vld [vmem:[%s13720_s4 + $0x1a8] sm:$0xff]   ;;  %v11215_v37 = vld [vmem:[%s13720_s4 + $0x180] sm:$0xff]  }
 0x3b7   :  { %10399 = vmatprep.subr.bf16.mxu1 %v12301_v2  ;;  %10411 = vmatprep.subr.bf16.mxu0 %v12301_v2 }
 0x3ba   :  { %10400 = vmatpush3.bf16.msra.mxu1 %v11173_v11  ;;  %10412 = vmatpush3.bf16.msra.mxu0 %v11174_v41  ;;  %v11216_v11 = vld [vmem:[%s13720_s4 + $0x1a0] sm:$0xff]   ;;  %v4306_v41 = vld [vmem:[#allocation4 + $0xc] sm:$0x1] }
 0x3bb   :  { %10401 = vmatprep.subr.bf16.mxu1 %v12301_v2  ;;  %10413 = vmatprep.subr.bf16.mxu0 %v12301_v2  ;;  %v4307_v1 = vpack.c.bf16 %v4306_v41, %v4306_v41 }
 0x3be   :  { %10402 = vmatpush3.bf16.msra.mxu1 %v11175_v52  ;;  %10414 = vmatpush3.bf16.msra.mxu0 %v11176_v27  ;;  %v4384_v52 = vld [vmem:[#allocation4 + $0xd] sm:$0x1] }
 0x3bf   :  { %10419 = vmatprep.subr.bf16.mxu1 %v12301_v2  ;;  %10431 = vmatprep.subr.bf16.mxu0 %v12301_v2  ;;  %v11217_v27 = vld [vmem:[%s13720_s4 + $0x1d8] sm:$0xff]  }
 0x3c1   :  { %10404 = vmatmul.mubr.msk.bf16.vlgmr.msra.gmra.mxu1 %vm3415_vm11, %v3527_v26  ;;  %10416 = vmatmul.mubr.msk.bf16.vlgmr.msra.gmra.mxu0 %vm3415_vm11, %v3605_v35  ;;  %v11220_v26 = vld [vmem:[%s13720_s4 + $0x1f0] sm:$0xff]   ;;  %v11221_v35 = vld [vmem:[%s13720_s4 + $0x1c8] sm:$0xff]  }
 0x3c2   :  { %10420 = vmatpush3.bf16.msra.mxu1 %v11177_v56  ;;  %10432 = vmatpush3.bf16.msra.mxu0 %v11178_v40  ;;  %v4385_v56 = vpack.c.bf16 %v4384_v52, %v4384_v52  ;;  %v11219_v40 = vld [vmem:[%s13720_s4 + $0x1d0] sm:$0xff]  }
 0x3c3   :  { %10421 = vmatprep.subr.bf16.mxu1 %v12301_v2  ;;  %10433 = vmatprep.subr.bf16.mxu0 %v12301_v2 }
 0x3c4   :  { %10427 = vmatprep.mubr.msk.bf16.mxu1 %vm11365_vm0, %v12301_v2  ;;  %10439 = vmatprep.mubr.msk.bf16.mxu0 %vm11365_vm0, %v12301_v2 }
 0x3c6   :  { %10422 = vmatpush3.bf16.msra.mxu1 %v11179_v49  ;;  %10434 = vmatpush3.bf16.msra.mxu0 %v11180_v53  ;;  %v11222_v49 = vld [vmem:[%s13720_s4 + $0x1e8] sm:$0xff]   ;;  %v11223_v53 = vld [vmem:[%s13720_s4 + $0x1c0] sm:$0xff]  }
 0x3c7   :  { %10423 = vmatprep.subr.bf16.mxu1 %v12301_v2  ;;  %10435 = vmatprep.subr.bf16.mxu0 %v12301_v2 }
 0x3ca   :  { %10424 = vmatpush3.bf16.msra.mxu1 %v11181_v5  ;;  %10436 = vmatpush3.bf16.msra.mxu0 %v11182_v14  ;;  %v11224_v5 = vld [vmem:[%s13720_s4 + $0x1e0] sm:$0xff]   ;;  %v4462_v14 = vld [vmem:[#allocation4 + $0xe] sm:$0x1] }
 0x3cb   :  { %10425 = vmatprep.subr.bf16.mxu1 %v12301_v2  ;;  %10437 = vmatprep.subr.bf16.mxu0 %v12301_v2  ;;  %v4463_v42 = vpack.c.bf16 %v4462_v14, %v4462_v14 }
 0x3ce   :  { %10426 = vmatpush3.bf16.msra.mxu1 %v11183_v16  ;;  %10438 = vmatpush3.bf16.msra.mxu0 %v11184_v24  ;;  %v4540_v16 = vld [vmem:[#allocation4 + $0xf] sm:$0x1]  ;;  %v11225_v24 = vld [vmem:[%s13716_s1] sm:$0xff]  }
 0x3cf   :  { %10443 = vmatprep.subr.bf16.mxu1 %v12301_v2  ;;  %10455 = vmatprep.subr.bf16.mxu0 %v12301_v2  ;;  %v4541_v19 = vpack.c.bf16 %v4540_v16, %v4540_v16 }
 0x3d1   :  { %10428 = vmatmul.mubr.msk.bf16.vlgmr.msra.gmra.mxu1 %vm3415_vm11, %v3683_v33  ;;  %10440 = vmatmul.mubr.msk.bf16.vlgmr.msra.gmra.mxu0 %vm3415_vm11, %v3761_v43  ;;  %v11228_v33 = vld [vmem:[%s13717_s0 + $0x74] sm:$0xff]   ;;  %v11229_v43 = vld [vmem:[%s13717_s0 + $0x7c] sm:$0xff]  }
 0x3d2   :  { %10444 = vmatpush3.bf16.msra.mxu1 %v11185_v32  ;;  %10456 = vmatpush3.bf16.msra.mxu0 %v11186_v4  ;;  %v11226_v32 = vld [vmem:[%s13717_s0 + $0x64] sm:$0xff]   ;;  %v11227_v4 = vld [vmem:[%s13717_s0 + $0x6c] sm:$0xff]  }
 0x3d3   :  { %10445 = vmatprep.subr.bf16.mxu1 %v12301_v2  ;;  %10457 = vmatprep.subr.bf16.mxu0 %v12301_v2 }
 0x3d4   :  { %10451 = vmatprep.mubr.msk.bf16.mxu1 %vm11365_vm0, %v12301_v2  ;;  %10463 = vmatprep.mubr.msk.bf16.mxu0 %vm11365_vm0, %v12301_v2 }
 0x3d6   :  { %10446 = vmatpush3.bf16.msra.mxu1 %v11187_v51  ;;  %10458 = vmatpush3.bf16.msra.mxu0 %v11188_v10  ;;  %v11230_v51 = vld [vmem:[%s13717_s0 + $0x84] sm:$0xff]   ;;  %v11231_v10 = vld [vmem:[%s13717_s0 + $0x8c] sm:$0xff]  }
 0x3d7   :  { %10447 = vmatprep.subr.bf16.mxu1 %v12301_v2  ;;  %10459 = vmatprep.subr.bf16.mxu0 %v12301_v2 }
 0x3da   :  { %10448 = vmatpush3.bf16.msra.mxu1 %v11189_v15  ;;  %10460 = vmatpush3.bf16.msra.mxu0 %v11190_v34  ;;  %v11232_v15 = vld [vmem:[%s13717_s0 + $0x94] sm:$0xff]   ;;  %v11233_v34 = vld [vmem:[%s13717_s0 + $0x9c] sm:$0xff]  }
 0x3db   :  { %10449 = vmatprep.subr.bf16.mxu1 %v12301_v2  ;;  %10461 = vmatprep.subr.bf16.mxu0 %v12301_v2 }
 0x3de   :  { %10450 = vmatpush3.bf16.msra.mxu1 %v11191_v31  ;;  %10462 = vmatpush3.bf16.msra.mxu0 %v11192_v62  ;;  %v11234_v31 = vld [vmem:[%s13717_s0 + $0xa4] sm:$0xff]   ;;  %v11235_v62 = vld [vmem:[%s13717_s0 + $0xac] sm:$0xff]  }
 0x3df   :  { %10467 = vmatprep.subr.bf16.mxu1 %v12301_v2  ;;  %10479 = vmatprep.subr.bf16.mxu0 %v12301_v2 }
 0x3e1   :  { %10452 = vmatmul.mubr.msk.bf16.vlgmr.msra.gmra.mxu1 %vm3415_vm11, %v3839_v0  ;;  %10464 = vmatmul.mubr.msk.bf16.vlgmr.msra.gmra.mxu0 %vm3415_vm11, %v3917_v12 }
 0x3e2   :  { %10468 = vmatpush3.bf16.msra.mxu1 %v11193_v63  ;;  %10480 = vmatpush3.bf16.msra.mxu0 %v11194_v55 }
 0x3e3   :  { %10469 = vmatprep.subr.bf16.mxu1 %v12301_v2  ;;  %10481 = vmatprep.subr.bf16.mxu0 %v12301_v2 }
 0x3e4   :  { %10475 = vmatprep.mubr.msk.bf16.mxu1 %vm11365_vm0, %v12301_v2  ;;  %10487 = vmatprep.mubr.msk.bf16.mxu0 %vm11365_vm0, %v12301_v2 }
 0x3e6   :  { %10470 = vmatpush3.bf16.msra.mxu1 %v11195_v29  ;;  %10482 = vmatpush3.bf16.msra.mxu0 %v11196_v48  ;;  %v11236_v48 = vld [vmem:[%s13717_s0 + $0xb4] sm:$0xff]  }
 0x3e7   :  { %10471 = vmatprep.subr.bf16.mxu1 %v12301_v2  ;;  %10483 = vmatprep.subr.bf16.mxu0 %v12301_v2 }
 0x3ea   :  { %10472 = vmatpush3.bf16.msra.mxu1 %v11197_v9  ;;  %10484 = vmatpush3.bf16.msra.mxu0 %v11198_v21 }
 0x3eb   :  { %10473 = vmatprep.subr.bf16.mxu1 %v12301_v2  ;;  %10485 = vmatprep.subr.bf16.mxu0 %v12301_v2 }
 0x3ee   :  { %10474 = vmatpush3.bf16.msra.mxu1 %v11199_v28  ;;  %10486 = vmatpush3.bf16.msra.mxu0 %v11200_v39  ;;  %v11237_v28 = vld [vmem:[%s13717_s0 + $0xbc] sm:$0xff]  }
 0x3ef   :  { %10491 = vmatprep.subr.bf16.mxu1 %v12301_v2  ;;  %10503 = vmatprep.subr.bf16.mxu0 %v12301_v2 }
 0x3f1   :  { %10476 = vmatmul.mubr.msk.bf16.vlgmr.msra.gmra.mxu1 %vm3415_vm11, %v3995_v22  ;;  %10488 = vmatmul.mubr.msk.bf16.vlgmr.msra.gmra.mxu0 %vm3415_vm11, %v4073_v60 }
 0x3f2   :  { %10492 = vmatpush3.bf16.msra.mxu1 %v11201_v18  ;;  %10504 = vmatpush3.bf16.msra.mxu0 %v11202_v20 }
 0x3f3   :  { %10493 = vmatprep.subr.bf16.mxu1 %v12301_v2  ;;  %10505 = vmatprep.subr.bf16.mxu0 %v12301_v2 }
 0x3f4   :  { %10499 = vmatprep.mubr.msk.bf16.mxu1 %vm11365_vm0, %v12301_v2  ;;  %10511 = vmatprep.mubr.msk.bf16.mxu0 %vm11365_vm0, %v12301_v2 }
 0x3f6   :  { %10494 = vmatpush3.bf16.msra.mxu1 %v11203_v45  ;;  %10506 = vmatpush3.bf16.msra.mxu0 %v11204_v38  ;;  %v11238_v38 = vld [vmem:[%s13717_s0 + $0xc4] ss:$0 sps:$4 sm:$0x33]  }
 0x3f7   :  { %10495 = vmatprep.subr.bf16.mxu1 %v12301_v2  ;;  %10507 = vmatprep.subr.bf16.mxu0 %v12301_v2 }
 0x3fa   :  { %10496 = vmatpush3.bf16.msra.mxu1 %v11205_v8  ;;  %10508 = vmatpush3.bf16.msra.mxu0 %v11206_v13 }
 0x3fb   :  { %10497 = vmatprep.subr.bf16.mxu1 %v12301_v2  ;;  %10509 = vmatprep.subr.bf16.mxu0 %v12301_v2 }
 0x3fe   :  { %10498 = vmatpush3.bf16.msra.mxu1 %v11207_v47  ;;  %10510 = vmatpush3.bf16.msra.mxu0 %v11208_v50 }
 0x3ff   :  { %10515 = vmatprep.subr.bf16.mxu1 %v12301_v2  ;;  %10527 = vmatprep.subr.bf16.mxu0 %v12301_v2 }
 0x401   :  { %10500 = vmatmul.mubr.msk.bf16.vlgmr.msra.gmra.mxu1 %vm3415_vm11, %v4151_v58  ;;  %10512 = vmatmul.mubr.msk.bf16.vlgmr.msra.gmra.mxu0 %vm3415_vm11, %v4229_v54 }
 0x402   :  { %10516 = vmatpush3.bf16.msra.mxu1 %v11209_v46  ;;  %10528 = vmatpush3.bf16.msra.mxu0 %v11210_v59 }
 0x403   :  { %10517 = vmatprep.subr.bf16.mxu1 %v12301_v2  ;;  %10529 = vmatprep.subr.bf16.mxu0 %v12301_v2 }
 0x404   :  { %10523 = vmatprep.mubr.msk.bf16.mxu1 %vm11365_vm0, %v12301_v2  ;;  %10535 = vmatprep.mubr.msk.bf16.mxu0 %vm11365_vm0, %v12301_v2 }
 0x406   :  { %10518 = vmatpush3.bf16.msra.mxu1 %v11211_v57  ;;  %10530 = vmatpush3.bf16.msra.mxu0 %v11212_v30  ;;  %v11240_v57 = vld [vmem:[%s13718_s2 + $0x38] sm:$0xff]  }
 0x407   :  { %10519 = vmatprep.subr.bf16.mxu1 %v12301_v2  ;;  %10531 = vmatprep.subr.bf16.mxu0 %v12301_v2 }
 0x40a   :  { %10520 = vmatpush3.bf16.msra.mxu1 %v11213_v36  ;;  %10532 = vmatpush3.bf16.msra.mxu0 %v11214_v17 }
 0x40b   :  { %10521 = vmatprep.subr.bf16.mxu1 %v12301_v2  ;;  %10533 = vmatprep.subr.bf16.mxu0 %v12301_v2 }
 0x40e   :  { %10522 = vmatpush3.bf16.msra.mxu1 %v11215_v37  ;;  %10534 = vmatpush3.bf16.msra.mxu0 %v11216_v11 }
 0x40f   :  { %10539 = vmatprep.subr.bf16.mxu1 %v12301_v2  ;;  %10551 = vmatprep.subr.bf16.mxu0 %v12301_v2 }
 0x411   :  { %10524 = vmatmul.mubr.msk.bf16.vlgmr.msra.gmra.mxu1 %vm3415_vm11, %v4307_v1  ;;  %10536 = vmatmul.mubr.msk.bf16.vlgmr.msra.gmra.mxu0 %vm3415_vm11, %v4385_v56 }
 0x412   :  { %10540 = vmatpush3.bf16.msra.mxu1 %v11217_v27  ;;  %10552 = vmatpush3.bf16.msra.mxu0 %v11218_v61 }
 0x413   :  { %10541 = vmatprep.subr.bf16.mxu1 %v12301_v2  ;;  %10553 = vmatprep.subr.bf16.mxu0 %v12301_v2 }
 0x414   :  { %10547 = vmatprep.mubr.msk.bf16.mxu1 %vm11365_vm0, %v12301_v2  ;;  %10559 = vmatprep.mubr.msk.bf16.mxu0 %vm11365_vm0, %v12301_v2 }
 0x416   :  { %10542 = vmatpush3.bf16.msra.mxu1 %v11219_v40  ;;  %10554 = vmatpush3.bf16.msra.mxu0 %v11220_v26 }
 0x417   :  { %10543 = vmatprep.subr.bf16.mxu1 %v12301_v2  ;;  %10555 = vmatprep.subr.bf16.mxu0 %v12301_v2 }
 0x41a   :  { %10544 = vmatpush3.bf16.msra.mxu1 %v11221_v35  ;;  %10556 = vmatpush3.bf16.msra.mxu0 %v11222_v49 }
 0x41b   :  { %10545 = vmatprep.subr.bf16.mxu1 %v12301_v2  ;;  %10557 = vmatprep.subr.bf16.mxu0 %v12301_v2 }
 0x41e   :  { %10546 = vmatpush3.bf16.msra.mxu1 %v11223_v53  ;;  %10558 = vmatpush3.bf16.msra.mxu0 %v11224_v5 }
 0x41f   :  { %10563 = vmatprep.subr.bf16.mxu1 %v12301_v2 }
 0x421   :  { %10548 = vmatmul.mubr.msk.bf16.vlgmr.msra.gmra.mxu1 %vm3415_vm11, %v4463_v42  ;;  %10560 = vmatmul.mubr.msk.bf16.vlgmr.msra.gmra.mxu0 %vm3415_vm11, %v4541_v19 }
 0x422   :  { %10564 = vmatpush3.bf16.msra.mxu1 %v11225_v24  ;;  %10565 = vmatprep.mubr.msk.bf16.mxu1 %vm11365_vm0, %v12301_v2 }
 0x423   :  { %10687 = vmatprep.subr.bf16.mxu1 %v11240_v57 }
 0x429   :  { %10566 = vmatmul.mubr.msk.bf16.vlgmr.msra.gmra.mxu1 %vm151_vm1, %v11226_v32 }
 0x42a   :  { %10569 = vmatprep.mubr.msk.bf16.mxu1 %vm11365_vm0, %v12301_v2  ;;  %10688 = vmatpush3.bf16.msra.mxu1 %v11240_v57 }
 0x431   :  { %10570 = vmatmul.mubr.msk.bf16.gmra.mxu1 %vm151_vm1, %v11227_v4 }
 0x432   :  { %10573 = vmatprep.mubr.msk.bf16.mxu1 %vm11365_vm0, %v12301_v2 }
 0x439   :  { %10574 = vmatmul.mubr.msk.bf16.gmra.mxu1 %vm151_vm1, %v11228_v33 }
 0x43a   :  { %10577 = vmatprep.mubr.msk.bf16.mxu1 %vm11365_vm0, %v12301_v2 }
 0x441   :  { %10578 = vmatmul.mubr.msk.bf16.gmra.mxu1 %vm151_vm1, %v11229_v43 }
 0x442   :  { %10581 = vmatprep.mubr.msk.bf16.mxu1 %vm11365_vm0, %v12301_v2 }
 0x449   :  { %10582 = vmatmul.mubr.msk.bf16.gmra.mxu1 %vm151_vm1, %v11230_v51  ;;  %v12646_v51 = vld [vmem:[%s13718_s2] sm:$0xff]  }
 0x44a   :  { %10585 = vmatprep.mubr.msk.bf16.mxu1 %vm11365_vm0, %v12301_v2 }
 0x451   :  { %10586 = vmatmul.mubr.msk.bf16.gmra.mxu1 %vm151_vm1, %v11231_v10 }
 0x452   :  { %10589 = vmatprep.mubr.msk.bf16.mxu1 %vm11365_vm0, %v12301_v2 }
 0x459   :  { %10590 = vmatmul.mubr.msk.bf16.gmra.mxu1 %vm151_vm1, %v11232_v15 }
 0x45a   :  { %10593 = vmatprep.mubr.msk.bf16.mxu1 %vm11365_vm0, %v12301_v2 }
 0x461   :  { %10594 = vmatmul.mubr.msk.bf16.gmra.mxu1 %vm151_vm1, %v11233_v34 }
 0x462   :  { %10597 = vmatprep.mubr.msk.bf16.mxu1 %vm11365_vm0, %v12301_v2 }
 0x469   :  { %10598 = vmatmul.mubr.msk.bf16.gmra.mxu1 %vm151_vm1, %v11234_v31 }
 0x46a   :  { %10601 = vmatprep.mubr.msk.bf16.mxu1 %vm11365_vm0, %v12301_v2 }
 0x471   :  { %10602 = vmatmul.mubr.msk.bf16.gmra.mxu1 %vm151_vm1, %v11235_v62  ;;  %v3453_v25 = vpop.f32.mrf.mxu1  ;;  %v3520_v44 = vpop.f32.mrf.mxu0 }
 0x472   :  { %v3521_v63 = vadd.f32 %v3520_v44, %v3453_v25  ;;  %10605 = vmatprep.mubr.msk.bf16.mxu1 %vm11365_vm0, %v12301_v2 }
 0x473   :  { %v10381_v55 = vpop.f32.mrf.mxu1  ;;  %v10393_v0 = vpop.f32.mrf.mxu0 }
 0x475   :  { %v3456_v12 = vpop.f32.mrf.mxu1  ;;  %v3523_v29 = vpop.f32.mrf.mxu0 }
 0x477   :  { %v10382_v9 = vpop.f32.mrf.mxu1  ;;  %v10394_v21 = vpop.f32.mrf.mxu0 }
 0x478   :  { %v12652_v9 = vld [vmem:[%s13718_s2 + $0x48] sm:$0xff]  }
 0x479   :  { %10606 = vmatmul.mubr.msk.bf16.gmra.mxu1 %vm151_vm1, %v11236_v48  ;;  %10707 = vmatprep.subr.bf16.mxu1 %v12652_v9 }
 0x47a   :  { %10609 = vmatprep.mubr.msk.bf16.mxu1 %vm11365_vm0, %v12301_v2 }
 0x481   :  { %v3597_v39 = vpop.f32.mrf.mxu1  ;;  %v3675_v23 = vpop.f32.mrf.mxu0  ;;  %10610 = vmatmul.mubr.msk.bf16.gmra.mxu1 %vm151_vm1, %v11237_v28 }
 0x482   :  { %v3603_v3 = vadd.f32 %v3597_v39, %v3521_v63  ;;  %10613 = vmatprep.mubr.msk.bf16.mxu1 %vm11365_vm0, %v12301_v2  ;;  %v11239_v2 = vld [vmem:[%s13718_s2 + $0x8] sm:$0xff]  }
 0x483   :  { %v10405_v18 = vpop.f32.mrf.mxu1  ;;  %v10417_v20 = vpop.f32.mrf.mxu0  ;;  %10617 = vmatprep.subr.bf16.mxu0 %v11239_v2 }
 0x484   :  { %v3681_v22 = vadd.f32 %v3675_v23, %v3603_v3  ;;  %10618 = vmatpush3.bf16.msra.mxu0 %v11239_v2 }
 0x485   :  { %v3600_v60 = vpop.f32.mrf.mxu1  ;;  %v3678_v45 = vpop.f32.mrf.mxu0  ;;  %10627 = vmatprep.subr.bf16.mxu0 %v12646_v51 }
 0x487   :  { %v10406_v8 = vpop.f32.mrf.mxu1  ;;  %v10418_v13 = vpop.f32.mrf.mxu0 }
 0x489   :  { %10614 = vmatmul.mubr.msk.bf16.gmra.mxu1 %vm151_vm1, %v11238_v38 }
 0x491   :  { %v3753_v47 = vpop.f32.mrf.mxu1  ;;  %v3831_v50 = vpop.f32.mrf.mxu0 }
 0x492   :  { %v3759_v42 = vadd.f32 %v3753_v47, %v3681_v22 }
 0x493   :  { %v10429_v6 = vpop.f32.mrf.mxu1  ;;  %v10441_v7 = vpop.f32.mrf.mxu0 }
 0x494   :  { %v3837_v43 = vadd.f32 %v3831_v50, %v3759_v42 }
 0x495   :  { %v3756_v46 = vpop.f32.mrf.mxu1  ;;  %v3834_v59 = vpop.f32.mrf.mxu0 }
 0x497   :  { %v10430_v58 = vpop.f32.mrf.mxu1  ;;  %v10442_v54 = vpop.f32.mrf.mxu0 }
 0x4a1   :  { %v3909_v30 = vpop.f32.mrf.mxu1  ;;  %v3987_v36 = vpop.f32.mrf.mxu0 }
 0x4a2   :  { %v3915_v10 = vadd.f32 %v3909_v30, %v3837_v43 }
 0x4a3   :  { %v10453_v17 = vpop.f32.mrf.mxu1  ;;  %v10465_v37 = vpop.f32.mrf.mxu0 }
 0x4a4   :  { %v3993_v15 = vadd.f32 %v3987_v36, %v3915_v10 }
 0x4a5   :  { %v3912_v11 = vpop.f32.mrf.mxu1  ;;  %v3990_v41 = vpop.f32.mrf.mxu0 }
 0x4a7   :  { %v10454_v52 = vpop.f32.mrf.mxu1  ;;  %v10466_v27 = vpop.f32.mrf.mxu0 }
 0x4a8   :  { %v5021_v27 = vld [vmem:[#allocation2 + $0x1] ss:$2 sm:$0xff] }
 0x4b1   :  { %v4065_v61 = vpop.f32.mrf.mxu1  ;;  %v4143_v1 = vpop.f32.mrf.mxu0 }
 0x4b2   :  { %v4071_v34 = vadd.f32 %v4065_v61, %v3993_v15 }
 0x4b3   :  { %v10477_v56 = vpop.f32.mrf.mxu1  ;;  %v10489_v40 = vpop.f32.mrf.mxu0 }
 0x4b4   :  { %v4149_v63 = vadd.f32 %v4143_v1, %v4071_v34 }
 0x4b5   :  { %v4068_v26 = vpop.f32.mrf.mxu1  ;;  %v4146_v35 = vpop.f32.mrf.mxu0 }
 0x4b7   :  { %v10478_v49 = vpop.f32.mrf.mxu1  ;;  %v10490_v53 = vpop.f32.mrf.mxu0 }
 0x4c1   :  { %v4221_v5 = vpop.f32.mrf.mxu1  ;;  %v4299_v14 = vpop.f32.mrf.mxu0 }
 0x4c2   :  { %v4227_v12 = vadd.f32 %v4221_v5, %v4149_v63 }
 0x4c3   :  { %v10501_v16 = vpop.f32.mrf.mxu1  ;;  %v10513_v24 = vpop.f32.mrf.mxu0 }
 0x4c4   :  { %v4305_v21 = vadd.f32 %v4299_v14, %v4227_v12  ;;  %v5726_v16 = vld [vmem:[#allocation2 + $0x15] ss:$2 sm:$0xff] }
 0x4c5   :  { %v4224_v19 = vpop.f32.mrf.mxu1  ;;  %v4302_v32 = vpop.f32.mrf.mxu0 }
 0x4c7   :  { %v10502_v4 = vpop.f32.mrf.mxu1  ;;  %v10514_v33 = vpop.f32.mrf.mxu0 }
 0x4d1   :  { %v4377_v31 = vpop.f32.mrf.mxu1  ;;  %v4455_v62 = vpop.f32.mrf.mxu0 }
 0x4d2   :  { %v4383_v28 = vadd.f32 %v4377_v31, %v4305_v21 }
 0x4d3   :  { %v10525_v25 = vpop.f32.mrf.mxu1  ;;  %v10537_v44 = vpop.f32.mrf.mxu0 }
 0x4d4   :  { %v4461_v39 = vadd.f32 %v4455_v62, %v4383_v28 }
 0x4d5   :  { %v4380_v55 = vpop.f32.mrf.mxu1  ;;  %v4458_v0 = vpop.f32.mrf.mxu0 }
 0x4d7   :  { %v10526_v29 = vpop.f32.mrf.mxu1  ;;  %v10538_v48 = vpop.f32.mrf.mxu0 }
 0x4e1   :  { %v4533_v23 = vpop.f32.mrf.mxu1  ;;  %v4611_v3 = vpop.f32.mrf.mxu0 }
 0x4e2   :  { %v4539_v18 = vadd.f32 %v4533_v23, %v4461_v39 }
 0x4e3   :  { %v10549_v20 = vpop.f32.mrf.mxu1  ;;  %v10561_v22 = vpop.f32.mrf.mxu0 }
 0x4e4   :  { %v4617_v60 = vadd.f32 %v4611_v3, %v4539_v18 }
 0x4e5   :  { %v4536_v45 = vpop.f32.mrf.mxu1  ;;  %v4614_v38 = vpop.f32.mrf.mxu0 }
 0x4e6   :  { %v9322_v8 = vmul.f32 -1.442695, %v4617_v60 }
 0x4e7   :  { %v10550_v13 = vpop.f32.mrf.mxu1  ;;  %v10562_v47 = vpop.f32.mrf.mxu0 }
 0x4e8   :  { %11351 = vpow2.f32 %v9322_v8 }
 0x4e9   :  { %v4795_v50 = vpop.f32.mrf.mxu1 }
 0x4ea   :  { %vm4897_vm12 = vcmp.gt.f32.partialorder %v4795_v50, 0.0  ;;  %v4922_v6 = vmul.f32 0.2, %v4795_v50 }
 0x4eb   :  { %v10567_v7 = vpop.f32.mrf.mxu1 }
 0x4ec   :  { %v4947_v46 = vsel %vm4897_vm12, %v4795_v50, %v4922_v6 }
 0x4ed   :  { %4972 = vst [vmem:[#allocation2 + $0x26] sm:$0xff] %v4947_v46  ;;  %v4798_v59 = vpop.f32.mrf.mxu1 }
 0x4ee   :  { %vm4898_vm13 = vcmp.gt.f32.partialorder %v4798_v59, 0.0  ;;  %v4923_v2 = vmul.f32 0.2, %v4798_v59 }
 0x4ef   :  { %v10568_v58 = vpop.f32.mrf.mxu1 }
 0x4f0   :  { %v4948_v54 = vsel %vm4898_vm13, %v4798_v59, %v4923_v2 }
 0x4f1   :  { %4973 = vst [vmem:[#allocation2 + $0x2e] sm:$0x3f] %v4948_v54  ;;  %4974 = vst [vmem:[#allocation2 + $0x32] sm:$0xc0] %v4948_v54  ;;  %v4803_v57 = vpop.f32.mrf.mxu1  ;;  %v12699_v54 = vld [vmem:[%s13718_s2 + $0x10] sm:$0xff]  }
 0x4f2   :  { %vm4899_vm14 = vcmp.gt.f32.partialorder %v4803_v57, 0.0  ;;  %v4924_v30 = vmul.f32 0.2, %v4803_v57 }
 0x4f3   :  { %v10571_v36 = vpop.f32.mrf.mxu1 }
 0x4f4   :  { %v4949_v17 = vsel %vm4899_vm14, %v4803_v57, %v4924_v30 }
 0x4f5   :  { %v11352_v37 = vpop.eup %11351  ;;  %4975 = vst [vmem:[#allocation2 + $0x3a] sm:$0xff] %v4949_v17  ;;  %v4806_v11 = vpop.f32.mrf.mxu1 }
 0x4f6   :  { %v4621_v41 = vadd.f32 1.0, %v11352_v37  ;;  %vm4900_vm15 = vcmp.gt.f32.partialorder %v4806_v11, 0.0  ;;  %v4925_v52 = vmul.f32 0.2, %v4806_v11 }
 0x4f7   :  { %v10572_v61 = vpop.f32.mrf.mxu1 }
 0x4f8   :  { %11353 = vrcp.f32 %v4621_v41  ;;  %v4950_v1 = vsel %vm4900_vm15, %v4806_v11, %v4925_v52  ;;  %v12655_v56 = vld [vmem:[#allocation2 + $0x25] ss:$2 sm:$0xff]  ;;  %v12666_v25 = vld [vmem:[#allocation2 + $0x24] ss:$2 sm:$0xff] }
 0x4f9   :  { %4976 = vst [vmem:[#allocation2 + $0x42] ss:$8 sps:$4 sm:$0xff] %v4950_v1   ;;  %v4811_v40 = vpop.f32.mrf.mxu1  ;;  %v5029_v26 = vpack.c.bf16 %v12655_v56, %v5021_v27  ;;  %v12668_v44 = vld [vmem:[#allocation2 + $0x26] ss:$2 sm:$0xff] }
 0x4fa   :  { %vm4901_vm2 = vcmp.gt.f32.partialorder %v4811_v40, 0.0  ;;  %v4926_v35 = vmul.f32 0.2, %v4811_v40 }
 0x4fb   :  { %v10575_v49 = vpop.f32.mrf.mxu1  ;;  %10619 = vmatprep.mubr.msk.bf16.mxu0 %vm151_vm1, %v5029_v26 }
 0x4fc   :  { %v4951_v53 = vsel %vm4901_vm2, %v4811_v40, %v4926_v35 }
 0x4fd   :  { %4978 = vst [vmem:[#allocation2 + $0x4e] sm:$0xff] %v4951_v53  ;;  %v4814_v5 = vpop.f32.mrf.mxu1 }
 0x4fe   :  { %vm4902_vm3 = vcmp.gt.f32.partialorder %v4814_v5, 0.0  ;;  %v4927_v14 = vmul.f32 0.2, %v4814_v5 }
 0x4ff   :  { %v10576_v24 = vpop.f32.mrf.mxu1 }
 0x500   :  { %v4952_v42 = vsel %vm4902_vm3, %v4814_v5, %v4927_v14  ;;  %v12659_v19 = vld [vmem:[#allocation2 + $0x39] ss:$2 sm:$0xff]  ;;  %v12684_v20 = vld [vmem:[#allocation2 + $0x36] ss:$2 sm:$0xff] }
 0x501   :  { %4979 = vst [vmem:[#allocation2 + $0x56] sm:$0x3] %v4952_v42  ;;  %4980 = vst [vmem:[#allocation2 + $0x5a] sm:$0xfc] %v4952_v42  ;;  %v4819_v32 = vpop.f32.mrf.mxu1  ;;  %v5734_v4 = vpack.c.bf16 %v12659_v19, %v5726_v16 }
 0x502   :  { %vm4903_vm4 = vcmp.gt.f32.partialorder %v4819_v32, 0.0  ;;  %v4928_v33 = vmul.f32 0.2, %v4819_v32 }
 0x503   :  { %v10579_v43 = vpop.f32.mrf.mxu1  ;;  %10689 = vmatprep.mubr.msk.bf16.mxu1 %vm151_vm1, %v5734_v4 }
 0x504   :  { %v4953_v10 = vsel %vm4903_vm4, %v4819_v32, %v4928_v33 }
 0x505   :  { %v11354_v15 = vpop.eup %11353  ;;  %4981 = vst [vmem:[#allocation2 + $0x62] sm:$0xff] %v4953_v10  ;;  %v4822_v34 = vpop.f32.mrf.mxu1 }
 0x506   :  { %4624 = vst [vmem:[%s13721_s5] sm:$0x1] %v11354_v15  ;;  %vm4904_vm5 = vcmp.gt.f32.partialorder %v4822_v34, 0.0  ;;  %v4929_v31 = vmul.f32 0.2, %v4822_v34 }
 0x507   :  { %v10580_v62 = vpop.f32.mrf.mxu1 }
 0x508   :  { %v4954_v63 = vsel %vm4904_vm5, %v4822_v34, %v4929_v31  ;;  %v12670_v55 = vld [vmem:[#allocation2 + $0x49] ss:$2 sm:$0xff]  ;;  %v12672_v0 = vld [vmem:[#allocation2 + $0x48] ss:$2 sm:$0xff] }
 0x509   :  { %v12674_v12 = vld [vmem:[#allocation2 + $0x4a] ss:$2 sm:$0xff]  ;;  %4982 = vst [vmem:[#allocation2 + $0x6e] sm:$0xff] %v4954_v63  ;;  %v4827_v29 = vpop.f32.mrf.mxu1  ;;  %v5930_v48 = vpack.c.bf16 %v12670_v55, %v12655_v56  ;;  %v5832_v21 = vpack.c.bf16 %v12672_v0, %v12666_v25 }
 0x50a   :  { %v6028_v28 = vpack.c.bf16 %v12674_v12, %v12668_v44  ;;  %vm4905_vm6 = vcmp.gt.f32.partialorder %v4827_v29, 0.0  ;;  %v4930_v39 = vmul.f32 0.2, %v4827_v29  ;;  %v11247_v56 = vld [vmem:[%s13718_s2 + $0x68] sm:$0xff]  }
 0x50b   :  { %v10583_v23 = vpop.f32.mrf.mxu1 }
 0x50c   :  { %v4955_v3 = vsel %vm4905_vm6, %v4827_v29, %v4930_v39  ;;  %v12682_v18 = vld [vmem:[#allocation2 + $0x5d] ss:$2 sm:$0xff]  ;;  %v12686_v22 = vld [vmem:[#allocation2 + $0x5a] ss:$2 sm:$0xff] }
 0x50d   :  { %4983 = vst [vmem:[#allocation2 + $0x76] sm:$0x3f] %v4955_v3  ;;  %4984 = vst [vmem:[#allocation2 + $0x7a] sm:$0xc0] %v4955_v3  ;;  %v4830_v60 = vpop.f32.mrf.mxu1  ;;  %v6518_v45 = vpack.c.bf16 %v12682_v18, %v12659_v19  ;;  %v6224_v38 = vpack.c.bf16 %v12686_v22, %v12684_v20  ;;  %v6517_v19 = vld [vmem:[#allocation2 + $0x135] ss:$2 sm:$0xff] }
 0x50e   :  { %vm4906_vm9 = vcmp.gt.f32.partialorder %v4830_v60, 0.0  ;;  %v4931_v8 = vmul.f32 0.2, %v4830_v60 }
 0x50f   :  { %v10584_v13 = vpop.f32.mrf.mxu1 }
 0x510   :  { %v4956_v47 = vsel %vm4906_vm9, %v4830_v60, %v4931_v8 }
 0x511   :  { %4985 = vst [vmem:[#allocation2 + $0x82] sm:$0xff] %v4956_v47  ;;  %v4835_v50 = vpop.f32.mrf.mxu1 }
 0x512   :  { %vm4907_vm10 = vcmp.gt.f32.partialorder %v4835_v50, 0.0  ;;  %v4932_v6 = vmul.f32 0.2, %v4835_v50 }
 0x513   :  { %v10587_v7 = vpop.f32.mrf.mxu1 }
 0x514   :  { %v4957_v46 = vsel %vm4907_vm10, %v4835_v50, %v4932_v6  ;;  %v12692_v59 = vld [vmem:[#allocation2 + $0x6d] ss:$2 sm:$0xff]  ;;  %v12716_v5 = vld [vmem:[#allocation2 + $0x6c] ss:$2 sm:$0xff] }
 0x515   :  { %4986 = vst [vmem:[#allocation2 + $0x8a] ss:$8 sps:$4 sm:$0xff] %v4957_v46   ;;  %v4838_v2 = vpop.f32.mrf.mxu1  ;;  %v5030_v58 = vpack.c.bf16 %v12692_v59, %v12670_v55  ;;  %v12720_v24 = vld [vmem:[#allocation2 + $0x6e] ss:$2 sm:$0xff]  ;;  %v5929_v55 = vld [vmem:[#allocation2 + $0x121] ss:$2 sm:$0xff] }
 0x516   :  { %vm4908_vm12 = vcmp.gt.f32.partialorder %v4838_v2, 0.0  ;;  %v4933_v57 = vmul.f32 0.2, %v4838_v2 }
 0x517   :  { %v10588_v30 = vpop.f32.mrf.mxu1  ;;  %10620 = vmatmul.mubr.msk.bf16.vlgmr.msra.gmra.mxu0 %vm151_vm1, %v5030_v58 }
 0x518   :  { %v4958_v36 = vsel %vm4908_vm12, %v4838_v2, %v4933_v57  ;;  %10628 = vmatpush3.bf16.msra.mxu0 %v12646_v51  ;;  %v12711_v51 = vld [vmem:[%s13718_s2 + $0x58] sm:$0xff]  }
 0x519   :  { %4988 = vst [vmem:[#allocation2 + $0x96] sm:$0xff] %v4958_v36  ;;  %v4843_v17 = vpop.f32.mrf.mxu1  ;;  %10637 = vmatprep.subr.bf16.mxu0 %v12699_v54 }
 0x51a   :  { %vm4909_vm13 = vcmp.gt.f32.partialorder %v4843_v17, 0.0  ;;  %v4934_v37 = vmul.f32 0.2, %v4843_v17 }
 0x51b   :  { %v10591_v11 = vpop.f32.mrf.mxu1 }
 0x51c   :  { %v4959_v41 = vsel %vm4909_vm13, %v4843_v17, %v4934_v37  ;;  %v12704_v52 = vld [vmem:[#allocation2 + $0x81] ss:$2 sm:$0xff]  ;;  %v12730_v34 = vld [vmem:[#allocation2 + $0x7e] ss:$2 sm:$0xff] }
 0x51d   :  { %4989 = vst [vmem:[#allocation2 + $0x9e] sm:$0x3] %v4959_v41  ;;  %4990 = vst [vmem:[#allocation2 + $0xa2] sm:$0xfc] %v4959_v41  ;;  %v4846_v27 = vpop.f32.mrf.mxu1  ;;  %v5735_v61 = vpack.c.bf16 %v12704_v52, %v12682_v18 }
 0x51e   :  { %vm4910_vm14 = vcmp.gt.f32.partialorder %v4846_v27, 0.0  ;;  %v4935_v1 = vmul.f32 0.2, %v4846_v27 }
 0x51f   :  { %v10592_v40 = vpop.f32.mrf.mxu1  ;;  %10690 = vmatmul.mubr.msk.bf16.vlgmr.msra.gmra.mxu1 %vm151_vm1, %v5735_v61 }
 0x520   :  { %v4960_v26 = vsel %vm4910_vm14, %v4846_v27, %v4935_v1  ;;  %10708 = vmatpush3.bf16.msra.mxu1 %v12652_v9 }
 0x521   :  { %4991 = vst [vmem:[#allocation2 + $0xaa] sm:$0xff] %v4960_v26  ;;  %v4851_v35 = vpop.f32.mrf.mxu1  ;;  %10727 = vmatprep.subr.bf16.mxu1 %v12711_v51 }
 0x522   :  { %vm4911_vm15 = vcmp.gt.f32.partialorder %v4851_v35, 0.0  ;;  %v4936_v49 = vmul.f32 0.2, %v4851_v35 }
 0x523   :  { %v10595_v53 = vpop.f32.mrf.mxu1 }
 0x524   :  { %v4961_v14 = vsel %vm4911_vm15, %v4851_v35, %v4936_v49  ;;  %v12718_v16 = vld [vmem:[#allocation2 + $0x90] ss:$2 sm:$0xff]  ;;  %v12738_v50 = vld [vmem:[#allocation2 + $0x91] ss:$2 sm:$0xff] }
 0x525   :  { %v12722_v42 = vld [vmem:[#allocation2 + $0x92] ss:$2 sm:$0xff]  ;;  %4992 = vst [vmem:[#allocation2 + $0xb6] sm:$0xff] %v4961_v14  ;;  %v4854_v32 = vpop.f32.mrf.mxu1  ;;  %v5833_v9 = vpack.c.bf16 %v12718_v16, %v12716_v5 }
 0x526   :  { %v6029_v4 = vpack.c.bf16 %v12722_v42, %v12720_v24  ;;  %vm4912_vm2 = vcmp.gt.f32.partialorder %v4854_v32, 0.0  ;;  %v4937_v33 = vmul.f32 0.2, %v4854_v32 }
 0x527   :  { %v10596_v43 = vpop.f32.mrf.mxu1 }
 0x528   :  { %v4962_v10 = vsel %vm4912_vm2, %v4854_v32, %v4937_v33  ;;  %v12728_v15 = vld [vmem:[#allocation2 + $0xa5] ss:$2 sm:$0xff]  ;;  %v12732_v31 = vld [vmem:[#allocation2 + $0xa2] ss:$2 sm:$0xff] }
 0x529   :  { %4993 = vst [vmem:[#allocation2 + $0xbe] sm:$0x3f] %v4962_v10  ;;  %4994 = vst [vmem:[#allocation2 + $0xc2] sm:$0xc0] %v4962_v10  ;;  %v4859_v62 = vpop.f32.mrf.mxu1  ;;  %v6519_v63 = vpack.c.bf16 %v12728_v15, %v12704_v52  ;;  %v6225_v29 = vpack.c.bf16 %v12732_v31, %v12730_v34  ;;  %v5621_v52 = vld [vmem:[#allocation2 + $0x14] ss:$2 sm:$0xff] }
 0x52a   :  { %vm4913_vm3 = vcmp.gt.f32.partialorder %v4859_v62, 0.0  ;;  %v4938_v39 = vmul.f32 0.2, %v4859_v62 }
 0x52b   :  { %v10599_v23 = vpop.f32.mrf.mxu1 }
 0x52c   :  { %v4963_v3 = vsel %vm4913_vm3, %v4859_v62, %v4938_v39 }
 0x52d   :  { %4995 = vst [vmem:[#allocation2 + $0xca] sm:$0xff] %v4963_v3  ;;  %v4862_v60 = vpop.f32.mrf.mxu1 }
 0x52e   :  { %vm4914_vm4 = vcmp.gt.f32.partialorder %v4862_v60, 0.0  ;;  %v4939_v8 = vmul.f32 0.2, %v4862_v60 }
 0x52f   :  { %v10600_v13 = vpop.f32.mrf.mxu1 }
 0x530   :  { %v4964_v47 = vsel %vm4914_vm4, %v4862_v60, %v4939_v8  ;;  %v12740_v6 = vld [vmem:[#allocation2 + $0xb5] ss:$2 sm:$0xff]  ;;  %v12750_v53 = vld [vmem:[#allocation2 + $0xb4] ss:$2 sm:$0xff] }
 0x531   :  { %4996 = vst [vmem:[#allocation2 + $0xd2] ss:$8 sps:$4 sm:$0xff] %v4964_v47   ;;  %v4867_v7 = vpop.f32.mrf.mxu1  ;;  %v5031_v46 = vpack.c.bf16 %v12740_v6, %v12738_v50  ;;  %v12754_v33 = vld [vmem:[#allocation2 + $0xb6] ss:$2 sm:$0xff] }
 0x532   :  { %vm4915_vm5 = vcmp.gt.f32.partialorder %v4867_v7, 0.0  ;;  %v4940_v2 = vmul.f32 0.2, %v4867_v7 }
 0x533   :  { %v10603_v58 = vpop.f32.mrf.mxu1  ;;  %10623 = vmatprep.mubr.msk.bf16.mxu0 %vm151_vm1, %v5031_v46 }
 0x534   :  { %v4965_v57 = vsel %vm4915_vm5, %v4867_v7, %v4940_v2 }
 0x535   :  { %4998 = vst [vmem:[#allocation2 + $0xde] sm:$0xff] %v4965_v57  ;;  %v4870_v30 = vpop.f32.mrf.mxu1 }
 0x536   :  { %vm4916_vm6 = vcmp.gt.f32.partialorder %v4870_v30, 0.0  ;;  %v4941_v36 = vmul.f32 0.2, %v4870_v30 }
 0x537   :  { %v10604_v17 = vpop.f32.mrf.mxu1 }
 0x538   :  { %v4966_v37 = vsel %vm4916_vm6, %v4870_v30, %v4941_v36  ;;  %v12745_v11 = vld [vmem:[#allocation2 + $0xc9] ss:$2 sm:$0xff]  ;;  %v12762_v8 = vld [vmem:[#allocation2 + $0xc6] ss:$2 sm:$0xff] }
 0x539   :  { %4999 = vst [vmem:[#allocation2 + $0xe6] sm:$0x3] %v4966_v37  ;;  %5000 = vst [vmem:[#allocation2 + $0xea] sm:$0xfc] %v4966_v37  ;;  %v4875_v41 = vpop.f32.mrf.mxu1  ;;  %v5736_v27 = vpack.c.bf16 %v12745_v11, %v12728_v15  ;;  %v5007_v36 = vld [vmem:[#allocation2] ss:$2 sm:$0xff] }
 0x53a   :  { %vm4917_vm9 = vcmp.gt.f32.partialorder %v4875_v41, 0.0  ;;  %v4942_v61 = vmul.f32 0.2, %v4875_v41  ;;  %v5622_v15 = vld [vmem:[#allocation2 + $0x38] ss:$2 sm:$0xff] }
 0x53b   :  { %v10607_v1 = vpop.f32.mrf.mxu1  ;;  %10693 = vmatprep.mubr.msk.bf16.mxu1 %vm151_vm1, %v5736_v27 }
 0x53c   :  { %v4967_v40 = vsel %vm4917_vm9, %v4875_v41, %v4942_v61 }
 0x53d   :  { %5001 = vst [vmem:[#allocation2 + $0xf2] sm:$0xff] %v4967_v40  ;;  %v4878_v26 = vpop.f32.mrf.mxu1  ;;  %v5015_v40 = vpack.c.bf16 %v12666_v25, %v5007_v36  ;;  %v5310_v36 = vld [vmem:[#allocation2 + $0x93] ss:$2 sm:$0xff] }
 0x53e   :  { %vm4918_vm10 = vcmp.gt.f32.partialorder %v4878_v26, 0.0  ;;  %v4943_v35 = vmul.f32 0.2, %v4878_v26 }
 0x53f   :  { %v10608_v49 = vpop.f32.mrf.mxu1 }
 0x540   :  { %v4968_v14 = vsel %vm4918_vm10, %v4878_v26, %v4943_v35  ;;  %v12752_v32 = vld [vmem:[#allocation2 + $0xd8] ss:$2 sm:$0xff]  ;;  %v5027_v41 = vld [vmem:[#allocation2 + $0xd9] ss:$2 sm:$0xff] }
 0x541   :  { %v12756_v43 = vld [vmem:[#allocation2 + $0xda] ss:$2 sm:$0xff]  ;;  %5002 = vst [vmem:[#allocation2 + $0xfe] sm:$0xff] %v4968_v14  ;;  %v4883_v10 = vpop.f32.mrf.mxu1  ;;  %v5834_v62 = vpack.c.bf16 %v12752_v32, %v12750_v53  ;;  %v5016_v14 = vpack.c.bf16 %v12716_v5, %v12672_v0  ;;  %v11254_v0 = vld [vmem:[%s13718_s2 + $0x70] sm:$0xff]  }
 0x542   :  { %v6030_v39 = vpack.c.bf16 %v12756_v43, %v12754_v33  ;;  %vm4919_vm12 = vcmp.gt.f32.partialorder %v4883_v10, 0.0  ;;  %v4944_v23 = vmul.f32 0.2, %v4883_v10 }
 0x543   :  { %v10611_v3 = vpop.f32.mrf.mxu1 }
 0x544   :  { %v4969_v60 = vsel %vm4919_vm12, %v4883_v10, %v4944_v23  ;;  %v12764_v13 = vld [vmem:[#allocation2 + $0xea] ss:$2 sm:$0xff]  ;;  %v12771_v35 = vld [vmem:[#allocation2 + $0xed] ss:$2 sm:$0xff]  ;;  %v5017_v3 = vpack.c.bf16 %v12750_v53, %v12718_v16 }
 0x545   :  { %5003 = vst [vmem:[#allocation2 + $0x106] sm:$0x3f] %v4969_v60  ;;  %5004 = vst [vmem:[#allocation2 + $0x10a] sm:$0xc0] %v4969_v60  ;;  %v4886_v47 = vpop.f32.mrf.mxu1  ;;  %v6226_v7 = vpack.c.bf16 %v12764_v13, %v12762_v8  ;;  %v11244_v23 = vld [vmem:[%s13718_s2 + $0x18] sm:$0xff]  }
 0x546   :  { %vm4920_vm13 = vcmp.gt.f32.partialorder %v4886_v47, 0.0  ;;  %v4945_v46 = vmul.f32 0.2, %v4886_v47 }
 0x547   :  { %v10612_v2 = vpop.f32.mrf.mxu1 }
 0x548   :  { %v4970_v58 = vsel %vm4920_vm13, %v4886_v47, %v4945_v46  ;;  %v5201_v47 = vld [vmem:[#allocation2 + $0x2] ss:$2 sm:$0xff]  ;;  %v5931_v46 = vpack.c.bf16 %v12738_v50, %v12692_v59  ;;  %v5210_v59 = vpack.c.bf16 %v12720_v24, %v12674_v12  ;;  %v6223_v12 = vld [vmem:[#allocation2 + $0x132] ss:$2 sm:$0xff] }
 0x549   :  { %5005 = vst [vmem:[#allocation2 + $0x112] sm:$0xff] %v4970_v58  ;;  %v4891_v57 = vpop.f32.mrf.mxu1  ;;  %v5209_v58 = vpack.c.bf16 %v12668_v44, %v5201_v47  ;;  %v11246_v50 = vld [vmem:[%s13718_s2 + $0x20] sm:$0xff]  }
 0x54a   :  { %vm4921_vm14 = vcmp.gt.f32.partialorder %v4891_v57, 0.0  ;;  %v4946_v30 = vmul.f32 0.2, %v4891_v57  ;;  %v5518_v47 = vld [vmem:[#allocation2 + $0x5b] ss:$2 sm:$0xff] }
 0x54b   :  { %v10615_v17 = vpop.f32.mrf.mxu1 }
 0x54c   :  { %v4971_v37 = vsel %vm4921_vm14, %v4891_v57, %v4946_v30  ;;  %v5028_v27 = vld [vmem:[#allocation2 + $0xfd] ss:$2 sm:$0xff]  ;;  %v12792_v60 = vld [vmem:[#allocation2 + $0xfc] ss:$2 sm:$0xff]  ;;  %v5932_v57 = vpack.c.bf16 %v5027_v41, %v12740_v6  ;;  %v5211_v6 = vpack.c.bf16 %v12754_v33, %v12722_v42 }
 0x54d   :  { %5006 = vst [vmem:[#allocation2 + $0x11a] sm:$0xf] %v4971_v37  ;;  %v5032_v61 = vpack.c.bf16 %v5028_v27, %v5027_v41  ;;  %v4894_v1 = vpop.f32.mrf.mxu1  ;;  %v5018_v2 = vpack.c.bf16 %v12792_v60, %v12752_v32  ;;  %v5307_v30 = vld [vmem:[#allocation2 + $0x27] ss:$2 sm:$0xff]  ;;  %v12819_v17 = vld [vmem:[#allocation2 + $0xfe] ss:$2 sm:$0xff] }
 0x54e   :  { %v5306_v37 = vld [vmem:[#allocation2 + $0x3] ss:$2 sm:$0xff]  ;;  %v5212_v1 = vpack.c.bf16 %v12819_v17, %v12756_v43 }
 0x54f   :  { %10624 = vmatmul.mubr.msk.bf16.gmra.mxu0 %vm151_vm1, %v5032_v61  ;;  %v10616_v26 = vpop.f32.mrf.mxu1  ;;  %v5312_v41 = vld [vmem:[#allocation2 + $0xdb] ss:$2 sm:$0xff] }
 0x550   :  { %10629 = vmatprep.mubr.msk.bf16.mxu0 %vm151_vm1, %v5015_v40  ;;  %v5311_v40 = vld [vmem:[#allocation2 + $0xb7] ss:$2 sm:$0xff]  ;;  %v5314_v26 = vpack.c.bf16 %v5307_v30, %v5306_v37  ;;  %v5521_v37 = vld [vmem:[#allocation2 + $0xc7] ss:$2 sm:$0xff] }
 0x554   :  { %v12773_v49 = vld [vmem:[#allocation2 + $0x111] ss:$2 sm:$0xff] }
 0x555   :  { %v5737_v10 = vpack.c.bf16 %v12773_v49, %v12771_v35 }
 0x557   :  { %10630 = vmatmul.mubr.msk.bf16.vlgmr.msra.gmra.mxu0 %vm151_vm1, %v5016_v14  ;;  %10694 = vmatmul.mubr.msk.bf16.gmra.mxu1 %vm151_vm1, %v5737_v10  ;;  %v6128_v14 = vpack.c.bf16 %v5312_v41, %v5311_v40  ;;  %v11249_v10 = vld [vmem:[%s13718_s2 + $0x78] sm:$0xff]  }
 0x558   :  { %10633 = vmatprep.mubr.msk.bf16.mxu0 %vm151_vm1, %v5017_v3  ;;  %10638 = vmatpush3.bf16.msra.mxu0 %v12699_v54  ;;  %v5933_v54 = vpack.c.bf16 %v5929_v55, %v5028_v27  ;;  %v5309_v27 = vld [vmem:[#allocation2 + $0x6f] ss:$2 sm:$0xff] }
 0x559   :  { %10709 = vmatprep.mubr.msk.bf16.mxu1 %vm151_vm1, %v5930_v48  ;;  %10647 = vmatprep.subr.bf16.mxu0 %v11244_v23  ;;  %v5308_v48 = vld [vmem:[#allocation2 + $0x4b] ss:$2 sm:$0xff]  ;;  %v6127_v61 = vpack.c.bf16 %v5310_v36, %v5309_v27 }
 0x55a   :  { %v6125_v3 = vld [vmem:[#allocation2 + $0x123] ss:$2 sm:$0xff] }
 0x55b   :  { %v5517_v55 = vld [vmem:[#allocation2 + $0x37] ss:$2 sm:$0xff] }
 0x55f   :  { %10634 = vmatmul.mubr.msk.bf16.gmra.mxu0 %vm151_vm1, %v5018_v2  ;;  %10710 = vmatmul.mubr.msk.bf16.vlgmr.msra.gmra.mxu1 %vm151_vm1, %v5931_v46  ;;  %v5315_v46 = vpack.c.bf16 %v5309_v27, %v5308_v48 }
 0x560   :  { %10639 = vmatprep.mubr.msk.bf16.mxu0 %vm151_vm1, %v5209_v58  ;;  %10713 = vmatprep.mubr.msk.bf16.mxu1 %vm151_vm1, %v5932_v57  ;;  %v11248_v58 = vld [vmem:[%s13718_s2 + $0x28] sm:$0xff]   ;;  %v5316_v57 = vpack.c.bf16 %v5311_v40, %v5310_v36  ;;  %v5420_v40 = vpack.c.bf16 %v12730_v34, %v12686_v22 }
 0x561   :  { %10728 = vmatpush3.bf16.msra.mxu1 %v12711_v51  ;;  %v6126_v51 = vpack.c.bf16 %v5308_v48, %v5307_v30  ;;  %v5411_v48 = vld [vmem:[#allocation2 + $0x12] ss:$2 sm:$0xff] }
 0x562   :  { %10747 = vmatprep.subr.bf16.mxu1 %v11247_v56  ;;  %v5419_v36 = vpack.c.bf16 %v12684_v20, %v5411_v48 }
 0x567   :  { %10640 = vmatmul.mubr.msk.bf16.vlgmr.msra.gmra.mxu0 %vm151_vm1, %v5210_v59  ;;  %10714 = vmatmul.mubr.msk.bf16.gmra.mxu1 %vm151_vm1, %v5933_v54  ;;  %v6322_v59 = vpack.c.bf16 %v5518_v47, %v5517_v55  ;;  %v5522_v54 = vld [vmem:[#allocation2 + $0xeb] ss:$2 sm:$0xff] }
 0x568   :  { %10643 = vmatprep.mubr.msk.bf16.mxu0 %vm151_vm1, %v5211_v6  ;;  %10648 = vmatpush3.bf16.msra.mxu0 %v11244_v23  ;;  %v5313_v23 = vld [vmem:[#allocation2 + $0xff] ss:$2 sm:$0xff]  ;;  %v6324_v27 = vpack.c.bf16 %v5522_v54, %v5521_v37 }
 0x569   :  { %10729 = vmatprep.mubr.msk.bf16.mxu1 %vm151_vm1, %v6126_v51  ;;  %10657 = vmatprep.subr.bf16.mxu0 %v11246_v50  ;;  %v6129_v2 = vpack.c.bf16 %v6125_v3, %v5313_v23  ;;  %v5519_v6 = vld [vmem:[#allocation2 + $0x7f] ss:$2 sm:$0xff]  ;;  %v5317_v30 = vpack.c.bf16 %v5313_v23, %v5312_v41 }
 0x56a   :  { %v5516_v23 = vld [vmem:[#allocation2 + $0x13] ss:$2 sm:$0xff]  ;;  %v5525_v18 = vpack.c.bf16 %v5519_v6, %v5518_v47  ;;  %v5626_v47 = vld [vmem:[#allocation2 + $0xc8] ss:$2 sm:$0xff] }
 0x56f   :  { %10644 = vmatmul.mubr.msk.bf16.gmra.mxu0 %vm151_vm1, %v5212_v1  ;;  %10730 = vmatmul.mubr.msk.bf16.vlgmr.msra.gmra.mxu1 %vm151_vm1, %v6127_v61  ;;  %v6321_v61 = vld [vmem:[#allocation2 + $0x133] ss:$2 sm:$0xff] }
 0x570   :  { %10649 = vmatprep.mubr.msk.bf16.mxu0 %vm151_vm1, %v5314_v26  ;;  %10733 = vmatprep.mubr.msk.bf16.mxu1 %vm151_vm1, %v6128_v14  ;;  %v12842_v1 = vld [vmem:[#allocation2] sm:$0xff]  ;;  %v11250_v26 = vld [vmem:[%s13718_s2 + $0x30] sm:$0xff]   ;;  %v5421_v14 = vpack.c.bf16 %v12762_v8, %v12732_v31 }
 0x571   :  { %10748 = vmatpush3.bf16.msra.mxu1 %v11247_v56  ;;  %v5520_v56 = vld [vmem:[#allocation2 + $0xa3] ss:$2 sm:$0xff]  ;;  %13766 = vst [vmem:[#allocation11_spill] sm:$0xff] %v12842_v1 }
 0x572   :  { %10767 = vmatprep.subr.bf16.mxu1 %v11249_v10  ;;  %v6323_v51 = vpack.c.bf16 %v5520_v56, %v5519_v6  ;;  %v5627_v6 = vld [vmem:[#allocation2 + $0xec] ss:$2 sm:$0xff] }
 0x573   :  { %v6422_v22 = vpack.c.bf16 %v5627_v6, %v5626_v47 }
 0x577   :  { %10650 = vmatmul.mubr.msk.bf16.vlgmr.msra.gmra.mxu0 %vm151_vm1, %v5315_v46  ;;  %10734 = vmatmul.mubr.msk.bf16.gmra.mxu1 %vm151_vm1, %v6129_v2  ;;  %v5524_v46 = vpack.c.bf16 %v5517_v55, %v5516_v23  ;;  %v6520_v2 = vpack.c.bf16 %v12771_v35, %v12745_v11  ;;  %v5526_v11 = vpack.c.bf16 %v5521_v37, %v5520_v56  ;;  %v11252_v56 = vld [vmem:[%s13718_s2 + $0x50] sm:$0xff]   ;;  %v5831_v37 = vld [vmem:[#allocation2 + $0x120] ss:$2 sm:$0xff] }
 0x578   :  { %10653 = vmatprep.mubr.msk.bf16.mxu0 %vm151_vm1, %v5316_v57  ;;  %10658 = vmatpush3.bf16.msra.mxu0 %v11246_v50  ;;  %v5523_v50 = vld [vmem:[#allocation2 + $0x10f] ss:$2 sm:$0xff]  ;;  %v5629_v35 = vpack.c.bf16 %v5622_v15, %v5621_v52  ;;  %v5623_v57 = vld [vmem:[#allocation2 + $0x5c] ss:$2 sm:$0xff]  ;;  %v5835_v25 = vpack.c.bf16 %v5831_v37, %v12792_v60 }
 0x579   :  { %10749 = vmatprep.mubr.msk.bf16.mxu1 %vm151_vm1, %v6322_v59  ;;  %10667 = vmatprep.subr.bf16.mxu0 %v11248_v58  ;;  %v6325_v41 = vpack.c.bf16 %v6321_v61, %v5523_v50  ;;  %v5625_v59 = vld [vmem:[#allocation2 + $0xa4] ss:$2 sm:$0xff]  ;;  %v6420_v5 = vpack.c.bf16 %v5623_v57, %v5622_v15 }
 0x57a   :  { %v5631_v48 = vpack.c.bf16 %v5626_v47, %v5625_v59 }
 0x57f   :  { %10654 = vmatmul.mubr.msk.bf16.gmra.mxu0 %vm151_vm1, %v5317_v30  ;;  %10750 = vmatmul.mubr.msk.bf16.vlgmr.msra.gmra.mxu1 %vm151_vm1, %v6323_v51  ;;  %v11253_v51 = vld [vmem:[%s13718_s2 + $0x60] sm:$0xff]  }
 0x580   :  { %10659 = vmatprep.mubr.msk.bf16.mxu0 %vm151_vm1, %v5419_v36  ;;  %10753 = vmatprep.mubr.msk.bf16.mxu1 %vm151_vm1, %v6324_v27 }
 0x581   :  { %10768 = vmatpush3.bf16.msra.mxu1 %v11249_v10  ;;  %v12859_v10 = vld [vmem:[#allocation2 + $0x10e] ss:$2 sm:$0xff] }
 0x582   :  { %10785 = vmatprep.subr.bf16.mxu1 %v12842_v1  ;;  %v5422_v3 = vpack.c.bf16 %v12859_v10, %v12764_v13 }
 0x587   :  { %10660 = vmatmul.mubr.msk.bf16.vlgmr.msra.gmra.mxu0 %vm151_vm1, %v5420_v40  ;;  %10754 = vmatmul.mubr.msk.bf16.gmra.mxu1 %vm151_vm1, %v6325_v41 }
 0x588   :  { %10663 = vmatprep.mubr.msk.bf16.mxu0 %vm151_vm1, %v5421_v14  ;;  %10668 = vmatpush3.bf16.msra.mxu0 %v11248_v58  ;;  %v11251_v58 = vld [vmem:[%s13718_s2 + $0x40] sm:$0xff]  }
 0x589   :  { %10769 = vmatprep.mubr.msk.bf16.mxu1 %vm151_vm1, %v6518_v45  ;;  %10677 = vmatprep.subr.bf16.mxu0 %v11250_v26  ;;  %v6521_v45 = vpack.c.bf16 %v6517_v19, %v12773_v49  ;;  %v5624_v49 = vld [vmem:[#allocation2 + $0x80] ss:$2 sm:$0xff] }
 0x58a   :  { %v5630_v55 = vpack.c.bf16 %v5624_v49, %v5623_v57  ;;  %v6421_v20 = vpack.c.bf16 %v5625_v59, %v5624_v49 }
 0x58f   :  { %10664 = vmatmul.mubr.msk.bf16.gmra.mxu0 %vm151_vm1, %v5422_v3  ;;  %10770 = vmatmul.mubr.msk.bf16.vlgmr.msra.gmra.mxu1 %vm151_vm1, %v6519_v63  ;;  %v5527_v63 = vpack.c.bf16 %v5523_v50, %v5522_v54  ;;  %v5628_v54 = vld [vmem:[#allocation2 + $0x110] ss:$2 sm:$0xff] }
 0x590   :  { %10669 = vmatprep.mubr.msk.bf16.mxu0 %vm151_vm1, %v5524_v46  ;;  %10773 = vmatprep.mubr.msk.bf16.mxu1 %vm151_vm1, %v6520_v2  ;;  %v5632_v30 = vpack.c.bf16 %v5628_v54, %v5627_v6 }
 0x597   :  { %10670 = vmatmul.mubr.msk.bf16.vlgmr.msra.gmra.mxu0 %vm151_vm1, %v5525_v18  ;;  %10774 = vmatmul.mubr.msk.bf16.gmra.mxu1 %vm151_vm1, %v6521_v45 }
 0x598   :  { %10673 = vmatprep.mubr.msk.bf16.mxu0 %vm151_vm1, %v5526_v11  ;;  %10678 = vmatpush3.bf16.msra.mxu0 %v11250_v26 }
 0x599   :  { %10697 = vmatprep.subr.bf16.mxu0 %v11251_v58  ;;  %10789 = vmatprep.mubr.msk.bf16.mxu1 %vm11365_vm0, %v12842_v1 }
 0x59f   :  { %10674 = vmatmul.mubr.msk.bf16.gmra.mxu0 %vm151_vm1, %v5527_v63 }
 0x5a0   :  { %10679 = vmatprep.mubr.msk.bf16.mxu0 %vm151_vm1, %v5629_v35 }
 0x5a7   :  { %10680 = vmatmul.mubr.msk.bf16.vlgmr.msra.gmra.mxu0 %vm151_vm1, %v5630_v55 }
 0x5a8   :  { %10683 = vmatprep.mubr.msk.bf16.mxu0 %vm151_vm1, %v5631_v48  ;;  %10698 = vmatpush3.bf16.msra.mxu0 %v11251_v58 }
 0x5a9   :  { %10717 = vmatprep.subr.bf16.mxu0 %v11252_v56 }
 0x5af   :  { %10684 = vmatmul.mubr.msk.bf16.gmra.mxu0 %vm151_vm1, %v5632_v30 }
 0x5b0   :  { %10699 = vmatprep.mubr.msk.bf16.mxu0 %vm151_vm1, %v5832_v21  ;;  %v6027_v21 = vld [vmem:[#allocation2 + $0x122] ss:$2 sm:$0xff] }
 0x5b1   :  { %v6031_v44 = vpack.c.bf16 %v6027_v21, %v12819_v17 }
 0x5b7   :  { %10700 = vmatmul.mubr.msk.bf16.vlgmr.msra.gmra.mxu0 %vm151_vm1, %v5833_v9 }
 0x5b8   :  { %10703 = vmatprep.mubr.msk.bf16.mxu0 %vm151_vm1, %v5834_v62  ;;  %10718 = vmatpush3.bf16.msra.mxu0 %v11252_v56 }
 0x5b9   :  { %10737 = vmatprep.subr.bf16.mxu0 %v11253_v51 }
 0x5bf   :  { %10704 = vmatmul.mubr.msk.bf16.gmra.mxu0 %vm151_vm1, %v5835_v25  ;;  %v11255_v25 = vld [vmem:[%s13719_s3 + $0x18] sm:$0xff]  }
 0x5c0   :  { %10719 = vmatprep.mubr.msk.bf16.mxu0 %vm151_vm1, %v6028_v28  ;;  %v6227_v28 = vpack.c.bf16 %v6223_v12, %v12859_v10 }
 0x5c7   :  { %10720 = vmatmul.mubr.msk.bf16.vlgmr.msra.gmra.mxu0 %vm151_vm1, %v6029_v4 }
 0x5c8   :  { %10723 = vmatprep.mubr.msk.bf16.mxu0 %vm151_vm1, %v6030_v39  ;;  %10738 = vmatpush3.bf16.msra.mxu0 %v11253_v51 }
 0x5c9   :  { %10757 = vmatprep.subr.bf16.mxu0 %v11254_v0 }
 0x5cf   :  { %10724 = vmatmul.mubr.msk.bf16.gmra.mxu0 %vm151_vm1, %v6031_v44 }
 0x5d0   :  { %10739 = vmatprep.mubr.msk.bf16.mxu0 %vm151_vm1, %v6224_v38  ;;  %v6419_v38 = vld [vmem:[#allocation2 + $0x134] ss:$2 sm:$0xff] }
 0x5d1   :  { %v6423_v16 = vpack.c.bf16 %v6419_v38, %v5628_v54 }
 0x5d7   :  { %10740 = vmatmul.mubr.msk.bf16.vlgmr.msra.gmra.mxu0 %vm151_vm1, %v6225_v29  ;;  %v10621_v24 = vpop.f32.mrf.mxu0 }
 0x5d8   :  { %10743 = vmatprep.mubr.msk.bf16.mxu0 %vm151_vm1, %v6226_v7  ;;  %10758 = vmatpush3.bf16.msra.mxu0 %v11254_v0  ;;  %v11256_v0 = vld [vmem:[%s13719_s3 + $0x8] sm:$0xff]  }
 0x5d9   :  { %10777 = vmatprep.subr.bf16.mxu0 %v12842_v1  ;;  %v5087_v42 = vpop.f32.mrf.mxu0  ;;  %10786 = vmatpush3.bf16.msra.mxu1 %v11256_v0 }
 0x5da   :  { %10787 = vmatprep.subr.bf16.mxu1 %v12842_v1 }
 0x5db   :  { %v10622_v9 = vpop.f32.mrf.mxu0 }
 0x5dd   :  { %v12944_v4 = vpop.f32.mrf.mxu0 }
 0x5df   :  { %10744 = vmatmul.mubr.msk.bf16.gmra.mxu0 %vm151_vm1, %v6227_v28  ;;  %v12950_v7 = vpop.f32.mrf.mxu1  ;;  %v11257_v28 = vld [vmem:[%s13719_s3 + $0x10] sm:$0xff]  }
 0x5e0   :  { %10759 = vmatprep.mubr.msk.bf16.mxu0 %vm151_vm1, %v6420_v5  ;;  %v11258_v5 = vld [vmem:[%s13719_s3] sm:$0xff]  }
 0x5e1   :  { %v12952_v27 = vpop.f32.mrf.mxu1  ;;  %10788 = vmatpush3.bf16.msra.mxu1 %v11258_v5 }
 0x5e2   :  { %10801 = vmatprep.subr.bf16.mxu1 %v12842_v1 }
 0x5e3   :  { %v12956_v26 = vpop.f32.mrf.mxu1 }
 0x5e5   :  { %v12958_v3 = vpop.f32.mrf.mxu1 }
 0x5e7   :  { %10760 = vmatmul.mubr.msk.bf16.vlgmr.msra.gmra.mxu0 %vm151_vm1, %v6421_v20 }
 0x5e8   :  { %10763 = vmatprep.mubr.msk.bf16.mxu0 %vm151_vm1, %v6422_v22  ;;  %10778 = vmatpush3.bf16.msra.mxu0 %v11255_v25 }
 0x5e9   :  { %10779 = vmatprep.subr.bf16.mxu0 %v12842_v1 }
 0x5ec   :  { %10780 = vmatpush3.bf16.msra.mxu0 %v11257_v28 }
 0x5ed   :  { %10793 = vmatprep.subr.bf16.mxu0 %v12842_v1 }
 0x5ef   :  { %10764 = vmatmul.mubr.msk.bf16.gmra.mxu0 %vm151_vm1, %v6423_v16 }
 0x5f0   :  { %10781 = vmatprep.mubr.msk.bf16.mxu0 %vm11365_vm0, %v12842_v1 }
 0x60f   :  { %v10625_v34 = vpop.f32.mrf.mxu0 }
 0x611   :  { %v5103_v31 = vpop.f32.mrf.mxu0 }
 0x613   :  { %v10626_v29 = vpop.f32.mrf.mxu0 }
 0x615   :  { %v12946_v53 = vpop.f32.mrf.mxu0 }
 0x617   :  { %v10631_v32 = vpop.f32.mrf.mxu0  ;;  %v12960_v19 = vpop.f32.mrf.mxu1 }
 0x618   :  { %v5179_v33 = vadd.f32 %v10631_v32, %v10621_v24 }
 0x619   :  { %v5170_v43 = vpop.f32.mrf.mxu0  ;;  %v12964_v11 = vpop.f32.mrf.mxu1 }
 0x61a   :  { %v5171_v62 = vadd.f32 %v5170_v43, %v5087_v42 }
 0x61b   :  { %v10632_v39 = vpop.f32.mrf.mxu0  ;;  %v12966_v49 = vpop.f32.mrf.mxu1 }
 0x61c   :  { %v5182_v8 = vadd.f32 %v10632_v39, %v10622_v9 }
 0x61d   :  { %v12948_v13 = vpop.f32.mrf.mxu0  ;;  %v12970_v59 = vpop.f32.mrf.mxu1 }
 0x61e   :  { %13767 = vst [vmem:[#allocation21_spill] sm:$0xff] %v12970_v59 }
 0x61f   :  { %v10635_v60 = vpop.f32.mrf.mxu0  ;;  %v12972_v30 = vpop.f32.mrf.mxu1 }
 0x620   :  { %v5195_v17 = vadd.f32 %v10635_v60, %v10625_v34 }
 0x621   :  { %v5186_v36 = vpop.f32.mrf.mxu0  ;;  %v12982_v44 = vpop.f32.mrf.mxu1 }
 0x622   :  { %v5187_v50 = vadd.f32 %v5186_v36, %v5103_v31 }
 0x623   :  { %v10636_v61 = vpop.f32.mrf.mxu0  ;;  %v12992_v16 = vpop.f32.mrf.mxu1 }
 0x624   :  { %v5198_v41 = vadd.f32 %v10636_v61, %v10626_v29 }
 0x625   :  { %v12954_v40 = vpop.f32.mrf.mxu0  ;;  %v12998_v34 = vpop.f32.mrf.mxu1 }
 0x626   :  { %13768 = vst [vmem:[#allocation6_spill] sm:$0xff] %v12998_v34 }
 0x627   :  { %v10641_v14 = vpop.f32.mrf.mxu0  ;;  %v13000_v43 = vpop.f32.mrf.mxu1 }
 0x628   :  { %v5300_v10 = vadd.f32 %v10641_v14, %v5179_v33  ;;  %13769 = vst [vmem:[#allocation7_spill] sm:$0xff] %v13000_v43 }
 0x629   :  { %v5267_v23 = vpop.f32.mrf.mxu0  ;;  %v13004_v60 = vpop.f32.mrf.mxu1 }
 0x62a   :  { %v5298_v46 = vadd.f32 %v5267_v23, %v5171_v62  ;;  %13770 = vst [vmem:[#allocation12_spill] sm:$0xff] %v13004_v60 }
 0x62b   :  { %v10642_v2 = vpop.f32.mrf.mxu0 }
 0x62c   :  { %v5301_v18 = vadd.f32 %v10642_v2, %v5182_v8 }
 0x62d   :  { %v12962_v45 = vpop.f32.mrf.mxu0 }
 0x62f   :  { %v10645_v58 = vpop.f32.mrf.mxu0 }
 0x630   :  { %v5304_v52 = vadd.f32 %v10645_v58, %v5195_v17 }
 0x631   :  { %v5283_v15 = vpop.f32.mrf.mxu0 }
 0x632   :  { %v5302_v63 = vadd.f32 %v5283_v15, %v5187_v50 }
 0x633   :  { %v10646_v35 = vpop.f32.mrf.mxu0 }
 0x634   :  { %v5305_v47 = vadd.f32 %v10646_v35, %v5198_v41  ;;  %v13010_v41 = vpop.f32.mrf.mxu1 }
 0x635   :  { %v12968_v57 = vpop.f32.mrf.mxu0  ;;  %13771 = vst [vmem:[#allocation5_spill] sm:$0xff] %v13010_v41 }
 0x637   :  { %v10651_v55 = vpop.f32.mrf.mxu0 }
 0x638   :  { %v5405_v56 = vadd.f32 %v10651_v55, %v5300_v10 }
 0x639   :  { %v5372_v48 = vpop.f32.mrf.mxu0 }
 0x63a   :  { %v5403_v54 = vadd.f32 %v5372_v48, %v5298_v46  ;;  %v13016_v46 = vpop.f32.mrf.mxu1 }
 0x63b   :  { %v10652_v6 = vpop.f32.mrf.mxu0  ;;  %13772 = vst [vmem:[#allocation8_spill] sm:$0xff] %v13016_v46 }
 0x63c   :  { %v5406_v51 = vadd.f32 %v10652_v6, %v5301_v18  ;;  %v13018_v58 = vpop.f32.mrf.mxu1 }
 0x63d   :  { %v12974_v37 = vpop.f32.mrf.mxu0  ;;  %13773 = vst [vmem:[#allocation13_spill] sm:$0xff] %v13018_v58 }
 0x63f   :  { %v10655_v21 = vpop.f32.mrf.mxu0 }
 0x640   :  { %v5409_v12 = vadd.f32 %v10655_v21, %v5304_v52 }
 0x641   :  { %v5388_v20 = vpop.f32.mrf.mxu0 }
 0x642   :  { %v5407_v22 = vadd.f32 %v5388_v20, %v5302_v63  ;;  %v13020_v63 = vpop.f32.mrf.mxu1 }
 0x643   :  { %v10656_v38 = vpop.f32.mrf.mxu0  ;;  %13774 = vst [vmem:[#allocation23_spill] sm:$0xff] %v13020_v63 }
 0x644   :  { %v5410_v24 = vadd.f32 %v10656_v38, %v5305_v47  ;;  %v13024_v55 = vpop.f32.mrf.mxu1 }
 0x645   :  { %v12994_v42 = vpop.f32.mrf.mxu0  ;;  %13775 = vst [vmem:[#allocation9_spill] sm:$0xff] %v13024_v55 }
 0x647   :  { %v10661_v9 = vpop.f32.mrf.mxu0 }
 0x648   :  { %v5510_v31 = vadd.f32 %v10661_v9, %v5405_v56 }
 0x649   :  { %v5477_v29 = vpop.f32.mrf.mxu0 }
 0x64a   :  { %v5508_v32 = vadd.f32 %v5477_v29, %v5403_v54  ;;  %v13028_v54 = vpop.f32.mrf.mxu1 }
 0x64b   :  { %v10662_v33 = vpop.f32.mrf.mxu0  ;;  %13776 = vst [vmem:[#allocation19_spill] sm:$0xff] %v13028_v54 }
 0x64c   :  { %v5511_v62 = vadd.f32 %v10662_v33, %v5406_v51  ;;  %v13030_v25 = vpop.f32.mrf.mxu1 }
 0x64d   :  { %v13002_v39 = vpop.f32.mrf.mxu0  ;;  %13777 = vst [vmem:[#allocation14_spill] sm:$0xff] %v13030_v25 }
 0x64f   :  { %v10665_v8 = vpop.f32.mrf.mxu0 }
 0x650   :  { %v13006_v17 = vadd.f32 %v10665_v8, %v5409_v12  ;;  %v13032_v12 = vpop.f32.mrf.mxu1 }
 0x651   :  { %v5493_v36 = vpop.f32.mrf.mxu0  ;;  %13778 = vst [vmem:[#allocation15_spill] sm:$0xff] %v13032_v12 }
 0x652   :  { %v13008_v50 = vadd.f32 %v5493_v36, %v5407_v22  ;;  %v13034_v20 = vpop.f32.mrf.mxu1 }
 0x653   :  { %v10666_v61 = vpop.f32.mrf.mxu0  ;;  %13779 = vst [vmem:[#allocation20_spill] sm:$0xff] %v13034_v20 }
 0x654   :  { %v13012_v14 = vadd.f32 %v10666_v61, %v5410_v24  ;;  %v13038_v24 = vpop.f32.mrf.mxu1 }
 0x655   :  { %v13014_v10 = vpop.f32.mrf.mxu0  ;;  %13780 = vst [vmem:[#allocation10_spill] sm:$0xff] %v13038_v24 }
 0x656   :  { %v13040_v33 = vpop.f32.mrf.mxu1 }
 0x657   :  { %v10671_v23 = vpop.f32.mrf.mxu0  ;;  %13781 = vst [vmem:[#allocation16_spill] sm:$0xff] %v13040_v33  ;;  %v5174_v33 = vadd.f32 %v12948_v13, %v12944_v4 }
 0x658   :  { %v13042_v61 = vpop.f32.mrf.mxu1 }
 0x659   :  { %v5582_v2 = vpop.f32.mrf.mxu0  ;;  %13782 = vst [vmem:[#allocation22_spill] sm:$0xff] %v13042_v61  ;;  %v5615_v61 = vadd.f32 %v10671_v23, %v5510_v31  ;;  %v5299_v59 = vadd.f32 %v12962_v45, %v5174_v33  ;;  %v5190_v23 = vadd.f32 %v12954_v40, %v12946_v53  ;;  %v13790_v33 = vld [vmem:[#allocation6_spill] sm:$0xff] }
 0x65a   :  { %v13046_v12 = vpop.f32.mrf.mxu1 }
 0x65b   :  { %v10672_v18 = vpop.f32.mrf.mxu0  ;;  %13784 = vst [vmem:[#allocation24_spill] sm:$0xff] %v13046_v12 }
 0x65c   :  { %v13050_v54 = vpop.f32.mrf.mxu1 }
 0x65d   :  { %v5585_v52 = vpop.f32.mrf.mxu0  ;;  %13786 = vst [vmem:[#allocation18_spill] sm:$0xff] %v13050_v54  ;;  %v5404_v54 = vadd.f32 %v12974_v37, %v5299_v59 }
 0x65e   :  { %v13052_v55 = vpop.f32.mrf.mxu1 }
 0x65f   :  { %v10675_v15 = vpop.f32.mrf.mxu0  ;;  %13787 = vst [vmem:[#allocation26_spill] sm:$0xff] %v13052_v55  ;;  %v5509_v58 = vadd.f32 %v13002_v39, %v5404_v54  ;;  %v5303_v39 = vadd.f32 %v12968_v57, %v5190_v23  ;;  %v13794_v23 = vld [vmem:[#allocation12_spill] sm:$0xff] }
 0x660   :  { %v13061_v12 = vpop.f32.mrf.mxu1 }
 0x661   :  { %v5598_v35 = vpop.f32.mrf.mxu0  ;;  %v5408_v40 = vadd.f32 %v12994_v42, %v5303_v39 }
 0x662   :  { %v13069_v13 = vpop.f32.mrf.mxu1 }
 0x663   :  { %v13022_v47 = vpop.f32.mrf.mxu0 }
 0x665   :  { %v13026_v56 = vpop.f32.mrf.mxu0 }
 0x667   :  { %v10681_v48 = vpop.f32.mrf.mxu0 }
 0x668   :  { %v5720_v43 = vadd.f32 %v10681_v48, %v5615_v61 }
 0x669   :  { %v5687_v6 = vpop.f32.mrf.mxu0 }
 0x66a   :  { %v5825_v45 = vadd.f32 %v12950_v7, %v5720_v43  ;;  %v5620_v43 = vadd.f32 %v13022_v47, %v13012_v14 }
 0x66b   :  { %v10682_v51 = vpop.f32.mrf.mxu0 }
 0x66d   :  { %v5690_v0 = vpop.f32.mrf.mxu0 }
 0x66f   :  { %v10685_v21 = vpop.f32.mrf.mxu0 }
 0x671   :  { %v5703_v28 = vpop.f32.mrf.mxu0 }
 0x673   :  { %v10686_v5 = vpop.f32.mrf.mxu0 }
 0x675   :  { %v13036_v22 = vpop.f32.mrf.mxu0 }
 0x677   :  { %v10701_v38 = vpop.f32.mrf.mxu0 }
 0x678   :  { %v5923_v37 = vadd.f32 %v10701_v38, %v5825_v45  ;;  %v13793_v45 = vld [vmem:[#allocation21_spill] sm:$0xff] }
 0x679   :  { %v5890_v9 = vpop.f32.mrf.mxu0 }
 0x67a   :  { %v6021_v57 = vadd.f32 %v12972_v30, %v5923_v37 }
 0x67b   :  { %v10702_v29 = vpop.f32.mrf.mxu0 }
 0x67d   :  { %v5893_v8 = vpop.f32.mrf.mxu0 }
 0x67f   :  { %v10705_v36 = vpop.f32.mrf.mxu0 }
 0x681   :  { %v5906_v1 = vpop.f32.mrf.mxu0 }
 0x683   :  { %v13044_v46 = vpop.f32.mrf.mxu0 }
 0x684   :  { %13783 = vst [vmem:[#allocation17_spill] sm:$0xff] %v13044_v46  ;;  %v5616_v46 = vadd.f32 %v10672_v18, %v5511_v62  ;;  %v5617_v18 = vadd.f32 %v5598_v35, %v13008_v50  ;;  %v5513_v50 = vadd.f32 %v13014_v10, %v5408_v40 }
 0x685   :  { %v13048_v25 = vpop.f32.mrf.mxu0 }
 0x686   :  { %13785 = vst [vmem:[#allocation25_spill] sm:$0xff] %v13048_v25  ;;  %v5613_v25 = vadd.f32 %v5582_v2, %v5508_v32  ;;  %v5721_v31 = vadd.f32 %v10682_v51, %v5616_v46  ;;  %v5614_v32 = vadd.f32 %v5585_v52, %v5509_v58  ;;  %v5619_v2 = vadd.f32 %v10675_v15, %v13006_v17 }
 0x687   :  { %v10721_v20 = vpop.f32.mrf.mxu0  ;;  %v5722_v17 = vadd.f32 %v5703_v28, %v5617_v18  ;;  %v5725_v52 = vadd.f32 %v10686_v5, %v5620_v43  ;;  %v13798_v43 = vld [vmem:[#allocation16_spill] sm:$0xff] }
 0x688   :  { %v5718_v55 = vadd.f32 %v5687_v6, %v5613_v25  ;;  %v5719_v48 = vadd.f32 %v5690_v0, %v5614_v32  ;;  %v5724_v54 = vadd.f32 %v10685_v21, %v5619_v2  ;;  %v13080_v6 = vpop.f32.mrf.mxu1  ;;  %v5826_v53 = vadd.f32 %v12956_v26, %v5721_v31  ;;  %v13792_v31 = vld [vmem:[#allocation23_spill] sm:$0xff] }
 0x689   :  { %v6086_v41 = vpop.f32.mrf.mxu0  ;;  %v6119_v26 = vadd.f32 %v10721_v20, %v6021_v57  ;;  %v5618_v25 = vadd.f32 %v13026_v56, %v5513_v50  ;;  %v5827_v0 = vadd.f32 %v12964_v11, %v5722_v17  ;;  %v13800_v57 = vld [vmem:[#allocation14_spill] sm:$0xff] }
 0x68a   :  { %v5823_v62 = vadd.f32 %v12952_v27, %v5718_v55  ;;  %v5924_v27 = vadd.f32 %v10702_v29, %v5826_v53  ;;  %v5824_v15 = vadd.f32 %v12958_v3, %v5719_v48  ;;  %v5829_v35 = vadd.f32 %v12960_v19, %v5724_v54  ;;  %v10771_v51 = vpop.f32.mrf.mxu1 }
 0x68b   :  { %v10722_v24 = vpop.f32.mrf.mxu0  ;;  %v5723_v28 = vadd.f32 %v13036_v22, %v5618_v25  ;;  %v5925_v3 = vadd.f32 %v5906_v1, %v5827_v0  ;;  %v5830_v19 = vadd.f32 %v12966_v49, %v5725_v52  ;;  %v13789_v29 = vld [vmem:[#allocation17_spill] sm:$0xff] }
 0x68c   :  { %v5921_v7 = vadd.f32 %v5890_v9, %v5823_v62  ;;  %v5922_v14 = vadd.f32 %v5893_v8, %v5824_v15  ;;  %v5927_v47 = vadd.f32 %v10705_v36, %v5829_v35  ;;  %v6022_v10 = vadd.f32 %v12992_v16, %v5924_v27  ;;  %v6576_v38 = vpop.f32.mrf.mxu1  ;;  %v13788_v9 = vld [vmem:[#allocation13_spill] sm:$0xff]  ;;  %v13791_v36 = vld [vmem:[#allocation7_spill] sm:$0xff]  ;;  %v13801_v35 = vld [vmem:[#allocation22_spill] sm:$0xff] }
 0x68d   :  { %v13056_v60 = vpop.f32.mrf.mxu0  ;;  %v5928_v56 = vadd.f32 %v13789_v29, %v5830_v19  ;;  %v5828_v22 = vadd.f32 %v13793_v45, %v5723_v28  ;;  %v13795_v62 = vld [vmem:[#allocation9_spill] sm:$0xff]  ;;  %v13804_v28 = vld [vmem:[#allocation24_spill] sm:$0xff] }
 0x68e   :  { %v6019_v42 = vadd.f32 %v12982_v44, %v5921_v7  ;;  %v6120_v20 = vadd.f32 %v10722_v24, %v6022_v10  ;;  %v6217_v44 = vadd.f32 %v13788_v9, %v6119_v26  ;;  %v6020_v8 = vadd.f32 %v13790_v33, %v5922_v14  ;;  %v10772_v2 = vpop.f32.mrf.mxu1  ;;  %v13796_v18 = vld [vmem:[#allocation25_spill] sm:$0xff] }
 0x68f   :  { %v13059_v63 = vpop.f32.mrf.mxu0  ;;  %v6025_v11 = vadd.f32 %v13791_v36, %v5927_v47  ;;  %v6023_v24 = vadd.f32 %v13794_v23, %v5925_v3  ;;  %v5926_v48 = vadd.f32 %v13796_v18, %v5828_v22  ;;  %v13803_v47 = vld [vmem:[#allocation15_spill] sm:$0xff] }
 0x690   :  { %v6117_v30 = vadd.f32 %v6086_v41, %v6019_v42  ;;  %v6118_v1 = vadd.f32 %v13056_v60, %v6020_v8  ;;  %v6218_v39 = vadd.f32 %v13795_v62, %v6120_v20  ;;  %v13802_v42 = vld [vmem:[#allocation8_spill] sm:$0xff] }
 0x691   :  { %v13064_v34 = vpop.f32.mrf.mxu0  ;;  %v6123_v49 = vadd.f32 %v13059_v63, %v6025_v11  ;;  %v13799_v63 = vld [vmem:[#allocation19_spill] sm:$0xff]  ;;  %v6024_v25 = vadd.f32 %v13802_v42, %v5926_v48  ;;  %v13805_v20 = vld [vmem:[#allocation20_spill] sm:$0xff] }
 0x692   :  { %v6215_v16 = vadd.f32 %v13792_v31, %v6117_v30  ;;  %v6121_v54 = vadd.f32 %v13064_v34, %v6023_v24  ;;  %v6216_v27 = vadd.f32 %v13799_v63, %v6118_v1 }
 0x693   :  { %v13067_v4 = vpop.f32.mrf.mxu0  ;;  %v6221_v50 = vadd.f32 %v13800_v57, %v6123_v49 }
 0x694   :  { %v6219_v0 = vadd.f32 %v13803_v47, %v6121_v54 }
 0x695   :  { %v13075_v59 = vpop.f32.mrf.mxu0 }
 0x696   :  { %v6122_v3 = vadd.f32 %v13075_v59, %v6024_v25  ;;  %v13808_v59 = vld [vmem:[#allocation10_spill] sm:$0xff] }
 0x697   :  { %v10741_v46 = vpop.f32.mrf.mxu0 }
 0x698   :  { %v6315_v41 = vadd.f32 %v10741_v46, %v6217_v44  ;;  %v13797_v46 = vld [vmem:[#allocation5_spill] sm:$0xff] }
 0x699   :  { %v6282_v58 = vpop.f32.mrf.mxu0  ;;  %v6026_v7 = vadd.f32 %v13797_v46, %v5928_v56 }
 0x69a   :  { %v6313_v37 = vadd.f32 %v6282_v58, %v6215_v16  ;;  %v6413_v17 = vadd.f32 %v13798_v43, %v6315_v41  ;;  %v6579_v58 = vpop.f32.mrf.mxu1  ;;  %v13807_v41 = vld [vmem:[#allocation26_spill] sm:$0xff] }
 0x69b   :  { %v10742_v55 = vpop.f32.mrf.mxu0  ;;  %v6124_v60 = vadd.f32 %v13067_v4, %v6026_v7 }
 0x69c   :  { %v6316_v40 = vadd.f32 %v10742_v55, %v6218_v39  ;;  %v6411_v26 = vadd.f32 %v13801_v35, %v6313_v37  ;;  %v10775_v29 = vpop.f32.mrf.mxu1 }
 0x69d   :  { %v6285_v21 = vpop.f32.mrf.mxu0  ;;  %v6222_v9 = vadd.f32 %v13805_v20, %v6124_v60 }
 0x69e   :  { %v6314_v34 = vadd.f32 %v6285_v21, %v6216_v27  ;;  %v6414_v4 = vadd.f32 %v13804_v28, %v6316_v40  ;;  %v6592_v23 = vpop.f32.mrf.mxu1 }
 0x69f   :  { %v10745_v5 = vpop.f32.mrf.mxu0 }
 0x6a0   :  { %v6319_v14 = vadd.f32 %v10745_v5, %v6221_v50  ;;  %v13806_v5 = vld [vmem:[#allocation18_spill] sm:$0xff]  ;;  %v10776_v40 = vpop.f32.mrf.mxu1 }
 0x6a1   :  { %v6298_v61 = vpop.f32.mrf.mxu0  ;;  %v6412_v36 = vadd.f32 %v13806_v5, %v6314_v34 }
 0x6a2   :  { %v6317_v19 = vadd.f32 %v6298_v61, %v6219_v0  ;;  %v6220_v61 = vadd.f32 %v13808_v59, %v6122_v3  ;;  %v6647_v0 = vld [vmem:[#allocation3] ss:$2 sm:$0xf]  ;;  %v11262_v59 = vld [vmem:[%s13719_s3 + $0x30] sm:$0xff]  }
 0x6a3   :  { %v10746_v32 = vpop.f32.mrf.mxu0 }
 0x6a4   :  { %v6320_v21 = vadd.f32 %v10746_v32, %v6222_v9  ;;  %v6415_v49 = vadd.f32 %v13061_v12, %v6317_v19 }
 0x6a5   :  { %v6301_v53 = vpop.f32.mrf.mxu0 }
 0x6a6   :  { %v6318_v37 = vadd.f32 %v6301_v53, %v6220_v61 }
 0x6a7   :  { %v10761_v52 = vpop.f32.mrf.mxu0 }
 0x6a8   :  { %v6511_v15 = vadd.f32 %v10761_v52, %v6413_v17  ;;  %v6416_v53 = vadd.f32 %v13080_v6, %v6318_v37  ;;  %v6595_v52 = vpop.f32.mrf.mxu1 }
 0x6a9   :  { %v6478_v55 = vpop.f32.mrf.mxu0 }
 0x6aa   :  { %v6609_v30 = vadd.f32 %v10771_v51, %v6511_v15  ;;  %v6509_v10 = vadd.f32 %v6478_v55, %v6411_v26  ;;  %v6417_v51 = vadd.f32 %v13807_v41, %v6319_v14  ;;  %v6664_v14 = vld [vmem:[#allocation3 + $0x1] ss:$2 sm:$0xf] }
 0x6ab   :  { %v10762_v44 = vpop.f32.mrf.mxu0 }
 0x6ac   :  { %vm6617_vm1 = vcmp.gt.f32.partialorder %v6609_v30, 0.0  ;;  %v6625_v56 = vmul.f32 0.2, %v6609_v30  ;;  %v6607_v33 = vadd.f32 %v6576_v38, %v6509_v10  ;;  %v6512_v8 = vadd.f32 %v10762_v44, %v6414_v4 }
 0x6ad   :  { %v6481_v11 = vpop.f32.mrf.mxu0 }
 0x6ae   :  { %v6633_v31 = vsel %vm6617_vm1, %v6609_v30, %v6625_v56  ;;  %vm6615_vm15 = vcmp.gt.f32.partialorder %v6607_v33, 0.0  ;;  %v6623_v16 = vmul.f32 0.2, %v6607_v33  ;;  %v6610_v45 = vadd.f32 %v10772_v2, %v6512_v8  ;;  %v11259_v8 = vld [vmem:[%s13719_s3 + $0x28] sm:$0xff]  }
 0x6af   :  { %6641 = vst [vmem:[#allocation3 + $0x1f] sm:$0xff] %v6633_v31  ;;  %v6510_v22 = vadd.f32 %v6481_v11, %v6412_v36  ;;  %v10765_v1 = vpop.f32.mrf.mxu0  ;;  %v6418_v2 = vadd.f32 %v13069_v13, %v6320_v21  ;;  %v11260_v21 = vld [vmem:[%s13719_s3 + $0x38] sm:$0xff]  }
 0x6b0   :  { %v6631_v38 = vsel %vm6615_vm15, %v6607_v33, %v6623_v16  ;;  %vm6618_vm2 = vcmp.gt.f32.partialorder %v6610_v45, 0.0  ;;  %v6626_v24 = vmul.f32 0.2, %v6610_v45  ;;  %v6515_v32 = vadd.f32 %v10765_v1, %v6417_v51  ;;  %v11261_v16 = vld [vmem:[%s13719_s3 + $0x20] sm:$0xff]  }
 0x6b1   :  { %6639 = vst [vmem:[#allocation3 + $0xb] sm:$0xff] %v6631_v38  ;;  %v6608_v62 = vadd.f32 %v6579_v58, %v6510_v22  ;;  %v6494_v39 = vpop.f32.mrf.mxu0  ;;  %v6868_v22 = vld [vmem:[#allocation3 + $0x3] ss:$2 sm:$0xf] }
 0x6b2   :  { %v6634_v18 = vsel %vm6618_vm2, %v6610_v45, %v6626_v24  ;;  %v6613_v48 = vadd.f32 %v10775_v29, %v6515_v32  ;;  %v6513_v54 = vadd.f32 %v6494_v39, %v6415_v49  ;;  %v6793_v45 = vld [vmem:[#allocation3 + $0x2] ss:$2 sm:$0xf] }
 0x6b3   :  { %6642 = vst [vmem:[#allocation3 + $0x29] sm:$0xff] %v6634_v18  ;;  %vm6616_vm3 = vcmp.gt.f32.partialorder %v6608_v62, 0.0  ;;  %v6624_v46 = vmul.f32 0.2, %v6608_v62  ;;  %v10766_v7 = vpop.f32.mrf.mxu0  ;;  %v13809_v49 = vld [vmem:[#allocation11_spill] sm:$0xff] }
 0x6b4   :  { %vm6621_vm4 = vcmp.gt.f32.partialorder %v6613_v48, 0.0  ;;  %v6629_v12 = vmul.f32 0.2, %v6613_v48  ;;  %v6611_v43 = vadd.f32 %v6592_v23, %v6513_v54  ;;  %v6516_v17 = vadd.f32 %v10766_v7, %v6418_v2  ;;  %v11264_v54 = vld [vmem:[%s13719_s3 + $0x58] sm:$0xff]  }
 0x6b5   :  { %v6632_v60 = vsel %vm6616_vm3, %v6608_v62, %v6624_v46  ;;  %v6497_v63 = vpop.f32.mrf.mxu0 }
 0x6b6   :  { %6640 = vst [vmem:[#allocation3 + $0x15] sm:$0xff] %v6632_v60  ;;  %v6637_v27 = vsel %vm6621_vm4, %v6613_v48, %v6629_v12  ;;  %vm6619_vm5 = vcmp.gt.f32.partialorder %v6611_v43, 0.0  ;;  %v6627_v57 = vmul.f32 0.2, %v6611_v43  ;;  %v6614_v50 = vadd.f32 %v10776_v40, %v6516_v17  ;;  %v11263_v48 = vld [vmem:[%s13719_s3 + $0x48] sm:$0xff]  }
 0x6b7   :  { %6645 = vst [vmem:[#allocation3 + $0x47] sm:$0xff] %v6637_v27  ;;  %v6514_v13 = vadd.f32 %v6497_v63, %v6416_v53  ;;  %v13201_v7 = vld [vmem:[#allocation3 + $0x1e] ss:$2 sm:$0xf]  ;;  %v11266_v63 = vld [vmem:[%s13719_s3 + $0x50] sm:$0xff]  }
 0x6b8   :  { %v6635_v58 = vsel %vm6619_vm5, %v6611_v43, %v6627_v57  ;;  %vm6622_vm6 = vcmp.gt.f32.partialorder %v6614_v50, 0.0  ;;  %v6630_v15 = vmul.f32 0.2, %v6614_v50  ;;  %v13203_v40 = vld [vmem:[#allocation3 + $0x1f] ss:$2 sm:$0xf] }
 0x6b9   :  { %6643 = vst [vmem:[#allocation3 + $0x33] sm:$0xff] %v6635_v58  ;;  %v6612_v35 = vadd.f32 %v6595_v52, %v6514_v13  ;;  %v11265_v53 = vld [vmem:[%s13719_s3 + $0x40] sm:$0xff]   ;;  %v6948_v27 = vrot.slane %v13201_v7, 4  ;;  %v7023_v57 = vrot.slane %v13203_v40, 4 }
 0x6ba   :  { %v6638_v26 = vsel %vm6622_vm6, %v6614_v50, %v6630_v15  ;;  %v13131_v30 = vld [vmem:[#allocation3 + $0x29] ss:$2 sm:$0xf]  ;;  %v13138_v3 = vld [vmem:[#allocation3 + $0x28] ss:$2 sm:$0xf] }
 0x6bb   :  { %6646 = vst [vmem:[#allocation3 + $0x51] sm:$0xff] %v6638_v26  ;;  %vm6620_vm9 = vcmp.gt.f32.partialorder %v6612_v35, 0.0  ;;  %v6628_v42 = vmul.f32 0.2, %v6612_v35 }
 0x6bc   :  { %v13175_v23 = vld [vmem:[#allocation3 + $0x2a] ss:$2 sm:$0xf]  ;;  %v13177_v38 = vld [vmem:[#allocation3 + $0x2b] ss:$2 sm:$0xf] }
 0x6bd   :  { %v6636_v25 = vsel %vm6620_vm9, %v6612_v35, %v6628_v42  ;;  %v13125_v6 = vld [vmem:[#allocation3 + $0x15] ss:$2 sm:$0xf]  ;;  %v13127_v34 = vld [vmem:[#allocation3 + $0x14] ss:$2 sm:$0xf] }
 0x6be   :  { %6644 = vst [vmem:[#allocation3 + $0x3d] sm:$0xff] %v6636_v25  ;;  %v6669_v47 = vrot.slane %v13125_v6, 4  ;;  %v6652_v55 = vrot.slane %v13127_v34, 4  ;;  %v13157_v11 = vld [vmem:[#allocation3 + $0x16] ss:$2 sm:$0xf] }
 0x6bf   :  { %v13159_v41 = vld [vmem:[#allocation3 + $0x17] ss:$2 sm:$0xf]  ;;  %v6798_v61 = vrot.slane %v13157_v11, 4  ;;  %v11267_v25 = vld [vmem:[%s13719_s3 + $0x68] sm:$0xff]  }
 0x6c0   :  { %v6674_v44 = vsel %vm2161_vm7, %v6664_v14, %v6669_v47  ;;  %v6657_v56 = vsel %vm2161_vm7, %v6647_v0, %v6652_v55  ;;  %v6873_v1 = vrot.slane %v13159_v41, 4  ;;  %v13187_v37 = vld [vmem:[#allocation3 + $0x46] ss:$2 sm:$0xf]  ;;  %v11268_v14 = vld [vmem:[%s13719_s3 + $0x78] sm:$0xff]  }
 0x6c1   :  { %v13189_v62 = vld [vmem:[#allocation3 + $0x47] ss:$2 sm:$0xf]  ;;  %v6803_v39 = vsel %vm2161_vm7, %v6793_v45, %v6798_v61  ;;  %v6951_v12 = vrot.slane %v13187_v37, 4 }
 0x6c2   :  { %v6878_v18 = vsel %vm2161_vm7, %v6868_v22, %v6873_v1  ;;  %v7026_v43 = vrot.slane %v13189_v62, 4  ;;  %v13209_v17 = vld [vmem:[#allocation3 + $0x32] ss:$2 sm:$0xf]  ;;  %v11271_v1 = vld [vmem:[%s13719_s3 + $0x88] sm:$0xff]  }
 0x6c3   :  { %v13211_v60 = vld [vmem:[#allocation3 + $0x33] ss:$2 sm:$0xf]  ;;  %v6943_v50 = vld [vmem:[#allocation3 + $0xa] ss:$2 sm:$0xf]  ;;  %v6954_v52 = vsel %vm2161_vm7, %v13209_v17, %v6951_v12 }
 0x6c4   :  { %v7018_v13 = vld [vmem:[#allocation3 + $0xb] ss:$2 sm:$0xf]  ;;  %v7029_v58 = vsel %vm2161_vm7, %v13211_v60, %v7026_v43  ;;  %v13231_v15 = vld [vmem:[#allocation3 + $0x48] ss:$2 sm:$0xf]  ;;  %v6953_v26 = vsel %vm2161_vm7, %v6943_v50, %v6948_v27 }
 0x6c5   :  { %v13133_v10 = vld [vmem:[#allocation3 + $0x3d] ss:$2 sm:$0xf]  ;;  %v13135_v28 = vld [vmem:[#allocation3 + $0x3c] ss:$2 sm:$0xf]  ;;  %v7028_v42 = vsel %vm2161_vm7, %v7018_v13, %v7023_v57  ;;  %v6955_v47 = vpack.c.bf16 %v6954_v52, %v6953_v26 }
 0x6c6   :  { %v6672_v4 = vrot.slane %v13133_v10, 4  ;;  %v6655_v19 = vrot.slane %v13135_v28, 4  ;;  %v13141_v20 = vld [vmem:[#allocation3 + $0x3e] ss:$2 sm:$0xf]  ;;  %v7030_v0 = vpack.c.bf16 %v7029_v58, %v7028_v42  ;;  %v11278_v26 = vld [vmem:[%s13719_s3 + $0xb0] sm:$0xff]  }
 0x6c7   :  { %v13143_v9 = vld [vmem:[#allocation3 + $0x3f] ss:$2 sm:$0xf]  ;;  %v6801_v51 = vrot.slane %v13141_v20, 4 }
 0x6c8   :  { %v6675_v29 = vsel %vm2161_vm7, %v13131_v30, %v6672_v4  ;;  %v6658_v33 = vsel %vm2161_vm7, %v13138_v3, %v6655_v19  ;;  %v6876_v31 = vrot.slane %v13143_v9, 4  ;;  %v13233_v35 = vld [vmem:[#allocation3 + $0x49] ss:$2 sm:$0xf]  ;;  %v7101_v19 = vrot.slane %v13231_v15, 4  ;;  %v13295_v12 = vld [vmem:[#allocation2] sm:$0xff] }
 0x6c9   :  { %v6676_v5 = vpack.c.bf16 %v6675_v29, %v6674_v44  ;;  %v6659_v36 = vpack.c.bf16 %v6658_v33, %v6657_v56  ;;  %v6804_v24 = vsel %vm2161_vm7, %v13175_v23, %v6801_v51  ;;  %v13245_v55 = vld [vmem:[#allocation3 + $0x20] ss:$2 sm:$0xf]  ;;  %v13247_v4 = vld [vmem:[#allocation3 + $0x21] ss:$2 sm:$0xf] }
 0x6ca   :  { %v6879_v32 = vsel %vm2161_vm7, %v13177_v38, %v6876_v31  ;;  %v6805_v2 = vpack.c.bf16 %v6804_v24, %v6803_v39  ;;  %v7176_v44 = vrot.slane %v13233_v35, 4  ;;  %v13253_v29 = vld [vmem:[#allocation3 + $0x34] ss:$2 sm:$0xf]  ;;  %v11275_v57 = vld [vmem:[%s13719_s3 + $0xa8] sm:$0xff]  }
 0x6cb   :  { %10782 = vmatmul.mubr.msk.bf16.vlgmr.msra.gmra.mxu0 %vm2202_vm8, %v6676_v5  ;;  %10790 = vmatmul.mubr.msk.bf16.vlgmr.msra.gmra.mxu1 %vm2202_vm8, %v6659_v36  ;;  %v6880_v46 = vpack.c.bf16 %v6879_v32, %v6878_v18  ;;  %v13255_v56 = vld [vmem:[#allocation3 + $0x35] ss:$2 sm:$0xf]  ;;  %v7173_v5 = vrot.slane %v13247_v4, 4  ;;  %v7104_v31 = vsel %vm2161_vm7, %v13253_v29, %v7101_v19 }
 0x6cc   :  { %10794 = vmatpush3.bf16.msra.mxu0 %v11259_v8  ;;  %10802 = vmatpush3.bf16.msra.mxu1 %v11260_v21  ;;  %v11269_v33 = vld [vmem:[%s13719_s3 + $0x60] sm:$0xff]   ;;  %v11270_v8 = vld [vmem:[%s13719_s3 + $0x70] sm:$0xff]   ;;  %v7098_v21 = vrot.slane %v13245_v55, 4  ;;  %v7243_v45 = vld [vmem:[#allocation3 + $0x50] ss:$2 sm:$0xf] }
 0x6cd   :  { %10795 = vmatprep.subr.bf16.mxu0 %v13809_v49  ;;  %10803 = vmatprep.subr.bf16.mxu1 %v13809_v49  ;;  %v7093_v36 = vld [vmem:[#allocation3 + $0xc] ss:$2 sm:$0xf]  ;;  %v7168_v51 = vld [vmem:[#allocation3 + $0xd] ss:$2 sm:$0xf] }
 0x6ce   :  { %10797 = vmatprep.mubr.msk.bf16.mxu0 %vm11365_vm0, %v13809_v49  ;;  %10805 = vmatprep.mubr.msk.bf16.mxu1 %vm11365_vm0, %v13809_v49  ;;  %v7103_v61 = vsel %vm2161_vm7, %v7093_v36, %v7098_v21  ;;  %v7178_v22 = vsel %vm2161_vm7, %v7168_v51, %v7173_v5  ;;  %v11272_v24 = vld [vmem:[%s13719_s3 + $0x98] sm:$0xff]   ;;  %v7248_v18 = vrot.slane %v7243_v45, 4  ;;  %v11277_v58 = vld [vmem:[%s13719_s3 + $0xa0] sm:$0xff]   ;;  %v11283_v51 = vld [vmem:[%s13719_s3 + $0xe8] sm:$0xff]  }
 0x6cf   :  { %v7105_v32 = vpack.c.bf16 %v7104_v31, %v7103_v61  ;;  %v7603_v19 = vld [vmem:[#allocation3 + $0x5b] ss:$2 sm:$0xf]  ;;  %v11284_v31 = vld [vmem:[%s13719_s3 + $0xf8] sm:$0xff]   ;;  %v11286_v61 = vld [vmem:[%s13719_s3 + $0xf0] sm:$0xff]  }
 0x6d0   :  { %10796 = vmatpush3.bf16.msra.mxu0 %v11261_v16  ;;  %10804 = vmatpush3.bf16.msra.mxu1 %v11262_v59  ;;  %v7179_v16 = vsel %vm2161_vm7, %v13255_v56, %v7176_v44  ;;  %v7315_v59 = vld [vmem:[#allocation3 + $0x51] ss:$2 sm:$0xf]  ;;  %v7251_v43 = vsel %vm2161_vm7, %v13135_v28, %v7248_v18  ;;  %v11281_v44 = vld [vmem:[%s13719_s3 + $0xc0] sm:$0xff]   ;;  %v7608_v21 = vrot.slane %v7603_v19, 4 }
 0x6d1   :  { %10809 = vmatprep.subr.bf16.mxu0 %v13809_v49  ;;  %10817 = vmatprep.subr.bf16.mxu1 %v13809_v49  ;;  %v7180_v39 = vpack.c.bf16 %v7179_v16, %v7178_v22  ;;  %v11276_v28 = vld [vmem:[%s13719_s3 + $0xb8] sm:$0xff]   ;;  %v7747_v45 = vld [vmem:[#allocation3 + $0x5d] ss:$2 sm:$0xf] }
 0x6d2   :  { %v7611_v36 = vsel %vm2161_vm7, %v13189_v62, %v7608_v21  ;;  %v7749_v62 = vrot.slane %v13255_v56, 4 }
 0x6d3   :  { %10798 = vmatmul.mubr.msk.bf16.vlgmr.msra.gmra.mxu0 %vm2202_vm8, %v6805_v2  ;;  %10806 = vmatmul.mubr.msk.bf16.vlgmr.msra.gmra.mxu1 %vm2202_vm8, %v6880_v46  ;;  %v11274_v2 = vld [vmem:[%s13719_s3 + $0x90] sm:$0xff]   ;;  %v7245_v46 = vrot.slane %v13138_v3, 4 }
 0x6d4   :  { %10810 = vmatpush3.bf16.msra.mxu0 %v11263_v48  ;;  %10818 = vmatpush3.bf16.msra.mxu1 %v11264_v54  ;;  %v7320_v48 = vrot.slane %v7315_v59, 4  ;;  %v11273_v54 = vld [vmem:[%s13719_s3 + $0x80] sm:$0xff]   ;;  %v7754_v56 = vsel %vm2161_vm7, %v13247_v4, %v7749_v62  ;;  %v11290_v4 = vld [vmem:[%s13720_s4 + $0x10] sm:$0xff]  }
 0x6d5   :  { %10811 = vmatprep.subr.bf16.mxu0 %v13809_v49  ;;  %10819 = vmatprep.subr.bf16.mxu1 %v13809_v49  ;;  %v11285_v59 = vld [vmem:[%s13719_s3 + $0xe0] sm:$0xff]  }
 0x6d6   :  { %10813 = vmatprep.mubr.msk.bf16.mxu0 %vm11365_vm0, %v13809_v49  ;;  %10821 = vmatprep.mubr.msk.bf16.mxu1 %vm11365_vm0, %v13809_v49  ;;  %v7323_v3 = vsel %vm2161_vm7, %v13133_v10, %v7320_v48  ;;  %v11291_v48 = vld [vmem:[%s13720_s4 + $0x28] sm:$0xff]  }
 0x6d8   :  { %10812 = vmatpush3.bf16.msra.mxu0 %v11265_v53  ;;  %10820 = vmatpush3.bf16.msra.mxu1 %v11266_v63  ;;  %v7387_v53 = vld [vmem:[#allocation3 + $0x52] ss:$2 sm:$0xf]  ;;  %v7250_v63 = vsel %vm2161_vm7, %v13127_v34, %v7245_v46  ;;  %v7461_v34 = vrot.slane %v13177_v38, 4 }
 0x6d9   :  { %10825 = vmatprep.subr.bf16.mxu0 %v13809_v49  ;;  %10833 = vmatprep.subr.bf16.mxu1 %v13809_v49  ;;  %v7252_v50 = vpack.c.bf16 %v7251_v43, %v7250_v63  ;;  %v7392_v13 = vrot.slane %v7387_v53, 4  ;;  %v11294_v46 = vld [vmem:[%s13720_s4] sm:$0xff]  }
 0x6db   :  { %10814 = vmatmul.mubr.msk.bf16.vlgmr.msra.gmra.mxu0 %vm2202_vm8, %v6955_v47  ;;  %10822 = vmatmul.mubr.msk.bf16.vlgmr.msra.gmra.mxu1 %vm2202_vm8, %v7030_v0  ;;  %v11280_v47 = vld [vmem:[%s13719_s3 + $0xd8] sm:$0xff]  }
 0x6dc   :  { %10826 = vmatpush3.bf16.msra.mxu0 %v11267_v25  ;;  %10834 = vmatpush3.bf16.msra.mxu1 %v11268_v14  ;;  %v7466_v25 = vsel %vm2161_vm7, %v13159_v41, %v7461_v34  ;;  %v11279_v14 = vld [vmem:[%s13719_s3 + $0xc8] sm:$0xff]   ;;  %v7605_v41 = vrot.slane %v13211_v60, 4 }
 0x6dd   :  { %10827 = vmatprep.subr.bf16.mxu0 %v13809_v49  ;;  %10835 = vmatprep.subr.bf16.mxu1 %v13809_v49 }
 0x6de   :  { %10829 = vmatprep.mubr.msk.bf16.mxu0 %vm11365_vm0, %v13809_v49  ;;  %10837 = vmatprep.mubr.msk.bf16.mxu1 %vm11365_vm0, %v13809_v49  ;;  %v7610_v60 = vsel %vm2161_vm7, %v13203_v40, %v7605_v41  ;;  %v7675_v40 = vld [vmem:[#allocation3 + $0x5c] ss:$2 sm:$0xf] }
 0x6df   :  { %v7612_v16 = vpack.c.bf16 %v7611_v36, %v7610_v60  ;;  %v7680_v22 = vrot.slane %v7675_v40, 4 }
 0x6e0   :  { %10828 = vmatpush3.bf16.msra.mxu0 %v11269_v33  ;;  %10836 = vmatpush3.bf16.msra.mxu1 %v11270_v8  ;;  %v11282_v33 = vld [vmem:[%s13719_s3 + $0xd0] sm:$0xff]  }
 0x6e1   :  { %10841 = vmatprep.subr.bf16.mxu0 %v13809_v49  ;;  %10849 = vmatprep.subr.bf16.mxu1 %v13809_v49  ;;  %v7317_v49 = vrot.slane %v13131_v30, 4  ;;  %v7459_v30 = vld [vmem:[#allocation3 + $0x53] ss:$2 sm:$0xf] }
 0x6e2   :  { %v7464_v52 = vrot.slane %v7459_v30, 4 }
 0x6e3   :  { %10830 = vmatmul.mubr.msk.bf16.vlgmr.msra.gmra.mxu0 %vm2202_vm8, %v7105_v32  ;;  %10838 = vmatmul.mubr.msk.bf16.vlgmr.msra.gmra.mxu1 %vm2202_vm8, %v7180_v39  ;;  %v7322_v27 = vsel %vm2161_vm7, %v13125_v6, %v7317_v49  ;;  %v7389_v6 = vrot.slane %v13175_v23, 4  ;;  %v7395_v23 = vsel %vm2161_vm7, %v13141_v20, %v7392_v13 }
 0x6e4   :  { %10842 = vmatpush3.bf16.msra.mxu0 %v11271_v1  ;;  %10850 = vmatpush3.bf16.msra.mxu1 %v11272_v24  ;;  %v7324_v10 = vpack.c.bf16 %v7323_v3, %v7322_v27  ;;  %v7467_v38 = vsel %vm2161_vm7, %v13143_v9, %v7464_v52  ;;  %v7531_v9 = vld [vmem:[#allocation3 + $0x5a] ss:$2 sm:$0xf]  ;;  %v7752_v1 = vrot.slane %v7747_v45, 4  ;;  %v7683_v24 = vsel %vm2161_vm7, %v13231_v15, %v7680_v22  ;;  %v11287_v15 = vld [vmem:[%s13720_s4 + $0x38] sm:$0xff]  }
 0x6e5   :  { %10843 = vmatprep.subr.bf16.mxu0 %v13295_v12  ;;  %10851 = vmatprep.subr.bf16.mxu1 %v13295_v12  ;;  %v7394_v42 = vsel %vm2161_vm7, %v13157_v11, %v7389_v6  ;;  %v7468_v0 = vpack.c.bf16 %v7467_v38, %v7466_v25  ;;  %v7533_v11 = vrot.slane %v13209_v17, 4  ;;  %v7536_v8 = vrot.slane %v7531_v9, 4 }
 0x6e6   :  { %10845 = vmatprep.mubr.msk.bf16.mxu0 %vm11365_vm0, %v13295_v12  ;;  %10853 = vmatprep.mubr.msk.bf16.mxu1 %vm11365_vm0, %v13295_v12  ;;  %v7396_v20 = vpack.c.bf16 %v7395_v23, %v7394_v42  ;;  %v7755_v32 = vsel %vm2161_vm7, %v13233_v35, %v7752_v1  ;;  %v11288_v35 = vld [vmem:[%s13720_s4 + $0x18] sm:$0xff]  }
 0x6e7   :  { %v7538_v17 = vsel %vm2161_vm7, %v13201_v7, %v7533_v11  ;;  %v7539_v5 = vsel %vm2161_vm7, %v13187_v37, %v7536_v8  ;;  %v7677_v37 = vrot.slane %v13253_v29, 4  ;;  %v7756_v18 = vpack.c.bf16 %v7755_v32, %v7754_v56 }
 0x6e8   :  { %10844 = vmatpush3.bf16.msra.mxu0 %v11273_v54  ;;  %10852 = vmatpush3.bf16.msra.mxu1 %v11274_v2  ;;  %v7540_v7 = vpack.c.bf16 %v7539_v5, %v7538_v17  ;;  %v11292_v54 = vld [vmem:[%s13720_s4 + $0x8] sm:$0xff]   ;;  %v11293_v2 = vld [vmem:[%s13720_s4 + $0x20] sm:$0xff]  }
 0x6e9   :  { %10857 = vmatprep.subr.bf16.mxu0 %v13295_v12  ;;  %10865 = vmatprep.subr.bf16.mxu1 %v13295_v12  ;;  %v7682_v29 = vsel %vm2161_vm7, %v13245_v55, %v7677_v37  ;;  %v11289_v55 = vld [vmem:[%s13720_s4 + $0x30] sm:$0xff]  }
 0x6ea   :  { %v7684_v39 = vpack.c.bf16 %v7683_v24, %v7682_v29 }
 0x6eb   :  { %10846 = vmatmul.mubr.msk.bf16.vlgmr.msra.gmra.mxu0 %vm2202_vm8, %v7252_v50  ;;  %10854 = vmatmul.mubr.msk.bf16.vlgmr.msra.gmra.mxu1 %vm2202_vm8, %v7324_v10 }
 0x6ec   :  { %10858 = vmatpush3.bf16.msra.mxu0 %v11275_v57  ;;  %10866 = vmatpush3.bf16.msra.mxu1 %v11276_v28 }
 0x6ed   :  { %10859 = vmatprep.subr.bf16.mxu0 %v13295_v12  ;;  %10867 = vmatprep.subr.bf16.mxu1 %v13295_v12 }
 0x6ee   :  { %10861 = vmatprep.mubr.msk.bf16.mxu0 %vm11365_vm0, %v13295_v12  ;;  %10869 = vmatprep.mubr.msk.bf16.mxu1 %vm11365_vm0, %v13295_v12 }
 0x6f0   :  { %10860 = vmatpush3.bf16.msra.mxu0 %v11277_v58  ;;  %10868 = vmatpush3.bf16.msra.mxu1 %v11278_v26 }
 0x6f1   :  { %10873 = vmatprep.subr.bf16.mxu0 %v13295_v12  ;;  %10881 = vmatprep.subr.bf16.mxu1 %v13295_v12 }
 0x6f3   :  { %10862 = vmatmul.mubr.msk.bf16.vlgmr.msra.gmra.mxu0 %vm2202_vm8, %v7396_v20  ;;  %10870 = vmatmul.mubr.msk.bf16.vlgmr.msra.gmra.mxu1 %vm2202_vm8, %v7468_v0 }
 0x6f4   :  { %10874 = vmatpush3.bf16.msra.mxu0 %v11279_v14  ;;  %10882 = vmatpush3.bf16.msra.mxu1 %v11280_v47 }
 0x6f5   :  { %10875 = vmatprep.subr.bf16.mxu0 %v13295_v12  ;;  %10883 = vmatprep.subr.bf16.mxu1 %v13295_v12 }
 0x6f6   :  { %10877 = vmatprep.mubr.msk.bf16.mxu0 %vm11365_vm0, %v13295_v12  ;;  %10885 = vmatprep.mubr.msk.bf16.mxu1 %vm11365_vm0, %v13295_v12 }
 0x6f8   :  { %10876 = vmatpush3.bf16.msra.mxu0 %v11281_v44  ;;  %10884 = vmatpush3.bf16.msra.mxu1 %v11282_v33 }
 0x6f9   :  { %10889 = vmatprep.subr.bf16.mxu0 %v13295_v12  ;;  %10897 = vmatprep.subr.bf16.mxu1 %v13295_v12 }
 0x6fb   :  { %10878 = vmatmul.mubr.msk.bf16.vlgmr.msra.gmra.mxu0 %vm2202_vm8, %v7540_v7  ;;  %10886 = vmatmul.mubr.msk.bf16.vlgmr.msra.gmra.mxu1 %vm2202_vm8, %v7612_v16 }
 0x6fc   :  { %10890 = vmatpush3.bf16.msra.mxu0 %v11283_v51  ;;  %10898 = vmatpush3.bf16.msra.mxu1 %v11284_v31 }
 0x6fd   :  { %10891 = vmatprep.subr.bf16.mxu0 %v13295_v12  ;;  %10899 = vmatprep.subr.bf16.mxu1 %v13295_v12 }
 0x6fe   :  { %10893 = vmatprep.mubr.msk.bf16.mxu0 %vm11365_vm0, %v13295_v12  ;;  %10901 = vmatprep.mubr.msk.bf16.mxu1 %vm11365_vm0, %v13295_v12 }
 0x700   :  { %10892 = vmatpush3.bf16.msra.mxu0 %v11285_v59  ;;  %10900 = vmatpush3.bf16.msra.mxu1 %v11286_v61 }
 0x701   :  { %10905 = vmatprep.subr.bf16.mxu0 %v13295_v12  ;;  %10917 = vmatprep.subr.bf16.mxu1 %v13295_v12 }
 0x703   :  { %10894 = vmatmul.mubr.msk.bf16.vlgmr.msra.gmra.mxu0 %vm2202_vm8, %v7684_v39  ;;  %10902 = vmatmul.mubr.msk.bf16.vlgmr.msra.gmra.mxu1 %vm2202_vm8, %v7756_v18 }
 0x704   :  { %10913 = vmatprep.mubr.msk.bf16.mxu0 %vm11365_vm0, %v13295_v12  ;;  %10925 = vmatprep.mubr.msk.bf16.mxu1 %vm11365_vm0, %v13295_v12 }
 0x705   :  { %10906 = vmatpush3.bf16.msra.mxu0 %v11287_v15  ;;  %10918 = vmatpush3.bf16.msra.mxu1 %v11288_v35 }
 0x706   :  { %10907 = vmatprep.subr.bf16.mxu0 %v13295_v12  ;;  %10919 = vmatprep.subr.bf16.mxu1 %v13295_v12 }
 0x709   :  { %10908 = vmatpush3.bf16.msra.mxu0 %v11289_v55  ;;  %10920 = vmatpush3.bf16.msra.mxu1 %v11290_v4 }
 0x70a   :  { %10909 = vmatprep.subr.bf16.mxu0 %v13295_v12  ;;  %10921 = vmatprep.subr.bf16.mxu1 %v13295_v12 }
 0x70d   :  { %10910 = vmatpush3.bf16.msra.mxu0 %v11291_v48  ;;  %10922 = vmatpush3.bf16.msra.mxu1 %v11292_v54 }
 0x70e   :  { %10911 = vmatprep.subr.bf16.mxu0 %v13295_v12  ;;  %10923 = vmatprep.subr.bf16.mxu1 %v13295_v12 }
 0x711   :  { %10912 = vmatpush3.bf16.msra.mxu0 %v11293_v2  ;;  %10924 = vmatpush3.bf16.msra.mxu1 %v11294_v46 }
 0x712   :  { %10929 = vmatprep.subr.bf16.mxu0 %v13295_v12  ;;  %10941 = vmatprep.subr.bf16.mxu1 %v13295_v12 }
 0x78b   :  { %v6730_v49 = vpop.f32.mrf.mxu0  ;;  %v6786_v43 = vpop.f32.mrf.mxu1 }
 0x78c   :  { %v6787_v25 = vadd.f32 %v6786_v43, %v6730_v49 }
 0x78d   :  { %v10783_v3 = vpop.f32.mrf.mxu0  ;;  %v10791_v53 = vpop.f32.mrf.mxu1 }
 0x78f   :  { %v6733_v30 = vpop.f32.mrf.mxu0  ;;  %v6789_v63 = vpop.f32.mrf.mxu1 }
 0x790   :  { %v6790_v19 = vadd.f32 %v6789_v63, %v6733_v30 }
 0x791   :  { %v10784_v27 = vpop.f32.mrf.mxu0  ;;  %v10792_v57 = vpop.f32.mrf.mxu1 }
 0x793   :  { %v6859_v28 = vpop.f32.mrf.mxu0  ;;  %v6934_v50 = vpop.f32.mrf.mxu1 }
 0x794   :  { %v6866_v20 = vadd.f32 %v6859_v28, %v6787_v25 }
 0x795   :  { %v10799_v10 = vpop.f32.mrf.mxu0  ;;  %v10807_v13 = vpop.f32.mrf.mxu1 }
 0x796   :  { %v6941_v44 = vadd.f32 %v6934_v50, %v6866_v20 }
 0x797   :  { %v6862_v52 = vpop.f32.mrf.mxu0  ;;  %v6937_v6 = vpop.f32.mrf.mxu1 }
 0x798   :  { %v6867_v33 = vadd.f32 %v6862_v52, %v6790_v19 }
 0x799   :  { %v10800_v34 = vpop.f32.mrf.mxu0  ;;  %v10808_v58 = vpop.f32.mrf.mxu1 }
 0x79a   :  { %v6942_v36 = vadd.f32 %v6937_v6, %v6867_v33 }
 0x79b   :  { %v7009_v26 = vpop.f32.mrf.mxu0  ;;  %v7084_v23 = vpop.f32.mrf.mxu1 }
 0x79c   :  { %v7016_v17 = vadd.f32 %v7009_v26, %v6941_v44 }
 0x79d   :  { %v10815_v38 = vpop.f32.mrf.mxu0  ;;  %v10823_v42 = vpop.f32.mrf.mxu1 }
 0x79e   :  { %v7091_v7 = vadd.f32 %v7084_v23, %v7016_v17 }
 0x79f   :  { %v7012_v14 = vpop.f32.mrf.mxu0  ;;  %v7087_v47 = vpop.f32.mrf.mxu1 }
 0x7a0   :  { %v7017_v16 = vadd.f32 %v7012_v14, %v6942_v36 }
 0x7a1   :  { %v10816_v0 = vpop.f32.mrf.mxu0  ;;  %v10824_v9 = vpop.f32.mrf.mxu1 }
 0x7a2   :  { %v7092_v61 = vadd.f32 %v7087_v47, %v7017_v16 }
 0x7a3   :  { %v7159_v11 = vpop.f32.mrf.mxu0  ;;  %v7234_v41 = vpop.f32.mrf.mxu1 }
 0x7a4   :  { %v7166_v37 = vadd.f32 %v7159_v11, %v7091_v7 }
 0x7a5   :  { %v10831_v8 = vpop.f32.mrf.mxu0  ;;  %v10839_v21 = vpop.f32.mrf.mxu1 }
 0x7a6   :  { %v7241_v29 = vadd.f32 %v7234_v41, %v7166_v37  ;;  %v11299_v37 = vld [vmem:[%s13720_s4 + $0x48] sm:$0xff]  }
 0x7a7   :  { %v7162_v60 = vpop.f32.mrf.mxu0  ;;  %v7237_v5 = vpop.f32.mrf.mxu1 }
 0x7a8   :  { %v7167_v56 = vadd.f32 %v7162_v60, %v7092_v61  ;;  %v11302_v61 = vld [vmem:[%s13720_s4 + $0x60] sm:$0xff]  }
 0x7a9   :  { %v10832_v51 = vpop.f32.mrf.mxu0  ;;  %v10840_v31 = vpop.f32.mrf.mxu1 }
 0x7aa   :  { %v7242_v35 = vadd.f32 %v7237_v5, %v7167_v56  ;;  %v11295_v5 = vld [vmem:[%s13720_s4 + $0x58] sm:$0xff]  }
 0x7ab   :  { %v7306_v40 = vpop.f32.mrf.mxu0  ;;  %v7378_v45 = vpop.f32.mrf.mxu1  ;;  %v11296_v31 = vld [vmem:[%s13720_s4 + $0x78] sm:$0xff]  }
 0x7ac   :  { %v7313_v39 = vadd.f32 %v7306_v40, %v7241_v29  ;;  %v11297_v40 = vld [vmem:[%s13720_s4 + $0x50] sm:$0xff]   ;;  %v11303_v29 = vld [vmem:[%s13720_s4 + $0x98] sm:$0xff]  }
 0x7ad   :  { %v10847_v62 = vpop.f32.mrf.mxu0  ;;  %v10855_v59 = vpop.f32.mrf.mxu1  ;;  %v11304_v56 = vld [vmem:[%s13720_s4 + $0xb8] sm:$0xff]  }
 0x7ae   :  { %v7385_v48 = vadd.f32 %v7378_v45, %v7313_v39  ;;  %v11298_v45 = vld [vmem:[%s13720_s4 + $0x70] sm:$0xff]   ;;  %v11300_v62 = vld [vmem:[%s13720_s4 + $0x68] sm:$0xff]   ;;  %v11301_v59 = vld [vmem:[%s13720_s4 + $0x40] sm:$0xff]  }
 0x7af   :  { %v7309_v22 = vpop.f32.mrf.mxu0  ;;  %v7381_v1 = vpop.f32.mrf.mxu1  ;;  %v11305_v39 = vld [vmem:[%s13720_s4 + $0x90] sm:$0xff]  }
 0x7b0   :  { %v7314_v54 = vadd.f32 %v7309_v22, %v7242_v35  ;;  %v11308_v35 = vld [vmem:[%s13720_s4 + $0xa8] sm:$0xff]  }
 0x7b1   :  { %v10848_v24 = vpop.f32.mrf.mxu0  ;;  %v10856_v32 = vpop.f32.mrf.mxu1 }
 0x7b2   :  { %v7386_v53 = vadd.f32 %v7381_v1, %v7314_v54 }
 0x7b3   :  { %v7450_v18 = vpop.f32.mrf.mxu0  ;;  %v7522_v15 = vpop.f32.mrf.mxu1 }
 0x7b4   :  { %v7457_v49 = vadd.f32 %v7450_v18, %v7385_v48  ;;  %v11306_v18 = vld [vmem:[%s13720_s4 + $0xb0] sm:$0xff]  }
 0x7b5   :  { %v10863_v55 = vpop.f32.mrf.mxu0  ;;  %v10871_v4 = vpop.f32.mrf.mxu1 }
 0x7b6   :  { %v7529_v27 = vadd.f32 %v7522_v15, %v7457_v49  ;;  %v11307_v15 = vld [vmem:[%s13720_s4 + $0x88] sm:$0xff]   ;;  %v11309_v55 = vld [vmem:[%s13720_s4 + $0x80] sm:$0xff]  }
 0x7b7   :  { %v7453_v2 = vpop.f32.mrf.mxu0  ;;  %v7525_v46 = vpop.f32.mrf.mxu1  ;;  %v11310_v4 = vld [vmem:[%s13720_s4 + $0xa0] sm:$0xff]  }
 0x7b8   :  { %v7458_v57 = vadd.f32 %v7453_v2, %v7386_v53  ;;  %v11311_v2 = vld [vmem:[%s13720_s4 + $0xd8] sm:$0xff]   ;;  %v11314_v53 = vld [vmem:[%s13720_s4 + $0xf0] sm:$0xff]  }
 0x7b9   :  { %v10864_v43 = vpop.f32.mrf.mxu0  ;;  %v10872_v3 = vpop.f32.mrf.mxu1 }
 0x7ba   :  { %v7530_v6 = vadd.f32 %v7525_v46, %v7458_v57  ;;  %v11312_v46 = vld [vmem:[%s13720_s4 + $0xf8] sm:$0xff]   ;;  %v11313_v3 = vld [vmem:[%s13720_s4 + $0xd0] sm:$0xff]   ;;  %v11318_v57 = vld [vmem:[%s13720_s4 + $0xe0] sm:$0xff]  }
 0x7bb   :  { %v7594_v30 = vpop.f32.mrf.mxu0  ;;  %v7666_v63 = vpop.f32.mrf.mxu1 }
 0x7bc   :  { %v7601_v10 = vadd.f32 %v7594_v30, %v7529_v27  ;;  %v11315_v30 = vld [vmem:[%s13720_s4 + $0xc8] sm:$0xff]   ;;  %v11317_v27 = vld [vmem:[%s13720_s4 + $0xc0] sm:$0xff]  }
 0x7bd   :  { %v10879_v28 = vpop.f32.mrf.mxu0  ;;  %v10887_v50 = vpop.f32.mrf.mxu1 }
 0x7be   :  { %v7673_v26 = vadd.f32 %v7666_v63, %v7601_v10  ;;  %v11316_v63 = vld [vmem:[%s13720_s4 + $0xe8] sm:$0xff]   ;;  %v11319_v10 = vld [vmem:[%s13720_s4 + $0x118] sm:$0xff]  }
 0x7bf   :  { %v7597_v13 = vpop.f32.mrf.mxu0  ;;  %v7669_v52 = vpop.f32.mrf.mxu1 }
 0x7c0   :  { %v7602_v23 = vadd.f32 %v7597_v13, %v7530_v6  ;;  %v11320_v13 = vld [vmem:[%s13720_s4 + $0x138] sm:$0xff]  }
 0x7c1   :  { %v10880_v34 = vpop.f32.mrf.mxu0  ;;  %v10888_v58 = vpop.f32.mrf.mxu1 }
 0x7c2   :  { %v7674_v20 = vadd.f32 %v7669_v52, %v7602_v23  ;;  %v11321_v34 = vld [vmem:[%s13720_s4 + $0x110] sm:$0xff]   ;;  %v11324_v23 = vld [vmem:[%s13720_s4 + $0x128] sm:$0xff]  }
 0x7c3   :  { %v7738_v38 = vpop.f32.mrf.mxu0  ;;  %v7810_v42 = vpop.f32.mrf.mxu1  ;;  %v11322_v58 = vld [vmem:[%s13720_s4 + $0x130] sm:$0xff]  }
 0x7c4   :  { %v7745_v25 = vadd.f32 %v7738_v38, %v7673_v26  ;;  %v11323_v26 = vld [vmem:[%s13720_s4 + $0x108] sm:$0xff]   ;;  %v11325_v38 = vld [vmem:[%s13720_s4 + $0x100] sm:$0xff]  }
 0x7c5   :  { %v10895_v14 = vpop.f32.mrf.mxu0  ;;  %v10903_v47 = vpop.f32.mrf.mxu1 }
 0x7c6   :  { %v7817_v0 = vadd.f32 %v7810_v42, %v7745_v25  ;;  %v11326_v42 = vld [vmem:[%s13720_s4 + $0x120] sm:$0xff]   ;;  %v11327_v47 = vld [vmem:[%s13720_s4 + $0x158] sm:$0xff]  }
 0x7c7   :  { %v7741_v9 = vpop.f32.mrf.mxu0  ;;  %v7813_v19 = vpop.f32.mrf.mxu1 }
 0x7c8   :  { %vm7819_vm7 = vcmp.gt.f32.partialorder %v7817_v0, 0.0  ;;  %v7821_v11 = vmul.f32 0.2, %v7817_v0  ;;  %v7746_v41 = vadd.f32 %v7741_v9, %v7674_v20  ;;  %v11328_v20 = vld [vmem:[%s13720_s4 + $0x178] sm:$0xff]  }
 0x7c9   :  { %v10896_v44 = vpop.f32.mrf.mxu0  ;;  %v10904_v33 = vpop.f32.mrf.mxu1 }
 0x7ca   :  { %v7823_v8 = vsel %vm7819_vm7, %v7817_v0, %v7821_v11  ;;  %v7818_v21 = vadd.f32 %v7813_v19, %v7746_v41  ;;  %v11329_v19 = vld [vmem:[%s13720_s4 + $0x150] sm:$0xff]   ;;  %v11331_v41 = vld [vmem:[%s13720_s4 + $0x148] sm:$0xff]   ;;  %v11333_v33 = vld [vmem:[%s13720_s4 + $0x140] sm:$0xff]  }
 0x7cb   :  { %7825 = vst [vmem:[#allocation4] sm:$0xff] %v7823_v8   ;;  %v11330_v11 = vld [vmem:[%s13720_s4 + $0x170] sm:$0xff]   ;;  %v11332_v44 = vld [vmem:[%s13720_s4 + $0x168] sm:$0xff]   ;;  %v11334_v8 = vld [vmem:[%s13720_s4 + $0x160] sm:$0xff]  }
 0x7cc   :  { %vm7820_vm8 = vcmp.gt.f32.partialorder %v7818_v21, 0.0  ;;  %v7822_v17 = vmul.f32 0.2, %v7818_v21 }
 0x7ce   :  { %v7824_v60 = vsel %vm7820_vm8, %v7818_v21, %v7822_v17 }
 0x7cf   :  { %7827 = vst [vmem:[#allocation4 + $0x8] sm:$0xff] %v7824_v60   ;;  %v11335_v60 = vld [vmem:[%s13720_s4 + $0x198] sm:$0xff]  }
 0x7d2   :  { %v7839_v36 = vld [vmem:[#allocation4 + $0x1] sm:$0x1]  ;;  %v7829_v51 = vld [vmem:[#allocation4] sm:$0x1]  ;;  %v7983_v22 = vld [vmem:[#allocation4 + $0x2] sm:$0x1] }
 0x7d3   :  { %v7840_v7 = vpack.c.bf16 %v7839_v36, %v7839_v36  ;;  %v7830_v16 = vpack.c.bf16 %v7829_v51, %v7829_v51  ;;  %v8061_v1 = vld [vmem:[#allocation4 + $0x3] sm:$0x1]  ;;  %v7984_v24 = vpack.c.bf16 %v7983_v22, %v7983_v22  ;;  %v8139_v48 = vld [vmem:[#allocation4 + $0x4] sm:$0x1]  ;;  %v8217_v54 = vld [vmem:[#allocation4 + $0x5] sm:$0x1] }
 0x7d4   :  { %v8062_v32 = vpack.c.bf16 %v8061_v1, %v8061_v1  ;;  %v8140_v49 = vpack.c.bf16 %v8139_v48, %v8139_v48  ;;  %v8218_v43 = vpack.c.bf16 %v8217_v54, %v8217_v54  ;;  %v8295_v28 = vld [vmem:[#allocation4 + $0x6] sm:$0x1]  ;;  %v8373_v50 = vld [vmem:[#allocation4 + $0x7] sm:$0x1]  ;;  %v11344_v22 = vld [vmem:[%s13720_s4 + $0x1f8] sm:$0xff]  }
 0x7d5   :  { %10914 = vmatmul.mubr.msk.bf16.vlgmr.msra.gmra.mxu0 %vm3415_vm11, %v7840_v7  ;;  %10926 = vmatmul.mubr.msk.bf16.vlgmr.msra.gmra.mxu1 %vm3415_vm11, %v7830_v16  ;;  %v8296_v52 = vpack.c.bf16 %v8295_v28, %v8295_v28  ;;  %v8374_v6 = vpack.c.bf16 %v8373_v50, %v8373_v50  ;;  %v11338_v7 = vld [vmem:[%s13720_s4 + $0x1b0] sm:$0xff]   ;;  %v11339_v16 = vld [vmem:[%s13720_s4 + $0x188] sm:$0xff]  }
 0x7d6   :  { %10930 = vmatpush3.bf16.msra.mxu0 %v11295_v5  ;;  %10942 = vmatpush3.bf16.msra.mxu1 %v11296_v31  ;;  %v8451_v25 = vld [vmem:[#allocation4 + $0x8] sm:$0x1]  ;;  %v8529_v14 = vld [vmem:[#allocation4 + $0x9] sm:$0x1]  ;;  %v8607_v21 = vld [vmem:[#allocation4 + $0xa] sm:$0x1] }
 0x7d7   :  { %10931 = vmatprep.subr.bf16.mxu0 %v13295_v12  ;;  %10943 = vmatprep.subr.bf16.mxu1 %v13295_v12  ;;  %v8452_v0 = vpack.c.bf16 %v8451_v25, %v8451_v25  ;;  %v8530_v9 = vpack.c.bf16 %v8529_v14, %v8529_v14  ;;  %v8685_v17 = vld [vmem:[#allocation4 + $0xb] sm:$0x1]  ;;  %v8608_v36 = vpack.c.bf16 %v8607_v21, %v8607_v21  ;;  %v11337_v31 = vld [vmem:[%s13720_s4 + $0x190] sm:$0xff]  }
 0x7d8   :  { %10937 = vmatprep.mubr.msk.bf16.mxu0 %vm11365_vm0, %v13295_v12  ;;  %10949 = vmatprep.mubr.msk.bf16.mxu1 %vm11365_vm0, %v13295_v12  ;;  %v11336_v5 = vld [vmem:[%s13720_s4 + $0x1b8] sm:$0xff]   ;;  %v8686_v51 = vpack.c.bf16 %v8685_v17, %v8685_v17 }
 0x7da   :  { %10932 = vmatpush3.bf16.msra.mxu0 %v11297_v40  ;;  %10944 = vmatpush3.bf16.msra.mxu1 %v11298_v45  ;;  %v11340_v40 = vld [vmem:[%s13720_s4 + $0x1a8] sm:$0xff]   ;;  %v11341_v45 = vld [vmem:[%s13720_s4 + $0x180] sm:$0xff]  }
 0x7db   :  { %10933 = vmatprep.subr.bf16.mxu0 %v13295_v12  ;;  %10945 = vmatprep.subr.bf16.mxu1 %v13295_v12 }
 0x7de   :  { %10934 = vmatpush3.bf16.msra.mxu0 %v11299_v37  ;;  %10946 = vmatpush3.bf16.msra.mxu1 %v11300_v62  ;;  %v11342_v37 = vld [vmem:[%s13720_s4 + $0x1a0] sm:$0xff]   ;;  %v8763_v62 = vld [vmem:[#allocation4 + $0xc] sm:$0x1] }
 0x7df   :  { %10935 = vmatprep.subr.bf16.mxu0 %v13295_v12  ;;  %10947 = vmatprep.subr.bf16.mxu1 %v13295_v12  ;;  %v8764_v1 = vpack.c.bf16 %v8763_v62, %v8763_v62 }
 0x7e2   :  { %10936 = vmatpush3.bf16.msra.mxu0 %v11301_v59  ;;  %10948 = vmatpush3.bf16.msra.mxu1 %v11302_v61  ;;  %v8841_v59 = vld [vmem:[#allocation4 + $0xd] sm:$0x1] }
 0x7e3   :  { %10953 = vmatprep.subr.bf16.mxu0 %v13295_v12  ;;  %10965 = vmatprep.subr.bf16.mxu1 %v13295_v12  ;;  %v11343_v61 = vld [vmem:[%s13720_s4 + $0x1d8] sm:$0xff]  }
 0x7e5   :  { %10938 = vmatmul.mubr.msk.bf16.vlgmr.msra.gmra.mxu0 %vm3415_vm11, %v7984_v24  ;;  %10950 = vmatmul.mubr.msk.bf16.vlgmr.msra.gmra.mxu1 %vm3415_vm11, %v8062_v32  ;;  %v11346_v24 = vld [vmem:[%s13720_s4 + $0x1f0] sm:$0xff]   ;;  %v11347_v32 = vld [vmem:[%s13720_s4 + $0x1c8] sm:$0xff]  }
 0x7e6   :  { %10954 = vmatpush3.bf16.msra.mxu0 %v11303_v29  ;;  %10966 = vmatpush3.bf16.msra.mxu1 %v11304_v56  ;;  %v8842_v29 = vpack.c.bf16 %v8841_v59, %v8841_v59  ;;  %v11345_v56 = vld [vmem:[%s13720_s4 + $0x1d0] sm:$0xff]  }
 0x7e7   :  { %10955 = vmatprep.subr.bf16.mxu0 %v13295_v12  ;;  %10967 = vmatprep.subr.bf16.mxu1 %v13295_v12 }
 0x7e8   :  { %10961 = vmatprep.mubr.msk.bf16.mxu0 %vm11365_vm0, %v13295_v12  ;;  %10973 = vmatprep.mubr.msk.bf16.mxu1 %vm11365_vm0, %v13295_v12 }
 0x7ea   :  { %10956 = vmatpush3.bf16.msra.mxu0 %v11305_v39  ;;  %10968 = vmatpush3.bf16.msra.mxu1 %v11306_v18  ;;  %v11348_v39 = vld [vmem:[%s13720_s4 + $0x1e8] sm:$0xff]   ;;  %v11349_v18 = vld [vmem:[%s13720_s4 + $0x1c0] sm:$0xff]  }
 0x7eb   :  { %10957 = vmatprep.subr.bf16.mxu0 %v13295_v12  ;;  %10969 = vmatprep.subr.bf16.mxu1 %v13295_v12 }
 0x7ee   :  { %10958 = vmatpush3.bf16.msra.mxu0 %v11307_v15  ;;  %10970 = vmatpush3.bf16.msra.mxu1 %v11308_v35  ;;  %v11350_v15 = vld [vmem:[%s13720_s4 + $0x1e0] sm:$0xff]   ;;  %v8919_v35 = vld [vmem:[#allocation4 + $0xe] sm:$0x1] }
 0x7ef   :  { %10959 = vmatprep.subr.bf16.mxu0 %v13295_v12  ;;  %10971 = vmatprep.subr.bf16.mxu1 %v13295_v12 }
 0x7f2   :  { %10960 = vmatpush3.bf16.msra.mxu0 %v11309_v55  ;;  %10972 = vmatpush3.bf16.msra.mxu1 %v11310_v4  ;;  %v8997_v55 = vld [vmem:[#allocation4 + $0xf] sm:$0x1]  ;;  %v8920_v4 = vpack.c.bf16 %v8919_v35, %v8919_v35 }
 0x7f3   :  { %10977 = vmatprep.subr.bf16.mxu0 %v13295_v12  ;;  %10989 = vmatprep.subr.bf16.mxu1 %v13295_v12  ;;  %v8998_v48 = vpack.c.bf16 %v8997_v55, %v8997_v55 }
 0x7f5   :  { %10962 = vmatmul.mubr.msk.bf16.vlgmr.msra.gmra.mxu0 %vm3415_vm11, %v8140_v49  ;;  %10974 = vmatmul.mubr.msk.bf16.vlgmr.msra.gmra.mxu1 %vm3415_vm11, %v8218_v43 }
 0x7f6   :  { %10978 = vmatpush3.bf16.msra.mxu0 %v11311_v2  ;;  %10990 = vmatpush3.bf16.msra.mxu1 %v11312_v46 }
 0x7f7   :  { %10979 = vmatprep.subr.bf16.mxu0 %v13295_v12  ;;  %10991 = vmatprep.subr.bf16.mxu1 %v13295_v12 }
 0x7f8   :  { %10985 = vmatprep.mubr.msk.bf16.mxu0 %vm11365_vm0, %v13295_v12  ;;  %10997 = vmatprep.mubr.msk.bf16.mxu1 %vm11365_vm0, %v13295_v12 }
 0x7fa   :  { %10980 = vmatpush3.bf16.msra.mxu0 %v11313_v3  ;;  %10992 = vmatpush3.bf16.msra.mxu1 %v11314_v53 }
 0x7fb   :  { %10981 = vmatprep.subr.bf16.mxu0 %v13295_v12  ;;  %10993 = vmatprep.subr.bf16.mxu1 %v13295_v12 }
 0x7fe   :  { %10982 = vmatpush3.bf16.msra.mxu0 %v11315_v30  ;;  %10994 = vmatpush3.bf16.msra.mxu1 %v11316_v63 }
 0x7ff   :  { %10983 = vmatprep.subr.bf16.mxu0 %v13295_v12  ;;  %10995 = vmatprep.subr.bf16.mxu1 %v13295_v12 }
 0x802   :  { %10984 = vmatpush3.bf16.msra.mxu0 %v11317_v27  ;;  %10996 = vmatpush3.bf16.msra.mxu1 %v11318_v57 }
 0x803   :  { %11001 = vmatprep.subr.bf16.mxu0 %v13295_v12  ;;  %11013 = vmatprep.subr.bf16.mxu1 %v13295_v12 }
 0x805   :  { %10986 = vmatmul.mubr.msk.bf16.vlgmr.msra.gmra.mxu0 %vm3415_vm11, %v8296_v52  ;;  %10998 = vmatmul.mubr.msk.bf16.vlgmr.msra.gmra.mxu1 %vm3415_vm11, %v8374_v6 }
 0x806   :  { %11002 = vmatpush3.bf16.msra.mxu0 %v11319_v10  ;;  %11014 = vmatpush3.bf16.msra.mxu1 %v11320_v13 }
 0x807   :  { %11003 = vmatprep.subr.bf16.mxu0 %v13295_v12  ;;  %11015 = vmatprep.subr.bf16.mxu1 %v13295_v12 }
 0x808   :  { %11009 = vmatprep.mubr.msk.bf16.mxu0 %vm11365_vm0, %v13295_v12  ;;  %11021 = vmatprep.mubr.msk.bf16.mxu1 %vm11365_vm0, %v13295_v12 }
 0x80a   :  { %11004 = vmatpush3.bf16.msra.mxu0 %v11321_v34  ;;  %11016 = vmatpush3.bf16.msra.mxu1 %v11322_v58 }
 0x80b   :  { %11005 = vmatprep.subr.bf16.mxu0 %v13295_v12  ;;  %11017 = vmatprep.subr.bf16.mxu1 %v13295_v12 }
 0x80e   :  { %11006 = vmatpush3.bf16.msra.mxu0 %v11323_v26  ;;  %11018 = vmatpush3.bf16.msra.mxu1 %v11324_v23 }
 0x80f   :  { %11007 = vmatprep.subr.bf16.mxu0 %v13295_v12  ;;  %11019 = vmatprep.subr.bf16.mxu1 %v13295_v12 }
 0x812   :  { %11008 = vmatpush3.bf16.msra.mxu0 %v11325_v38  ;;  %11020 = vmatpush3.bf16.msra.mxu1 %v11326_v42 }
 0x813   :  { %11025 = vmatprep.subr.bf16.mxu0 %v13295_v12  ;;  %11037 = vmatprep.subr.bf16.mxu1 %v13295_v12 }
 0x815   :  { %11010 = vmatmul.mubr.msk.bf16.vlgmr.msra.gmra.mxu0 %vm3415_vm11, %v8452_v0  ;;  %11022 = vmatmul.mubr.msk.bf16.vlgmr.msra.gmra.mxu1 %vm3415_vm11, %v8530_v9 }
 0x816   :  { %11026 = vmatpush3.bf16.msra.mxu0 %v11327_v47  ;;  %11038 = vmatpush3.bf16.msra.mxu1 %v11328_v20 }
 0x817   :  { %11027 = vmatprep.subr.bf16.mxu0 %v13295_v12  ;;  %11039 = vmatprep.subr.bf16.mxu1 %v13295_v12 }
 0x818   :  { %11033 = vmatprep.mubr.msk.bf16.mxu0 %vm11365_vm0, %v13295_v12  ;;  %11045 = vmatprep.mubr.msk.bf16.mxu1 %vm11365_vm0, %v13295_v12 }
 0x81a   :  { %11028 = vmatpush3.bf16.msra.mxu0 %v11329_v19  ;;  %11040 = vmatpush3.bf16.msra.mxu1 %v11330_v11 }
 0x81b   :  { %11029 = vmatprep.subr.bf16.mxu0 %v13295_v12  ;;  %11041 = vmatprep.subr.bf16.mxu1 %v13295_v12 }
 0x81e   :  { %11030 = vmatpush3.bf16.msra.mxu0 %v11331_v41  ;;  %11042 = vmatpush3.bf16.msra.mxu1 %v11332_v44 }
 0x81f   :  { %11031 = vmatprep.subr.bf16.mxu0 %v13295_v12  ;;  %11043 = vmatprep.subr.bf16.mxu1 %v13295_v12 }
 0x822   :  { %11032 = vmatpush3.bf16.msra.mxu0 %v11333_v33  ;;  %11044 = vmatpush3.bf16.msra.mxu1 %v11334_v8 }
 0x823   :  { %11049 = vmatprep.subr.bf16.mxu0 %v13295_v12  ;;  %11061 = vmatprep.subr.bf16.mxu1 %v13295_v12 }
 0x825   :  { %11034 = vmatmul.mubr.msk.bf16.vlgmr.msra.gmra.mxu0 %vm3415_vm11, %v8608_v36  ;;  %11046 = vmatmul.mubr.msk.bf16.vlgmr.msra.gmra.mxu1 %vm3415_vm11, %v8686_v51 }
 0x826   :  { %11050 = vmatpush3.bf16.msra.mxu0 %v11335_v60  ;;  %11062 = vmatpush3.bf16.msra.mxu1 %v11336_v5 }
 0x827   :  { %11051 = vmatprep.subr.bf16.mxu0 %v13295_v12  ;;  %11063 = vmatprep.subr.bf16.mxu1 %v13295_v12 }
 0x828   :  { %11057 = vmatprep.mubr.msk.bf16.mxu0 %vm11365_vm0, %v13295_v12  ;;  %11069 = vmatprep.mubr.msk.bf16.mxu1 %vm11365_vm0, %v13295_v12 }
 0x82a   :  { %11052 = vmatpush3.bf16.msra.mxu0 %v11337_v31  ;;  %11064 = vmatpush3.bf16.msra.mxu1 %v11338_v7 }
 0x82b   :  { %11053 = vmatprep.subr.bf16.mxu0 %v13295_v12  ;;  %11065 = vmatprep.subr.bf16.mxu1 %v13295_v12 }
 0x82e   :  { %11054 = vmatpush3.bf16.msra.mxu0 %v11339_v16  ;;  %11066 = vmatpush3.bf16.msra.mxu1 %v11340_v40 }
 0x82f   :  { %11055 = vmatprep.subr.bf16.mxu0 %v13295_v12  ;;  %11067 = vmatprep.subr.bf16.mxu1 %v13295_v12 }
 0x832   :  { %11056 = vmatpush3.bf16.msra.mxu0 %v11341_v45  ;;  %11068 = vmatpush3.bf16.msra.mxu1 %v11342_v37 }
 0x833   :  { %11073 = vmatprep.subr.bf16.mxu0 %v13295_v12  ;;  %11085 = vmatprep.subr.bf16.mxu1 %v13295_v12 }
 0x835   :  { %11058 = vmatmul.mubr.msk.bf16.vlgmr.msra.gmra.mxu0 %vm3415_vm11, %v8764_v1  ;;  %11070 = vmatmul.mubr.msk.bf16.vlgmr.msra.gmra.mxu1 %vm3415_vm11, %v8842_v29 }
 0x836   :  { %11074 = vmatpush3.bf16.msra.mxu0 %v11343_v61  ;;  %11086 = vmatpush3.bf16.msra.mxu1 %v11344_v22 }
 0x837   :  { %11075 = vmatprep.subr.bf16.mxu0 %v13295_v12  ;;  %11087 = vmatprep.subr.bf16.mxu1 %v13295_v12 }
 0x838   :  { %11081 = vmatprep.mubr.msk.bf16.mxu0 %vm11365_vm0, %v13295_v12  ;;  %11093 = vmatprep.mubr.msk.bf16.mxu1 %vm11365_vm0, %v13295_v12 }
 0x83a   :  { %11076 = vmatpush3.bf16.msra.mxu0 %v11345_v56  ;;  %11088 = vmatpush3.bf16.msra.mxu1 %v11346_v24 }
 0x83b   :  { %11077 = vmatprep.subr.bf16.mxu0 %v13295_v12  ;;  %11089 = vmatprep.subr.bf16.mxu1 %v13295_v12 }
 0x83e   :  { %11078 = vmatpush3.bf16.msra.mxu0 %v11347_v32  ;;  %11090 = vmatpush3.bf16.msra.mxu1 %v11348_v39 }
 0x83f   :  { %11079 = vmatprep.subr.bf16.mxu0 %v13295_v12  ;;  %11091 = vmatprep.subr.bf16.mxu1 %v13295_v12 }
 0x842   :  { %11080 = vmatpush3.bf16.msra.mxu0 %v11349_v18  ;;  %11092 = vmatpush3.bf16.msra.mxu1 %v11350_v15 }
 0x845   :  { %11082 = vmatmul.mubr.msk.bf16.vlgmr.msra.gmra.mxu0 %vm3415_vm11, %v8920_v4  ;;  %11094 = vmatmul.mubr.msk.bf16.vlgmr.msra.gmra.mxu1 %vm3415_vm11, %v8998_v48 }
 0x895   :  { %v7910_v54 = vpop.f32.mrf.mxu0  ;;  %v7977_v2 = vpop.f32.mrf.mxu1 }
 0x896   :  { %v7978_v46 = vadd.f32 %v7977_v2, %v7910_v54 }
 0x897   :  { %v10915_v49 = vpop.f32.mrf.mxu0  ;;  %v10927_v43 = vpop.f32.mrf.mxu1 }
 0x899   :  { %v7913_v3 = vpop.f32.mrf.mxu0  ;;  %v7980_v53 = vpop.f32.mrf.mxu1 }
 0x89b   :  { %v10916_v30 = vpop.f32.mrf.mxu0  ;;  %v10928_v63 = vpop.f32.mrf.mxu1 }
 0x8a5   :  { %v8054_v12 = vpop.f32.mrf.mxu0  ;;  %v8132_v27 = vpop.f32.mrf.mxu1 }
 0x8a6   :  { %v8060_v57 = vadd.f32 %v8054_v12, %v7978_v46 }
 0x8a7   :  { %v10939_v28 = vpop.f32.mrf.mxu0  ;;  %v10951_v50 = vpop.f32.mrf.mxu1 }
 0x8a8   :  { %v8138_v10 = vadd.f32 %v8132_v27, %v8060_v57 }
 0x8a9   :  { %v8057_v13 = vpop.f32.mrf.mxu0  ;;  %v8135_v52 = vpop.f32.mrf.mxu1 }
 0x8ab   :  { %v10940_v6 = vpop.f32.mrf.mxu0  ;;  %v10952_v34 = vpop.f32.mrf.mxu1 }
 0x8b5   :  { %v8210_v58 = vpop.f32.mrf.mxu0  ;;  %v8288_v26 = vpop.f32.mrf.mxu1 }
 0x8b6   :  { %v8216_v37 = vadd.f32 %v8210_v58, %v8138_v10 }
 0x8b7   :  { %v10963_v23 = vpop.f32.mrf.mxu0  ;;  %v10975_v38 = vpop.f32.mrf.mxu1 }
 0x8b8   :  { %v8294_v1 = vadd.f32 %v8288_v26, %v8216_v37 }
 0x8b9   :  { %v8213_v42 = vpop.f32.mrf.mxu0  ;;  %v8291_v25 = vpop.f32.mrf.mxu1 }
 0x8bb   :  { %v10964_v14 = vpop.f32.mrf.mxu0  ;;  %v10976_v47 = vpop.f32.mrf.mxu1 }
 0x8c5   :  { %v8366_v20 = vpop.f32.mrf.mxu0  ;;  %v8444_v0 = vpop.f32.mrf.mxu1 }
 0x8c6   :  { %v8372_v29 = vadd.f32 %v8366_v20, %v8294_v1 }
 0x8c7   :  { %v10987_v9 = vpop.f32.mrf.mxu0  ;;  %v10999_v19 = vpop.f32.mrf.mxu1 }
 0x8c8   :  { %v8450_v56 = vadd.f32 %v8444_v0, %v8372_v29 }
 0x8c9   :  { %v8369_v11 = vpop.f32.mrf.mxu0  ;;  %v8447_v41 = vpop.f32.mrf.mxu1 }
 0x8cb   :  { %v10988_v44 = vpop.f32.mrf.mxu0  ;;  %v11000_v33 = vpop.f32.mrf.mxu1 }
 0x8d5   :  { %v8522_v8 = vpop.f32.mrf.mxu0  ;;  %v8600_v21 = vpop.f32.mrf.mxu1 }
 0x8d6   :  { %v8528_v24 = vadd.f32 %v8522_v8, %v8450_v56 }
 0x8d7   :  { %v11011_v17 = vpop.f32.mrf.mxu0  ;;  %v11023_v60 = vpop.f32.mrf.mxu1 }
 0x8d8   :  { %v8606_v35 = vadd.f32 %v8600_v21, %v8528_v24 }
 0x8d9   :  { %v8525_v5 = vpop.f32.mrf.mxu0  ;;  %v8603_v36 = vpop.f32.mrf.mxu1 }
 0x8db   :  { %v11012_v51 = vpop.f32.mrf.mxu0  ;;  %v11024_v31 = vpop.f32.mrf.mxu1 }
 0x8e5   :  { %v8678_v7 = vpop.f32.mrf.mxu0  ;;  %v8756_v16 = vpop.f32.mrf.mxu1 }
 0x8e6   :  { %v8684_v48 = vadd.f32 %v8678_v7, %v8606_v35 }
 0x8e7   :  { %v11035_v40 = vpop.f32.mrf.mxu0  ;;  %v11047_v45 = vpop.f32.mrf.mxu1 }
 0x8e8   :  { %v8762_v46 = vadd.f32 %v8756_v16, %v8684_v48 }
 0x8e9   :  { %v8681_v62 = vpop.f32.mrf.mxu0  ;;  %v8759_v59 = vpop.f32.mrf.mxu1 }
 0x8eb   :  { %v11036_v61 = vpop.f32.mrf.mxu0  ;;  %v11048_v22 = vpop.f32.mrf.mxu1 }
 0x8f5   :  { %v8834_v32 = vpop.f32.mrf.mxu0  ;;  %v8912_v39 = vpop.f32.mrf.mxu1 }
 0x8f6   :  { %v8840_v49 = vadd.f32 %v8834_v32, %v8762_v46 }
 0x8f7   :  { %v11059_v18 = vpop.f32.mrf.mxu0  ;;  %v11071_v15 = vpop.f32.mrf.mxu1 }
 0x8f8   :  { %v8918_v43 = vadd.f32 %v8912_v39, %v8840_v49 }
 0x8f9   :  { %v8837_v55 = vpop.f32.mrf.mxu0  ;;  %v8915_v4 = vpop.f32.mrf.mxu1 }
 0x8fb   :  { %v11060_v54 = vpop.f32.mrf.mxu0  ;;  %v11072_v2 = vpop.f32.mrf.mxu1 }
 0x905   :  { %v8990_v3 = vpop.f32.mrf.mxu0  ;;  %v9068_v53 = vpop.f32.mrf.mxu1 }
 0x906   :  { %v8996_v30 = vadd.f32 %v8990_v3, %v8918_v43 }
 0x907   :  { %v11083_v63 = vpop.f32.mrf.mxu0  ;;  %v11095_v12 = vpop.f32.mrf.mxu1 }
 0x908   :  { %v9074_v27 = vadd.f32 %v9068_v53, %v8996_v30 }
 0x909   :  { %v8993_v57 = vpop.f32.mrf.mxu0  ;;  %v9071_v28 = vpop.f32.mrf.mxu1 }
 0x90a   :  { %v9583_v50 = vmul.f32 -1.442695, %v9074_v27 }
 0x90b   :  { %v11084_v10 = vpop.f32.mrf.mxu0  ;;  %v11096_v13 = vpop.f32.mrf.mxu1 }
 0x90c   :  { %11355 = vpow2.f32 %v9583_v50 }
 0x919   :  { %v11356_v52 = vpop.eup %11355 }
 0x91a   :  { %v9078_v6 = vadd.f32 1.0, %v11356_v52 }
 0x91c   :  { %11357 = vrcp.f32 %v9078_v6 }
 0x929   :  { %v11358_v34 = vpop.eup %11357 }
 0x92a   :  { %9584 = vst [vmem:[%s13721_s5 + $0x1] sm:$0x1] %v11358_v34 }

</bundles_post_ra>
